<compile_context>
chip_gen: v7x
topology: tpu7x:2x2x1
jax: 0.10.0
libtpu: 0.0.40
codegen_flags: <defaults>
</compile_context>

<pallas_src>
import functools
import math

import jax
import jax.numpy as jnp
from jax import lax
from jax.experimental import pallas as pl
from jax.experimental.pallas import tpu as pltpu

EPS = 1e-5
LANE = 128          # lane width: pad channel dims to a multiple of this
TM = 256            # row tile (multiple of 8, power of two)
VMEM_LIMIT = 32 * 1024 * 1024


def _rup(v, m):
    return (v + m - 1) // m * m


def _cparams(sem):
    return pltpu.CompilerParams(dimension_semantics=sem,
                                vmem_limit_bytes=VMEM_LIMIT)


# ----------------------------- Pallas kernels -----------------------------
# stats kernels: accumulate per-channel sum / sum-of-squares of y = x @ W over
# the whole (row-tiled) batch, then emit (scale, shift) = (gamma*rstd,
# beta - mean*gamma*rstd) so the apply pass is a single fused multiply-add.

def _mm_stats_kernel(x_ref, w_ref, g_ref, b_ref, s_ref, sum_sc, sq_sc, *,
                     inv_count):
    i = pl.program_id(0)

    @pl.when(i == 0)
    def _():
        sum_sc[...] = jnp.zeros_like(sum_sc)
        sq_sc[...] = jnp.zeros_like(sq_sc)

    y = jnp.dot(x_ref[...], w_ref[...], preferred_element_type=jnp.float32)
    sum_sc[...] += jnp.sum(y, axis=0, keepdims=True)
    sq_sc[...] += jnp.sum(y * y, axis=0, keepdims=True)

    @pl.when(i == pl.num_programs(0) - 1)
    def _():
        mean = sum_sc[...] * inv_count
        var = jnp.maximum(sq_sc[...] * inv_count - mean * mean, 0.0)
        scale = g_ref[...] * lax.rsqrt(var + EPS)
        shift = b_ref[...] - mean * scale
        s_ref[...] = jnp.concatenate([scale, shift], axis=0)


def _mm_apply_kernel(x_ref, w_ref, s_ref, o_ref):
    y = jnp.dot(x_ref[...], w_ref[...], preferred_element_type=jnp.float32)
    o_ref[...] = jnp.maximum(y * s_ref[0:1, :] + s_ref[1:2, :],
                             0.0).astype(o_ref.dtype)


def _mm_apply_add_kernel(x_ref, w_ref, s_ref, sh_ref, o_ref):
    # BN(x@w) + identity shortcut, relu  (conv3 with identity shortcut)
    y = jnp.dot(x_ref[...], w_ref[...], preferred_element_type=jnp.float32)
    y = y * s_ref[0:1, :] + s_ref[1:2, :] + sh_ref[...].astype(jnp.float32)
    o_ref[...] = jnp.maximum(y, 0.0).astype(o_ref.dtype)


def _mm_apply_proj_kernel(x_ref, w_ref, s_ref, xs_ref, wsc_ref, o_ref):
    # BN(x@w) + (xs @ Wsc) shortcut fused in the same kernel, relu
    y = jnp.dot(x_ref[...], w_ref[...], preferred_element_type=jnp.float32)
    y = y * s_ref[0:1, :] + s_ref[1:2, :]
    y = y + jnp.dot(xs_ref[...], wsc_ref[...],
                    preferred_element_type=jnp.float32)
    o_ref[...] = jnp.maximum(y, 0.0).astype(o_ref.dtype)


def _conv2_taps_matmul(main_ref, halo_ref, w_ref, taps, tm):
    # 3x3 conv as 9 accumulated matmuls over shifted row windows of a single
    # (plane, flat-row, channel) buffer (main tile + halo), no im2col.
    big = jnp.concatenate([main_ref[...], halo_ref[...]], axis=1)
    acc = None
    for t, (p, d) in enumerate(taps):          # static unrolled, 9 taps
        xt = big[p, d:d + tm, :]
        y = jnp.dot(xt, w_ref[t], preferred_element_type=jnp.float32)
        acc = y if acc is None else acc + y
    return acc


def _conv2_stats_kernel(main_ref, halo_ref, w_ref, m_ref, g_ref, b_ref,
                        s_ref, sum_sc, sq_sc, *, taps, tm, inv_count):
    i = pl.program_id(0)

    @pl.when(i == 0)
    def _():
        sum_sc[...] = jnp.zeros_like(sum_sc)
        sq_sc[...] = jnp.zeros_like(sq_sc)

    y = _conv2_taps_matmul(main_ref, halo_ref, w_ref, taps, tm)
    m = m_ref[...]                              # (tm, 1) row-validity mask
    ym = y * m
    sum_sc[...] += jnp.sum(ym, axis=0, keepdims=True)
    sq_sc[...] += jnp.sum(ym * y, axis=0, keepdims=True)

    @pl.when(i == pl.num_programs(0) - 1)
    def _():
        mean = sum_sc[...] * inv_count
        var = jnp.maximum(sq_sc[...] * inv_count - mean * mean, 0.0)
        scale = g_ref[...] * lax.rsqrt(var + EPS)
        shift = b_ref[...] - mean * scale
        s_ref[...] = jnp.concatenate([scale, shift], axis=0)


def _conv2_apply_kernel(main_ref, halo_ref, w_ref, s_ref, o_ref, *, taps, tm):
    y = _conv2_taps_matmul(main_ref, halo_ref, w_ref, taps, tm)
    o_ref[...] = jnp.maximum(y * s_ref[0:1, :] + s_ref[1:2, :],
                             0.0).astype(o_ref.dtype)


# ------------------------------ pallas_call wrappers -----------------------

def mm_stats(x, w, gamma, beta, count, tm=TM):
    Mp, K = x.shape
    _, Np = w.shape
    assert Mp % tm == 0
    kern = functools.partial(_mm_stats_kernel, inv_count=1.0 / count)
    return pl.pallas_call(
        kern,
        out_shape=jax.ShapeDtypeStruct((2, Np), jnp.float32),
        grid=(Mp // tm,),
        in_specs=[pl.BlockSpec((tm, K), lambda i: (i, 0)),
                  pl.BlockSpec((K, Np), lambda i: (0, 0)),
                  pl.BlockSpec((1, Np), lambda i: (0, 0)),
                  pl.BlockSpec((1, Np), lambda i: (0, 0))],
        out_specs=pl.BlockSpec((2, Np), lambda i: (0, 0)),
        scratch_shapes=[pltpu.VMEM((1, Np), jnp.float32),
                        pltpu.VMEM((1, Np), jnp.float32)],
        compiler_params=_cparams(("arbitrary",)),
    )(x, w, gamma, beta)


def mm_apply(x, w, stats, *, short=None, xs=None, wsc=None,
             out_dtype=jnp.bfloat16, tm=TM):
    Mp, K = x.shape
    _, Np = w.shape
    assert Mp % tm == 0
    in_specs = [pl.BlockSpec((tm, K), lambda i: (i, 0)),
                pl.BlockSpec((K, Np), lambda i: (0, 0)),
                pl.BlockSpec((2, Np), lambda i: (0, 0))]
    args = [x, w, stats]
    if short is not None:                        # fused identity shortcut
        assert short.shape == (Mp, Np)
        kern = _mm_apply_add_kernel
        in_specs.append(pl.BlockSpec((tm, Np), lambda i: (i, 0)))
        args.append(short)
    elif xs is not None:                         # fused 1x1 projection shortcut
        Ks = xs.shape[1]
        kern = _mm_apply_proj_kernel
        in_specs += [pl.BlockSpec((tm, Ks), lambda i: (i, 0)),
                     pl.BlockSpec((Ks, Np), lambda i: (0, 0))]
        args += [xs, wsc]
    else:
        kern = _mm_apply_kernel
    return pl.pallas_call(
        kern,
        out_shape=jax.ShapeDtypeStruct((Mp, Np), out_dtype),
        grid=(Mp // tm,),
        in_specs=in_specs,
        out_specs=pl.BlockSpec((tm, Np), lambda i: (i, 0)),
        compiler_params=_cparams(("parallel",)),
    )(*args)


def conv2_stats(planes, w2, mask, gamma, beta, count, taps, halo, tm):
    Pn, Rtot, K = planes.shape
    _, _, Np = w2.shape
    mt = (Rtot - halo) // tm
    hb = tm // halo
    kern = functools.partial(_conv2_stats_kernel, taps=tuple(taps), tm=tm,
                             inv_count=1.0 / count)
    return pl.pallas_call(
        kern,
        out_shape=jax.ShapeDtypeStruct((2, Np), jnp.float32),
        grid=(mt,),
        in_specs=[pl.BlockSpec((Pn, tm, K), lambda i: (0, i, 0)),
                  pl.BlockSpec((Pn, halo, K), lambda i: (0, (i + 1) * hb, 0)),
                  pl.BlockSpec((9, K, Np), lambda i: (0, 0, 0)),
                  pl.BlockSpec((tm, 1), lambda i: (i, 0)),
                  pl.BlockSpec((1, Np), lambda i: (0, 0)),
                  pl.BlockSpec((1, Np), lambda i: (0, 0))],
        out_specs=pl.BlockSpec((2, Np), lambda i: (0, 0)),
        scratch_shapes=[pltpu.VMEM((1, Np), jnp.float32),
                        pltpu.VMEM((1, Np), jnp.float32)],
        compiler_params=_cparams(("arbitrary",)),
    )(planes, planes, w2, mask, gamma, beta)


def conv2_apply(planes, w2, stats, taps, halo, tm):
    Pn, Rtot, K = planes.shape
    _, _, Np = w2.shape
    mt = (Rtot - halo) // tm
    hb = tm // halo
    kern = functools.partial(_conv2_apply_kernel, taps=tuple(taps), tm=tm)
    return pl.pallas_call(
        kern,
        out_shape=jax.ShapeDtypeStruct((mt * tm, Np), jnp.bfloat16),
        grid=(mt,),
        in_specs=[pl.BlockSpec((Pn, tm, K), lambda i: (0, i, 0)),
                  pl.BlockSpec((Pn, halo, K), lambda i: (0, (i + 1) * hb, 0)),
                  pl.BlockSpec((9, K, Np), lambda i: (0, 0, 0)),
                  pl.BlockSpec((2, Np), lambda i: (0, 0))],
        out_specs=pl.BlockSpec((tm, Np), lambda i: (i, 0)),
        compiler_params=_cparams(("parallel",)),
    )(planes, planes, w2, stats)


# ------------------------------- JAX glue ---------------------------------

def _prep_weights(params, indim, outdim):
    bdim = outdim // 4
    Ci, Cb, Co = _rup(indim, LANE), _rup(bdim, LANE), _rup(outdim, LANE)
    w1 = jnp.pad(params["W1"][:, :, 0, 0].T,
                 ((0, Ci - indim), (0, Cb - bdim))).astype(jnp.bfloat16)
    w2 = jnp.transpose(params["W2"], (2, 3, 1, 0)).reshape(9, bdim, bdim)
    w2 = jnp.pad(w2, ((0, 0), (0, Cb - bdim), (0, Cb - bdim))).astype(jnp.bfloat16)
    w3 = jnp.pad(params["W3"][:, :, 0, 0].T,
                 ((0, Cb - bdim), (0, Co - outdim))).astype(jnp.bfloat16)
    wsc = None
    if "Wsc" in params:
        wsc = jnp.pad(params["Wsc"][:, :, 0, 0].T,
                      ((0, Ci - indim), (0, Co - outdim))).astype(jnp.bfloat16)
    return w1, w2, w3, wsc


def _prep_bn(gamma, beta, cp):
    c = gamma.shape[-1]
    g = jnp.pad(gamma.reshape(1, c), ((0, 0), (0, cp - c))).astype(jnp.float32)
    b = jnp.pad(beta.reshape(1, c), ((0, 0), (0, cp - c))).astype(jnp.float32)
    return g, b


def bottleneck_forward(x, params, indim, outdim, half_res):
    N, Cin, H, W = x.shape
    assert Cin == indim
    stride = 2 if half_res else 1
    if indim == outdim:
        assert not half_res, "identity shortcut requires stride 1"
    bdim = outdim // 4
    Ci, Cb, Co = _rup(indim, LANE), _rup(bdim, LANE), _rup(outdim, LANE)

    w1, w2, w3, wsc = _prep_weights(params, indim, outdim)
    g1, b1 = _prep_bn(params["gamma1"], params["beta1"], Cb)
    g2, b2 = _prep_bn(params["gamma2"], params["beta2"], Cb)
    g3, b3 = _prep_bn(params["gamma3"], params["beta3"], Co)

    # NCHW -> flat NHWC once at entry (lane-dense, bf16, zero padded).
    x_nhwc = jnp.transpose(x, (0, 2, 3, 1))
    M1 = N * H * W
    M1p = _rup(M1, TM)
    x_flat = jnp.pad(x_nhwc.reshape(M1, indim),
                     ((0, M1p - M1), (0, Ci - indim))).astype(jnp.bfloat16)

    # ---- stage 1: 1x1 conv + BN1 + relu (conv1 bias would be a no-op).
    st1 = mm_stats(x_flat, w1, g1, b1, count=M1)
    out1 = mm_apply(x_flat, w1, st1)                       # (M1p, Cb) bf16

    # ---- stage 2: 3x3 conv (pad 1, stride) + BN2 + relu, no im2col.
    # Pad spatially once; for stride 2 split into 4 column/row-parity planes so
    # every tap becomes a contiguous flat shift of one plane.
    out1_img = out1[:M1].reshape(N, H, W, Cb)
    if stride == 1:
        Hq, Wq, Pn = H + 2, W + 2, 1
        planes = jnp.pad(out1_img, ((0, 0), (1, 1), (1, 1), (0, 0)))
        planes = planes.reshape(1, N * Hq * Wq, Cb)
        taps = [(0, kh * Wq + kw) for kh in range(3) for kw in range(3)]
    else:
        Hq, Wq, Pn = (H + 3) // 2, (W + 3) // 2, 4
        padded = jnp.pad(out1_img, ((0, 0), (1, 2 * Hq - H - 1),
                                    (1, 2 * Wq - W - 1), (0, 0)))
        planes = jnp.stack(
            [padded[:, a::2, b::2, :].reshape(N * Hq * Wq, Cb)
             for a in range(2) for b in range(2)], axis=0)
        taps = [((kh % 2) * 2 + (kw % 2), (kh // 2) * Wq + (kw // 2))
                for kh in range(3) for kw in range(3)]
    Ho = (H + 2 - 3) // stride + 1
    Wo = (W + 2 - 3) // stride + 1

    dmax = max(d for _, d in taps)
    halo = max(8, pl.next_power_of_2(dmax))
    tm2 = max(TM, halo)                      # halo always divides the row tile
    R = N * Hq * Wq
    Rp = _rup(R, tm2)
    planes = jnp.pad(planes, ((0, 0), (0, Rp + halo - R), (0, 0)))

    # validity mask: BN2 stats only over real (ho < Ho, wo < Wo) positions
    ridx = jnp.arange(Rp)
    rr = ridx % (Hq * Wq)
    mask = ((ridx < R) & (rr // Wq < Ho) & (rr % Wq < Wo))
    mask = mask.astype(jnp.float32).reshape(Rp, 1)
    M2 = N * Ho * Wo

    # conv2 bias is dropped: it is exactly cancelled by BN2's mean subtraction.
    st2 = conv2_stats(planes, w2, mask, g2, b2, count=M2, taps=taps,
                      halo=halo, tm=tm2)
    out2 = conv2_apply(planes, w2, st2, taps=taps, halo=halo, tm=tm2)

    # compact back to valid rows for stage 3
    out2c = out2[:R].reshape(N, Hq, Wq, Cb)[:, :Ho, :Wo, :]
    M3 = N * Ho * Wo
    M3p = _rup(M3, TM)
    out2c = jnp.pad(out2c.reshape(M3, Cb), ((0, M3p - M3), (0, 0)))

    # ---- stage 3: 1x1 conv + BN3 + (fused) shortcut add + relu
    st3 = mm_stats(out2c, w3, g3, b3, count=M3)
    if indim == outdim:
        out3 = mm_apply(out2c, w3, st3, short=x_flat, out_dtype=jnp.float32)
    else:
        xs = x_nhwc[:, ::stride, ::stride, :].reshape(M3, indim)
        xs = jnp.pad(xs, ((0, M3p - M3), (0, Ci - indim))).astype(jnp.bfloat16)
        out3 = mm_apply(out2c, w3, st3, xs=xs, wsc=wsc, out_dtype=jnp.float32)

    out3 = out3[:M3, :outdim].reshape(N, Ho, Wo, outdim)
    return jnp.transpose(out3, (0, 3, 1, 2))


bottleneck_forward_jit = jax.jit(bottleneck_forward, static_argnums=(2, 3, 4))


# ---------------------- deterministic parameter init ----------------------

def init_params(key, indim, outdim):
    bdim = outdim // 4
    k1, k2, k3, k4, k5 = jax.random.split(key, 5)

    def conv_init(k, shape):          # (outC, inC, kh, kw), He init like init_layer
        n = shape[2] * shape[3] * shape[0]
        return jax.random.normal(k, shape, jnp.float32) * math.sqrt(2.0 / n)

    params = {
        "W1": conv_init(k1, (bdim, indim, 1, 1)),
        "gamma1": jnp.ones((1, bdim), jnp.float32),
        "beta1": jnp.zeros((1, bdim), jnp.float32),
        "W2": conv_init(k2, (bdim, bdim, 3, 3)),
        "b2": jax.random.normal(k3, (bdim,), jnp.float32) * 0.1,
        "gamma2": jnp.ones((1, bdim), jnp.float32),
        "beta2": jnp.zeros((1, bdim), jnp.float32),
        "W3": conv_init(k4, (outdim, bdim, 1, 1)),
        "gamma3": jnp.ones((1, outdim), jnp.float32),
        "beta3": jnp.zeros((1, outdim), jnp.float32),
    }
    if indim != outdim:
        params["Wsc"] = conv_init(k5, (outdim, indim, 1, 1))
    return params


# ------------------------- pure-JAX reference check ------------------------

def _conv2d(x, w, stride=1, padding=0):
    return lax.conv_general_dilated(
        x, w, window_strides=(stride, stride),
        padding=[(padding, padding), (padding, padding)],
        dimension_numbers=("NCHW", "OIHW", "NCHW"))


def _bn_train(x, gamma, beta):
    mean = jnp.mean(x, axis=(0, 2, 3), keepdims=True)
    var = jnp.mean(jnp.square(x - mean), axis=(0, 2, 3), keepdims=True)
    return ((x - mean) * lax.rsqrt(var + EPS) * gamma.reshape(1, -1, 1, 1)
            + beta.reshape(1, -1, 1, 1))


def reference_forward(x, params, indim, outdim, half_res):
    stride = 2 if half_res else 1
    short = x if indim == outdim else _conv2d(x, params["Wsc"], stride=stride)
    out = jnp.maximum(_bn_train(_conv2d(x, params["W1"]),
                                params["gamma1"], params["beta1"]), 0.0)
    out = _conv2d(out, params["W2"], stride=stride, padding=1) \
        + params["b2"].reshape(1, -1, 1, 1)
    out = jnp.maximum(_bn_train(out, params["gamma2"], params["beta2"]), 0.0)
    out = _bn_train(_conv2d(out, params["W3"]),
                    params["gamma3"], params["beta3"]) + short
    return jnp.maximum(out, 0.0)


# ---------------------------------- main -----------------------------------

if __name__ == "__main__":
    key = jax.random.PRNGKey(0)
    k1, k2, k3, k4 = jax.random.split(key, 4)

    # config A: projection shortcut + stride 2
    indim, outdim, half_res = 8, 16, True
    N, H, W = 2, 16, 16
    x = jax.random.normal(k1, (N, indim, H, W), jnp.float32)
    params = init_params(k2, indim, outdim)
    out = jax.block_until_ready(
        bottleneck_forward_jit(x, params, indim, outdim, half_res))
    ref = reference_forward(x, params, indim, outdim, half_res)
    assert out.shape == (N, outdim, H // 2, W // 2), out.shape
    errA = float(jnp.max(jnp.abs(out - ref)))
    assert jnp.allclose(out, ref, rtol=5e-2, atol=5e-2), errA

    # config B: identity shortcut + stride 1
    indim, outdim, half_res = 16, 16, False
    x = jax.random.normal(k3, (N, indim, H, W), jnp.float32)
    params = init_params(k4, indim, outdim)
    out = jax.block_until_ready(
        bottleneck_forward_jit(x, params, indim, outdim, half_res))
    ref = reference_forward(x, params, indim, outdim, half_res)
    assert out.shape == (N, outdim, H, W), out.shape
    errB = float(jnp.max(jnp.abs(out - ref)))
    assert jnp.allclose(out, ref, rtol=5e-2, atol=5e-2), errB

    print("KERNEL_OK")
</pallas_src>

<mosaic_0001>
module attributes {stable_mosaic.version = 11 : i64} {
  func.func @_mm_stats_kernel(%arg0: i32, %arg1: memref<256x128xbf16, #tpu.memory_space<vmem>>, %arg2: memref<128x128xbf16, #tpu.memory_space<vmem>>, %arg3: memref<1x128xf32, #tpu.memory_space<vmem>>, %arg4: memref<1x128xf32, #tpu.memory_space<vmem>>, %arg5: memref<2x128xf32, #tpu.memory_space<vmem>>, %arg6: memref<1x128xf32, #tpu.memory_space<vmem>>, %arg7: memref<1x128xf32, #tpu.memory_space<vmem>>) attributes {dimension_semantics = [#tpu.dimension_semantics<arbitrary>], iteration_bounds = array<i64: 2>, scalar_prefetch = 0 : i64, scratch_operands = 2 : i64, tpu.core_type = #tpu.core_type<tc>, window_params = [{transform_indices = @transform_0, window_bounds = array<i64: 256, 128>}, {pipeline_mode = #tpu.pipeline_mode<synchronous>, transform_indices = @transform_1, window_bounds = array<i64: 128, 128>}, {pipeline_mode = #tpu.pipeline_mode<synchronous>, transform_indices = @transform_2, window_bounds = array<i64: 1, 128>}, {pipeline_mode = #tpu.pipeline_mode<synchronous>, transform_indices = @transform_3, window_bounds = array<i64: 1, 128>}, {pipeline_mode = #tpu.pipeline_mode<synchronous>, transform_indices = @transform_4, window_bounds = array<i64: 2, 128>}]} {
    %c0_i32 = arith.constant 0 : i32
    %0 = arith.cmpi eq, %arg0, %c0_i32 : i32
    %1 = arith.extui %0 : i1 to i32
    %c0_i32_0 = arith.constant 0 : i32
    %2 = arith.cmpi ne, %1, %c0_i32_0 : i32
    scf.if %2 {
      %cst_15 = arith.constant 0.000000e+00 : f32
      %20 = vector.broadcast %cst_15 : f32 to vector<1x128xf32>
      %c0_16 = arith.constant 0 : index
      %c0_17 = arith.constant 0 : index
      %21 = vector.load %arg6[%c0_16, %c0_17] : memref<1x128xf32, #tpu.memory_space<vmem>>, vector<1x128xf32>
      tpu.vector_store %arg6[%c0_16, %c0_17], %20 {strides = array<i32>} : memref<1x128xf32, #tpu.memory_space<vmem>>, vector<1x128xf32>,
      %cst_18 = arith.constant 0.000000e+00 : f32
      %22 = vector.broadcast %cst_18 : f32 to vector<1x128xf32>
      %c0_19 = arith.constant 0 : index
      %c0_20 = arith.constant 0 : index
      %23 = vector.load %arg7[%c0_19, %c0_20] : memref<1x128xf32, #tpu.memory_space<vmem>>, vector<1x128xf32>
      tpu.vector_store %arg7[%c0_19, %c0_20], %22 {strides = array<i32>} : memref<1x128xf32, #tpu.memory_space<vmem>>, vector<1x128xf32>,
    } else {
    }
    %c0 = arith.constant 0 : index
    %c0_1 = arith.constant 0 : index
    %3 = vector.load %arg1[%c0, %c0_1] : memref<256x128xbf16, #tpu.memory_space<vmem>>, vector<256x128xbf16>
    %c0_2 = arith.constant 0 : index
    %c0_3 = arith.constant 0 : index
    %4 = vector.load %arg2[%c0_2, %c0_3] : memref<128x128xbf16, #tpu.memory_space<vmem>>, vector<128x128xbf16>
    %cst = arith.constant dense<0.000000e+00> : vector<256x128xf32>
    %5 = tpu.matmul %3, %4, %cst {dimension_numbers = #tpu.dot_dimension_numbers<[1], [0], [0], [1], [0, 0, 1, 1], [], []>} : vector<256x128xbf16>, vector<128x128xbf16>, vector<256x128xf32> -> vector<256x128xf32>
    %c0_4 = arith.constant 0 : index
    %c0_5 = arith.constant 0 : index
    %6 = vector.load %arg6[%c0_4, %c0_5] : memref<1x128xf32, #tpu.memory_space<vmem>>, vector<1x128xf32>
    %cst_6 = arith.constant dense<0.000000e+00> : vector<128xf32>
    %7 = vector.multi_reduction <add>, %5, %cst_6 [0] : vector<256x128xf32> to vector<128xf32>
    %8 = vector.shape_cast %7 : vector<128xf32> to vector<1x128xf32>
    %9 = arith.addf %6, %8 : vector<1x128xf32>
    %c0_7 = arith.constant 0 : index
    %c0_8 = arith.constant 0 : index
    %10 = vector.load %arg6[%c0_7, %c0_8] : memref<1x128xf32, #tpu.memory_space<vmem>>, vector<1x128xf32>
    tpu.vector_store %arg6[%c0_7, %c0_8], %9 {strides = array<i32>} : memref<1x128xf32, #tpu.memory_space<vmem>>, vector<1x128xf32>,
    %c0_9 = arith.constant 0 : index
    %c0_10 = arith.constant 0 : index
    %11 = vector.load %arg7[%c0_9, %c0_10] : memref<1x128xf32, #tpu.memory_space<vmem>>, vector<1x128xf32>
    %12 = arith.mulf %5, %5 : vector<256x128xf32>
    %cst_11 = arith.constant dense<0.000000e+00> : vector<128xf32>
    %13 = vector.multi_reduction <add>, %12, %cst_11 [0] : vector<256x128xf32> to vector<128xf32>
    %14 = vector.shape_cast %13 : vector<128xf32> to vector<1x128xf32>
    %15 = arith.addf %11, %14 : vector<1x128xf32>
    %c0_12 = arith.constant 0 : index
    %c0_13 = arith.constant 0 : index
    %16 = vector.load %arg7[%c0_12, %c0_13] : memref<1x128xf32, #tpu.memory_space<vmem>>, vector<1x128xf32>
    tpu.vector_store %arg7[%c0_12, %c0_13], %15 {strides = array<i32>} : memref<1x128xf32, #tpu.memory_space<vmem>>, vector<1x128xf32>,
    %c1_i32 = arith.constant 1 : i32
    %17 = arith.cmpi eq, %arg0, %c1_i32 : i32
    %18 = arith.extui %17 : i1 to i32
    %c0_i32_14 = arith.constant 0 : i32
    %19 = arith.cmpi ne, %18, %c0_i32_14 : i32
    scf.if %19 {
      %c0_15 = arith.constant 0 : index
      %c0_16 = arith.constant 0 : index
      %20 = vector.load %arg6[%c0_15, %c0_16] : memref<1x128xf32, #tpu.memory_space<vmem>>, vector<1x128xf32>
      %cst_17 = arith.constant 0.001953125 : f32
      %21 = vector.broadcast %cst_17 : f32 to vector<1x128xf32>
      %22 = arith.mulf %20, %21 : vector<1x128xf32>
      %c0_18 = arith.constant 0 : index
      %c0_19 = arith.constant 0 : index
      %23 = vector.load %arg7[%c0_18, %c0_19] : memref<1x128xf32, #tpu.memory_space<vmem>>, vector<1x128xf32>
      %cst_20 = arith.constant 0.001953125 : f32
      %24 = vector.broadcast %cst_20 : f32 to vector<1x128xf32>
      %25 = arith.mulf %23, %24 : vector<1x128xf32>
      %26 = arith.mulf %22, %22 : vector<1x128xf32>
      %27 = arith.subf %25, %26 : vector<1x128xf32>
      %cst_21 = arith.constant 0.000000e+00 : f32
      %28 = vector.broadcast %cst_21 : f32 to vector<1x128xf32>
      %29 = arith.maximumf %27, %28 : vector<1x128xf32>
      %c0_22 = arith.constant 0 : index
      %c0_23 = arith.constant 0 : index
      %30 = vector.load %arg3[%c0_22, %c0_23] : memref<1x128xf32, #tpu.memory_space<vmem>>, vector<1x128xf32>
      %cst_24 = arith.constant 9.99999974E-6 : f32
      %31 = vector.broadcast %cst_24 : f32 to vector<1x128xf32>
      %32 = arith.addf %29, %31 : vector<1x128xf32>
      %33 = math.rsqrt %32 : vector<1x128xf32>
      %34 = arith.mulf %30, %33 : vector<1x128xf32>
      %c0_25 = arith.constant 0 : index
      %c0_26 = arith.constant 0 : index
      %35 = vector.load %arg4[%c0_25, %c0_26] : memref<1x128xf32, #tpu.memory_space<vmem>>, vector<1x128xf32>
      %36 = arith.mulf %22, %34 : vector<1x128xf32>
      %37 = arith.subf %35, %36 : vector<1x128xf32>
      %38 = tpu.concatenate %34, %37 in 0 : vector<1x128xf32>, vector<1x128xf32> -> vector<2x128xf32>
      %c0_27 = arith.constant 0 : index
      %c0_28 = arith.constant 0 : index
      %39 = vector.load %arg5[%c0_27, %c0_28] : memref<2x128xf32, #tpu.memory_space<vmem>>, vector<2x128xf32>
      tpu.vector_store %arg5[%c0_27, %c0_28], %38 {strides = array<i32>} : memref<2x128xf32, #tpu.memory_space<vmem>>, vector<2x128xf32>,
    } else {
    }
    return
  }
  func.func @transform_0(%arg0: i32) -> (i32, i32) {
    %c0_i32 = arith.constant 0 : i32
    %c0_i32_0 = arith.constant 0 : i32
    return %arg0, %c0_i32 : i32, i32
  }
  func.func @transform_1(%arg0: i32) -> (i32, i32) {
    %c0_i32 = arith.constant 0 : i32
    %c0_i32_0 = arith.constant 0 : i32
    %c0_i32_1 = arith.constant 0 : i32
    return %c0_i32, %c0_i32_0 : i32, i32
  }
  func.func @transform_2(%arg0: i32) -> (i32, i32) {
    %c0_i32 = arith.constant 0 : i32
    %c0_i32_0 = arith.constant 0 : i32
    %c0_i32_1 = arith.constant 0 : i32
    return %c0_i32, %c0_i32_0 : i32, i32
  }
  func.func @transform_3(%arg0: i32) -> (i32, i32) {
    %c0_i32 = arith.constant 0 : i32
    %c0_i32_0 = arith.constant 0 : i32
    %c0_i32_1 = arith.constant 0 : i32
    return %c0_i32, %c0_i32_0 : i32, i32
  }
  func.func @transform_4(%arg0: i32) -> (i32, i32) {
    %c0_i32 = arith.constant 0 : i32
    %c0_i32_0 = arith.constant 0 : i32
    %c0_i32_1 = arith.constant 0 : i32
    return %c0_i32, %c0_i32_0 : i32, i32
  }
}

module attributes {stable_mosaic.version = 11 : i64} {
  func.func @_mm_apply_kernel(%arg0: i32, %arg1: memref<256x128xbf16, #tpu.memory_space<vmem>>, %arg2: memref<128x128xbf16, #tpu.memory_space<vmem>>, %arg3: memref<2x128xf32, #tpu.memory_space<vmem>>, %arg4: memref<256x128xbf16, #tpu.memory_space<vmem>>) attributes {dimension_semantics = [#tpu.dimension_semantics<parallel>], iteration_bounds = array<i64: 2>, scalar_prefetch = 0 : i64, scratch_operands = 0 : i64, tpu.core_type = #tpu.core_type<tc>, window_params = [{transform_indices = @transform_0, window_bounds = array<i64: 256, 128>}, {pipeline_mode = #tpu.pipeline_mode<synchronous>, transform_indices = @transform_1, window_bounds = array<i64: 128, 128>}, {pipeline_mode = #tpu.pipeline_mode<synchronous>, transform_indices = @transform_2, window_bounds = array<i64: 2, 128>}, {transform_indices = @transform_3, window_bounds = array<i64: 256, 128>}]} {
    %c0 = arith.constant 0 : index
    %c0_0 = arith.constant 0 : index
    %0 = vector.load %arg1[%c0, %c0_0] : memref<256x128xbf16, #tpu.memory_space<vmem>>, vector<256x128xbf16>
    %c0_1 = arith.constant 0 : index
    %c0_2 = arith.constant 0 : index
    %1 = vector.load %arg2[%c0_1, %c0_2] : memref<128x128xbf16, #tpu.memory_space<vmem>>, vector<128x128xbf16>
    %cst = arith.constant dense<0.000000e+00> : vector<256x128xf32>
    %2 = tpu.matmul %0, %1, %cst {dimension_numbers = #tpu.dot_dimension_numbers<[1], [0], [0], [1], [0, 0, 1, 1], [], []>} : vector<256x128xbf16>, vector<128x128xbf16>, vector<256x128xf32> -> vector<256x128xf32>
    %c0_3 = arith.constant 0 : index
    %c0_4 = arith.constant 0 : index
    %3 = vector.load %arg3[%c0_3, %c0_4] : memref<2x128xf32, #tpu.memory_space<vmem>>, vector<1x128xf32>
    %4 = vector.broadcast %3 : vector<1x128xf32> to vector<256x128xf32>
    %5 = arith.mulf %2, %4 : vector<256x128xf32>
    %c1 = arith.constant 1 : index
    %c0_5 = arith.constant 0 : index
    %6 = vector.load %arg3[%c1, %c0_5] : memref<2x128xf32, #tpu.memory_space<vmem>>, vector<1x128xf32>
    %7 = vector.broadcast %6 : vector<1x128xf32> to vector<256x128xf32>
    %8 = arith.addf %5, %7 : vector<256x128xf32>
    %cst_6 = arith.constant 0.000000e+00 : f32
    %9 = vector.broadcast %cst_6 : f32 to vector<256x128xf32>
    %10 = arith.maximumf %8, %9 : vector<256x128xf32>
    %11 = arith.truncf %10 : vector<256x128xf32> to vector<256x128xbf16>
    %c0_7 = arith.constant 0 : index
    %c0_8 = arith.constant 0 : index
    %12 = vector.load %arg4[%c0_7, %c0_8] : memref<256x128xbf16, #tpu.memory_space<vmem>>, vector<256x128xbf16>
    tpu.vector_store %arg4[%c0_7, %c0_8], %11 {strides = array<i32>} : memref<256x128xbf16, #tpu.memory_space<vmem>>, vector<256x128xbf16>,
    return
  }
  func.func @transform_0(%arg0: i32) -> (i32, i32) {
    %c0_i32 = arith.constant 0 : i32
    %c0_i32_0 = arith.constant 0 : i32
    return %arg0, %c0_i32 : i32, i32
  }
  func.func @transform_1(%arg0: i32) -> (i32, i32) {
    %c0_i32 = arith.constant 0 : i32
    %c0_i32_0 = arith.constant 0 : i32
    %c0_i32_1 = arith.constant 0 : i32
    return %c0_i32, %c0_i32_0 : i32, i32
  }
  func.func @transform_2(%arg0: i32) -> (i32, i32) {
    %c0_i32 = arith.constant 0 : i32
    %c0_i32_0 = arith.constant 0 : i32
    %c0_i32_1 = arith.constant 0 : i32
    return %c0_i32, %c0_i32_0 : i32, i32
  }
  func.func @transform_3(%arg0: i32) -> (i32, i32) {
    %c0_i32 = arith.constant 0 : i32
    %c0_i32_0 = arith.constant 0 : i32
    return %arg0, %c0_i32 : i32, i32
  }
}

module attributes {stable_mosaic.version = 11 : i64} {
  func.func @_conv2_apply_kernel(%arg0: i32, %arg1: memref<4x256x128xbf16, #tpu.memory_space<vmem>>, %arg2: memref<4x16x128xbf16, #tpu.memory_space<vmem>>, %arg3: memref<9x128x128xbf16, #tpu.memory_space<vmem>>, %arg4: memref<2x128xf32, #tpu.memory_space<vmem>>, %arg5: memref<256x128xbf16, #tpu.memory_space<vmem>>) attributes {dimension_semantics = [#tpu.dimension_semantics<parallel>], iteration_bounds = array<i64: 1>, scalar_prefetch = 0 : i64, scratch_operands = 0 : i64, tpu.core_type = #tpu.core_type<tc>, window_params = [{transform_indices = @transform_0, window_bounds = array<i64: 4, 256, 128>}, {transform_indices = @transform_1, window_bounds = array<i64: 4, 16, 128>}, {pipeline_mode = #tpu.pipeline_mode<synchronous>, transform_indices = @transform_2, window_bounds = array<i64: 9, 128, 128>}, {pipeline_mode = #tpu.pipeline_mode<synchronous>, transform_indices = @transform_3, window_bounds = array<i64: 2, 128>}, {transform_indices = @transform_4, window_bounds = array<i64: 256, 128>}]} {
    %c0 = arith.constant 0 : index
    %c0_0 = arith.constant 0 : index
    %c0_1 = arith.constant 0 : index
    %0 = vector.load %arg1[%c0, %c0_0, %c0_1] : memref<4x256x128xbf16, #tpu.memory_space<vmem>>, vector<4x256x128xbf16>
    %c0_2 = arith.constant 0 : index
    %c0_3 = arith.constant 0 : index
    %c0_4 = arith.constant 0 : index
    %1 = vector.load %arg2[%c0_2, %c0_3, %c0_4] : memref<4x16x128xbf16, #tpu.memory_space<vmem>>, vector<4x16x128xbf16>
    %2 = tpu.concatenate %0, %1 in 1 : vector<4x256x128xbf16>, vector<4x16x128xbf16> -> vector<4x272x128xbf16>
    %3 = vector.extract_strided_slice %2 {offsets = [0, 0, 0], sizes = [1, 256, 128], strides = [1, 1, 1]} : vector<4x272x128xbf16> to vector<1x256x128xbf16>
    %4 = vector.shape_cast %3 : vector<1x256x128xbf16> to vector<256x128xbf16>
    %c0_5 = arith.constant 0 : index
    %c0_6 = arith.constant 0 : index
    %c0_7 = arith.constant 0 : index
    %5 = vector.load %arg3[%c0_5, %c0_6, %c0_7] : memref<9x128x128xbf16, #tpu.memory_space<vmem>>, vector<1x128x128xbf16>
    %6 = vector.shape_cast %5 : vector<1x128x128xbf16> to vector<128x128xbf16>
    %cst = arith.constant dense<0.000000e+00> : vector<256x128xf32>
    %7 = tpu.matmul %4, %6, %cst {dimension_numbers = #tpu.dot_dimension_numbers<[1], [0], [0], [1], [0, 0, 1, 1], [], []>} : vector<256x128xbf16>, vector<128x128xbf16>, vector<256x128xf32> -> vector<256x128xf32>
    %8 = vector.extract_strided_slice %2 {offsets = [1, 0, 0], sizes = [1, 256, 128], strides = [1, 1, 1]} : vector<4x272x128xbf16> to vector<1x256x128xbf16>
    %9 = vector.shape_cast %8 : vector<1x256x128xbf16> to vector<256x128xbf16>
    %c1 = arith.constant 1 : index
    %c0_8 = arith.constant 0 : index
    %c0_9 = arith.constant 0 : index
    %10 = vector.load %arg3[%c1, %c0_8, %c0_9] : memref<9x128x128xbf16, #tpu.memory_space<vmem>>, vector<1x128x128xbf16>
    %11 = vector.shape_cast %10 : vector<1x128x128xbf16> to vector<128x128xbf16>
    %cst_10 = arith.constant dense<0.000000e+00> : vector<256x128xf32>
    %12 = tpu.matmul %9, %11, %cst_10 {dimension_numbers = #tpu.dot_dimension_numbers<[1], [0], [0], [1], [0, 0, 1, 1], [], []>} : vector<256x128xbf16>, vector<128x128xbf16>, vector<256x128xf32> -> vector<256x128xf32>
    %13 = arith.addf %7, %12 : vector<256x128xf32>
    %14 = vector.extract_strided_slice %2 {offsets = [0, 1, 0], sizes = [1, 256, 128], strides = [1, 1, 1]} : vector<4x272x128xbf16> to vector<1x256x128xbf16>
    %15 = vector.shape_cast %14 : vector<1x256x128xbf16> to vector<256x128xbf16>
    %c2 = arith.constant 2 : index
    %c0_11 = arith.constant 0 : index
    %c0_12 = arith.constant 0 : index
    %16 = vector.load %arg3[%c2, %c0_11, %c0_12] : memref<9x128x128xbf16, #tpu.memory_space<vmem>>, vector<1x128x128xbf16>
    %17 = vector.shape_cast %16 : vector<1x128x128xbf16> to vector<128x128xbf16>
    %cst_13 = arith.constant dense<0.000000e+00> : vector<256x128xf32>
    %18 = tpu.matmul %15, %17, %cst_13 {dimension_numbers = #tpu.dot_dimension_numbers<[1], [0], [0], [1], [0, 0, 1, 1], [], []>} : vector<256x128xbf16>, vector<128x128xbf16>, vector<256x128xf32> -> vector<256x128xf32>
    %19 = arith.addf %13, %18 : vector<256x128xf32>
    %20 = vector.extract_strided_slice %2 {offsets = [2, 0, 0], sizes = [1, 256, 128], strides = [1, 1, 1]} : vector<4x272x128xbf16> to vector<1x256x128xbf16>
    %21 = vector.shape_cast %20 : vector<1x256x128xbf16> to vector<256x128xbf16>
    %c3 = arith.constant 3 : index
    %c0_14 = arith.constant 0 : index
    %c0_15 = arith.constant 0 : index
    %22 = vector.load %arg3[%c3, %c0_14, %c0_15] : memref<9x128x128xbf16, #tpu.memory_space<vmem>>, vector<1x128x128xbf16>
    %23 = vector.shape_cast %22 : vector<1x128x128xbf16> to vector<128x128xbf16>
    %cst_16 = arith.constant dense<0.000000e+00> : vector<256x128xf32>
    %24 = tpu.matmul %21, %23, %cst_16 {dimension_numbers = #tpu.dot_dimension_numbers<[1], [0], [0], [1], [0, 0, 1, 1], [], []>} : vector<256x128xbf16>, vector<128x128xbf16>, vector<256x128xf32> -> vector<256x128xf32>
    %25 = arith.addf %19, %24 : vector<256x128xf32>
    %26 = vector.extract_strided_slice %2 {offsets = [3, 0, 0], sizes = [1, 256, 128], strides = [1, 1, 1]} : vector<4x272x128xbf16> to vector<1x256x128xbf16>
    %27 = vector.shape_cast %26 : vector<1x256x128xbf16> to vector<256x128xbf16>
    %c4 = arith.constant 4 : index
    %c0_17 = arith.constant 0 : index
    %c0_18 = arith.constant 0 : index
    %28 = vector.load %arg3[%c4, %c0_17, %c0_18] : memref<9x128x128xbf16, #tpu.memory_space<vmem>>, vector<1x128x128xbf16>
    %29 = vector.shape_cast %28 : vector<1x128x128xbf16> to vector<128x128xbf16>
    %cst_19 = arith.constant dense<0.000000e+00> : vector<256x128xf32>
    %30 = tpu.matmul %27, %29, %cst_19 {dimension_numbers = #tpu.dot_dimension_numbers<[1], [0], [0], [1], [0, 0, 1, 1], [], []>} : vector<256x128xbf16>, vector<128x128xbf16>, vector<256x128xf32> -> vector<256x128xf32>
    %31 = arith.addf %25, %30 : vector<256x128xf32>
    %32 = vector.extract_strided_slice %2 {offsets = [2, 1, 0], sizes = [1, 256, 128], strides = [1, 1, 1]} : vector<4x272x128xbf16> to vector<1x256x128xbf16>
    %33 = vector.shape_cast %32 : vector<1x256x128xbf16> to vector<256x128xbf16>
    %c5 = arith.constant 5 : index
    %c0_20 = arith.constant 0 : index
    %c0_21 = arith.constant 0 : index
    %34 = vector.load %arg3[%c5, %c0_20, %c0_21] : memref<9x128x128xbf16, #tpu.memory_space<vmem>>, vector<1x128x128xbf16>
    %35 = vector.shape_cast %34 : vector<1x128x128xbf16> to vector<128x128xbf16>
    %cst_22 = arith.constant dense<0.000000e+00> : vector<256x128xf32>
    %36 = tpu.matmul %33, %35, %cst_22 {dimension_numbers = #tpu.dot_dimension_numbers<[1], [0], [0], [1], [0, 0, 1, 1], [], []>} : vector<256x128xbf16>, vector<128x128xbf16>, vector<256x128xf32> -> vector<256x128xf32>
    %37 = arith.addf %31, %36 : vector<256x128xf32>
    %38 = vector.extract_strided_slice %2 {offsets = [0, 9, 0], sizes = [1, 256, 128], strides = [1, 1, 1]} : vector<4x272x128xbf16> to vector<1x256x128xbf16>
    %39 = vector.shape_cast %38 : vector<1x256x128xbf16> to vector<256x128xbf16>
    %c6 = arith.constant 6 : index
    %c0_23 = arith.constant 0 : index
    %c0_24 = arith.constant 0 : index
    %40 = vector.load %arg3[%c6, %c0_23, %c0_24] : memref<9x128x128xbf16, #tpu.memory_space<vmem>>, vector<1x128x128xbf16>
    %41 = vector.shape_cast %40 : vector<1x128x128xbf16> to vector<128x128xbf16>
    %cst_25 = arith.constant dense<0.000000e+00> : vector<256x128xf32>
    %42 = tpu.matmul %39, %41, %cst_25 {dimension_numbers = #tpu.dot_dimension_numbers<[1], [0], [0], [1], [0, 0, 1, 1], [], []>} : vector<256x128xbf16>, vector<128x128xbf16>, vector<256x128xf32> -> vector<256x128xf32>
    %43 = arith.addf %37, %42 : vector<256x128xf32>
    %44 = vector.extract_strided_slice %2 {offsets = [1, 9, 0], sizes = [1, 256, 128], strides = [1, 1, 1]} : vector<4x272x128xbf16> to vector<1x256x128xbf16>
    %45 = vector.shape_cast %44 : vector<1x256x128xbf16> to vector<256x128xbf16>
    %c7 = arith.constant 7 : index
    %c0_26 = arith.constant 0 : index
    %c0_27 = arith.constant 0 : index
    %46 = vector.load %arg3[%c7, %c0_26, %c0_27] : memref<9x128x128xbf16, #tpu.memory_space<vmem>>, vector<1x128x128xbf16>
    %47 = vector.shape_cast %46 : vector<1x128x128xbf16> to vector<128x128xbf16>
    %cst_28 = arith.constant dense<0.000000e+00> : vector<256x128xf32>
    %48 = tpu.matmul %45, %47, %cst_28 {dimension_numbers = #tpu.dot_dimension_numbers<[1], [0], [0], [1], [0, 0, 1, 1], [], []>} : vector<256x128xbf16>, vector<128x128xbf16>, vector<256x128xf32> -> vector<256x128xf32>
    %49 = arith.addf %43, %48 : vector<256x128xf32>
    %50 = vector.extract_strided_slice %2 {offsets = [0, 10, 0], sizes = [1, 256, 128], strides = [1, 1, 1]} : vector<4x272x128xbf16> to vector<1x256x128xbf16>
    %51 = vector.shape_cast %50 : vector<1x256x128xbf16> to vector<256x128xbf16>
    %c8 = arith.constant 8 : index
    %c0_29 = arith.constant 0 : index
    %c0_30 = arith.constant 0 : index
    %52 = vector.load %arg3[%c8, %c0_29, %c0_30] : memref<9x128x128xbf16, #tpu.memory_space<vmem>>, vector<1x128x128xbf16>
    %53 = vector.shape_cast %52 : vector<1x128x128xbf16> to vector<128x128xbf16>
    %cst_31 = arith.constant dense<0.000000e+00> : vector<256x128xf32>
    %54 = tpu.matmul %51, %53, %cst_31 {dimension_numbers = #tpu.dot_dimension_numbers<[1], [0], [0], [1], [0, 0, 1, 1], [], []>} : vector<256x128xbf16>, vector<128x128xbf16>, vector<256x128xf32> -> vector<256x128xf32>
    %55 = arith.addf %49, %54 : vector<256x128xf32>
    %c0_32 = arith.constant 0 : index
    %c0_33 = arith.constant 0 : index
    %56 = vector.load %arg4[%c0_32, %c0_33] : memref<2x128xf32, #tpu.memory_space<vmem>>, vector<1x128xf32>
    %57 = vector.broadcast %56 : vector<1x128xf32> to vector<256x128xf32>
    %58 = arith.mulf %55, %57 : vector<256x128xf32>
    %c1_34 = arith.constant 1 : index
    %c0_35 = arith.constant 0 : index
    %59 = vector.load %arg4[%c1_34, %c0_35] : memref<2x128xf32, #tpu.memory_space<vmem>>, vector<1x128xf32>
    %60 = vector.broadcast %59 : vector<1x128xf32> to vector<256x128xf32>
    %61 = arith.addf %58, %60 : vector<256x128xf32>
    %cst_36 = arith.constant 0.000000e+00 : f32
    %62 = vector.broadcast %cst_36 : f32 to vector<256x128xf32>
    %63 = arith.maximumf %61, %62 : vector<256x128xf32>
    %64 = arith.truncf %63 : vector<256x128xf32> to vector<256x128xbf16>
    %c0_37 = arith.constant 0 : index
    %c0_38 = arith.constant 0 : index
    %65 = vector.load %arg5[%c0_37, %c0_38] : memref<256x128xbf16, #tpu.memory_space<vmem>>, vector<256x128xbf16>
    tpu.vector_store %arg5[%c0_37, %c0_38], %64 {strides = array<i32>} : memref<256x128xbf16, #tpu.memory_space<vmem>>, vector<256x128xbf16>,
    return
  }
  func.func @transform_0(%arg0: i32) -> (i32, i32, i32) {
    %c0_i32 = arith.constant 0 : i32
    %c0_i32_0 = arith.constant 0 : i32
    %c0_i32_1 = arith.constant 0 : i32
    return %c0_i32, %arg0, %c0_i32_0 : i32, i32, i32
  }
  func.func @transform_1(%arg0: i32) -> (i32, i32, i32) {
    %c1_i32 = arith.constant 1 : i32
    %0 = arith.addi %arg0, %c1_i32 : i32
    %c16_i32 = arith.constant 16 : i32
    %1 = arith.muli %0, %c16_i32 : i32
    %c0_i32 = arith.constant 0 : i32
    %c0_i32_0 = arith.constant 0 : i32
    %c0_i32_1 = arith.constant 0 : i32
    return %c0_i32, %1, %c0_i32_0 : i32, i32, i32
  }
  func.func @transform_2(%arg0: i32) -> (i32, i32, i32) {
    %c0_i32 = arith.constant 0 : i32
    %c0_i32_0 = arith.constant 0 : i32
    %c0_i32_1 = arith.constant 0 : i32
    %c0_i32_2 = arith.constant 0 : i32
    return %c0_i32, %c0_i32_0, %c0_i32_1 : i32, i32, i32
  }
  func.func @transform_3(%arg0: i32) -> (i32, i32) {
    %c0_i32 = arith.constant 0 : i32
    %c0_i32_0 = arith.constant 0 : i32
    %c0_i32_1 = arith.constant 0 : i32
    return %c0_i32, %c0_i32_0 : i32, i32
  }
  func.func @transform_4(%arg0: i32) -> (i32, i32) {
    %c0_i32 = arith.constant 0 : i32
    %c0_i32_0 = arith.constant 0 : i32
    return %arg0, %c0_i32 : i32, i32
  }
}

module attributes {stable_mosaic.version = 11 : i64} {
  func.func @_conv2_stats_kernel(%arg0: i32, %arg1: memref<4x256x128xbf16, #tpu.memory_space<vmem>>, %arg2: memref<4x16x128xbf16, #tpu.memory_space<vmem>>, %arg3: memref<9x128x128xbf16, #tpu.memory_space<vmem>>, %arg4: memref<256x1xf32, #tpu.memory_space<vmem>>, %arg5: memref<1x128xf32, #tpu.memory_space<vmem>>, %arg6: memref<1x128xf32, #tpu.memory_space<vmem>>, %arg7: memref<2x128xf32, #tpu.memory_space<vmem>>, %arg8: memref<1x128xf32, #tpu.memory_space<vmem>>, %arg9: memref<1x128xf32, #tpu.memory_space<vmem>>) attributes {dimension_semantics = [#tpu.dimension_semantics<arbitrary>], iteration_bounds = array<i64: 1>, scalar_prefetch = 0 : i64, scratch_operands = 2 : i64, tpu.core_type = #tpu.core_type<tc>, window_params = [{transform_indices = @transform_0, window_bounds = array<i64: 4, 256, 128>}, {transform_indices = @transform_1, window_bounds = array<i64: 4, 16, 128>}, {pipeline_mode = #tpu.pipeline_mode<synchronous>, transform_indices = @transform_2, window_bounds = array<i64: 9, 128, 128>}, {transform_indices = @transform_3, window_bounds = array<i64: 256, 1>}, {pipeline_mode = #tpu.pipeline_mode<synchronous>, transform_indices = @transform_4, window_bounds = array<i64: 1, 128>}, {pipeline_mode = #tpu.pipeline_mode<synchronous>, transform_indices = @transform_5, window_bounds = array<i64: 1, 128>}, {pipeline_mode = #tpu.pipeline_mode<synchronous>, transform_indices = @transform_6, window_bounds = array<i64: 2, 128>}]} {
    %c0_i32 = arith.constant 0 : i32
    %0 = arith.cmpi eq, %arg0, %c0_i32 : i32
    %1 = arith.extui %0 : i1 to i32
    %c0_i32_0 = arith.constant 0 : i32
    %2 = arith.cmpi ne, %1, %c0_i32_0 : i32
    scf.if %2 {
      %cst_47 = arith.constant 0.000000e+00 : f32
      %76 = vector.broadcast %cst_47 : f32 to vector<1x128xf32>
      %c0_48 = arith.constant 0 : index
      %c0_49 = arith.constant 0 : index
      %77 = vector.load %arg8[%c0_48, %c0_49] : memref<1x128xf32, #tpu.memory_space<vmem>>, vector<1x128xf32>
      tpu.vector_store %arg8[%c0_48, %c0_49], %76 {strides = array<i32>} : memref<1x128xf32, #tpu.memory_space<vmem>>, vector<1x128xf32>,
      %cst_50 = arith.constant 0.000000e+00 : f32
      %78 = vector.broadcast %cst_50 : f32 to vector<1x128xf32>
      %c0_51 = arith.constant 0 : index
      %c0_52 = arith.constant 0 : index
      %79 = vector.load %arg9[%c0_51, %c0_52] : memref<1x128xf32, #tpu.memory_space<vmem>>, vector<1x128xf32>
      tpu.vector_store %arg9[%c0_51, %c0_52], %78 {strides = array<i32>} : memref<1x128xf32, #tpu.memory_space<vmem>>, vector<1x128xf32>,
    } else {
    }
    %c0 = arith.constant 0 : index
    %c0_1 = arith.constant 0 : index
    %c0_2 = arith.constant 0 : index
    %3 = vector.load %arg1[%c0, %c0_1, %c0_2] : memref<4x256x128xbf16, #tpu.memory_space<vmem>>, vector<4x256x128xbf16>
    %c0_3 = arith.constant 0 : index
    %c0_4 = arith.constant 0 : index
    %c0_5 = arith.constant 0 : index
    %4 = vector.load %arg2[%c0_3, %c0_4, %c0_5] : memref<4x16x128xbf16, #tpu.memory_space<vmem>>, vector<4x16x128xbf16>
    %5 = tpu.concatenate %3, %4 in 1 : vector<4x256x128xbf16>, vector<4x16x128xbf16> -> vector<4x272x128xbf16>
    %6 = vector.extract_strided_slice %5 {offsets = [0, 0, 0], sizes = [1, 256, 128], strides = [1, 1, 1]} : vector<4x272x128xbf16> to vector<1x256x128xbf16>
    %7 = vector.shape_cast %6 : vector<1x256x128xbf16> to vector<256x128xbf16>
    %c0_6 = arith.constant 0 : index
    %c0_7 = arith.constant 0 : index
    %c0_8 = arith.constant 0 : index
    %8 = vector.load %arg3[%c0_6, %c0_7, %c0_8] : memref<9x128x128xbf16, #tpu.memory_space<vmem>>, vector<1x128x128xbf16>
    %9 = vector.shape_cast %8 : vector<1x128x128xbf16> to vector<128x128xbf16>
    %cst = arith.constant dense<0.000000e+00> : vector<256x128xf32>
    %10 = tpu.matmul %7, %9, %cst {dimension_numbers = #tpu.dot_dimension_numbers<[1], [0], [0], [1], [0, 0, 1, 1], [], []>} : vector<256x128xbf16>, vector<128x128xbf16>, vector<256x128xf32> -> vector<256x128xf32>
    %11 = vector.extract_strided_slice %5 {offsets = [1, 0, 0], sizes = [1, 256, 128], strides = [1, 1, 1]} : vector<4x272x128xbf16> to vector<1x256x128xbf16>
    %12 = vector.shape_cast %11 : vector<1x256x128xbf16> to vector<256x128xbf16>
    %c1 = arith.constant 1 : index
    %c0_9 = arith.constant 0 : index
    %c0_10 = arith.constant 0 : index
    %13 = vector.load %arg3[%c1, %c0_9, %c0_10] : memref<9x128x128xbf16, #tpu.memory_space<vmem>>, vector<1x128x128xbf16>
    %14 = vector.shape_cast %13 : vector<1x128x128xbf16> to vector<128x128xbf16>
    %cst_11 = arith.constant dense<0.000000e+00> : vector<256x128xf32>
    %15 = tpu.matmul %12, %14, %cst_11 {dimension_numbers = #tpu.dot_dimension_numbers<[1], [0], [0], [1], [0, 0, 1, 1], [], []>} : vector<256x128xbf16>, vector<128x128xbf16>, vector<256x128xf32> -> vector<256x128xf32>
    %16 = arith.addf %10, %15 : vector<256x128xf32>
    %17 = vector.extract_strided_slice %5 {offsets = [0, 1, 0], sizes = [1, 256, 128], strides = [1, 1, 1]} : vector<4x272x128xbf16> to vector<1x256x128xbf16>
    %18 = vector.shape_cast %17 : vector<1x256x128xbf16> to vector<256x128xbf16>
    %c2 = arith.constant 2 : index
    %c0_12 = arith.constant 0 : index
    %c0_13 = arith.constant 0 : index
    %19 = vector.load %arg3[%c2, %c0_12, %c0_13] : memref<9x128x128xbf16, #tpu.memory_space<vmem>>, vector<1x128x128xbf16>
    %20 = vector.shape_cast %19 : vector<1x128x128xbf16> to vector<128x128xbf16>
    %cst_14 = arith.constant dense<0.000000e+00> : vector<256x128xf32>
    %21 = tpu.matmul %18, %20, %cst_14 {dimension_numbers = #tpu.dot_dimension_numbers<[1], [0], [0], [1], [0, 0, 1, 1], [], []>} : vector<256x128xbf16>, vector<128x128xbf16>, vector<256x128xf32> -> vector<256x128xf32>
    %22 = arith.addf %16, %21 : vector<256x128xf32>
    %23 = vector.extract_strided_slice %5 {offsets = [2, 0, 0], sizes = [1, 256, 128], strides = [1, 1, 1]} : vector<4x272x128xbf16> to vector<1x256x128xbf16>
    %24 = vector.shape_cast %23 : vector<1x256x128xbf16> to vector<256x128xbf16>
    %c3 = arith.constant 3 : index
    %c0_15 = arith.constant 0 : index
    %c0_16 = arith.constant 0 : index
    %25 = vector.load %arg3[%c3, %c0_15, %c0_16] : memref<9x128x128xbf16, #tpu.memory_space<vmem>>, vector<1x128x128xbf16>
    %26 = vector.shape_cast %25 : vector<1x128x128xbf16> to vector<128x128xbf16>
    %cst_17 = arith.constant dense<0.000000e+00> : vector<256x128xf32>
    %27 = tpu.matmul %24, %26, %cst_17 {dimension_numbers = #tpu.dot_dimension_numbers<[1], [0], [0], [1], [0, 0, 1, 1], [], []>} : vector<256x128xbf16>, vector<128x128xbf16>, vector<256x128xf32> -> vector<256x128xf32>
    %28 = arith.addf %22, %27 : vector<256x128xf32>
    %29 = vector.extract_strided_slice %5 {offsets = [3, 0, 0], sizes = [1, 256, 128], strides = [1, 1, 1]} : vector<4x272x128xbf16> to vector<1x256x128xbf16>
    %30 = vector.shape_cast %29 : vector<1x256x128xbf16> to vector<256x128xbf16>
    %c4 = arith.constant 4 : index
    %c0_18 = arith.constant 0 : index
    %c0_19 = arith.constant 0 : index
    %31 = vector.load %arg3[%c4, %c0_18, %c0_19] : memref<9x128x128xbf16, #tpu.memory_space<vmem>>, vector<1x128x128xbf16>
    %32 = vector.shape_cast %31 : vector<1x128x128xbf16> to vector<128x128xbf16>
    %cst_20 = arith.constant dense<0.000000e+00> : vector<256x128xf32>
    %33 = tpu.matmul %30, %32, %cst_20 {dimension_numbers = #tpu.dot_dimension_numbers<[1], [0], [0], [1], [0, 0, 1, 1], [], []>} : vector<256x128xbf16>, vector<128x128xbf16>, vector<256x128xf32> -> vector<256x128xf32>
    %34 = arith.addf %28, %33 : vector<256x128xf32>
    %35 = vector.extract_strided_slice %5 {offsets = [2, 1, 0], sizes = [1, 256, 128], strides = [1, 1, 1]} : vector<4x272x128xbf16> to vector<1x256x128xbf16>
    %36 = vector.shape_cast %35 : vector<1x256x128xbf16> to vector<256x128xbf16>
    %c5 = arith.constant 5 : index
    %c0_21 = arith.constant 0 : index
    %c0_22 = arith.constant 0 : index
    %37 = vector.load %arg3[%c5, %c0_21, %c0_22] : memref<9x128x128xbf16, #tpu.memory_space<vmem>>, vector<1x128x128xbf16>
    %38 = vector.shape_cast %37 : vector<1x128x128xbf16> to vector<128x128xbf16>
    %cst_23 = arith.constant dense<0.000000e+00> : vector<256x128xf32>
    %39 = tpu.matmul %36, %38, %cst_23 {dimension_numbers = #tpu.dot_dimension_numbers<[1], [0], [0], [1], [0, 0, 1, 1], [], []>} : vector<256x128xbf16>, vector<128x128xbf16>, vector<256x128xf32> -> vector<256x128xf32>
    %40 = arith.addf %34, %39 : vector<256x128xf32>
    %41 = vector.extract_strided_slice %5 {offsets = [0, 9, 0], sizes = [1, 256, 128], strides = [1, 1, 1]} : vector<4x272x128xbf16> to vector<1x256x128xbf16>
    %42 = vector.shape_cast %41 : vector<1x256x128xbf16> to vector<256x128xbf16>
    %c6 = arith.constant 6 : index
    %c0_24 = arith.constant 0 : index
    %c0_25 = arith.constant 0 : index
    %43 = vector.load %arg3[%c6, %c0_24, %c0_25] : memref<9x128x128xbf16, #tpu.memory_space<vmem>>, vector<1x128x128xbf16>
    %44 = vector.shape_cast %43 : vector<1x128x128xbf16> to vector<128x128xbf16>
    %cst_26 = arith.constant dense<0.000000e+00> : vector<256x128xf32>
    %45 = tpu.matmul %42, %44, %cst_26 {dimension_numbers = #tpu.dot_dimension_numbers<[1], [0], [0], [1], [0, 0, 1, 1], [], []>} : vector<256x128xbf16>, vector<128x128xbf16>, vector<256x128xf32> -> vector<256x128xf32>
    %46 = arith.addf %40, %45 : vector<256x128xf32>
    %47 = vector.extract_strided_slice %5 {offsets = [1, 9, 0], sizes = [1, 256, 128], strides = [1, 1, 1]} : vector<4x272x128xbf16> to vector<1x256x128xbf16>
    %48 = vector.shape_cast %47 : vector<1x256x128xbf16> to vector<256x128xbf16>
    %c7 = arith.constant 7 : index
    %c0_27 = arith.constant 0 : index
    %c0_28 = arith.constant 0 : index
    %49 = vector.load %arg3[%c7, %c0_27, %c0_28] : memref<9x128x128xbf16, #tpu.memory_space<vmem>>, vector<1x128x128xbf16>
    %50 = vector.shape_cast %49 : vector<1x128x128xbf16> to vector<128x128xbf16>
    %cst_29 = arith.constant dense<0.000000e+00> : vector<256x128xf32>
    %51 = tpu.matmul %48, %50, %cst_29 {dimension_numbers = #tpu.dot_dimension_numbers<[1], [0], [0], [1], [0, 0, 1, 1], [], []>} : vector<256x128xbf16>, vector<128x128xbf16>, vector<256x128xf32> -> vector<256x128xf32>
    %52 = arith.addf %46, %51 : vector<256x128xf32>
    %53 = vector.extract_strided_slice %5 {offsets = [0, 10, 0], sizes = [1, 256, 128], strides = [1, 1, 1]} : vector<4x272x128xbf16> to vector<1x256x128xbf16>
    %54 = vector.shape_cast %53 : vector<1x256x128xbf16> to vector<256x128xbf16>
    %c8 = arith.constant 8 : index
    %c0_30 = arith.constant 0 : index
    %c0_31 = arith.constant 0 : index
    %55 = vector.load %arg3[%c8, %c0_30, %c0_31] : memref<9x128x128xbf16, #tpu.memory_space<vmem>>, vector<1x128x128xbf16>
    %56 = vector.shape_cast %55 : vector<1x128x128xbf16> to vector<128x128xbf16>
    %cst_32 = arith.constant dense<0.000000e+00> : vector<256x128xf32>
    %57 = tpu.matmul %54, %56, %cst_32 {dimension_numbers = #tpu.dot_dimension_numbers<[1], [0], [0], [1], [0, 0, 1, 1], [], []>} : vector<256x128xbf16>, vector<128x128xbf16>, vector<256x128xf32> -> vector<256x128xf32>
    %58 = arith.addf %52, %57 : vector<256x128xf32>
    %c0_33 = arith.constant 0 : index
    %c0_34 = arith.constant 0 : index
    %59 = vector.load %arg4[%c0_33, %c0_34] : memref<256x1xf32, #tpu.memory_space<vmem>>, vector<256x1xf32>
    %60 = vector.broadcast %59 : vector<256x1xf32> to vector<256x128xf32>
    %61 = arith.mulf %58, %60 : vector<256x128xf32>
    %c0_35 = arith.constant 0 : index
    %c0_36 = arith.constant 0 : index
    %62 = vector.load %arg8[%c0_35, %c0_36] : memref<1x128xf32, #tpu.memory_space<vmem>>, vector<1x128xf32>
    %cst_37 = arith.constant dense<0.000000e+00> : vector<128xf32>
    %63 = vector.multi_reduction <add>, %61, %cst_37 [0] : vector<256x128xf32> to vector<128xf32>
    %64 = vector.shape_cast %63 : vector<128xf32> to vector<1x128xf32>
    %65 = arith.addf %62, %64 : vector<1x128xf32>
    %c0_38 = arith.constant 0 : index
    %c0_39 = arith.constant 0 : index
    %66 = vector.load %arg8[%c0_38, %c0_39] : memref<1x128xf32, #tpu.memory_space<vmem>>, vector<1x128xf32>
    tpu.vector_store %arg8[%c0_38, %c0_39], %65 {strides = array<i32>} : memref<1x128xf32, #tpu.memory_space<vmem>>, vector<1x128xf32>,
    %c0_40 = arith.constant 0 : index
    %c0_41 = arith.constant 0 : index
    %67 = vector.load %arg9[%c0_40, %c0_41] : memref<1x128xf32, #tpu.memory_space<vmem>>, vector<1x128xf32>
    %68 = arith.mulf %61, %58 : vector<256x128xf32>
    %cst_42 = arith.constant dense<0.000000e+00> : vector<128xf32>
    %69 = vector.multi_reduction <add>, %68, %cst_42 [0] : vector<256x128xf32> to vector<128xf32>
    %70 = vector.shape_cast %69 : vector<128xf32> to vector<1x128xf32>
    %71 = arith.addf %67, %70 : vector<1x128xf32>
    %c0_43 = arith.constant 0 : index
    %c0_44 = arith.constant 0 : index
    %72 = vector.load %arg9[%c0_43, %c0_44] : memref<1x128xf32, #tpu.memory_space<vmem>>, vector<1x128xf32>
    tpu.vector_store %arg9[%c0_43, %c0_44], %71 {strides = array<i32>} : memref<1x128xf32, #tpu.memory_space<vmem>>, vector<1x128xf32>,
    %c0_i32_45 = arith.constant 0 : i32
    %73 = arith.cmpi eq, %arg0, %c0_i32_45 : i32
    %74 = arith.extui %73 : i1 to i32
    %c0_i32_46 = arith.constant 0 : i32
    %75 = arith.cmpi ne, %74, %c0_i32_46 : i32
    scf.if %75 {
      %c0_47 = arith.constant 0 : index
      %c0_48 = arith.constant 0 : index
      %76 = vector.load %arg8[%c0_47, %c0_48] : memref<1x128xf32, #tpu.memory_space<vmem>>, vector<1x128xf32>
      %cst_49 = arith.constant 7.812500e-03 : f32
      %77 = vector.broadcast %cst_49 : f32 to vector<1x128xf32>
      %78 = arith.mulf %76, %77 : vector<1x128xf32>
      %c0_50 = arith.constant 0 : index
      %c0_51 = arith.constant 0 : index
      %79 = vector.load %arg9[%c0_50, %c0_51] : memref<1x128xf32, #tpu.memory_space<vmem>>, vector<1x128xf32>
      %cst_52 = arith.constant 7.812500e-03 : f32
      %80 = vector.broadcast %cst_52 : f32 to vector<1x128xf32>
      %81 = arith.mulf %79, %80 : vector<1x128xf32>
      %82 = arith.mulf %78, %78 : vector<1x128xf32>
      %83 = arith.subf %81, %82 : vector<1x128xf32>
      %cst_53 = arith.constant 0.000000e+00 : f32
      %84 = vector.broadcast %cst_53 : f32 to vector<1x128xf32>
      %85 = arith.maximumf %83, %84 : vector<1x128xf32>
      %c0_54 = arith.constant 0 : index
      %c0_55 = arith.constant 0 : index
      %86 = vector.load %arg5[%c0_54, %c0_55] : memref<1x128xf32, #tpu.memory_space<vmem>>, vector<1x128xf32>
      %cst_56 = arith.constant 9.99999974E-6 : f32
      %87 = vector.broadcast %cst_56 : f32 to vector<1x128xf32>
      %88 = arith.addf %85, %87 : vector<1x128xf32>
      %89 = math.rsqrt %88 : vector<1x128xf32>
      %90 = arith.mulf %86, %89 : vector<1x128xf32>
      %c0_57 = arith.constant 0 : index
      %c0_58 = arith.constant 0 : index
      %91 = vector.load %arg6[%c0_57, %c0_58] : memref<1x128xf32, #tpu.memory_space<vmem>>, vector<1x128xf32>
      %92 = arith.mulf %78, %90 : vector<1x128xf32>
      %93 = arith.subf %91, %92 : vector<1x128xf32>
      %94 = tpu.concatenate %90, %93 in 0 : vector<1x128xf32>, vector<1x128xf32> -> vector<2x128xf32>
      %c0_59 = arith.constant 0 : index
      %c0_60 = arith.constant 0 : index
      %95 = vector.load %arg7[%c0_59, %c0_60] : memref<2x128xf32, #tpu.memory_space<vmem>>, vector<2x128xf32>
      tpu.vector_store %arg7[%c0_59, %c0_60], %94 {strides = array<i32>} : memref<2x128xf32, #tpu.memory_space<vmem>>, vector<2x128xf32>,
    } else {
    }
    return
  }
  func.func @transform_0(%arg0: i32) -> (i32, i32, i32) {
    %c0_i32 = arith.constant 0 : i32
    %c0_i32_0 = arith.constant 0 : i32
    %c0_i32_1 = arith.constant 0 : i32
    return %c0_i32, %arg0, %c0_i32_0 : i32, i32, i32
  }
  func.func @transform_1(%arg0: i32) -> (i32, i32, i32) {
    %c1_i32 = arith.constant 1 : i32
    %0 = arith.addi %arg0, %c1_i32 : i32
    %c16_i32 = arith.constant 16 : i32
    %1 = arith.muli %0, %c16_i32 : i32
    %c0_i32 = arith.constant 0 : i32
    %c0_i32_0 = arith.constant 0 : i32
    %c0_i32_1 = arith.constant 0 : i32
    return %c0_i32, %1, %c0_i32_0 : i32, i32, i32
  }
  func.func @transform_2(%arg0: i32) -> (i32, i32, i32) {
    %c0_i32 = arith.constant 0 : i32
    %c0_i32_0 = arith.constant 0 : i32
    %c0_i32_1 = arith.constant 0 : i32
    %c0_i32_2 = arith.constant 0 : i32
    return %c0_i32, %c0_i32_0, %c0_i32_1 : i32, i32, i32
  }
  func.func @transform_3(%arg0: i32) -> (i32, i32) {
    %c0_i32 = arith.constant 0 : i32
    %c0_i32_0 = arith.constant 0 : i32
    return %arg0, %c0_i32 : i32, i32
  }
  func.func @transform_4(%arg0: i32) -> (i32, i32) {
    %c0_i32 = arith.constant 0 : i32
    %c0_i32_0 = arith.constant 0 : i32
    %c0_i32_1 = arith.constant 0 : i32
    return %c0_i32, %c0_i32_0 : i32, i32
  }
  func.func @transform_5(%arg0: i32) -> (i32, i32) {
    %c0_i32 = arith.constant 0 : i32
    %c0_i32_0 = arith.constant 0 : i32
    %c0_i32_1 = arith.constant 0 : i32
    return %c0_i32, %c0_i32_0 : i32, i32
  }
  func.func @transform_6(%arg0: i32) -> (i32, i32) {
    %c0_i32 = arith.constant 0 : i32
    %c0_i32_0 = arith.constant 0 : i32
    %c0_i32_1 = arith.constant 0 : i32
    return %c0_i32, %c0_i32_0 : i32, i32
  }
}

module attributes {stable_mosaic.version = 11 : i64} {
  func.func @_mm_stats_kernel(%arg0: i32, %arg1: memref<256x128xbf16, #tpu.memory_space<vmem>>, %arg2: memref<128x128xbf16, #tpu.memory_space<vmem>>, %arg3: memref<1x128xf32, #tpu.memory_space<vmem>>, %arg4: memref<1x128xf32, #tpu.memory_space<vmem>>, %arg5: memref<2x128xf32, #tpu.memory_space<vmem>>, %arg6: memref<1x128xf32, #tpu.memory_space<vmem>>, %arg7: memref<1x128xf32, #tpu.memory_space<vmem>>) attributes {dimension_semantics = [#tpu.dimension_semantics<arbitrary>], iteration_bounds = array<i64: 1>, scalar_prefetch = 0 : i64, scratch_operands = 2 : i64, tpu.core_type = #tpu.core_type<tc>, window_params = [{transform_indices = @transform_0, window_bounds = array<i64: 256, 128>}, {pipeline_mode = #tpu.pipeline_mode<synchronous>, transform_indices = @transform_1, window_bounds = array<i64: 128, 128>}, {pipeline_mode = #tpu.pipeline_mode<synchronous>, transform_indices = @transform_2, window_bounds = array<i64: 1, 128>}, {pipeline_mode = #tpu.pipeline_mode<synchronous>, transform_indices = @transform_3, window_bounds = array<i64: 1, 128>}, {pipeline_mode = #tpu.pipeline_mode<synchronous>, transform_indices = @transform_4, window_bounds = array<i64: 2, 128>}]} {
    %c0_i32 = arith.constant 0 : i32
    %0 = arith.cmpi eq, %arg0, %c0_i32 : i32
    %1 = arith.extui %0 : i1 to i32
    %c0_i32_0 = arith.constant 0 : i32
    %2 = arith.cmpi ne, %1, %c0_i32_0 : i32
    scf.if %2 {
      %cst_16 = arith.constant 0.000000e+00 : f32
      %20 = vector.broadcast %cst_16 : f32 to vector<1x128xf32>
      %c0_17 = arith.constant 0 : index
      %c0_18 = arith.constant 0 : index
      %21 = vector.load %arg6[%c0_17, %c0_18] : memref<1x128xf32, #tpu.memory_space<vmem>>, vector<1x128xf32>
      tpu.vector_store %arg6[%c0_17, %c0_18], %20 {strides = array<i32>} : memref<1x128xf32, #tpu.memory_space<vmem>>, vector<1x128xf32>,
      %cst_19 = arith.constant 0.000000e+00 : f32
      %22 = vector.broadcast %cst_19 : f32 to vector<1x128xf32>
      %c0_20 = arith.constant 0 : index
      %c0_21 = arith.constant 0 : index
      %23 = vector.load %arg7[%c0_20, %c0_21] : memref<1x128xf32, #tpu.memory_space<vmem>>, vector<1x128xf32>
      tpu.vector_store %arg7[%c0_20, %c0_21], %22 {strides = array<i32>} : memref<1x128xf32, #tpu.memory_space<vmem>>, vector<1x128xf32>,
    } else {
    }
    %c0 = arith.constant 0 : index
    %c0_1 = arith.constant 0 : index
    %3 = vector.load %arg1[%c0, %c0_1] : memref<256x128xbf16, #tpu.memory_space<vmem>>, vector<256x128xbf16>
    %c0_2 = arith.constant 0 : index
    %c0_3 = arith.constant 0 : index
    %4 = vector.load %arg2[%c0_2, %c0_3] : memref<128x128xbf16, #tpu.memory_space<vmem>>, vector<128x128xbf16>
    %cst = arith.constant dense<0.000000e+00> : vector<256x128xf32>
    %5 = tpu.matmul %3, %4, %cst {dimension_numbers = #tpu.dot_dimension_numbers<[1], [0], [0], [1], [0, 0, 1, 1], [], []>} : vector<256x128xbf16>, vector<128x128xbf16>, vector<256x128xf32> -> vector<256x128xf32>
    %c0_4 = arith.constant 0 : index
    %c0_5 = arith.constant 0 : index
    %6 = vector.load %arg6[%c0_4, %c0_5] : memref<1x128xf32, #tpu.memory_space<vmem>>, vector<1x128xf32>
    %cst_6 = arith.constant dense<0.000000e+00> : vector<128xf32>
    %7 = vector.multi_reduction <add>, %5, %cst_6 [0] : vector<256x128xf32> to vector<128xf32>
    %8 = vector.shape_cast %7 : vector<128xf32> to vector<1x128xf32>
    %9 = arith.addf %6, %8 : vector<1x128xf32>
    %c0_7 = arith.constant 0 : index
    %c0_8 = arith.constant 0 : index
    %10 = vector.load %arg6[%c0_7, %c0_8] : memref<1x128xf32, #tpu.memory_space<vmem>>, vector<1x128xf32>
    tpu.vector_store %arg6[%c0_7, %c0_8], %9 {strides = array<i32>} : memref<1x128xf32, #tpu.memory_space<vmem>>, vector<1x128xf32>,
    %c0_9 = arith.constant 0 : index
    %c0_10 = arith.constant 0 : index
    %11 = vector.load %arg7[%c0_9, %c0_10] : memref<1x128xf32, #tpu.memory_space<vmem>>, vector<1x128xf32>
    %12 = arith.mulf %5, %5 : vector<256x128xf32>
    %cst_11 = arith.constant dense<0.000000e+00> : vector<128xf32>
    %13 = vector.multi_reduction <add>, %12, %cst_11 [0] : vector<256x128xf32> to vector<128xf32>
    %14 = vector.shape_cast %13 : vector<128xf32> to vector<1x128xf32>
    %15 = arith.addf %11, %14 : vector<1x128xf32>
    %c0_12 = arith.constant 0 : index
    %c0_13 = arith.constant 0 : index
    %16 = vector.load %arg7[%c0_12, %c0_13] : memref<1x128xf32, #tpu.memory_space<vmem>>, vector<1x128xf32>
    tpu.vector_store %arg7[%c0_12, %c0_13], %15 {strides = array<i32>} : memref<1x128xf32, #tpu.memory_space<vmem>>, vector<1x128xf32>,
    %c0_i32_14 = arith.constant 0 : i32
    %17 = arith.cmpi eq, %arg0, %c0_i32_14 : i32
    %18 = arith.extui %17 : i1 to i32
    %c0_i32_15 = arith.constant 0 : i32
    %19 = arith.cmpi ne, %18, %c0_i32_15 : i32
    scf.if %19 {
      %c0_16 = arith.constant 0 : index
      %c0_17 = arith.constant 0 : index
      %20 = vector.load %arg6[%c0_16, %c0_17] : memref<1x128xf32, #tpu.memory_space<vmem>>, vector<1x128xf32>
      %cst_18 = arith.constant 7.812500e-03 : f32
      %21 = vector.broadcast %cst_18 : f32 to vector<1x128xf32>
      %22 = arith.mulf %20, %21 : vector<1x128xf32>
      %c0_19 = arith.constant 0 : index
      %c0_20 = arith.constant 0 : index
      %23 = vector.load %arg7[%c0_19, %c0_20] : memref<1x128xf32, #tpu.memory_space<vmem>>, vector<1x128xf32>
      %cst_21 = arith.constant 7.812500e-03 : f32
      %24 = vector.broadcast %cst_21 : f32 to vector<1x128xf32>
      %25 = arith.mulf %23, %24 : vector<1x128xf32>
      %26 = arith.mulf %22, %22 : vector<1x128xf32>
      %27 = arith.subf %25, %26 : vector<1x128xf32>
      %cst_22 = arith.constant 0.000000e+00 : f32
      %28 = vector.broadcast %cst_22 : f32 to vector<1x128xf32>
      %29 = arith.maximumf %27, %28 : vector<1x128xf32>
      %c0_23 = arith.constant 0 : index
      %c0_24 = arith.constant 0 : index
      %30 = vector.load %arg3[%c0_23, %c0_24] : memref<1x128xf32, #tpu.memory_space<vmem>>, vector<1x128xf32>
      %cst_25 = arith.constant 9.99999974E-6 : f32
      %31 = vector.broadcast %cst_25 : f32 to vector<1x128xf32>
      %32 = arith.addf %29, %31 : vector<1x128xf32>
      %33 = math.rsqrt %32 : vector<1x128xf32>
      %34 = arith.mulf %30, %33 : vector<1x128xf32>
      %c0_26 = arith.constant 0 : index
      %c0_27 = arith.constant 0 : index
      %35 = vector.load %arg4[%c0_26, %c0_27] : memref<1x128xf32, #tpu.memory_space<vmem>>, vector<1x128xf32>
      %36 = arith.mulf %22, %34 : vector<1x128xf32>
      %37 = arith.subf %35, %36 : vector<1x128xf32>
      %38 = tpu.concatenate %34, %37 in 0 : vector<1x128xf32>, vector<1x128xf32> -> vector<2x128xf32>
      %c0_28 = arith.constant 0 : index
      %c0_29 = arith.constant 0 : index
      %39 = vector.load %arg5[%c0_28, %c0_29] : memref<2x128xf32, #tpu.memory_space<vmem>>, vector<2x128xf32>
      tpu.vector_store %arg5[%c0_28, %c0_29], %38 {strides = array<i32>} : memref<2x128xf32, #tpu.memory_space<vmem>>, vector<2x128xf32>,
    } else {
    }
    return
  }
  func.func @transform_0(%arg0: i32) -> (i32, i32) {
    %c0_i32 = arith.constant 0 : i32
    %c0_i32_0 = arith.constant 0 : i32
    return %arg0, %c0_i32 : i32, i32
  }
  func.func @transform_1(%arg0: i32) -> (i32, i32) {
    %c0_i32 = arith.constant 0 : i32
    %c0_i32_0 = arith.constant 0 : i32
    %c0_i32_1 = arith.constant 0 : i32
    return %c0_i32, %c0_i32_0 : i32, i32
  }
  func.func @transform_2(%arg0: i32) -> (i32, i32) {
    %c0_i32 = arith.constant 0 : i32
    %c0_i32_0 = arith.constant 0 : i32
    %c0_i32_1 = arith.constant 0 : i32
    return %c0_i32, %c0_i32_0 : i32, i32
  }
  func.func @transform_3(%arg0: i32) -> (i32, i32) {
    %c0_i32 = arith.constant 0 : i32
    %c0_i32_0 = arith.constant 0 : i32
    %c0_i32_1 = arith.constant 0 : i32
    return %c0_i32, %c0_i32_0 : i32, i32
  }
  func.func @transform_4(%arg0: i32) -> (i32, i32) {
    %c0_i32 = arith.constant 0 : i32
    %c0_i32_0 = arith.constant 0 : i32
    %c0_i32_1 = arith.constant 0 : i32
    return %c0_i32, %c0_i32_0 : i32, i32
  }
}

module attributes {stable_mosaic.version = 11 : i64} {
  func.func @_mm_apply_proj_kernel(%arg0: i32, %arg1: memref<256x128xbf16, #tpu.memory_space<vmem>>, %arg2: memref<128x128xbf16, #tpu.memory_space<vmem>>, %arg3: memref<2x128xf32, #tpu.memory_space<vmem>>, %arg4: memref<256x128xbf16, #tpu.memory_space<vmem>>, %arg5: memref<128x128xbf16, #tpu.memory_space<vmem>>, %arg6: memref<256x128xf32, #tpu.memory_space<vmem>>) attributes {dimension_semantics = [#tpu.dimension_semantics<parallel>], iteration_bounds = array<i64: 1>, scalar_prefetch = 0 : i64, scratch_operands = 0 : i64, tpu.core_type = #tpu.core_type<tc>, window_params = [{transform_indices = @transform_0, window_bounds = array<i64: 256, 128>}, {pipeline_mode = #tpu.pipeline_mode<synchronous>, transform_indices = @transform_1, window_bounds = array<i64: 128, 128>}, {pipeline_mode = #tpu.pipeline_mode<synchronous>, transform_indices = @transform_2, window_bounds = array<i64: 2, 128>}, {transform_indices = @transform_3, window_bounds = array<i64: 256, 128>}, {pipeline_mode = #tpu.pipeline_mode<synchronous>, transform_indices = @transform_4, window_bounds = array<i64: 128, 128>}, {transform_indices = @transform_5, window_bounds = array<i64: 256, 128>}]} {
    %c0 = arith.constant 0 : index
    %c0_0 = arith.constant 0 : index
    %0 = vector.load %arg1[%c0, %c0_0] : memref<256x128xbf16, #tpu.memory_space<vmem>>, vector<256x128xbf16>
    %c0_1 = arith.constant 0 : index
    %c0_2 = arith.constant 0 : index
    %1 = vector.load %arg2[%c0_1, %c0_2] : memref<128x128xbf16, #tpu.memory_space<vmem>>, vector<128x128xbf16>
    %cst = arith.constant dense<0.000000e+00> : vector<256x128xf32>
    %2 = tpu.matmul %0, %1, %cst {dimension_numbers = #tpu.dot_dimension_numbers<[1], [0], [0], [1], [0, 0, 1, 1], [], []>} : vector<256x128xbf16>, vector<128x128xbf16>, vector<256x128xf32> -> vector<256x128xf32>
    %c0_3 = arith.constant 0 : index
    %c0_4 = arith.constant 0 : index
    %3 = vector.load %arg3[%c0_3, %c0_4] : memref<2x128xf32, #tpu.memory_space<vmem>>, vector<1x128xf32>
    %4 = vector.broadcast %3 : vector<1x128xf32> to vector<256x128xf32>
    %5 = arith.mulf %2, %4 : vector<256x128xf32>
    %c1 = arith.constant 1 : index
    %c0_5 = arith.constant 0 : index
    %6 = vector.load %arg3[%c1, %c0_5] : memref<2x128xf32, #tpu.memory_space<vmem>>, vector<1x128xf32>
    %7 = vector.broadcast %6 : vector<1x128xf32> to vector<256x128xf32>
    %8 = arith.addf %5, %7 : vector<256x128xf32>
    %c0_6 = arith.constant 0 : index
    %c0_7 = arith.constant 0 : index
    %9 = vector.load %arg4[%c0_6, %c0_7] : memref<256x128xbf16, #tpu.memory_space<vmem>>, vector<256x128xbf16>
    %c0_8 = arith.constant 0 : index
    %c0_9 = arith.constant 0 : index
    %10 = vector.load %arg5[%c0_8, %c0_9] : memref<128x128xbf16, #tpu.memory_space<vmem>>, vector<128x128xbf16>
    %cst_10 = arith.constant dense<0.000000e+00> : vector<256x128xf32>
    %11 = tpu.matmul %9, %10, %cst_10 {dimension_numbers = #tpu.dot_dimension_numbers<[1], [0], [0], [1], [0, 0, 1, 1], [], []>} : vector<256x128xbf16>, vector<128x128xbf16>, vector<256x128xf32> -> vector<256x128xf32>
    %12 = arith.addf %8, %11 : vector<256x128xf32>
    %cst_11 = arith.constant 0.000000e+00 : f32
    %13 = vector.broadcast %cst_11 : f32 to vector<256x128xf32>
    %14 = arith.maximumf %12, %13 : vector<256x128xf32>
    %c0_12 = arith.constant 0 : index
    %c0_13 = arith.constant 0 : index
    %15 = vector.load %arg6[%c0_12, %c0_13] : memref<256x128xf32, #tpu.memory_space<vmem>>, vector<256x128xf32>
    tpu.vector_store %arg6[%c0_12, %c0_13], %14 {strides = array<i32>} : memref<256x128xf32, #tpu.memory_space<vmem>>, vector<256x128xf32>,
    return
  }
  func.func @transform_0(%arg0: i32) -> (i32, i32) {
    %c0_i32 = arith.constant 0 : i32
    %c0_i32_0 = arith.constant 0 : i32
    return %arg0, %c0_i32 : i32, i32
  }
  func.func @transform_1(%arg0: i32) -> (i32, i32) {
    %c0_i32 = arith.constant 0 : i32
    %c0_i32_0 = arith.constant 0 : i32
    %c0_i32_1 = arith.constant 0 : i32
    return %c0_i32, %c0_i32_0 : i32, i32
  }
  func.func @transform_2(%arg0: i32) -> (i32, i32) {
    %c0_i32 = arith.constant 0 : i32
    %c0_i32_0 = arith.constant 0 : i32
    %c0_i32_1 = arith.constant 0 : i32
    return %c0_i32, %c0_i32_0 : i32, i32
  }
  func.func @transform_3(%arg0: i32) -> (i32, i32) {
    %c0_i32 = arith.constant 0 : i32
    %c0_i32_0 = arith.constant 0 : i32
    return %arg0, %c0_i32 : i32, i32
  }
  func.func @transform_4(%arg0: i32) -> (i32, i32) {
    %c0_i32 = arith.constant 0 : i32
    %c0_i32_0 = arith.constant 0 : i32
    %c0_i32_1 = arith.constant 0 : i32
    return %c0_i32, %c0_i32_0 : i32, i32
  }
  func.func @transform_5(%arg0: i32) -> (i32, i32) {
    %c0_i32 = arith.constant 0 : i32
    %c0_i32_0 = arith.constant 0 : i32
    return %arg0, %c0_i32 : i32, i32
  }
}

</mosaic_0001>

<bundles_post_ra>
// kernel: bottleneck_forward.7
= control target key start
LH: loop header
LB: loop body
LE: loop exit
PB: predicated region body
PF: predicated region fallthrough
CT: control target
= control target key end

     0   :  { %s1194_s12 = smov 0   ;;  %s1352_s0 = inlined_call_operand.vmem [shape: bf16[512,128], index: 0, kind: input, shape index: {}]   ;;  %s1353_s1 = inlined_call_operand.vmem [shape: bf16[128,128], index: 1, kind: input, shape index: {}]   ;;  %s1354_s2 = inlined_call_operand.vmem [shape: f32[2,128], index: 2, kind: input, shape index: {}]   ;;  %s1355_s3 = inlined_call_operand.vmem [shape: bf16[512,128], index: 3, kind: output, shape index: {}]  }
   0x1 LB: > { %s850_s13 = sadd.s32 4294967295, %s1172_s12   ;;  %p854_p0 = scmp.ge.s32.totalorder %s1172_s12, 1  ;;  %s1172_s12 = sphi %s1194_s12, %s13_s12  }
   0x2   : > { %p138_p1 = scmp.lt.s32.totalorder %s1172_s12, 3 }
   0x4   : > { %p139_p2 = pnand %p854_p0, %p138_p1 }
   0x5   : > { %v1142_v0 = vld [vmem:[%s1353_s1] sm:$0xff] (!%p139_p2)   ;;  %s855_s16 = sshll.u32 (!%p139_p2), %s850_s13, 5  ;;  %v1143_v1 = vld [vmem:[%s1353_s1 + $0x8] sm:$0xff] (!%p139_p2)   ;;  %v1144_v2 = vld [vmem:[%s1353_s1 + $0x10] sm:$0xff] (!%p139_p2)  }
   0x6   : > { %142 = sbr.rel (%p139_p2) target bundleno = 287 (0x11f), region = 32  ;;  %p163_p3 = scmp.lt.s32.totalorder (!%p139_p2), %s855_s16, 63  ;;  %1070 = vmatprep.subr.bf16.mxu0 (!%p139_p2), %v1142_v0  ;;  %1118 = vmatprep.subr.bf16.mxu1 (!%p139_p2), %v1142_v0  ;;  %v1145_v3 = vld [vmem:[%s1353_s1 + $0x18] sm:$0xff] (!%p139_p2)   ;;  %v1146_v6 = vld [vmem:[%s1353_s1 + $0x20] sm:$0xff] (!%p139_p2)   ;;  %v1147_v7 = vld [vmem:[%s1353_s1 + $0x28] sm:$0xff] (!%p139_p2)  }
   0x7   : > { %1071 = vmatpush3.bf16.msra.mxu0 (!%p139_p2), %v1142_v0  ;;  %1126 = vmatpush3.bf16.msra.mxu1 (!%p139_p2), %v1142_v0  ;;  %v1148_v8 = vld [vmem:[%s1353_s1 + $0x30] sm:$0xff] (!%p139_p2)   ;;  %v1149_v9 = vld [vmem:[%s1353_s1 + $0x38] sm:$0xff] (!%p139_p2)   ;;  %v1255_v24 = vld [vmem:[%s1354_s2] ss:$0 sm:$0xff] (!%p139_p2) }
   0x8   : > { %1072 = vmatprep.subr.bf16.mxu0 (!%p139_p2), %v1143_v1  ;;  %1119 = vmatprep.subr.bf16.mxu1 (!%p139_p2), %v1143_v1  ;;  %v1260_v26 = vld [vmem:[%s1354_s2 + $0x1] ss:$0 sm:$0xff] (!%p139_p2) }
   0xb   : > { %1073 = vmatpush3.bf16.msra.mxu0 (!%p139_p2), %v1143_v1  ;;  %1127 = vmatpush3.bf16.msra.mxu1 (!%p139_p2), %v1143_v1 }
   0xc   : > { %1074 = vmatprep.subr.bf16.mxu0 (!%p139_p2), %v1144_v2  ;;  %1120 = vmatprep.subr.bf16.mxu1 (!%p139_p2), %v1144_v2 }
   0xd   : > { %s1357_s16 = smov (!%p163_p3, %s855_s16), 63 }
   0xe   : > { %s856_s21 = sshll.u32 %s1357_s16, 2 }
   0xf   : > { %s1219_s24 = scalar_lea.vmem %s1352_s0, %s856_s21  ;;  %1075 = vmatpush3.bf16.msra.mxu0 %v1144_v2  ;;  %1128 = vmatpush3.bf16.msra.mxu1 %v1144_v2  ;;  %s1283_s15 = scalar_lea.vmem %s1355_s3, %s856_s21 }
  0x10   : > { %v1150_v4 = vld [vmem:[%s1219_s24] sm:$0xff]   ;;  %1076 = vmatprep.subr.bf16.mxu0 %v1145_v3  ;;  %1121 = vmatprep.subr.bf16.mxu1 %v1145_v3  ;;  %v1152_v10 = vld [vmem:[%s1219_s24 + $0x8] sm:$0xff]   ;;  %v1154_v12 = vld [vmem:[%s1219_s24 + $0x10] sm:$0xff]  }
  0x11   : > { %v1151_v5 = vld [vmem:[%s1219_s24 + $0x40] sm:$0xff]   ;;  %1086 = vmatprep.mubr.bf16.mxu0 %v1150_v4  ;;  %v1153_v11 = vld [vmem:[%s1219_s24 + $0x48] sm:$0xff]   ;;  %v1155_v13 = vld [vmem:[%s1219_s24 + $0x50] sm:$0xff]  }
  0x12   : > { %1102 = vmatprep.mubr.bf16.mxu1 %v1151_v5  ;;  %v1156_v14 = vld [vmem:[%s1219_s24 + $0x18] sm:$0xff]   ;;  %v1158_v16 = vld [vmem:[%s1219_s24 + $0x20] sm:$0xff]   ;;  %v1160_v18 = vld [vmem:[%s1219_s24 + $0x28] sm:$0xff]  }
  0x13   : > { %1077 = vmatpush3.bf16.msra.mxu0 %v1145_v3  ;;  %1129 = vmatpush3.bf16.msra.mxu1 %v1145_v3  ;;  %v1157_v15 = vld [vmem:[%s1219_s24 + $0x58] sm:$0xff]   ;;  %v1159_v17 = vld [vmem:[%s1219_s24 + $0x60] sm:$0xff]   ;;  %v1161_v19 = vld [vmem:[%s1219_s24 + $0x68] sm:$0xff]  }
  0x14   : > { %1078 = vmatprep.subr.bf16.mxu0 %v1146_v6  ;;  %1122 = vmatprep.subr.bf16.mxu1 %v1146_v6  ;;  %v1162_v20 = vld [vmem:[%s1219_s24 + $0x30] sm:$0xff]   ;;  %v1164_v22 = vld [vmem:[%s1219_s24 + $0x38] sm:$0xff]  }
  0x15   : > { %v1163_v21 = vld [vmem:[%s1219_s24 + $0x70] sm:$0xff]   ;;  %v1165_v23 = vld [vmem:[%s1219_s24 + $0x78] sm:$0xff]  }
  0x17   : > { %1079 = vmatpush3.bf16.msra.mxu0 %v1146_v6  ;;  %1130 = vmatpush3.bf16.msra.mxu1 %v1146_v6 }
  0x18   : > { %1080 = vmatprep.subr.bf16.mxu0 %v1147_v7  ;;  %1123 = vmatprep.subr.bf16.mxu1 %v1147_v7 }
  0x1b   : > { %1081 = vmatpush3.bf16.msra.mxu0 %v1147_v7  ;;  %1131 = vmatpush3.bf16.msra.mxu1 %v1147_v7 }
  0x1c   : > { %1082 = vmatprep.subr.bf16.mxu0 %v1148_v8  ;;  %1124 = vmatprep.subr.bf16.mxu1 %v1148_v8 }
  0x1f   : > { %1083 = vmatpush3.bf16.msra.mxu0 %v1148_v8  ;;  %1132 = vmatpush3.bf16.msra.mxu1 %v1148_v8 }
  0x20   : > { %1084 = vmatprep.subr.bf16.mxu0 %v1149_v9  ;;  %1125 = vmatprep.subr.bf16.mxu1 %v1149_v9 }
  0x23   : > { %1085 = vmatpush3.bf16.msra.mxu0 %v1149_v9  ;;  %1133 = vmatpush3.bf16.msra.mxu1 %v1149_v9 }
  0x26   : > { %1087 = vmatmul.mubr.bf16.vlgmr.msra.gmra.mrb[0].mxu0 %v1152_v10  ;;  %1103 = vmatmul.mubr.bf16.vlgmr.msra.gmra.mrb[0].mxu1 %v1153_v11 }
  0x27   : > { %1090 = vmatprep.mubr.bf16.mxu0 %v1154_v12  ;;  %1106 = vmatprep.mubr.bf16.mxu1 %v1155_v13 }
  0x2e   : > { %1091 = vmatmul.mubr.bf16.gmra.mrb[4].mxu0 %v1156_v14  ;;  %1107 = vmatmul.mubr.bf16.gmra.mrb[4].mxu1 %v1157_v15 }
  0x2f   : > { %1094 = vmatprep.mubr.bf16.mxu0 %v1158_v16  ;;  %1110 = vmatprep.mubr.bf16.mxu1 %v1159_v17 }
  0x36   : > { %1095 = vmatmul.mubr.bf16.gmra.mrb[8].mxu0 %v1160_v18  ;;  %1111 = vmatmul.mubr.bf16.gmra.mrb[8].mxu1 %v1161_v19 }
  0x37   : > { %1098 = vmatprep.mubr.bf16.mxu0 %v1162_v20  ;;  %1114 = vmatprep.mubr.bf16.mxu1 %v1163_v21 }
  0x3e   : > { %1099 = vmatmul.mubr.bf16.gmra.mrb[12].mxu0 %v1164_v22  ;;  %1115 = vmatmul.mubr.bf16.gmra.mrb[12].mxu1 %v1165_v23 }
  0xf9   : > { %v1088_v25 = vpop.f32.mrb[0].mxu0  ;;  %v1104_v27 = vpop.f32.mrb[0].mxu1 }
  0xfa   : > { %v535_v28 = vmul.f32 %v1088_v25, %v1255_v24  ;;  %v551_v29 = vmul.f32 %v1104_v27, %v1255_v24  ;;  %v401_v30 = vpop.f32.mrb[1].mxu0  ;;  %v465_v31 = vpop.f32.mrb[1].mxu1 }
  0xfb   : > { %v533_v32 = vmul.f32 %v1255_v24, %v401_v30  ;;  %v549_v33 = vmul.f32 %v1255_v24, %v465_v31  ;;  %v1089_v34 = vpop.f32.mrb[2].mxu0  ;;  %v1105_v35 = vpop.f32.mrb[2].mxu1 }
  0xfc   : > { %v572_v36 = vadd.f32 %v1260_v26, %v535_v28  ;;  %v588_v37 = vadd.f32 %v1260_v26, %v551_v29  ;;  %v536_v38 = vmul.f32 %v1089_v34, %v1255_v24  ;;  %v552_v39 = vmul.f32 %v1105_v35, %v1255_v24  ;;  %v404_v40 = vpop.f32.mrb[3].mxu0  ;;  %v468_v41 = vpop.f32.mrb[3].mxu1 }
  0xfd   : > { %v570_v42 = vadd.f32 %v1260_v26, %v533_v32  ;;  %v586_v43 = vadd.f32 %v1260_v26, %v549_v33  ;;  %v534_v44 = vmul.f32 %v1255_v24, %v404_v40  ;;  %v550_v45 = vmul.f32 %v1255_v24, %v468_v41 }
  0xfe   : > { %v573_v46 = vadd.f32 %v1260_v26, %v536_v38  ;;  %v589_v47 = vadd.f32 %v1260_v26, %v552_v39  ;;  %v604_v50 = vmax.f32 %v572_v36, 0.0  ;;  %v620_v51 = vmax.f32 %v588_v37, 0.0 }
  0xff   : > { %v571_v48 = vadd.f32 %v1260_v26, %v534_v44  ;;  %v587_v49 = vadd.f32 %v1260_v26, %v550_v45  ;;  %v602_v54 = vmax.f32 %v570_v42, 0.0  ;;  %v618_v55 = vmax.f32 %v586_v43, 0.0 }
 0x100   : > { %v605_v52 = vmax.f32 %v573_v46, 0.0  ;;  %v621_v53 = vmax.f32 %v589_v47, 0.0 }
 0x101   : > { %v603_v56 = vmax.f32 %v571_v48, 0.0  ;;  %v619_v57 = vmax.f32 %v587_v49, 0.0  ;;  %v1092_v58 = vpop.f32.mrb[4].mxu0  ;;  %v1108_v59 = vpop.f32.mrb[4].mxu1 }
 0x102   : > { %v959_v60 = vpack.c.bf16 %v605_v52, %v604_v50  ;;  %v999_v61 = vpack.c.bf16 %v621_v53, %v620_v51  ;;  %v539_v62 = vmul.f32 %v1092_v58, %v1255_v24  ;;  %v555_v63 = vmul.f32 %v1108_v59, %v1255_v24  ;;  %v417_v0 = vpop.f32.mrb[5].mxu0  ;;  %v481_v1 = vpop.f32.mrb[5].mxu1 }
 0x103   : > { %v954_v2 = vpack.c.bf16 %v603_v56, %v602_v54  ;;  %v994_v3 = vpack.c.bf16 %v619_v57, %v618_v55  ;;  %v537_v4 = vmul.f32 %v1255_v24, %v417_v0  ;;  %v553_v5 = vmul.f32 %v1255_v24, %v481_v1  ;;  %v1093_v6 = vpop.f32.mrb[6].mxu0  ;;  %v1109_v7 = vpop.f32.mrb[6].mxu1 }
 0x104   : > { %1031 = vst [vmem:[%s1283_s15 + $0x8] sm:$0xff] %v959_v60   ;;  %1039 = vst [vmem:[%s1283_s15 + $0x48] sm:$0xff] %v999_v61   ;;  %v576_v8 = vadd.f32 %v1260_v26, %v539_v62  ;;  %v592_v9 = vadd.f32 %v1260_v26, %v555_v63  ;;  %v540_v10 = vmul.f32 %v1093_v6, %v1255_v24  ;;  %v420_v12 = vpop.f32.mrb[7].mxu0  ;;  %v484_v13 = vpop.f32.mrb[7].mxu1 }
 0x105   : > { %v556_v11 = vmul.f32 %v1109_v7, %v1255_v24  ;;  %955 = vst [vmem:[%s1283_s15] sm:$0xff] %v954_v2   ;;  %1038 = vst [vmem:[%s1283_s15 + $0x40] sm:$0xff] %v994_v3   ;;  %v574_v14 = vadd.f32 %v1260_v26, %v537_v4  ;;  %v590_v15 = vadd.f32 %v1260_v26, %v553_v5 }
 0x106   : > { %v538_v16 = vmul.f32 %v1255_v24, %v420_v12  ;;  %v554_v17 = vmul.f32 %v1255_v24, %v484_v13  ;;  %v577_v18 = vadd.f32 %v1260_v26, %v540_v10  ;;  %v608_v22 = vmax.f32 %v576_v8, 0.0 }
 0x107   : > { %v593_v19 = vadd.f32 %v1260_v26, %v556_v11  ;;  %v624_v23 = vmax.f32 %v592_v9, 0.0  ;;  %v606_v28 = vmax.f32 %v574_v14, 0.0  ;;  %v622_v29 = vmax.f32 %v590_v15, 0.0 }
 0x108   : > { %v575_v20 = vadd.f32 %v1260_v26, %v538_v16  ;;  %v591_v21 = vadd.f32 %v1260_v26, %v554_v17  ;;  %v609_v25 = vmax.f32 %v577_v18, 0.0 }
 0x109   : > { %v625_v27 = vmax.f32 %v593_v19, 0.0  ;;  %v1096_v32 = vpop.f32.mrb[8].mxu0  ;;  %v1112_v33 = vpop.f32.mrb[8].mxu1 }
 0x10a   : > { %v607_v30 = vmax.f32 %v575_v20, 0.0  ;;  %v623_v31 = vmax.f32 %v591_v21, 0.0  ;;  %v969_v34 = vpack.c.bf16 %v609_v25, %v608_v22  ;;  %v543_v36 = vmul.f32 %v1096_v32, %v1255_v24  ;;  %v433_v38 = vpop.f32.mrb[9].mxu0  ;;  %v497_v39 = vpop.f32.mrb[9].mxu1 }
 0x10b   : > { %v1009_v35 = vpack.c.bf16 %v625_v27, %v624_v23  ;;  %v559_v37 = vmul.f32 %v1112_v33, %v1255_v24  ;;  %v541_v42 = vmul.f32 %v1255_v24, %v433_v38  ;;  %v557_v43 = vmul.f32 %v1255_v24, %v497_v39  ;;  %v1097_v44 = vpop.f32.mrb[10].mxu0  ;;  %v1113_v45 = vpop.f32.mrb[10].mxu1 }
 0x10c   : > { %v964_v40 = vpack.c.bf16 %v607_v30, %v606_v28  ;;  %v1004_v41 = vpack.c.bf16 %v623_v31, %v622_v29  ;;  %1033 = vst [vmem:[%s1283_s15 + $0x18] sm:$0xff] %v969_v34   ;;  %v580_v46 = vadd.f32 %v1260_v26, %v543_v36  ;;  %v544_v48 = vmul.f32 %v1097_v44, %v1255_v24  ;;  %v436_v50 = vpop.f32.mrb[11].mxu0  ;;  %v500_v51 = vpop.f32.mrb[11].mxu1 }
 0x10d   : > { %1041 = vst [vmem:[%s1283_s15 + $0x58] sm:$0xff] %v1009_v35   ;;  %v596_v47 = vadd.f32 %v1260_v26, %v559_v37  ;;  %v560_v49 = vmul.f32 %v1113_v45, %v1255_v24  ;;  %v578_v52 = vadd.f32 %v1260_v26, %v541_v42  ;;  %v594_v53 = vadd.f32 %v1260_v26, %v557_v43 }
 0x10e   : > { %1032 = vst [vmem:[%s1283_s15 + $0x10] sm:$0xff] %v964_v40   ;;  %1040 = vst [vmem:[%s1283_s15 + $0x50] sm:$0xff] %v1004_v41   ;;  %v542_v54 = vmul.f32 %v1255_v24, %v436_v50  ;;  %v558_v55 = vmul.f32 %v1255_v24, %v500_v51  ;;  %v581_v56 = vadd.f32 %v1260_v26, %v544_v48  ;;  %v612_v60 = vmax.f32 %v580_v46, 0.0 }
 0x10f   : > { %v597_v57 = vadd.f32 %v1260_v26, %v560_v49  ;;  %v628_v61 = vmax.f32 %v596_v47, 0.0  ;;  %v610_v0 = vmax.f32 %v578_v52, 0.0  ;;  %v626_v1 = vmax.f32 %v594_v53, 0.0 }
 0x110   : > { %v579_v58 = vadd.f32 %v1260_v26, %v542_v54  ;;  %v595_v59 = vadd.f32 %v1260_v26, %v558_v55  ;;  %v613_v62 = vmax.f32 %v581_v56, 0.0 }
 0x111   : > { %v629_v63 = vmax.f32 %v597_v57, 0.0  ;;  %v1100_v4 = vpop.f32.mrb[12].mxu0  ;;  %v1116_v5 = vpop.f32.mrb[12].mxu1 }
 0x112   : > { %v611_v2 = vmax.f32 %v579_v58, 0.0  ;;  %v627_v3 = vmax.f32 %v595_v59, 0.0  ;;  %v979_v6 = vpack.c.bf16 %v613_v62, %v612_v60  ;;  %v547_v8 = vmul.f32 %v1100_v4, %v1255_v24  ;;  %v449_v10 = vpop.f32.mrb[13].mxu0  ;;  %v513_v11 = vpop.f32.mrb[13].mxu1 }
 0x113   : > { %v1019_v7 = vpack.c.bf16 %v629_v63, %v628_v61  ;;  %v563_v9 = vmul.f32 %v1116_v5, %v1255_v24  ;;  %v545_v14 = vmul.f32 %v1255_v24, %v449_v10  ;;  %v561_v15 = vmul.f32 %v1255_v24, %v513_v11  ;;  %v1101_v16 = vpop.f32.mrb[14].mxu0  ;;  %v1117_v17 = vpop.f32.mrb[14].mxu1 }
 0x114   : > { %v974_v12 = vpack.c.bf16 %v611_v2, %v610_v0  ;;  %v1014_v13 = vpack.c.bf16 %v627_v3, %v626_v1  ;;  %1035 = vst [vmem:[%s1283_s15 + $0x28] sm:$0xff] %v979_v6   ;;  %v584_v18 = vadd.f32 %v1260_v26, %v547_v8  ;;  %v548_v20 = vmul.f32 %v1101_v16, %v1255_v24  ;;  %v452_v22 = vpop.f32.mrb[15].mxu0  ;;  %v516_v23 = vpop.f32.mrb[15].mxu1 }
 0x115   : > { %1043 = vst [vmem:[%s1283_s15 + $0x68] sm:$0xff] %v1019_v7   ;;  %v600_v19 = vadd.f32 %v1260_v26, %v563_v9  ;;  %v564_v21 = vmul.f32 %v1117_v17, %v1255_v24  ;;  %v582_v25 = vadd.f32 %v1260_v26, %v545_v14  ;;  %v598_v27 = vadd.f32 %v1260_v26, %v561_v15 }
 0x116   : > { %1034 = vst [vmem:[%s1283_s15 + $0x20] sm:$0xff] %v974_v12   ;;  %1042 = vst [vmem:[%s1283_s15 + $0x60] sm:$0xff] %v1014_v13   ;;  %v546_v28 = vmul.f32 %v1255_v24, %v452_v22  ;;  %v562_v29 = vmul.f32 %v1255_v24, %v516_v23  ;;  %v585_v30 = vadd.f32 %v1260_v26, %v548_v20  ;;  %v616_v34 = vmax.f32 %v584_v18, 0.0 }
 0x117   : > { %v601_v31 = vadd.f32 %v1260_v26, %v564_v21  ;;  %v632_v35 = vmax.f32 %v600_v19, 0.0  ;;  %v614_v38 = vmax.f32 %v582_v25, 0.0  ;;  %v630_v39 = vmax.f32 %v598_v27, 0.0 }
 0x118   : > { %v583_v32 = vadd.f32 %v1260_v26, %v546_v28  ;;  %v599_v33 = vadd.f32 %v1260_v26, %v562_v29  ;;  %v617_v36 = vmax.f32 %v585_v30, 0.0 }
 0x119   : > { %v633_v37 = vmax.f32 %v601_v31, 0.0 }
 0x11a   : > { %v615_v40 = vmax.f32 %v583_v32, 0.0  ;;  %v631_v24 = vmax.f32 %v599_v33, 0.0  ;;  %v989_v41 = vpack.c.bf16 %v617_v36, %v616_v34 }
 0x11b   : > { %v1029_v42 = vpack.c.bf16 %v633_v37, %v632_v35 }
 0x11c   : > { %v984_v43 = vpack.c.bf16 %v615_v40, %v614_v38  ;;  %v1024_v44 = vpack.c.bf16 %v631_v24, %v630_v39  ;;  %1037 = vst [vmem:[%s1283_s15 + $0x38] sm:$0xff] %v989_v41  }
 0x11d   : > { %1045 = vst [vmem:[%s1283_s15 + $0x78] sm:$0xff] %v1029_v42  }
 0x11e   : > { %1036 = vst [vmem:[%s1283_s15 + $0x30] sm:$0xff] %v984_v43   ;;  %1044 = vst [vmem:[%s1283_s15 + $0x70] sm:$0xff] %v1024_v44  }
 0x11f PF: > { %s13_s12 = sadd.s32 1, %s1172_s12  }
 0x120   : > { %p10_p4 = scmp.ge.s32.totalorder %s13_s12, 4  }
 0x122   :  { %12 = sbr.rel (!%p10_p4) target bundleno = 1 (0x1), region = 62 }

// kernel: bottleneck_forward.6
= control target key start
LH: loop header
LB: loop body
LE: loop exit
PB: predicated region body
PF: predicated region fallthrough
CT: control target
= control target key end

     0   :  { %s903_s15 = smov 0   ;;  %s1023_s0 = inlined_call_operand.vmem [shape: bf16[512,128], index: 0, kind: input, shape index: {}]   ;;  %s1024_s1 = inlined_call_operand.vmem [shape: bf16[128,128], index: 1, kind: input, shape index: {}]   ;;  %s1025_s2 = inlined_call_operand.vmem [shape: f32[1,128], index: 2, kind: input, shape index: {}]   ;;  %s1026_s3 = inlined_call_operand.vmem [shape: f32[1,128], index: 3, kind: input, shape index: {}]   ;;  %s1027_s4 = inlined_call_operand.vmem [shape: f32[2,128], index: 4, kind: output, shape index: {}]  }
   0x1 LB: > { %s909_s16 = sadd.s32 4294967295, %s875_s15   ;;  %p715_p0 = scmp.ge.s32.totalorder %s875_s15, 1  ;;  %s875_s15 = sphi %s903_s15, %s14_s15  }
   0x2   : > { %p158_p1 = scmp.lt.s32.totalorder %s875_s15, 3 }
   0x4   : > { %p159_p2 = pnand %p715_p0, %p158_p1 }
   0x5   : > { %s716_s17 = sshll.u32 (!%p159_p2), %s909_s16, 5  ;;  %p718_p4 = scmp.ne.s32.totalorder (!%p159_p2), %s909_s16, 0 }
   0x6   : > { %162 = sbr.rel (%p159_p2) target bundleno = 383 (0x17f), region = 36  ;;  %p180_p3 = scmp.lt.s32.totalorder (!%p159_p2), %s716_s17, 63 }
   0xd   : > { %s1029_s17 = smov (!%p180_p3, %s716_s17), 63  ;;  %189 = sbr.rel (%p718_p4) target bundleno = 20 (0x14), region = 40 }
   0xe   : > { %s717_s18 = sshll.u32 %s1029_s17, 2  ;;  %v877_v0 = vmov (!%p718_p4), 0.0  }
   0xf   : > { %s917_s21 = scalar_lea.vmem %s1023_s0, %s717_s18  ;;  %190 = vst [vmem:[#allocation2] sm:$0x1] (!%p718_p4), %v877_v0  ;;  %191 = vst [vmem:[#allocation3] sm:$0x1] (!%p718_p4), %v877_v0 }
  0x14 PF: > { %v843_v1 = vld [vmem:[%s1024_s1] sm:$0xff]   ;;  %v844_v2 = vld [vmem:[%s1024_s1 + $0x8] sm:$0xff]   ;;  %v845_v3 = vld [vmem:[%s1024_s1 + $0x10] sm:$0xff]   ;;  %p743_p5 = scmp.ne.s32.totalorder %s909_s16, 1 }
  0x15   : > { %770 = vmatprep.subr.bf16.mxu0 %v843_v1  ;;  %818 = vmatprep.subr.bf16.mxu1 %v843_v1  ;;  %v846_v4 = vld [vmem:[%s1024_s1 + $0x18] sm:$0xff]   ;;  %v851_v5 = vld [vmem:[%s917_s21] sm:$0xff]   ;;  %v848_v7 = vld [vmem:[%s1024_s1 + $0x28] sm:$0xff]   ;;  %vm681_vm0 = vcmask (!%p743_p5), 1040384  }
  0x16   : > { %771 = vmatpush3.bf16.msra.mxu0 %v843_v1  ;;  %826 = vmatpush3.bf16.msra.mxu1 %v843_v1  ;;  %v847_v6 = vld [vmem:[%s1024_s1 + $0x20] sm:$0xff]   ;;  %v849_v9 = vld [vmem:[%s1024_s1 + $0x30] sm:$0xff]   ;;  %v850_v10 = vld [vmem:[%s1024_s1 + $0x38] sm:$0xff]  }
  0x17   : > { %772 = vmatprep.subr.bf16.mxu0 %v844_v2  ;;  %819 = vmatprep.subr.bf16.mxu1 %v844_v2  ;;  %v859_v8 = vld [vmem:[%s917_s21 + $0x40] sm:$0xff]   ;;  %v852_v11 = vld [vmem:[%s917_s21 + $0x8] sm:$0xff]   ;;  %v853_v13 = vld [vmem:[%s917_s21 + $0x10] sm:$0xff]  }
  0x18   : > { %786 = vmatprep.mubr.bf16.mxu0 %v851_v5  ;;  %802 = vmatprep.mubr.bf16.mxu1 %v859_v8  ;;  %v860_v12 = vld [vmem:[%s917_s21 + $0x48] sm:$0xff]   ;;  %v861_v14 = vld [vmem:[%s917_s21 + $0x50] sm:$0xff]   ;;  %v854_v15 = vld [vmem:[%s917_s21 + $0x18] sm:$0xff]  }
  0x19   : > { %v862_v16 = vld [vmem:[%s917_s21 + $0x58] sm:$0xff]   ;;  %v855_v17 = vld [vmem:[%s917_s21 + $0x20] sm:$0xff]   ;;  %v856_v19 = vld [vmem:[%s917_s21 + $0x28] sm:$0xff]  }
  0x1a   : > { %773 = vmatpush3.bf16.msra.mxu0 %v844_v2  ;;  %827 = vmatpush3.bf16.msra.mxu1 %v844_v2  ;;  %v863_v18 = vld [vmem:[%s917_s21 + $0x60] sm:$0xff]   ;;  %v864_v20 = vld [vmem:[%s917_s21 + $0x68] sm:$0xff]   ;;  %v857_v21 = vld [vmem:[%s917_s21 + $0x30] sm:$0xff]  }
  0x1b   : > { %774 = vmatprep.subr.bf16.mxu0 %v845_v3  ;;  %820 = vmatprep.subr.bf16.mxu1 %v845_v3  ;;  %v865_v22 = vld [vmem:[%s917_s21 + $0x70] sm:$0xff]   ;;  %v858_v23 = vld [vmem:[%s917_s21 + $0x38] sm:$0xff]  }
  0x1c   : > { %v866_v24 = vld [vmem:[%s917_s21 + $0x78] sm:$0xff]  }
  0x1e   : > { %775 = vmatpush3.bf16.msra.mxu0 %v845_v3  ;;  %828 = vmatpush3.bf16.msra.mxu1 %v845_v3 }
  0x1f   : > { %776 = vmatprep.subr.bf16.mxu0 %v846_v4  ;;  %821 = vmatprep.subr.bf16.mxu1 %v846_v4 }
  0x22   : > { %777 = vmatpush3.bf16.msra.mxu0 %v846_v4  ;;  %829 = vmatpush3.bf16.msra.mxu1 %v846_v4 }
  0x23   : > { %778 = vmatprep.subr.bf16.mxu0 %v847_v6  ;;  %822 = vmatprep.subr.bf16.mxu1 %v847_v6 }
  0x26   : > { %779 = vmatpush3.bf16.msra.mxu0 %v847_v6  ;;  %830 = vmatpush3.bf16.msra.mxu1 %v847_v6 }
  0x27   : > { %780 = vmatprep.subr.bf16.mxu0 %v848_v7  ;;  %823 = vmatprep.subr.bf16.mxu1 %v848_v7 }
  0x2a   : > { %781 = vmatpush3.bf16.msra.mxu0 %v848_v7  ;;  %831 = vmatpush3.bf16.msra.mxu1 %v848_v7 }
  0x2b   : > { %782 = vmatprep.subr.bf16.mxu0 %v849_v9  ;;  %824 = vmatprep.subr.bf16.mxu1 %v849_v9 }
  0x2e   : > { %783 = vmatpush3.bf16.msra.mxu0 %v849_v9  ;;  %832 = vmatpush3.bf16.msra.mxu1 %v849_v9 }
  0x2f   : > { %784 = vmatprep.subr.bf16.mxu0 %v850_v10  ;;  %825 = vmatprep.subr.bf16.mxu1 %v850_v10 }
  0x32   : > { %785 = vmatpush3.bf16.msra.mxu0 %v850_v10  ;;  %833 = vmatpush3.bf16.msra.mxu1 %v850_v10 }
  0x35   : > { %787 = vmatmul.mubr.bf16.vlgmr.msra.gmra.mrb[0].mxu0 %v852_v11  ;;  %803 = vmatmul.mubr.bf16.vlgmr.msra.gmra.mrb[0].mxu1 %v860_v12 }
  0x36   : > { %790 = vmatprep.mubr.bf16.mxu0 %v853_v13  ;;  %806 = vmatprep.mubr.bf16.mxu1 %v861_v14 }
  0x3d   : > { %791 = vmatmul.mubr.bf16.gmra.mrb[4].mxu0 %v854_v15  ;;  %807 = vmatmul.mubr.bf16.gmra.mrb[4].mxu1 %v862_v16 }
  0x3e   : > { %794 = vmatprep.mubr.bf16.mxu0 %v855_v17  ;;  %810 = vmatprep.mubr.bf16.mxu1 %v863_v18 }
  0x45   : > { %795 = vmatmul.mubr.bf16.gmra.mrb[8].mxu0 %v856_v19  ;;  %811 = vmatmul.mubr.bf16.gmra.mrb[8].mxu1 %v864_v20 }
  0x46   : > { %798 = vmatprep.mubr.bf16.mxu0 %v857_v21  ;;  %814 = vmatprep.mubr.bf16.mxu1 %v865_v22 }
  0x4d   : > { %799 = vmatmul.mubr.bf16.gmra.mrb[12].mxu0 %v858_v23  ;;  %815 = vmatmul.mubr.bf16.gmra.mrb[12].mxu1 %v866_v24 }
 0x108   : > { %v788_v25 = vpop.f32.mrb[0].mxu0  ;;  %v960_v26 = vpop.f32.mrb[0].mxu1 }
 0x109   : > { %v418_v27 = vpop.f32.mrb[1].mxu0  ;;  %v962_v28 = vpop.f32.mrb[1].mxu1  ;;  %v588_v36 = vmul.f32 %v788_v25, %v788_v25 }
 0x10a   : > { %v789_v29 = vpop.f32.mrb[2].mxu0  ;;  %v964_v30 = vpop.f32.mrb[2].mxu1  ;;  %v586_v33 = vmul.f32 %v418_v27, %v418_v27 }
 0x10b   : > { %v421_v31 = vpop.f32.mrb[3].mxu0  ;;  %v966_v32 = vpop.f32.mrb[3].mxu1  ;;  %v589_v39 = vmul.f32 %v789_v29, %v789_v29 }
 0x10c   : > { %v546_v34 = vadd.f32 %v421_v31, %v418_v27  ;;  %v587_v35 = vmul.f32 %v421_v31, %v421_v31 }
 0x10e   : > { %v547_v37 = vadd.f32 %v788_v25, %v546_v34  ;;  %v618_v38 = vadd.f32 %v587_v35, %v586_v33 }
 0x110   : > { %v619_v40 = vadd.f32 %v618_v38, %v588_v36  ;;  %v792_v41 = vpop.f32.mrb[4].mxu0  ;;  %v548_v42 = vadd.f32 %v789_v29, %v547_v37  ;;  %v968_v43 = vpop.f32.mrb[4].mxu1 }
 0x111   : > { %v434_v44 = vpop.f32.mrb[5].mxu0  ;;  %v970_v45 = vpop.f32.mrb[5].mxu1  ;;  %v592_v56 = vmul.f32 %v792_v41, %v792_v41 }
 0x112   : > { %v549_v46 = vadd.f32 %v548_v42, %v434_v44  ;;  %v590_v47 = vmul.f32 %v434_v44, %v434_v44  ;;  %v620_v48 = vadd.f32 %v619_v40, %v589_v39  ;;  %v793_v49 = vpop.f32.mrb[6].mxu0  ;;  %v972_v50 = vpop.f32.mrb[6].mxu1  ;;  %v602_v42 = vmul.f32 %v962_v28, %v962_v28 }
 0x113   : > { %v437_v51 = vpop.f32.mrb[7].mxu0  ;;  %v974_v52 = vpop.f32.mrb[7].mxu1  ;;  %v593_v59 = vmul.f32 %v793_v49, %v793_v49 }
 0x114   : > { %v621_v53 = vadd.f32 %v620_v48, %v590_v47  ;;  %v550_v54 = vadd.f32 %v549_v46, %v437_v51  ;;  %v591_v55 = vmul.f32 %v437_v51, %v437_v51  ;;  %v604_v51 = vmul.f32 %v960_v26, %v960_v26 }
 0x116   : > { %v551_v57 = vadd.f32 %v792_v41, %v550_v54  ;;  %v622_v58 = vadd.f32 %v621_v53, %v591_v55  ;;  %v605_v55 = vmul.f32 %v964_v30, %v964_v30 }
 0x118   : > { %v623_v60 = vadd.f32 %v622_v58, %v592_v56  ;;  %v796_v61 = vpop.f32.mrb[8].mxu0  ;;  %v552_v62 = vadd.f32 %v793_v49, %v551_v57  ;;  %v976_v63 = vpop.f32.mrb[8].mxu1  ;;  %v603_v49 = vmul.f32 %v966_v32, %v966_v32 }
 0x119   : > { %v450_v0 = vpop.f32.mrb[9].mxu0  ;;  %v514_v1 = vpop.f32.mrb[9].mxu1  ;;  %v596_v12 = vmul.f32 %v796_v61, %v796_v61 }
 0x11a   : > { %v553_v2 = vadd.f32 %v552_v62, %v450_v0  ;;  %v594_v3 = vmul.f32 %v450_v0, %v450_v0  ;;  %v624_v4 = vadd.f32 %v623_v60, %v593_v59  ;;  %v797_v5 = vpop.f32.mrb[10].mxu0  ;;  %v978_v6 = vpop.f32.mrb[10].mxu1 }
 0x11b   : > { %v453_v7 = vpop.f32.mrb[11].mxu0  ;;  %v517_v8 = vpop.f32.mrb[11].mxu1  ;;  %v597_v15 = vmul.f32 %v797_v5, %v797_v5 }
 0x11c   : > { %v625_v9 = vadd.f32 %v624_v4, %v594_v3  ;;  %v554_v10 = vadd.f32 %v553_v2, %v453_v7  ;;  %v595_v11 = vmul.f32 %v453_v7, %v453_v7 }
 0x11e   : > { %v555_v13 = vadd.f32 %v796_v61, %v554_v10  ;;  %v626_v14 = vadd.f32 %v625_v9, %v595_v11  ;;  %v607_v61 = vmul.f32 %v974_v52, %v974_v52  ;;  %v611_v10 = vmul.f32 %v517_v8, %v517_v8 }
 0x120   : > { %v627_v16 = vadd.f32 %v626_v14, %v596_v12  ;;  %v800_v17 = vpop.f32.mrb[12].mxu0  ;;  %v556_v18 = vadd.f32 %v797_v5, %v555_v13  ;;  %v816_v19 = vpop.f32.mrb[12].mxu1 }
 0x121   : > { %v466_v20 = vpop.f32.mrb[13].mxu0  ;;  %v530_v21 = vpop.f32.mrb[13].mxu1  ;;  %v600_v36 = vmul.f32 %v800_v17, %v800_v17 }
 0x122   : > { %v557_v22 = vadd.f32 %v556_v18, %v466_v20  ;;  %v598_v23 = vmul.f32 %v466_v20, %v466_v20  ;;  %v628_v24 = vadd.f32 %v627_v16, %v597_v15  ;;  %v801_v25 = vpop.f32.mrb[14].mxu0  ;;  %v817_v27 = vpop.f32.mrb[14].mxu1  ;;  %v614_v15 = vmul.f32 %v530_v21, %v530_v21 }
 0x123   : > { %v469_v29 = vpop.f32.mrb[15].mxu0  ;;  %v533_v31 = vpop.f32.mrb[15].mxu1  ;;  %v601_v39 = vmul.f32 %v801_v25, %v801_v25  ;;  %v616_v20 = vmul.f32 %v816_v19, %v816_v19 }
 0x124   : > { %v629_v33 = vadd.f32 %v628_v24, %v598_v23  ;;  %v558_v34 = vadd.f32 %v557_v22, %v469_v29  ;;  %v599_v35 = vmul.f32 %v469_v29, %v469_v29  ;;  %v615_v18 = vmul.f32 %v533_v31, %v533_v31 }
 0x125   : > { %v617_v23 = vmul.f32 %v817_v27, %v817_v27 }
 0x126   : > { %v559_v37 = vadd.f32 %v800_v17, %v558_v34  ;;  %v630_v38 = vadd.f32 %v629_v33, %v599_v35 }
 0x128   : > { %v631_v40 = vadd.f32 %v630_v38, %v600_v36  ;;  %v560_v41 = vadd.f32 %v801_v25, %v559_v37 }
 0x12a   : > { %v561_v44 = vadd.f32 %v560_v41, %v962_v28  ;;  %v632_v46 = vadd.f32 %v631_v40, %v601_v39  ;;  %v606_v28 = vmul.f32 %v970_v45, %v970_v45  ;;  %v545_v39 = vld [vmem:[#allocation2] sm:$0x1] }
 0x12c   : > { %v633_v47 = vadd.f32 %v632_v46, %v602_v42  ;;  %v562_v48 = vadd.f32 %v561_v44, %v966_v32 }
 0x12e   : > { %v563_v53 = vadd.f32 %v960_v26, %v562_v48  ;;  %v634_v54 = vadd.f32 %v633_v47, %v603_v49  ;;  %v608_v26 = vmul.f32 %v968_v43, %v968_v43 }
 0x130   : > { %v635_v56 = vadd.f32 %v634_v54, %v604_v51  ;;  %v564_v57 = vadd.f32 %v964_v30, %v563_v53  ;;  %v609_v30 = vmul.f32 %v972_v50, %v972_v50 }
 0x132   : > { %v565_v58 = vadd.f32 %v564_v57, %v970_v45  ;;  %v636_v59 = vadd.f32 %v635_v56, %v605_v55  ;;  %v610_v45 = vmul.f32 %v514_v1, %v514_v1  ;;  %v676_v55 = vlaneseq (!%p743_p5)  ;;  %v668_v56 = vld [vmem:[%s1025_s2] sm:$0x1] (!%p743_p5) }
 0x134   : > { %v637_v60 = vadd.f32 %v636_v59, %v606_v28  ;;  %v566_v32 = vadd.f32 %v565_v58, %v974_v52  ;;  %v612_v52 = vmul.f32 %v976_v63, %v976_v63  ;;  %v677_v57 = vshrl.u32 (!%p743_p5), %v676_v55, 7  ;;  %v672_v59 = vld [vmem:[%s1026_s3] sm:$0x1] (!%p743_p5) }
 0x136   : > { %v567_v62 = vadd.f32 %v968_v43, %v566_v32  ;;  %v638_v0 = vadd.f32 %v637_v60, %v607_v61  ;;  %v613_v43 = vmul.f32 %v978_v6, %v978_v6  ;;  %v678_v32 = vsub.s32 (!%p743_p5), 0, %v677_v57 }
 0x138   : > { %v639_v2 = vadd.f32 %v638_v0, %v608_v26  ;;  %v568_v3 = vadd.f32 %v972_v50, %v567_v62 }
 0x13a   : > { %v569_v4 = vadd.f32 %v568_v3, %v514_v1  ;;  %v640_v5 = vadd.f32 %v639_v2, %v609_v30 }
 0x13c   : > { %v641_v7 = vadd.f32 %v640_v5, %v610_v45  ;;  %v570_v9 = vadd.f32 %v569_v4, %v517_v8 }
 0x13e   : > { %v571_v11 = vadd.f32 %v976_v63, %v570_v9  ;;  %v642_v12 = vadd.f32 %v641_v7, %v611_v10 }
 0x140   : > { %v643_v13 = vadd.f32 %v642_v12, %v612_v52  ;;  %v572_v14 = vadd.f32 %v978_v6, %v571_v11 }
 0x142   : > { %v573_v50 = vadd.f32 %v572_v14, %v530_v21  ;;  %v644_v16 = vadd.f32 %v643_v13, %v613_v43 }
 0x144   : > { %v645_v1 = vadd.f32 %v644_v16, %v614_v15  ;;  %v574_v17 = vadd.f32 %v573_v50, %v533_v31  ;;  %v585_v31 = vld [vmem:[#allocation3] sm:$0x1] }
 0x146   : > { %v575_v8 = vadd.f32 %v816_v19, %v574_v17  ;;  %v646_v22 = vadd.f32 %v645_v1, %v615_v18 }
 0x148   : > { %v576_v24 = vadd.f32 %v817_v27, %v575_v8  ;;  %v647_v25 = vadd.f32 %v646_v22, %v616_v20 }
 0x14a   : > { %v577_v63 = vrot.slane %v576_v24, 4  ;;  %v648_v29 = vadd.f32 %v647_v25, %v617_v23 }
 0x14c   : > { %v578_v33 = vadd.f32 %v577_v63, %v576_v24  ;;  %v649_v34 = vrot.slane %v648_v29, 4 }
 0x14e   : > { %v579_v35 = vrot.slane %v578_v33, 2  ;;  %v650_v36 = vadd.f32 %v649_v34, %v648_v29 }
 0x150   : > { %v580_v37 = vadd.f32 %v579_v35, %v578_v33  ;;  %v651_v6 = vrot.slane %v650_v36, 2 }
 0x152   : > { %v581_v38 = vrot.slane %v580_v37, 1  ;;  %v652_v21 = vadd.f32 %v651_v6, %v650_v36 }
 0x154   : > { %v582_v40 = vadd.f32 %v581_v38, %v580_v37  ;;  %v653_v41 = vrot.slane %v652_v21, 1  ;;  %660 = sbr.rel (%p743_p5) target bundleno = 383 (0x17f), region = 44 }
 0x156   : > { %v583_v42 = vadd.f32 %v582_v40, %v545_v39  ;;  %v654_v19 = vadd.f32 %v653_v41, %v652_v21 }
 0x158   : > { %584 = vst [vmem:[#allocation2] sm:$0x1] %v583_v42  ;;  %v655_v44 = vadd.f32 %v654_v19, %v585_v31 }
 0x15a   : > { %656 = vst [vmem:[#allocation3] sm:$0x1] %v655_v44 }
 0x15f   : > { %v661_v27 = vld [vmem:[#allocation2] sm:$0x1] }
 0x160   : > { %v662_v47 = vmul.f32 0.001953125, %v661_v27 }
 0x161   : > { %v663_v46 = vld [vmem:[#allocation3] sm:$0x1] }
 0x162   : > { %v664_v48 = vmul.f32 0.001953125, %v663_v46  ;;  %v665_v49 = vmul.f32 %v662_v47, %v662_v47 }
 0x164   : > { %v666_v51 = vsub.f32 %v664_v48, %v665_v49 }
 0x166   : > { %v667_v53 = vmax.f32 %v666_v51, 0.0 }
 0x168   : > { %v669_v54 = vadd.f32 1e-05, %v667_v53 }
 0x16a   : > { %867 = vrsqrt.f32 %v669_v54 }
 0x174   : > { %v868_v28 = vpop.eup %867 }
 0x175   : > { %v671_v58 = vmul.f32 %v868_v28, %v668_v56 }
 0x177   : > { %v673_v60 = vmul.f32 %v671_v58, %v662_v47 }
 0x179   : > { %v674_v61 = vsub.f32 %v672_v59, %v673_v60 }
 0x17b   : > { %v679_v26 = vrot.slane %v674_v61, %v678_v32 }
 0x17d   : > { %v682_v62 = vsel %vm681_vm0, %v671_v58, %v679_v26 }
 0x17e   : > { %683 = vst [vmem:[%s1027_s4] sm:$0x3] %v682_v62 }
 0x17f PF: > { %s14_s15 = sadd.s32 1, %s875_s15  }
 0x180   : > { %p11_p6 = scmp.ge.s32.totalorder %s14_s15, 4  }
 0x182   :  { %13 = sbr.rel (!%p11_p6) target bundleno = 1 (0x1), region = 70 }

// kernel: bottleneck_forward.10
= control target key start
LH: loop header
LB: loop body
LE: loop exit
PB: predicated region body
PF: predicated region fallthrough
CT: control target
= control target key end

     0   :  { %v658_v24 = vmov 0.0   ;;  %vm512_vm0 = vcmask 1040384   ;;  %s815_s1 = inlined_call_operand.vmem [shape: bf16[128,128], index: 1, kind: input, shape index: {}]   ;;  %s816_s0 = inlined_call_operand.vmem [shape: bf16[256,128], index: 0, kind: input, shape index: {}]   ;;  %s817_s2 = inlined_call_operand.vmem [shape: f32[1,128], index: 2, kind: input, shape index: {}]   ;;  %s818_s3 = inlined_call_operand.vmem [shape: f32[1,128], index: 3, kind: input, shape index: {}]   ;;  %s819_s4 = inlined_call_operand.vmem [shape: f32[2,128], index: 4, kind: output, shape index: {}]  }
   0x1   :  { %v632_v0 = vld [vmem:[%s815_s1] sm:$0xff]   ;;  %v633_v1 = vld [vmem:[%s815_s1 + $0x8] sm:$0xff]   ;;  %v634_v2 = vld [vmem:[%s815_s1 + $0x10] sm:$0xff]   ;;  %22 = vst [vmem:[#allocation2] sm:$0x1] %v658_v24 }
   0x2   :  { %567 = vmatprep.subr.bf16.mxu0 %v632_v0  ;;  %615 = vmatprep.subr.bf16.mxu1 %v632_v0  ;;  %v635_v3 = vld [vmem:[%s815_s1 + $0x18] sm:$0xff]   ;;  %v640_v4 = vld [vmem:[%s816_s0] sm:$0xff]   ;;  %v637_v6 = vld [vmem:[%s815_s1 + $0x28] sm:$0xff]   ;;  %23 = vst [vmem:[#allocation3] sm:$0x1] %v658_v24 }
   0x3   :  { %568 = vmatpush3.bf16.msra.mxu0 %v632_v0  ;;  %623 = vmatpush3.bf16.msra.mxu1 %v632_v0  ;;  %v636_v5 = vld [vmem:[%s815_s1 + $0x20] sm:$0xff]   ;;  %v638_v8 = vld [vmem:[%s815_s1 + $0x30] sm:$0xff]   ;;  %v639_v9 = vld [vmem:[%s815_s1 + $0x38] sm:$0xff]  }
   0x4   :  { %569 = vmatprep.subr.bf16.mxu0 %v633_v1  ;;  %616 = vmatprep.subr.bf16.mxu1 %v633_v1  ;;  %v648_v7 = vld [vmem:[%s816_s0 + $0x40] sm:$0xff]   ;;  %v641_v10 = vld [vmem:[%s816_s0 + $0x8] sm:$0xff]   ;;  %v642_v12 = vld [vmem:[%s816_s0 + $0x10] sm:$0xff]  }
   0x5   :  { %583 = vmatprep.mubr.bf16.mxu0 %v640_v4  ;;  %599 = vmatprep.mubr.bf16.mxu1 %v648_v7  ;;  %v649_v11 = vld [vmem:[%s816_s0 + $0x48] sm:$0xff]   ;;  %v650_v13 = vld [vmem:[%s816_s0 + $0x50] sm:$0xff]   ;;  %v643_v14 = vld [vmem:[%s816_s0 + $0x18] sm:$0xff]  }
   0x6   :  { %v651_v15 = vld [vmem:[%s816_s0 + $0x58] sm:$0xff]   ;;  %v644_v16 = vld [vmem:[%s816_s0 + $0x20] sm:$0xff]   ;;  %v645_v18 = vld [vmem:[%s816_s0 + $0x28] sm:$0xff]  }
   0x7   :  { %570 = vmatpush3.bf16.msra.mxu0 %v633_v1  ;;  %624 = vmatpush3.bf16.msra.mxu1 %v633_v1  ;;  %v652_v17 = vld [vmem:[%s816_s0 + $0x60] sm:$0xff]   ;;  %v653_v19 = vld [vmem:[%s816_s0 + $0x68] sm:$0xff]   ;;  %v646_v20 = vld [vmem:[%s816_s0 + $0x30] sm:$0xff]  }
   0x8   :  { %571 = vmatprep.subr.bf16.mxu0 %v634_v2  ;;  %617 = vmatprep.subr.bf16.mxu1 %v634_v2  ;;  %v654_v21 = vld [vmem:[%s816_s0 + $0x70] sm:$0xff]   ;;  %v647_v22 = vld [vmem:[%s816_s0 + $0x38] sm:$0xff]  }
   0x9   :  { %v655_v23 = vld [vmem:[%s816_s0 + $0x78] sm:$0xff]  }
   0xb   :  { %572 = vmatpush3.bf16.msra.mxu0 %v634_v2  ;;  %625 = vmatpush3.bf16.msra.mxu1 %v634_v2 }
   0xc   :  { %573 = vmatprep.subr.bf16.mxu0 %v635_v3  ;;  %618 = vmatprep.subr.bf16.mxu1 %v635_v3 }
   0xf   :  { %574 = vmatpush3.bf16.msra.mxu0 %v635_v3  ;;  %626 = vmatpush3.bf16.msra.mxu1 %v635_v3 }
  0x10   :  { %575 = vmatprep.subr.bf16.mxu0 %v636_v5  ;;  %619 = vmatprep.subr.bf16.mxu1 %v636_v5 }
  0x13   :  { %576 = vmatpush3.bf16.msra.mxu0 %v636_v5  ;;  %627 = vmatpush3.bf16.msra.mxu1 %v636_v5 }
  0x14   :  { %577 = vmatprep.subr.bf16.mxu0 %v637_v6  ;;  %620 = vmatprep.subr.bf16.mxu1 %v637_v6 }
  0x17   :  { %578 = vmatpush3.bf16.msra.mxu0 %v637_v6  ;;  %628 = vmatpush3.bf16.msra.mxu1 %v637_v6 }
  0x18   :  { %579 = vmatprep.subr.bf16.mxu0 %v638_v8  ;;  %621 = vmatprep.subr.bf16.mxu1 %v638_v8 }
  0x1b   :  { %580 = vmatpush3.bf16.msra.mxu0 %v638_v8  ;;  %629 = vmatpush3.bf16.msra.mxu1 %v638_v8 }
  0x1c   :  { %581 = vmatprep.subr.bf16.mxu0 %v639_v9  ;;  %622 = vmatprep.subr.bf16.mxu1 %v639_v9 }
  0x1f   :  { %582 = vmatpush3.bf16.msra.mxu0 %v639_v9  ;;  %630 = vmatpush3.bf16.msra.mxu1 %v639_v9 }
  0x22   :  { %584 = vmatmul.mubr.bf16.vlgmr.msra.gmra.mrb[0].mxu0 %v641_v10  ;;  %600 = vmatmul.mubr.bf16.vlgmr.msra.gmra.mrb[0].mxu1 %v649_v11 }
  0x23   :  { %587 = vmatprep.mubr.bf16.mxu0 %v642_v12  ;;  %603 = vmatprep.mubr.bf16.mxu1 %v650_v13 }
  0x2a   :  { %588 = vmatmul.mubr.bf16.gmra.mrb[4].mxu0 %v643_v14  ;;  %604 = vmatmul.mubr.bf16.gmra.mrb[4].mxu1 %v651_v15 }
  0x2b   :  { %591 = vmatprep.mubr.bf16.mxu0 %v644_v16  ;;  %607 = vmatprep.mubr.bf16.mxu1 %v652_v17 }
  0x32   :  { %592 = vmatmul.mubr.bf16.gmra.mrb[8].mxu0 %v645_v18  ;;  %608 = vmatmul.mubr.bf16.gmra.mrb[8].mxu1 %v653_v19 }
  0x33   :  { %595 = vmatprep.mubr.bf16.mxu0 %v646_v20  ;;  %611 = vmatprep.mubr.bf16.mxu1 %v654_v21 }
  0x3a   :  { %596 = vmatmul.mubr.bf16.gmra.mrb[12].mxu0 %v647_v22  ;;  %612 = vmatmul.mubr.bf16.gmra.mrb[12].mxu1 %v655_v23 }
  0xf5   :  { %v585_v25 = vpop.f32.mrb[0].mxu0  ;;  %v756_v26 = vpop.f32.mrb[0].mxu1 }
  0xf6   :  { %v250_v27 = vpop.f32.mrb[1].mxu0  ;;  %v758_v28 = vpop.f32.mrb[1].mxu1  ;;  %v420_v36 = vmul.f32 %v585_v25, %v585_v25 }
  0xf7   :  { %v586_v29 = vpop.f32.mrb[2].mxu0  ;;  %v760_v30 = vpop.f32.mrb[2].mxu1  ;;  %v418_v33 = vmul.f32 %v250_v27, %v250_v27 }
  0xf8   :  { %v253_v31 = vpop.f32.mrb[3].mxu0  ;;  %v762_v32 = vpop.f32.mrb[3].mxu1  ;;  %v421_v39 = vmul.f32 %v586_v29, %v586_v29 }
  0xf9   :  { %v378_v34 = vadd.f32 %v253_v31, %v250_v27  ;;  %v419_v35 = vmul.f32 %v253_v31, %v253_v31 }
  0xfb   :  { %v379_v37 = vadd.f32 %v585_v25, %v378_v34  ;;  %v450_v38 = vadd.f32 %v419_v35, %v418_v33 }
  0xfd   :  { %v451_v40 = vadd.f32 %v450_v38, %v420_v36  ;;  %v589_v41 = vpop.f32.mrb[4].mxu0  ;;  %v380_v42 = vadd.f32 %v586_v29, %v379_v37  ;;  %v764_v43 = vpop.f32.mrb[4].mxu1 }
  0xfe   :  { %v266_v44 = vpop.f32.mrb[5].mxu0  ;;  %v766_v45 = vpop.f32.mrb[5].mxu1  ;;  %v424_v56 = vmul.f32 %v589_v41, %v589_v41 }
  0xff   :  { %v381_v46 = vadd.f32 %v380_v42, %v266_v44  ;;  %v422_v47 = vmul.f32 %v266_v44, %v266_v44  ;;  %v452_v48 = vadd.f32 %v451_v40, %v421_v39  ;;  %v590_v49 = vpop.f32.mrb[6].mxu0  ;;  %v768_v50 = vpop.f32.mrb[6].mxu1  ;;  %v434_v42 = vmul.f32 %v758_v28, %v758_v28 }
 0x100   :  { %v269_v51 = vpop.f32.mrb[7].mxu0  ;;  %v770_v52 = vpop.f32.mrb[7].mxu1  ;;  %v425_v59 = vmul.f32 %v590_v49, %v590_v49 }
 0x101   :  { %v453_v53 = vadd.f32 %v452_v48, %v422_v47  ;;  %v382_v54 = vadd.f32 %v381_v46, %v269_v51  ;;  %v423_v55 = vmul.f32 %v269_v51, %v269_v51  ;;  %v436_v51 = vmul.f32 %v756_v26, %v756_v26 }
 0x103   :  { %v383_v57 = vadd.f32 %v589_v41, %v382_v54  ;;  %v454_v58 = vadd.f32 %v453_v53, %v423_v55  ;;  %v437_v55 = vmul.f32 %v760_v30, %v760_v30 }
 0x105   :  { %v455_v60 = vadd.f32 %v454_v58, %v424_v56  ;;  %v593_v61 = vpop.f32.mrb[8].mxu0  ;;  %v384_v62 = vadd.f32 %v590_v49, %v383_v57  ;;  %v772_v63 = vpop.f32.mrb[8].mxu1  ;;  %v435_v49 = vmul.f32 %v762_v32, %v762_v32 }
 0x106   :  { %v282_v0 = vpop.f32.mrb[9].mxu0  ;;  %v346_v1 = vpop.f32.mrb[9].mxu1  ;;  %v428_v12 = vmul.f32 %v593_v61, %v593_v61 }
 0x107   :  { %v385_v2 = vadd.f32 %v384_v62, %v282_v0  ;;  %v426_v3 = vmul.f32 %v282_v0, %v282_v0  ;;  %v456_v4 = vadd.f32 %v455_v60, %v425_v59  ;;  %v594_v5 = vpop.f32.mrb[10].mxu0  ;;  %v774_v6 = vpop.f32.mrb[10].mxu1 }
 0x108   :  { %v285_v7 = vpop.f32.mrb[11].mxu0  ;;  %v349_v8 = vpop.f32.mrb[11].mxu1  ;;  %v429_v15 = vmul.f32 %v594_v5, %v594_v5 }
 0x109   :  { %v457_v9 = vadd.f32 %v456_v4, %v426_v3  ;;  %v386_v10 = vadd.f32 %v385_v2, %v285_v7  ;;  %v427_v11 = vmul.f32 %v285_v7, %v285_v7 }
 0x10b   :  { %v387_v13 = vadd.f32 %v593_v61, %v386_v10  ;;  %v458_v14 = vadd.f32 %v457_v9, %v427_v11  ;;  %v439_v61 = vmul.f32 %v770_v52, %v770_v52  ;;  %v443_v10 = vmul.f32 %v349_v8, %v349_v8 }
 0x10d   :  { %v459_v16 = vadd.f32 %v458_v14, %v428_v12  ;;  %v597_v17 = vpop.f32.mrb[12].mxu0  ;;  %v388_v18 = vadd.f32 %v594_v5, %v387_v13  ;;  %v613_v19 = vpop.f32.mrb[12].mxu1 }
 0x10e   :  { %v298_v20 = vpop.f32.mrb[13].mxu0  ;;  %v362_v21 = vpop.f32.mrb[13].mxu1  ;;  %v432_v36 = vmul.f32 %v597_v17, %v597_v17 }
 0x10f   :  { %v389_v22 = vadd.f32 %v388_v18, %v298_v20  ;;  %v430_v23 = vmul.f32 %v298_v20, %v298_v20  ;;  %v460_v24 = vadd.f32 %v459_v16, %v429_v15  ;;  %v598_v25 = vpop.f32.mrb[14].mxu0  ;;  %v614_v27 = vpop.f32.mrb[14].mxu1  ;;  %v446_v15 = vmul.f32 %v362_v21, %v362_v21 }
 0x110   :  { %v301_v29 = vpop.f32.mrb[15].mxu0  ;;  %v365_v31 = vpop.f32.mrb[15].mxu1  ;;  %v433_v39 = vmul.f32 %v598_v25, %v598_v25  ;;  %v448_v20 = vmul.f32 %v613_v19, %v613_v19 }
 0x111   :  { %v461_v33 = vadd.f32 %v460_v24, %v430_v23  ;;  %v390_v34 = vadd.f32 %v389_v22, %v301_v29  ;;  %v431_v35 = vmul.f32 %v301_v29, %v301_v29  ;;  %v447_v18 = vmul.f32 %v365_v31, %v365_v31 }
 0x112   :  { %v449_v23 = vmul.f32 %v614_v27, %v614_v27 }
 0x113   :  { %v391_v37 = vadd.f32 %v597_v17, %v390_v34  ;;  %v462_v38 = vadd.f32 %v461_v33, %v431_v35 }
 0x115   :  { %v463_v40 = vadd.f32 %v462_v38, %v432_v36  ;;  %v392_v41 = vadd.f32 %v598_v25, %v391_v37 }
 0x117   :  { %v393_v44 = vadd.f32 %v392_v41, %v758_v28  ;;  %v464_v46 = vadd.f32 %v463_v40, %v433_v39  ;;  %v438_v28 = vmul.f32 %v766_v45, %v766_v45  ;;  %v377_v39 = vld [vmem:[#allocation2] sm:$0x1] }
 0x119   :  { %v465_v47 = vadd.f32 %v464_v46, %v434_v42  ;;  %v394_v48 = vadd.f32 %v393_v44, %v762_v32 }
 0x11b   :  { %v395_v53 = vadd.f32 %v756_v26, %v394_v48  ;;  %v466_v54 = vadd.f32 %v465_v47, %v435_v49  ;;  %v440_v26 = vmul.f32 %v764_v43, %v764_v43 }
 0x11d   :  { %v467_v56 = vadd.f32 %v466_v54, %v436_v51  ;;  %v396_v57 = vadd.f32 %v760_v30, %v395_v53  ;;  %v441_v30 = vmul.f32 %v768_v50, %v768_v50 }
 0x11f   :  { %v397_v58 = vadd.f32 %v396_v57, %v766_v45  ;;  %v468_v59 = vadd.f32 %v467_v56, %v437_v55  ;;  %v442_v45 = vmul.f32 %v346_v1, %v346_v1  ;;  %v507_v55 = vlaneseq  ;;  %v499_v56 = vld [vmem:[%s817_s2] sm:$0x1] }
 0x121   :  { %v469_v60 = vadd.f32 %v468_v59, %v438_v28  ;;  %v398_v32 = vadd.f32 %v397_v58, %v770_v52  ;;  %v444_v52 = vmul.f32 %v772_v63, %v772_v63  ;;  %v508_v57 = vshrl.u32 %v507_v55, 7  ;;  %v503_v59 = vld [vmem:[%s818_s3] sm:$0x1] }
 0x123   :  { %v399_v62 = vadd.f32 %v764_v43, %v398_v32  ;;  %v470_v0 = vadd.f32 %v469_v60, %v439_v61  ;;  %v445_v43 = vmul.f32 %v774_v6, %v774_v6  ;;  %v509_v32 = vsub.s32 0, %v508_v57 }
 0x125   :  { %v471_v2 = vadd.f32 %v470_v0, %v440_v26  ;;  %v400_v3 = vadd.f32 %v768_v50, %v399_v62 }
 0x127   :  { %v401_v4 = vadd.f32 %v400_v3, %v346_v1  ;;  %v472_v5 = vadd.f32 %v471_v2, %v441_v30 }
 0x129   :  { %v473_v7 = vadd.f32 %v472_v5, %v442_v45  ;;  %v402_v9 = vadd.f32 %v401_v4, %v349_v8 }
 0x12b   :  { %v403_v11 = vadd.f32 %v772_v63, %v402_v9  ;;  %v474_v12 = vadd.f32 %v473_v7, %v443_v10 }
 0x12d   :  { %v475_v13 = vadd.f32 %v474_v12, %v444_v52  ;;  %v404_v14 = vadd.f32 %v774_v6, %v403_v11 }
 0x12f   :  { %v405_v50 = vadd.f32 %v404_v14, %v362_v21  ;;  %v476_v16 = vadd.f32 %v475_v13, %v445_v43 }
 0x131   :  { %v477_v1 = vadd.f32 %v476_v16, %v446_v15  ;;  %v406_v17 = vadd.f32 %v405_v50, %v365_v31  ;;  %v417_v31 = vld [vmem:[#allocation3] sm:$0x1] }
 0x133   :  { %v407_v8 = vadd.f32 %v613_v19, %v406_v17  ;;  %v478_v22 = vadd.f32 %v477_v1, %v447_v18 }
 0x135   :  { %v408_v24 = vadd.f32 %v614_v27, %v407_v8  ;;  %v479_v25 = vadd.f32 %v478_v22, %v448_v20 }
 0x137   :  { %v409_v63 = vrot.slane %v408_v24, 4  ;;  %v480_v29 = vadd.f32 %v479_v25, %v449_v23 }
 0x139   :  { %v410_v33 = vadd.f32 %v409_v63, %v408_v24  ;;  %v481_v34 = vrot.slane %v480_v29, 4 }
 0x13b   :  { %v411_v35 = vrot.slane %v410_v33, 2  ;;  %v482_v36 = vadd.f32 %v481_v34, %v480_v29 }
 0x13d   :  { %v412_v37 = vadd.f32 %v411_v35, %v410_v33  ;;  %v483_v6 = vrot.slane %v482_v36, 2 }
 0x13f   :  { %v413_v38 = vrot.slane %v412_v37, 1  ;;  %v484_v21 = vadd.f32 %v483_v6, %v482_v36 }
 0x141   :  { %v414_v40 = vadd.f32 %v413_v38, %v412_v37  ;;  %v485_v41 = vrot.slane %v484_v21, 1 }
 0x143   :  { %v415_v42 = vadd.f32 %v414_v40, %v377_v39  ;;  %v486_v19 = vadd.f32 %v485_v41, %v484_v21 }
 0x145   :  { %416 = vst [vmem:[#allocation2] sm:$0x1] %v415_v42  ;;  %v487_v44 = vadd.f32 %v486_v19, %v417_v31 }
 0x147   :  { %488 = vst [vmem:[#allocation3] sm:$0x1] %v487_v44 }
 0x14c   :  { %v492_v27 = vld [vmem:[#allocation2] sm:$0x1] }
 0x14d   :  { %v493_v46 = vmul.f32 0.0078125, %v492_v27 }
 0x14e   :  { %v494_v47 = vld [vmem:[#allocation3] sm:$0x1] }
 0x14f   :  { %v495_v48 = vmul.f32 0.0078125, %v494_v47  ;;  %v496_v49 = vmul.f32 %v493_v46, %v493_v46 }
 0x151   :  { %v497_v51 = vsub.f32 %v495_v48, %v496_v49 }
 0x153   :  { %v498_v53 = vmax.f32 %v497_v51, 0.0 }
 0x155   :  { %v500_v54 = vadd.f32 1e-05, %v498_v53 }
 0x157   :  { %656 = vrsqrt.f32 %v500_v54 }
 0x161   :  { %v657_v28 = vpop.eup %656 }
 0x162   :  { %v502_v58 = vmul.f32 %v657_v28, %v499_v56 }
 0x164   :  { %v504_v60 = vmul.f32 %v502_v58, %v493_v46 }
 0x166   :  { %v505_v61 = vsub.f32 %v503_v59, %v504_v60 }
 0x168   :  { %v510_v26 = vrot.slane %v505_v61, %v509_v32 }
 0x16a   :  { %v513_v62 = vsel %vm512_vm0, %v502_v58, %v510_v26 }
 0x16b   :  { %514 = vst [vmem:[%s819_s4] sm:$0x3] %v513_v62 }

// kernel: bottleneck_forward.11
= control target key start
LH: loop header
LB: loop body
LE: loop exit
PB: predicated region body
PF: predicated region fallthrough
CT: control target
= control target key end

     0   :  { %s1487_s1 = inlined_call_operand.vmem [shape: bf16[128,128], index: 1, kind: input, shape index: {}]   ;;  %s1488_s4 = inlined_call_operand.vmem [shape: bf16[128,128], index: 4, kind: input, shape index: {}]   ;;  %s1489_s0 = inlined_call_operand.vmem [shape: bf16[256,128], index: 0, kind: input, shape index: {}]   ;;  %s1490_s3 = inlined_call_operand.vmem [shape: bf16[256,128], index: 3, kind: input, shape index: {}]   ;;  %s1491_s2 = inlined_call_operand.vmem [shape: f32[2,128], index: 2, kind: input, shape index: {}]   ;;  %s1492_s5 = inlined_call_operand.vmem [shape: f32[256,128], index: 5, kind: output, shape index: {}]  }
   0x1   :  { %v1095_v0 = vld [vmem:[%s1487_s1] sm:$0xff]   ;;  %v1097_v2 = vld [vmem:[%s1487_s1 + $0x8] sm:$0xff]   ;;  %v1099_v4 = vld [vmem:[%s1487_s1 + $0x10] sm:$0xff]  }
   0x2   :  { %v1096_v1 = vld [vmem:[%s1488_s4] sm:$0xff]   ;;  %999 = vmatprep.subr.bf16.mxu0 %v1095_v0  ;;  %v1098_v3 = vld [vmem:[%s1488_s4 + $0x8] sm:$0xff]   ;;  %v1100_v5 = vld [vmem:[%s1488_s4 + $0x10] sm:$0xff]  }
   0x3   :  { %1000 = vmatpush3.bf16.msra.mxu0 %v1095_v0  ;;  %1047 = vmatprep.subr.bf16.mxu1 %v1096_v1  ;;  %v1101_v6 = vld [vmem:[%s1487_s1 + $0x18] sm:$0xff]   ;;  %v1103_v8 = vld [vmem:[%s1487_s1 + $0x20] sm:$0xff]   ;;  %v1105_v10 = vld [vmem:[%s1487_s1 + $0x28] sm:$0xff]  }
   0x4   :  { %1048 = vmatpush3.bf16.msra.mxu1 %v1096_v1  ;;  %1001 = vmatprep.subr.bf16.mxu0 %v1097_v2  ;;  %v1102_v7 = vld [vmem:[%s1488_s4 + $0x18] sm:$0xff]   ;;  %v1104_v9 = vld [vmem:[%s1488_s4 + $0x20] sm:$0xff]   ;;  %v1106_v12 = vld [vmem:[%s1488_s4 + $0x28] sm:$0xff]  }
   0x5   :  { %1049 = vmatprep.subr.bf16.mxu1 %v1098_v3  ;;  %v1111_v11 = vld [vmem:[%s1489_s0] sm:$0xff]   ;;  %v1107_v14 = vld [vmem:[%s1487_s1 + $0x30] sm:$0xff]   ;;  %v1109_v16 = vld [vmem:[%s1487_s1 + $0x38] sm:$0xff]  }
   0x6   :  { %1015 = vmatprep.mubr.bf16.mxu0 %v1111_v11  ;;  %v1113_v13 = vld [vmem:[%s1490_s3] sm:$0xff]   ;;  %v1108_v15 = vld [vmem:[%s1488_s4 + $0x30] sm:$0xff]   ;;  %v1110_v17 = vld [vmem:[%s1488_s4 + $0x38] sm:$0xff]  }
   0x7   :  { %1002 = vmatpush3.bf16.msra.mxu0 %v1097_v2  ;;  %1063 = vmatprep.mubr.bf16.mxu1 %v1113_v13  ;;  %v1112_v18 = vld [vmem:[%s1489_s0 + $0x8] sm:$0xff]   ;;  %v1115_v20 = vld [vmem:[%s1489_s0 + $0x10] sm:$0xff]   ;;  %v1116_v22 = vld [vmem:[%s1489_s0 + $0x18] sm:$0xff]  }
   0x8   :  { %1050 = vmatpush3.bf16.msra.mxu1 %v1098_v3  ;;  %1003 = vmatprep.subr.bf16.mxu0 %v1099_v4  ;;  %v1114_v19 = vld [vmem:[%s1490_s3 + $0x8] sm:$0xff]   ;;  %v1117_v21 = vld [vmem:[%s1490_s3 + $0x10] sm:$0xff]   ;;  %v1118_v23 = vld [vmem:[%s1490_s3 + $0x18] sm:$0xff]  }
   0x9   :  { %1051 = vmatprep.subr.bf16.mxu1 %v1100_v5  ;;  %v1119_v24 = vld [vmem:[%s1489_s0 + $0x20] sm:$0xff]   ;;  %v1120_v26 = vld [vmem:[%s1489_s0 + $0x28] sm:$0xff]   ;;  %v1123_v28 = vld [vmem:[%s1489_s0 + $0x30] sm:$0xff]  }
   0xa   :  { %v1121_v25 = vld [vmem:[%s1490_s3 + $0x20] sm:$0xff]   ;;  %v1122_v27 = vld [vmem:[%s1490_s3 + $0x28] sm:$0xff]   ;;  %v1125_v29 = vld [vmem:[%s1490_s3 + $0x30] sm:$0xff]  }
   0xb   :  { %1004 = vmatpush3.bf16.msra.mxu0 %v1099_v4  ;;  %v1124_v30 = vld [vmem:[%s1489_s0 + $0x38] sm:$0xff]   ;;  %v1127_v32 = vld [vmem:[%s1489_s0 + $0x40] sm:$0xff]   ;;  %v1128_v34 = vld [vmem:[%s1489_s0 + $0x48] sm:$0xff]  }
   0xc   :  { %1052 = vmatpush3.bf16.msra.mxu1 %v1100_v5  ;;  %1005 = vmatprep.subr.bf16.mxu0 %v1101_v6  ;;  %v1126_v31 = vld [vmem:[%s1490_s3 + $0x38] sm:$0xff]   ;;  %v1129_v33 = vld [vmem:[%s1490_s3 + $0x40] sm:$0xff]   ;;  %v1130_v35 = vld [vmem:[%s1490_s3 + $0x48] sm:$0xff]  }
   0xd   :  { %1053 = vmatprep.subr.bf16.mxu1 %v1102_v7  ;;  %v1131_v36 = vld [vmem:[%s1489_s0 + $0x50] sm:$0xff]   ;;  %v1132_v38 = vld [vmem:[%s1489_s0 + $0x58] sm:$0xff]   ;;  %v1135_v40 = vld [vmem:[%s1489_s0 + $0x60] sm:$0xff]  }
   0xe   :  { %v1133_v37 = vld [vmem:[%s1490_s3 + $0x50] sm:$0xff]   ;;  %v1134_v39 = vld [vmem:[%s1490_s3 + $0x58] sm:$0xff]   ;;  %v1137_v41 = vld [vmem:[%s1490_s3 + $0x60] sm:$0xff]  }
   0xf   :  { %1006 = vmatpush3.bf16.msra.mxu0 %v1101_v6  ;;  %v1136_v42 = vld [vmem:[%s1489_s0 + $0x68] sm:$0xff]   ;;  %v1139_v44 = vld [vmem:[%s1489_s0 + $0x70] sm:$0xff]   ;;  %v1140_v46 = vld [vmem:[%s1489_s0 + $0x78] sm:$0xff]  }
  0x10   :  { %1054 = vmatpush3.bf16.msra.mxu1 %v1102_v7  ;;  %1007 = vmatprep.subr.bf16.mxu0 %v1103_v8  ;;  %v1138_v43 = vld [vmem:[%s1490_s3 + $0x68] sm:$0xff]   ;;  %v1141_v45 = vld [vmem:[%s1490_s3 + $0x70] sm:$0xff]   ;;  %v1142_v47 = vld [vmem:[%s1490_s3 + $0x78] sm:$0xff]  }
  0x11   :  { %1055 = vmatprep.subr.bf16.mxu1 %v1104_v9  ;;  %v1320_v48 = vld [vmem:[%s1491_s2] ss:$0 sm:$0xff]  ;;  %v1325_v50 = vld [vmem:[%s1491_s2 + $0x1] ss:$0 sm:$0xff] }
  0x13   :  { %1008 = vmatpush3.bf16.msra.mxu0 %v1103_v8 }
  0x14   :  { %1056 = vmatpush3.bf16.msra.mxu1 %v1104_v9  ;;  %1009 = vmatprep.subr.bf16.mxu0 %v1105_v10 }
  0x15   :  { %1057 = vmatprep.subr.bf16.mxu1 %v1106_v12 }
  0x17   :  { %1010 = vmatpush3.bf16.msra.mxu0 %v1105_v10 }
  0x18   :  { %1058 = vmatpush3.bf16.msra.mxu1 %v1106_v12  ;;  %1011 = vmatprep.subr.bf16.mxu0 %v1107_v14 }
  0x19   :  { %1059 = vmatprep.subr.bf16.mxu1 %v1108_v15 }
  0x1b   :  { %1012 = vmatpush3.bf16.msra.mxu0 %v1107_v14 }
  0x1c   :  { %1060 = vmatpush3.bf16.msra.mxu1 %v1108_v15  ;;  %1013 = vmatprep.subr.bf16.mxu0 %v1109_v16 }
  0x1d   :  { %1061 = vmatprep.subr.bf16.mxu1 %v1110_v17 }
  0x1f   :  { %1014 = vmatpush3.bf16.msra.mxu0 %v1109_v16 }
  0x20   :  { %1062 = vmatpush3.bf16.msra.mxu1 %v1110_v17 }
  0x22   :  { %1016 = vmatmul.mubr.bf16.vlgmr.msra.gmra.mrb[0].mxu0 %v1112_v18 }
  0x23   :  { %1064 = vmatmul.mubr.bf16.vlgmr.msra.gmra.mrb[0].mxu1 %v1114_v19  ;;  %1019 = vmatprep.mubr.bf16.mxu0 %v1115_v20 }
  0x24   :  { %1067 = vmatprep.mubr.bf16.mxu1 %v1117_v21 }
  0x2a   :  { %1020 = vmatmul.mubr.bf16.gmra.mrb[4].mxu0 %v1116_v22 }
  0x2b   :  { %1068 = vmatmul.mubr.bf16.gmra.mrb[4].mxu1 %v1118_v23  ;;  %1023 = vmatprep.mubr.bf16.mxu0 %v1119_v24 }
  0x2c   :  { %1071 = vmatprep.mubr.bf16.mxu1 %v1121_v25 }
  0x32   :  { %1024 = vmatmul.mubr.bf16.gmra.mrb[8].mxu0 %v1120_v26 }
  0x33   :  { %1072 = vmatmul.mubr.bf16.gmra.mrb[8].mxu1 %v1122_v27  ;;  %1027 = vmatprep.mubr.bf16.mxu0 %v1123_v28 }
  0x34   :  { %1075 = vmatprep.mubr.bf16.mxu1 %v1125_v29 }
  0x3a   :  { %1028 = vmatmul.mubr.bf16.gmra.mrb[12].mxu0 %v1124_v30 }
  0x3b   :  { %1076 = vmatmul.mubr.bf16.gmra.mrb[12].mxu1 %v1126_v31  ;;  %1031 = vmatprep.mubr.bf16.mxu0 %v1127_v32 }
  0x3c   :  { %1079 = vmatprep.mubr.bf16.mxu1 %v1129_v33 }
  0x42   :  { %1032 = vmatmul.mubr.bf16.gmra.mrb[16].mxu0 %v1128_v34 }
  0x43   :  { %1080 = vmatmul.mubr.bf16.gmra.mrb[16].mxu1 %v1130_v35  ;;  %1035 = vmatprep.mubr.bf16.mxu0 %v1131_v36 }
  0x44   :  { %1083 = vmatprep.mubr.bf16.mxu1 %v1133_v37 }
  0x4a   :  { %1036 = vmatmul.mubr.bf16.gmra.mrb[20].mxu0 %v1132_v38 }
  0x4b   :  { %1084 = vmatmul.mubr.bf16.gmra.mrb[20].mxu1 %v1134_v39  ;;  %1039 = vmatprep.mubr.bf16.mxu0 %v1135_v40 }
  0x4c   :  { %1087 = vmatprep.mubr.bf16.mxu1 %v1137_v41 }
  0x52   :  { %1040 = vmatmul.mubr.bf16.gmra.mrb[24].mxu0 %v1136_v42 }
  0x53   :  { %1088 = vmatmul.mubr.bf16.gmra.mrb[24].mxu1 %v1138_v43  ;;  %1043 = vmatprep.mubr.bf16.mxu0 %v1139_v44 }
  0x54   :  { %1091 = vmatprep.mubr.bf16.mxu1 %v1141_v45 }
  0x5a   :  { %1044 = vmatmul.mubr.bf16.gmra.mrb[28].mxu0 %v1140_v46 }
  0x5b   :  { %1092 = vmatmul.mubr.bf16.gmra.mrb[28].mxu1 %v1142_v47 }
  0xf5   :  { %v1017_v49 = vpop.f32.mrb[0].mxu0 }
  0xf6   :  { %v381_v51 = vmul.f32 %v1017_v49, %v1320_v48  ;;  %v247_v52 = vpop.f32.mrb[1].mxu0  ;;  %v1065_v53 = vpop.f32.mrb[0].mxu1 }
  0xf7   :  { %v379_v54 = vmul.f32 %v1320_v48, %v247_v52  ;;  %v1018_v55 = vpop.f32.mrb[2].mxu0  ;;  %v674_v56 = vpop.f32.mrb[1].mxu1 }
  0xf8   :  { %v418_v57 = vadd.f32 %v1325_v50, %v381_v51  ;;  %v382_v58 = vmul.f32 %v1018_v55, %v1320_v48  ;;  %v250_v59 = vpop.f32.mrb[3].mxu0  ;;  %v1066_v60 = vpop.f32.mrb[2].mxu1 }
  0xf9   :  { %v416_v61 = vadd.f32 %v1325_v50, %v379_v54  ;;  %v380_v62 = vmul.f32 %v1320_v48, %v250_v59  ;;  %v677_v63 = vpop.f32.mrb[3].mxu1 }
  0xfa   :  { %v803_v0 = vadd.f32 %v1065_v53, %v418_v57  ;;  %v419_v1 = vadd.f32 %v1325_v50, %v382_v58 }
  0xfb   :  { %v801_v2 = vadd.f32 %v674_v56, %v416_v61  ;;  %v417_v3 = vadd.f32 %v1325_v50, %v380_v62 }
  0xfc   :  { %v835_v4 = vmax.f32 %v803_v0, 0.0  ;;  %v804_v5 = vadd.f32 %v1066_v60, %v419_v1 }
  0xfd   :  { %v833_v6 = vmax.f32 %v801_v2, 0.0  ;;  %v802_v7 = vadd.f32 %v677_v63, %v417_v3  ;;  %v1021_v8 = vpop.f32.mrb[4].mxu0 }
  0xfe   :  { %867 = vst [vmem:[%s1492_s5 + $0x10] sm:$0xff] %v835_v4  ;;  %v836_v9 = vmax.f32 %v804_v5, 0.0  ;;  %v385_v10 = vmul.f32 %v1021_v8, %v1320_v48  ;;  %v263_v11 = vpop.f32.mrb[5].mxu0  ;;  %v1069_v12 = vpop.f32.mrb[4].mxu1 }
  0xff   :  { %865 = vst [vmem:[%s1492_s5] sm:$0xff] %v833_v6  ;;  %v834_v13 = vmax.f32 %v802_v7, 0.0  ;;  %v383_v14 = vmul.f32 %v1320_v48, %v263_v11  ;;  %v1022_v15 = vpop.f32.mrb[6].mxu0  ;;  %v690_v16 = vpop.f32.mrb[5].mxu1 }
 0x100   :  { %868 = vst [vmem:[%s1492_s5 + $0x18] sm:$0xff] %v836_v9  ;;  %v422_v17 = vadd.f32 %v1325_v50, %v385_v10  ;;  %v386_v18 = vmul.f32 %v1022_v15, %v1320_v48  ;;  %v266_v19 = vpop.f32.mrb[7].mxu0  ;;  %v1070_v20 = vpop.f32.mrb[6].mxu1 }
 0x101   :  { %866 = vst [vmem:[%s1492_s5 + $0x8] sm:$0xff] %v834_v13  ;;  %v420_v21 = vadd.f32 %v1325_v50, %v383_v14  ;;  %v384_v22 = vmul.f32 %v1320_v48, %v266_v19  ;;  %v693_v23 = vpop.f32.mrb[7].mxu1 }
 0x102   :  { %v807_v24 = vadd.f32 %v1069_v12, %v422_v17  ;;  %v423_v25 = vadd.f32 %v1325_v50, %v386_v18 }
 0x103   :  { %v805_v26 = vadd.f32 %v690_v16, %v420_v21  ;;  %v421_v27 = vadd.f32 %v1325_v50, %v384_v22 }
 0x104   :  { %v839_v28 = vmax.f32 %v807_v24, 0.0  ;;  %v808_v29 = vadd.f32 %v1070_v20, %v423_v25 }
 0x105   :  { %v837_v30 = vmax.f32 %v805_v26, 0.0  ;;  %v806_v31 = vadd.f32 %v693_v23, %v421_v27  ;;  %v1025_v32 = vpop.f32.mrb[8].mxu0 }
 0x106   :  { %871 = vst [vmem:[%s1492_s5 + $0x30] sm:$0xff] %v839_v28  ;;  %v840_v33 = vmax.f32 %v808_v29, 0.0  ;;  %v389_v34 = vmul.f32 %v1025_v32, %v1320_v48  ;;  %v279_v35 = vpop.f32.mrb[9].mxu0  ;;  %v1073_v36 = vpop.f32.mrb[8].mxu1 }
 0x107   :  { %869 = vst [vmem:[%s1492_s5 + $0x20] sm:$0xff] %v837_v30  ;;  %v838_v37 = vmax.f32 %v806_v31, 0.0  ;;  %v387_v38 = vmul.f32 %v1320_v48, %v279_v35  ;;  %v1026_v39 = vpop.f32.mrb[10].mxu0  ;;  %v706_v40 = vpop.f32.mrb[9].mxu1 }
 0x108   :  { %872 = vst [vmem:[%s1492_s5 + $0x38] sm:$0xff] %v840_v33  ;;  %v426_v41 = vadd.f32 %v1325_v50, %v389_v34  ;;  %v390_v42 = vmul.f32 %v1026_v39, %v1320_v48  ;;  %v282_v43 = vpop.f32.mrb[11].mxu0  ;;  %v1074_v44 = vpop.f32.mrb[10].mxu1 }
 0x109   :  { %870 = vst [vmem:[%s1492_s5 + $0x28] sm:$0xff] %v838_v37  ;;  %v424_v45 = vadd.f32 %v1325_v50, %v387_v38  ;;  %v388_v46 = vmul.f32 %v1320_v48, %v282_v43  ;;  %v709_v47 = vpop.f32.mrb[11].mxu1 }
 0x10a   :  { %v811_v49 = vadd.f32 %v1073_v36, %v426_v41  ;;  %v427_v51 = vadd.f32 %v1325_v50, %v390_v42 }
 0x10b   :  { %v809_v52 = vadd.f32 %v706_v40, %v424_v45  ;;  %v425_v53 = vadd.f32 %v1325_v50, %v388_v46 }
 0x10c   :  { %v843_v54 = vmax.f32 %v811_v49, 0.0  ;;  %v812_v55 = vadd.f32 %v1074_v44, %v427_v51 }
 0x10d   :  { %v841_v56 = vmax.f32 %v809_v52, 0.0  ;;  %v810_v57 = vadd.f32 %v709_v47, %v425_v53  ;;  %v1029_v58 = vpop.f32.mrb[12].mxu0 }
 0x10e   :  { %875 = vst [vmem:[%s1492_s5 + $0x50] sm:$0xff] %v843_v54  ;;  %v844_v59 = vmax.f32 %v812_v55, 0.0  ;;  %v393_v60 = vmul.f32 %v1029_v58, %v1320_v48  ;;  %v295_v61 = vpop.f32.mrb[13].mxu0  ;;  %v1077_v62 = vpop.f32.mrb[12].mxu1 }
 0x10f   :  { %873 = vst [vmem:[%s1492_s5 + $0x40] sm:$0xff] %v841_v56  ;;  %v842_v63 = vmax.f32 %v810_v57, 0.0  ;;  %v391_v0 = vmul.f32 %v1320_v48, %v295_v61  ;;  %v1030_v1 = vpop.f32.mrb[14].mxu0  ;;  %v722_v2 = vpop.f32.mrb[13].mxu1 }
 0x110   :  { %876 = vst [vmem:[%s1492_s5 + $0x58] sm:$0xff] %v844_v59  ;;  %v430_v3 = vadd.f32 %v1325_v50, %v393_v60  ;;  %v394_v4 = vmul.f32 %v1030_v1, %v1320_v48  ;;  %v298_v5 = vpop.f32.mrb[15].mxu0  ;;  %v1078_v6 = vpop.f32.mrb[14].mxu1 }
 0x111   :  { %874 = vst [vmem:[%s1492_s5 + $0x48] sm:$0xff] %v842_v63  ;;  %v428_v7 = vadd.f32 %v1325_v50, %v391_v0  ;;  %v392_v8 = vmul.f32 %v1320_v48, %v298_v5  ;;  %v725_v9 = vpop.f32.mrb[15].mxu1 }
 0x112   :  { %v815_v10 = vadd.f32 %v1077_v62, %v430_v3  ;;  %v431_v11 = vadd.f32 %v1325_v50, %v394_v4 }
 0x113   :  { %v813_v12 = vadd.f32 %v722_v2, %v428_v7  ;;  %v429_v13 = vadd.f32 %v1325_v50, %v392_v8 }
 0x114   :  { %v847_v14 = vmax.f32 %v815_v10, 0.0  ;;  %v816_v15 = vadd.f32 %v1078_v6, %v431_v11 }
 0x115   :  { %v845_v16 = vmax.f32 %v813_v12, 0.0  ;;  %v814_v17 = vadd.f32 %v725_v9, %v429_v13  ;;  %v1033_v18 = vpop.f32.mrb[16].mxu0 }
 0x116   :  { %879 = vst [vmem:[%s1492_s5 + $0x70] sm:$0xff] %v847_v14  ;;  %v848_v19 = vmax.f32 %v816_v15, 0.0  ;;  %v397_v20 = vmul.f32 %v1033_v18, %v1320_v48  ;;  %v311_v21 = vpop.f32.mrb[17].mxu0  ;;  %v1081_v22 = vpop.f32.mrb[16].mxu1 }
 0x117   :  { %877 = vst [vmem:[%s1492_s5 + $0x60] sm:$0xff] %v845_v16  ;;  %v846_v23 = vmax.f32 %v814_v17, 0.0  ;;  %v395_v24 = vmul.f32 %v1320_v48, %v311_v21  ;;  %v1034_v25 = vpop.f32.mrb[18].mxu0  ;;  %v738_v26 = vpop.f32.mrb[17].mxu1 }
 0x118   :  { %880 = vst [vmem:[%s1492_s5 + $0x78] sm:$0xff] %v848_v19  ;;  %v434_v27 = vadd.f32 %v1325_v50, %v397_v20  ;;  %v398_v28 = vmul.f32 %v1034_v25, %v1320_v48  ;;  %v314_v29 = vpop.f32.mrb[19].mxu0  ;;  %v1082_v30 = vpop.f32.mrb[18].mxu1 }
 0x119   :  { %878 = vst [vmem:[%s1492_s5 + $0x68] sm:$0xff] %v846_v23  ;;  %v432_v31 = vadd.f32 %v1325_v50, %v395_v24  ;;  %v396_v32 = vmul.f32 %v1320_v48, %v314_v29  ;;  %v741_v33 = vpop.f32.mrb[19].mxu1 }
 0x11a   :  { %v819_v34 = vadd.f32 %v1081_v22, %v434_v27  ;;  %v435_v35 = vadd.f32 %v1325_v50, %v398_v28 }
 0x11b   :  { %v817_v36 = vadd.f32 %v738_v26, %v432_v31  ;;  %v433_v37 = vadd.f32 %v1325_v50, %v396_v32 }
 0x11c   :  { %v851_v38 = vmax.f32 %v819_v34, 0.0  ;;  %v820_v39 = vadd.f32 %v1082_v30, %v435_v35 }
 0x11d   :  { %v849_v40 = vmax.f32 %v817_v36, 0.0  ;;  %v818_v41 = vadd.f32 %v741_v33, %v433_v37  ;;  %v1037_v42 = vpop.f32.mrb[20].mxu0 }
 0x11e   :  { %883 = vst [vmem:[%s1492_s5 + $0x90] sm:$0xff] %v851_v38  ;;  %v852_v43 = vmax.f32 %v820_v39, 0.0  ;;  %v401_v44 = vmul.f32 %v1037_v42, %v1320_v48  ;;  %v327_v45 = vpop.f32.mrb[21].mxu0  ;;  %v1085_v46 = vpop.f32.mrb[20].mxu1 }
 0x11f   :  { %881 = vst [vmem:[%s1492_s5 + $0x80] sm:$0xff] %v849_v40  ;;  %v850_v47 = vmax.f32 %v818_v41, 0.0  ;;  %v399_v49 = vmul.f32 %v1320_v48, %v327_v45  ;;  %v1038_v51 = vpop.f32.mrb[22].mxu0  ;;  %v754_v52 = vpop.f32.mrb[21].mxu1 }
 0x120   :  { %884 = vst [vmem:[%s1492_s5 + $0x98] sm:$0xff] %v852_v43  ;;  %v438_v53 = vadd.f32 %v1325_v50, %v401_v44  ;;  %v402_v54 = vmul.f32 %v1038_v51, %v1320_v48  ;;  %v330_v55 = vpop.f32.mrb[23].mxu0  ;;  %v1086_v56 = vpop.f32.mrb[22].mxu1 }
 0x121   :  { %882 = vst [vmem:[%s1492_s5 + $0x88] sm:$0xff] %v850_v47  ;;  %v436_v57 = vadd.f32 %v1325_v50, %v399_v49  ;;  %v400_v58 = vmul.f32 %v1320_v48, %v330_v55  ;;  %v757_v59 = vpop.f32.mrb[23].mxu1 }
 0x122   :  { %v823_v60 = vadd.f32 %v1085_v46, %v438_v53  ;;  %v439_v61 = vadd.f32 %v1325_v50, %v402_v54 }
 0x123   :  { %v821_v62 = vadd.f32 %v754_v52, %v436_v57  ;;  %v437_v63 = vadd.f32 %v1325_v50, %v400_v58 }
 0x124   :  { %v855_v0 = vmax.f32 %v823_v60, 0.0  ;;  %v824_v1 = vadd.f32 %v1086_v56, %v439_v61 }
 0x125   :  { %v853_v2 = vmax.f32 %v821_v62, 0.0  ;;  %v822_v3 = vadd.f32 %v757_v59, %v437_v63  ;;  %v1041_v4 = vpop.f32.mrb[24].mxu0 }
 0x126   :  { %887 = vst [vmem:[%s1492_s5 + $0xb0] sm:$0xff] %v855_v0  ;;  %v856_v5 = vmax.f32 %v824_v1, 0.0  ;;  %v405_v6 = vmul.f32 %v1041_v4, %v1320_v48  ;;  %v343_v7 = vpop.f32.mrb[25].mxu0  ;;  %v1089_v8 = vpop.f32.mrb[24].mxu1 }
 0x127   :  { %885 = vst [vmem:[%s1492_s5 + $0xa0] sm:$0xff] %v853_v2  ;;  %v854_v9 = vmax.f32 %v822_v3, 0.0  ;;  %v403_v10 = vmul.f32 %v1320_v48, %v343_v7  ;;  %v1042_v11 = vpop.f32.mrb[26].mxu0  ;;  %v770_v12 = vpop.f32.mrb[25].mxu1 }
 0x128   :  { %888 = vst [vmem:[%s1492_s5 + $0xb8] sm:$0xff] %v856_v5  ;;  %v442_v13 = vadd.f32 %v1325_v50, %v405_v6  ;;  %v406_v14 = vmul.f32 %v1042_v11, %v1320_v48  ;;  %v346_v15 = vpop.f32.mrb[27].mxu0  ;;  %v1090_v16 = vpop.f32.mrb[26].mxu1 }
 0x129   :  { %886 = vst [vmem:[%s1492_s5 + $0xa8] sm:$0xff] %v854_v9  ;;  %v440_v17 = vadd.f32 %v1325_v50, %v403_v10  ;;  %v404_v18 = vmul.f32 %v1320_v48, %v346_v15  ;;  %v773_v19 = vpop.f32.mrb[27].mxu1 }
 0x12a   :  { %v827_v20 = vadd.f32 %v1089_v8, %v442_v13  ;;  %v443_v21 = vadd.f32 %v1325_v50, %v406_v14 }
 0x12b   :  { %v825_v22 = vadd.f32 %v770_v12, %v440_v17  ;;  %v441_v23 = vadd.f32 %v1325_v50, %v404_v18 }
 0x12c   :  { %v859_v24 = vmax.f32 %v827_v20, 0.0  ;;  %v828_v25 = vadd.f32 %v1090_v16, %v443_v21 }
 0x12d   :  { %v857_v26 = vmax.f32 %v825_v22, 0.0  ;;  %v826_v27 = vadd.f32 %v773_v19, %v441_v23  ;;  %v1045_v28 = vpop.f32.mrb[28].mxu0 }
 0x12e   :  { %891 = vst [vmem:[%s1492_s5 + $0xd0] sm:$0xff] %v859_v24  ;;  %v860_v29 = vmax.f32 %v828_v25, 0.0  ;;  %v409_v30 = vmul.f32 %v1045_v28, %v1320_v48  ;;  %v359_v31 = vpop.f32.mrb[29].mxu0  ;;  %v1093_v32 = vpop.f32.mrb[28].mxu1 }
 0x12f   :  { %889 = vst [vmem:[%s1492_s5 + $0xc0] sm:$0xff] %v857_v26  ;;  %v858_v33 = vmax.f32 %v826_v27, 0.0  ;;  %v407_v34 = vmul.f32 %v1320_v48, %v359_v31  ;;  %v1046_v35 = vpop.f32.mrb[30].mxu0  ;;  %v786_v36 = vpop.f32.mrb[29].mxu1 }
 0x130   :  { %892 = vst [vmem:[%s1492_s5 + $0xd8] sm:$0xff] %v860_v29  ;;  %v446_v37 = vadd.f32 %v1325_v50, %v409_v30  ;;  %v410_v38 = vmul.f32 %v1046_v35, %v1320_v48  ;;  %v362_v39 = vpop.f32.mrb[31].mxu0  ;;  %v1094_v40 = vpop.f32.mrb[30].mxu1 }
 0x131   :  { %890 = vst [vmem:[%s1492_s5 + $0xc8] sm:$0xff] %v858_v33  ;;  %v444_v41 = vadd.f32 %v1325_v50, %v407_v34  ;;  %v408_v42 = vmul.f32 %v1320_v48, %v362_v39  ;;  %v789_v43 = vpop.f32.mrb[31].mxu1 }
 0x132   :  { %v831_v44 = vadd.f32 %v1093_v32, %v446_v37  ;;  %v447_v45 = vadd.f32 %v1325_v50, %v410_v38 }
 0x133   :  { %v829_v46 = vadd.f32 %v786_v36, %v444_v41  ;;  %v445_v47 = vadd.f32 %v1325_v50, %v408_v42 }
 0x134   :  { %v863_v49 = vmax.f32 %v831_v44, 0.0  ;;  %v832_v51 = vadd.f32 %v1094_v40, %v447_v45 }
 0x135   :  { %v861_v52 = vmax.f32 %v829_v46, 0.0  ;;  %v830_v53 = vadd.f32 %v789_v43, %v445_v47 }
 0x136   :  { %895 = vst [vmem:[%s1492_s5 + $0xf0] sm:$0xff] %v863_v49  ;;  %v864_v54 = vmax.f32 %v832_v51, 0.0 }
 0x137   :  { %893 = vst [vmem:[%s1492_s5 + $0xe0] sm:$0xff] %v861_v52  ;;  %v862_v48 = vmax.f32 %v830_v53, 0.0 }
 0x138   :  { %896 = vst [vmem:[%s1492_s5 + $0xf8] sm:$0xff] %v864_v54 }
 0x139   :  { %894 = vst [vmem:[%s1492_s5 + $0xe8] sm:$0xff] %v862_v48 }

// kernel: bottleneck_forward.9
= control target key start
LH: loop header
LB: loop body
LE: loop exit
PB: predicated region body
PF: predicated region fallthrough
CT: control target
= control target key end

     0   :  { %vm1645_vm0 = vsmask.f32 7424  ;;  %vm2974_vm1 = vsmask.f32 3328  ;;  %vm3744_vm2 = vcmask 1042432   ;;  %s7015_s0 = inlined_call_operand.vmem [shape: bf16[4,272,128], index: 0, kind: input, shape index: {}, may-alias: {0,1}]   ;;  %s7016_s1 = inlined_call_operand.vmem [shape: bf16[4,272,128], index: 1, kind: input, shape index: {}, may-alias: {0,1}]   ;;  %s7017_s2 = inlined_call_operand.vmem [shape: bf16[9,128,128], index: 2, kind: input, shape index: {}]   ;;  %s7018_s3 = inlined_call_operand.vmem [shape: f32[2,128], index: 3, kind: input, shape index: {}]   ;;  %s7019_s4 = inlined_call_operand.vmem [shape: bf16[256,128], index: 4, kind: output, shape index: {}]  }
   0x1   :  { %v5670_v0 = vld [vmem:[%s7017_s2 + $0x40] sm:$0xff]   ;;  %v5672_v2 = vld [vmem:[%s7017_s2 + $0x48] sm:$0xff]   ;;  %v5674_v4 = vld [vmem:[%s7017_s2 + $0x50] sm:$0xff]  }
   0x2   :  { %v5671_v1 = vld [vmem:[%s7017_s2 + $0x100] sm:$0xff]   ;;  %4966 = vmatprep.subr.bf16.mxu1 %v5670_v0  ;;  %v5673_v3 = vld [vmem:[%s7017_s2 + $0x108] sm:$0xff]   ;;  %v5675_v5 = vld [vmem:[%s7017_s2 + $0x110] sm:$0xff]  }
   0x3   :  { %5158 = vmatprep.subr.bf16.mxu0 %v5671_v1  ;;  %4967 = vmatpush3.bf16.msra.mxu1 %v5670_v0  ;;  %v5676_v6 = vld [vmem:[%s7017_s2 + $0x58] sm:$0xff]   ;;  %v5678_v8 = vld [vmem:[%s7017_s2 + $0x60] sm:$0xff]   ;;  %v5680_v10 = vld [vmem:[%s7017_s2 + $0x68] sm:$0xff]  }
   0x4   :  { %5159 = vmatpush3.bf16.msra.mxu0 %v5671_v1  ;;  %4968 = vmatprep.subr.bf16.mxu1 %v5672_v2  ;;  %v5677_v7 = vld [vmem:[%s7017_s2 + $0x118] sm:$0xff]   ;;  %v5679_v9 = vld [vmem:[%s7017_s2 + $0x120] sm:$0xff]   ;;  %v90_v11 = vld [vmem:[%s7015_s0 + $0x88] sm:$0xff]  }
   0x5   :  { %5160 = vmatprep.subr.bf16.mxu0 %v5673_v3  ;;  %v218_v12 = vld [vmem:[%s7015_s0 + $0x198] sm:$0xff]   ;;  %91 = vst [vmem:[#allocation2 + $0x80] sm:$0xff] %v90_v11   ;;  %v94_v13 = vld [vmem:[%s7015_s0 + $0x90] sm:$0xff]   ;;  %v5681_v14 = vld [vmem:[%s7017_s2 + $0x128] sm:$0xff]  }
   0x6   :  { %219 = vst [vmem:[#allocation2 + $0x180] sm:$0xff] %v218_v12   ;;  %95 = vst [vmem:[#allocation2 + $0x88] sm:$0xff] %v94_v13   ;;  %v222_v15 = vld [vmem:[%s7015_s0 + $0x1a0] sm:$0xff]   ;;  %v5682_v16 = vld [vmem:[%s7017_s2 + $0x70] sm:$0xff]  }
   0x7   :  { %4969 = vmatpush3.bf16.msra.mxu1 %v5672_v2  ;;  %223 = vst [vmem:[#allocation2 + $0x188] sm:$0xff] %v222_v15   ;;  %v98_v17 = vld [vmem:[%s7015_s0 + $0x98] sm:$0xff]   ;;  %v226_v18 = vld [vmem:[%s7015_s0 + $0x1a8] sm:$0xff]   ;;  %v102_v19 = vld [vmem:[%s7015_s0 + $0xa0] sm:$0xff]  }
   0x8   :  { %5161 = vmatpush3.bf16.msra.mxu0 %v5673_v3  ;;  %4970 = vmatprep.subr.bf16.mxu1 %v5674_v4  ;;  %99 = vst [vmem:[#allocation2 + $0x90] sm:$0xff] %v98_v17   ;;  %v5683_v20 = vld [vmem:[%s7017_s2 + $0x130] sm:$0xff]   ;;  %227 = vst [vmem:[#allocation2 + $0x190] sm:$0xff] %v226_v18   ;;  %v5684_v22 = vld [vmem:[%s7017_s2 + $0x78] sm:$0xff]  }
   0x9   :  { %5162 = vmatprep.subr.bf16.mxu0 %v5675_v5  ;;  %103 = vst [vmem:[#allocation2 + $0x98] sm:$0xff] %v102_v19   ;;  %v230_v21 = vld [vmem:[%s7015_s0 + $0x1b0] sm:$0xff]   ;;  %v5685_v25 = vld [vmem:[%s7017_s2 + $0x138] sm:$0xff]   ;;  %v5689_v26 = vld [vmem:[%s7017_s2] sm:$0xff]  }
   0xa   :  { %231 = vst [vmem:[#allocation2 + $0x198] sm:$0xff] %v230_v21   ;;  %v5691_v27 = vld [vmem:[%s7017_s2 + $0x140] sm:$0xff]   ;;  %v5692_v30 = vld [vmem:[%s7017_s2 + $0x148] sm:$0xff]   ;;  %v234_v34 = vld [vmem:[%s7015_s0 + $0x1b8] sm:$0xff]  }
   0xb   :  { %4971 = vmatpush3.bf16.msra.mxu1 %v5674_v4  ;;  %v106_v33 = vld [vmem:[%s7015_s0 + $0xa8] sm:$0xff]   ;;  %v110_v35 = vld [vmem:[%s7015_s0 + $0xb0] sm:$0xff]   ;;  %235 = vst [vmem:[#allocation2 + $0x1a0] sm:$0xff] %v234_v34   ;;  %v238_v37 = vld [vmem:[%s7015_s0 + $0x1c0] sm:$0xff]  }
   0xc   :  { %5163 = vmatpush3.bf16.msra.mxu0 %v5675_v5  ;;  %4972 = vmatprep.subr.bf16.mxu1 %v5676_v6  ;;  %v5929_v23 = vld [vmem:[#allocation2 + $0x80] sm:$0xff]   ;;  %107 = vst [vmem:[#allocation2 + $0xa0] sm:$0xff] %v106_v33   ;;  %v5696_v36 = vld [vmem:[%s7017_s2 + $0x8] sm:$0xff]   ;;  %111 = vst [vmem:[#allocation2 + $0xa8] sm:$0xff] %v110_v35  }
   0xd   :  { %5164 = vmatprep.subr.bf16.mxu0 %v5677_v7  ;;  %v5687_v24 = vld [vmem:[#allocation2 + $0x180] sm:$0xff]   ;;  %4982 = vmatprep.mubr.bf16.mxu1 %v5929_v23  ;;  %v5941_v28 = vld [vmem:[#allocation2 + $0x88] sm:$0xff]   ;;  %v5698_v38 = vld [vmem:[%s7017_s2 + $0x150] sm:$0xff]   ;;  %239 = vst [vmem:[#allocation2 + $0x1a8] sm:$0xff] %v238_v37   ;;  %v3319_v12 = vshrl.u32 %v5929_v23, 16 }
   0xe   :  { %5174 = vmatprep.mubr.bf16.mxu0 %v5687_v24  ;;  %v5690_v29 = vld [vmem:[#allocation2 + $0x188] sm:$0xff]   ;;  %v5703_v40 = vld [vmem:[%s7017_s2 + $0x10] sm:$0xff]   ;;  %v114_v41 = vld [vmem:[%s7015_s0 + $0xb8] sm:$0xff]   ;;  %v3327_v24 = vshrl.u32 %v5941_v28, 16 }
   0xf   :  { %4973 = vmatpush3.bf16.msra.mxu1 %v5676_v6  ;;  %v5946_v31 = vld [vmem:[#allocation2 + $0x90] sm:$0xff]   ;;  %v242_v42 = vld [vmem:[%s7015_s0 + $0x1c8] sm:$0xff]   ;;  %v118_v43 = vld [vmem:[%s7015_s0 + $0xc0] sm:$0xff]   ;;  %115 = vst [vmem:[#allocation2 + $0xb0] sm:$0xff] %v114_v41  }
  0x10   :  { %5165 = vmatpush3.bf16.msra.mxu0 %v5677_v7  ;;  %4974 = vmatprep.subr.bf16.mxu1 %v5678_v8  ;;  %v5694_v32 = vld [vmem:[#allocation2 + $0x190] sm:$0xff]   ;;  %v5968_v39 = vld [vmem:[#allocation2 + $0x98] sm:$0xff]   ;;  %243 = vst [vmem:[#allocation2 + $0x1b0] sm:$0xff] %v242_v42   ;;  %119 = vst [vmem:[#allocation2 + $0xb8] sm:$0xff] %v118_v43   ;;  %v3336_v13 = vshrl.u32 %v5946_v31, 16 }
  0x11   :  { %5166 = vmatprep.subr.bf16.mxu0 %v5679_v9  ;;  %v5697_v44 = vld [vmem:[#allocation2 + $0x198] sm:$0xff]   ;;  %v246_v46 = vld [vmem:[%s7015_s0 + $0x1d0] sm:$0xff]   ;;  %v5705_v50 = vld [vmem:[%s7017_s2 + $0x160] sm:$0xff]  }
  0x12   :  { %v5699_v45 = vld [vmem:[%s7017_s2 + $0x158] sm:$0xff]   ;;  %247 = vst [vmem:[#allocation2 + $0x1b8] sm:$0xff] %v246_v46   ;;  %v5701_v48 = vld [vmem:[#allocation2 + $0x1a0] sm:$0xff]   ;;  %v5706_v55 = vld [vmem:[%s7017_s2 + $0x168] sm:$0xff]  }
  0x13   :  { %4975 = vmatpush3.bf16.msra.mxu1 %v5678_v8  ;;  %v5988_v47 = vld [vmem:[#allocation2 + $0xa0] sm:$0xff]   ;;  %v5710_v49 = vld [vmem:[%s7017_s2 + $0x18] sm:$0xff]   ;;  %v5998_v51 = vld [vmem:[#allocation2 + $0xa8] sm:$0xff]  }
  0x14   :  { %5167 = vmatpush3.bf16.msra.mxu0 %v5679_v9  ;;  %4976 = vmatprep.subr.bf16.mxu1 %v5680_v10  ;;  %v5704_v52 = vld [vmem:[#allocation2 + $0x1a8] sm:$0xff]   ;;  %v154_v57 = vld [vmem:[%s7015_s0 + $0x110] sm:$0xff]   ;;  %v158_v58 = vld [vmem:[%s7015_s0 + $0x118] sm:$0xff]  }
  0x15   :  { %5168 = vmatprep.subr.bf16.mxu0 %v5681_v14  ;;  %v122_v56 = vld [vmem:[%s7015_s0 + $0xc8] sm:$0xff]   ;;  %v5712_v59 = vld [vmem:[%s7017_s2 + $0x170] sm:$0xff]   ;;  %155 = vst [vmem:[#allocation2 + $0x100] sm:$0xff] %v154_v57   ;;  %159 = vst [vmem:[#allocation2 + $0x108] sm:$0xff] %v158_v58   ;;  %v3354_v57 = vshrl.u32 %v5988_v47, 16 }
  0x16   :  { %v6000_v53 = vld [vmem:[#allocation2 + $0xb0] sm:$0xff]   ;;  %123 = vst [vmem:[#allocation2 + $0xc0] sm:$0xff] %v122_v56   ;;  %v5718_v62 = vld [vmem:[%s7017_s2 + $0x20] sm:$0xff]   ;;  %v130_v1 = vld [vmem:[%s7015_s0 + $0xd8] sm:$0xff]  }
  0x17   :  { %4977 = vmatpush3.bf16.msra.mxu1 %v5680_v10  ;;  %v5708_v54 = vld [vmem:[#allocation2 + $0x1b0] sm:$0xff]   ;;  %v6022_v61 = vld [vmem:[#allocation2 + $0xb8] sm:$0xff]   ;;  %v162_v63 = vld [vmem:[%s7015_s0 + $0x120] sm:$0xff]   ;;  %131 = vst [vmem:[#allocation2 + $0xd0] sm:$0xff] %v130_v1   ;;  %v3363_v1 = vshrl.u32 %v5998_v51, 16 }
  0x18   :  { %5169 = vmatpush3.bf16.msra.mxu0 %v5681_v14  ;;  %4978 = vmatprep.subr.bf16.mxu1 %v5682_v16  ;;  %v126_v60 = vld [vmem:[%s7015_s0 + $0xd0] sm:$0xff]   ;;  %163 = vst [vmem:[#allocation2 + $0x110] sm:$0xff] %v162_v63   ;;  %v166_v2 = vld [vmem:[%s7015_s0 + $0x128] sm:$0xff]   ;;  %v134_v3 = vld [vmem:[%s7015_s0 + $0xe0] sm:$0xff]  }
  0x19   :  { %5170 = vmatprep.subr.bf16.mxu0 %v5683_v20  ;;  %127 = vst [vmem:[#allocation2 + $0xc8] sm:$0xff] %v126_v60   ;;  %v5711_v0 = vld [vmem:[#allocation2 + $0x1b8] sm:$0xff]   ;;  %167 = vst [vmem:[#allocation2 + $0x118] sm:$0xff] %v166_v2   ;;  %v5724_v4 = vld [vmem:[%s7017_s2 + $0x28] sm:$0xff]  }
  0x1a   :  { %135 = vst [vmem:[#allocation2 + $0xd8] sm:$0xff] %v134_v3   ;;  %v170_v5 = vld [vmem:[%s7015_s0 + $0x130] sm:$0xff]   ;;  %v5713_v6 = vld [vmem:[%s7017_s2 + $0x178] sm:$0xff]   ;;  %v138_v7 = vld [vmem:[%s7015_s0 + $0xe8] sm:$0xff]  }
  0x1b   :  { %4979 = vmatpush3.bf16.msra.mxu1 %v5682_v16  ;;  %171 = vst [vmem:[#allocation2 + $0x120] sm:$0xff] %v170_v5   ;;  %v174_v8 = vld [vmem:[%s7015_s0 + $0x138] sm:$0xff]   ;;  %v142_v9 = vld [vmem:[%s7015_s0 + $0xf0] sm:$0xff]   ;;  %139 = vst [vmem:[#allocation2 + $0xe0] sm:$0xff] %v138_v7   ;;  %v3339_v16 = vshll.u32 %v5946_v31, 16 }
  0x1c   :  { %5171 = vmatpush3.bf16.msra.mxu0 %v5683_v20  ;;  %4980 = vmatprep.subr.bf16.mxu1 %v5684_v22  ;;  %175 = vst [vmem:[#allocation2 + $0x128] sm:$0xff] %v174_v8   ;;  %143 = vst [vmem:[#allocation2 + $0xe8] sm:$0xff] %v142_v9   ;;  %v5720_v11 = vld [vmem:[%s7017_s2 + $0x180] sm:$0xff]   ;;  %v5716_v15 = vld [vmem:[#allocation2 + $0x108] sm:$0xff]   ;;  %v3329_v9 = vrot.slane %v3327_v24, 4 }
  0x1d   :  { %5172 = vmatprep.subr.bf16.mxu0 %v5685_v25  ;;  %v6058_v10 = vld [vmem:[#allocation2 + $0xc0] sm:$0xff]   ;;  %v2576_v20 = vshll.u32 %v5716_v15, 16  ;;  %v2580_v21 = vshrl.u32 %v5716_v15, 16  ;;  %v3341_v34 = vrot.slane %v3339_v16, 5  ;;  %v5726_v43 = vld [vmem:[%s7017_s2 + $0x188] sm:$0xff]   ;;  %v5732_v5 = vld [vmem:[%s7017_s2 + $0x190] sm:$0xff]  }
  0x1e   :  { %v5715_v14 = vld [vmem:[#allocation2 + $0x100] sm:$0xff]   ;;  %v182_v7 = vld [vmem:[%s7015_s0 + $0x148] sm:$0xff]   ;;  %v5736_v15 = vld [vmem:[%s7017_s2 + $0x38] sm:$0xff]  }
  0x1f   :  { %4981 = vmatpush3.bf16.msra.mxu1 %v5684_v22  ;;  %v2569_v18 = vshrl.u32 %v5715_v14, 16  ;;  %v2571_v19 = vshll.u32 %v5715_v14, 16  ;;  %v3322_v22 = vshll.u32 %v5929_v23, 16  ;;  %v178_v63 = vld [vmem:[%s7015_s0 + $0x140] sm:$0xff]   ;;  %183 = vst [vmem:[#allocation2 + $0x138] sm:$0xff] %v182_v7   ;;  %v186_v16 = vld [vmem:[%s7015_s0 + $0x150] sm:$0xff]  }
  0x20   :  { %5173 = vmatpush3.bf16.msra.mxu0 %v5685_v25  ;;  %5014 = vmatprep.subr.bf16.mxu1 %v5689_v26  ;;  %v6067_v17 = vld [vmem:[#allocation2 + $0xc8] sm:$0xff]   ;;  %v5719_v25 = vld [vmem:[#allocation2 + $0x110] sm:$0xff]   ;;  %v5722_v33 = vld [vmem:[#allocation2 + $0x118] sm:$0xff]   ;;  %179 = vst [vmem:[#allocation2 + $0x130] sm:$0xff] %v178_v63   ;;  %v3372_v7 = vshrl.u32 %v6000_v53, 16 }
  0x21   :  { %5206 = vmatprep.subr.bf16.mxu0 %v5691_v27  ;;  %v2588_v23 = vshrl.u32 %v5719_v25, 16  ;;  %v3324_v8 = vrot.slane %v3322_v22, 5  ;;  %187 = vst [vmem:[#allocation2 + $0x140] sm:$0xff] %v186_v16   ;;  %v26_v22 = vld [vmem:[%s7015_s0] sm:$0xff]  }
  0x22   :  { %4983 = vmatmul.mubr.bf16.vlgmr.msra.gmra.mrb[0].mxu1 %v5941_v28  ;;  %v5725_v42 = vld [vmem:[#allocation2 + $0x120] sm:$0xff]   ;;  %27 = vst [vmem:[#allocation2] sm:$0xff] %v26_v22  }
  0x23   :  { %5175 = vmatmul.mubr.bf16.vlgmr.msra.gmra.mrb[0].mxu0 %v5690_v29  ;;  %5015 = vmatpush3.bf16.msra.mxu1 %v5689_v26  ;;  %v6071_v26 = vld [vmem:[#allocation2 + $0xd0] sm:$0xff]   ;;  %v2578_v29 = vrot.slane %v2576_v20, 1  ;;  %v6088_v56 = vld [vmem:[#allocation2 + $0xe0] sm:$0xff]  }
  0x24   :  { %5207 = vmatpush3.bf16.msra.mxu0 %v5691_v27  ;;  %4986 = vmatprep.mubr.bf16.mxu1 %v5946_v31  ;;  %v2573_v27 = vrot.slane %v2571_v19, 1  ;;  %v3338_v31 = vrot.slane %v3336_v13, 4 }
  0x25   :  { %5208 = vmatprep.subr.bf16.mxu0 %v5692_v30  ;;  %5178 = vmatprep.mubr.bf16.mxu0 %v5694_v32  ;;  %v2584_v32 = vshll.u32 %v5719_v25, 16  ;;  %v3356_v25 = vrot.slane %v3354_v57, 4 }
  0x26   :  { %5016 = vmatprep.subr.bf16.mxu1 %v5696_v36  ;;  %v2574_v35 = vor.u32 %v2573_v27, %v2569_v18  ;;  %v3342_v14 = vor.u32 %v3341_v34, %v3338_v31  ;;  %v30_v31 = vld [vmem:[%s7015_s0 + $0x8] sm:$0xff]   ;;  %v194_v34 = vld [vmem:[%s7015_s0 + $0x160] sm:$0xff]  }
  0x27   :  { %5017 = vmatpush3.bf16.msra.mxu1 %v5696_v36  ;;  %v2582_v36 = vor.u32 %v2580_v21, %v2578_v29  ;;  %v2586_v37 = vrot.slane %v2584_v32, 1  ;;  %v5738_v21 = vld [vmem:[%s7017_s2 + $0x198] sm:$0xff]   ;;  %31 = vst [vmem:[#allocation2 + $0x8] sm:$0xff] %v30_v31   ;;  %195 = vst [vmem:[#allocation2 + $0x150] sm:$0xff] %v194_v34   ;;  %v210_v34 = vld [vmem:[%s7015_s0 + $0x180] sm:$0xff]  }
  0x28   :  { %5209 = vmatpush3.bf16.msra.mxu0 %v5692_v30  ;;  %5018 = vmatprep.subr.bf16.mxu1 %v5703_v40  ;;  %v3330_v30 = vshll.u32 %v5941_v28, 16  ;;  %v2579_v41 = vsel %vm1645_vm0, %v2574_v35, %v2578_v29  ;;  %v2596_v28 = vshrl.u32 %v5722_v33, 16  ;;  %211 = vst [vmem:[#allocation2 + $0x170] sm:$0xff] %v210_v34  }
  0x29   :  { %5210 = vmatprep.subr.bf16.mxu0 %v5698_v38 }
  0x2a   :  { %4987 = vmatmul.mubr.bf16.gmra.mrb[4].mxu1 %v5968_v39  ;;  %v3332_v13 = vrot.slane %v3330_v30, 5  ;;  %v190_v30 = vld [vmem:[%s7015_s0 + $0x158] sm:$0xff]  }
  0x2b   :  { %5179 = vmatmul.mubr.bf16.gmra.mrb[4].mxu0 %v5697_v44  ;;  %4990 = vmatprep.mubr.bf16.mxu1 %v5988_v47  ;;  %v2587_v44 = vsel %vm1645_vm0, %v2582_v36, %v2586_v37  ;;  %191 = vst [vmem:[#allocation2 + $0x148] sm:$0xff] %v190_v30   ;;  %v3384_v30 = vshll.u32 %v6022_v61, 16 }
  0x2c   :  { %5211 = vmatpush3.bf16.msra.mxu0 %v5698_v38  ;;  %5182 = vmatprep.mubr.bf16.mxu0 %v5701_v48  ;;  %v2592_v38 = vshll.u32 %v5722_v33, 16  ;;  %v6082_v48 = vld [vmem:[#allocation2 + $0xd8] sm:$0xff]   ;;  %v3333_v24 = vor.u32 %v3332_v13, %v3329_v9  ;;  %v6141_v33 = vld [vmem:[%s7017_s2 + $0x80] sm:$0xff]   ;;  %v34_v9 = vld [vmem:[%s7015_s0 + $0x10] sm:$0xff]  }
  0x2d   :  { %5212 = vmatprep.subr.bf16.mxu0 %v5699_v45  ;;  %5019 = vmatpush3.bf16.msra.mxu1 %v5703_v40  ;;  %v3345_v40 = vshrl.u32 %v5968_v39, 16  ;;  %35 = vst [vmem:[#allocation2 + $0x10] sm:$0xff] %v34_v9  }
  0x2e   :  { %5020 = vmatprep.subr.bf16.mxu1 %v5710_v49  ;;  %v2594_v46 = vrot.slane %v2592_v38, 1  ;;  %v6150_v36 = vsel %vm2974_vm1, %v3333_v24, %v3342_v14  ;;  %v5731_v38 = vld [vmem:[#allocation2 + $0x130] sm:$0xff]  }
  0x2f   :  { %v3347_v19 = vrot.slane %v3345_v40, 4 }
  0x30   :  { %5213 = vmatpush3.bf16.msra.mxu0 %v5699_v45  ;;  %v2590_v45 = vor.u32 %v2588_v23, %v2586_v37  ;;  %v3365_v37 = vrot.slane %v3363_v1, 4 }
  0x31   :  { %5214 = vmatprep.subr.bf16.mxu0 %v5705_v50  ;;  %5021 = vmatpush3.bf16.msra.mxu1 %v5710_v49  ;;  %v2600_v49 = vshll.u32 %v5725_v42, 16 }
  0x32   :  { %4991 = vmatmul.mubr.bf16.gmra.mrb[8].mxu1 %v5998_v51  ;;  %5022 = vmatprep.subr.bf16.mxu1 %v5718_v62  ;;  %v5740_v1 = vld [vmem:[#allocation2 + $0x148] sm:$0xff]  }
  0x33   :  { %5183 = vmatmul.mubr.bf16.gmra.mrb[8].mxu0 %v5704_v52  ;;  %4994 = vmatprep.mubr.bf16.mxu1 %v6000_v53  ;;  %v3348_v52 = vshll.u32 %v5968_v39, 16  ;;  %v2602_v58 = vrot.slane %v2600_v49, 1  ;;  %v5730_v39 = vld [vmem:[%s7017_s2 + $0x30] sm:$0xff]   ;;  %v5734_v49 = vld [vmem:[#allocation2 + $0x138] sm:$0xff]   ;;  %v2644_v16 = vshrl.u32 %v5740_v1, 16 }
  0x34   :  { %5215 = vmatpush3.bf16.msra.mxu0 %v5705_v50  ;;  %5186 = vmatprep.mubr.bf16.mxu0 %v5708_v54  ;;  %v6084_v50 = vld [vmem:[#allocation2 + $0x128] sm:$0xff]   ;;  %v2595_v54 = vsel %vm1645_vm0, %v2590_v45, %v2594_v46  ;;  %v2624_v57 = vshll.u32 %v5734_v49, 16 }
  0x35   :  { %5216 = vmatprep.subr.bf16.mxu0 %v5706_v55  ;;  %5023 = vmatpush3.bf16.msra.mxu1 %v5718_v62  ;;  %v2608_v60 = vshll.u32 %v6084_v50, 16  ;;  %v3357_v62 = vshll.u32 %v5988_v47, 16  ;;  %v3350_v20 = vrot.slane %v3348_v52, 5  ;;  %v2612_v29 = vshrl.u32 %v6084_v50, 16 }
  0x36   :  { %5024 = vmatprep.subr.bf16.mxu1 %v5724_v4  ;;  %v2620_v50 = vshrl.u32 %v5731_v38, 16 }
  0x37   :  { %v2610_v3 = vrot.slane %v2608_v60, 1  ;;  %v3359_v27 = vrot.slane %v3357_v62, 5  ;;  %v3351_v32 = vor.u32 %v3350_v20, %v3347_v19  ;;  %v2626_v62 = vrot.slane %v2624_v57, 1  ;;  %v5748_v19 = vld [vmem:[%s7017_s2 + $0x88] sm:$0xff]   ;;  %v202_v20 = vld [vmem:[%s7015_s0 + $0x170] sm:$0xff]  }
  0x38   :  { %5217 = vmatpush3.bf16.msra.mxu0 %v5706_v55  ;;  %v2598_v55 = vor.u32 %v2596_v28, %v2594_v46  ;;  %203 = vst [vmem:[#allocation2 + $0x160] sm:$0xff] %v202_v20  }
  0x39   :  { %5218 = vmatprep.subr.bf16.mxu0 %v5712_v59  ;;  %5025 = vmatpush3.bf16.msra.mxu1 %v5724_v4  ;;  %v3366_v4 = vshll.u32 %v5998_v51, 16  ;;  %v3360_v23 = vor.u32 %v3359_v27, %v3356_v25  ;;  %v6153_v40 = vsel %vm2974_vm1, %v3342_v14, %v3351_v32  ;;  %v42_v25 = vld [vmem:[%s7015_s0 + $0x20] sm:$0xff]   ;;  %v3381_v27 = vshrl.u32 %v6022_v61, 16 }
  0x3a   :  { %4995 = vmatmul.mubr.bf16.gmra.mrb[12].mxu1 %v6022_v61  ;;  %v2603_v47 = vsel %vm1645_vm0, %v2598_v55, %v2602_v58  ;;  %5026 = vmatprep.subr.bf16.mxu1 %v5730_v39  ;;  %43 = vst [vmem:[#allocation2 + $0x20] sm:$0xff] %v42_v25   ;;  %v5756_v61 = vld [vmem:[%s7017_s2 + $0x1b0] sm:$0xff]  }
  0x3b   :  { %5187 = vmatmul.mubr.bf16.gmra.mrb[12].mxu0 %v5711_v0  ;;  %4998 = vmatprep.mubr.bf16.mxu1 %v6058_v10  ;;  %v3321_v0 = vrot.slane %v3319_v12, 4  ;;  %v150_v12 = vld [vmem:[%s7015_s0 + $0x100] sm:$0xff]   ;;  %v6161_v28 = vsel %vm2974_vm1, %v3351_v32, %v3360_v23 }
  0x3c   :  { %5219 = vmatpush3.bf16.msra.mxu0 %v5712_v59  ;;  %5222 = vmatprep.mubr.bf16.mxu0 %v2579_v41  ;;  %v2604_v59 = vshrl.u32 %v5725_v42, 16  ;;  %151 = vst [vmem:[#allocation2 + $0xf8] sm:$0xff] %v150_v12   ;;  %v3368_v41 = vrot.slane %v3366_v4, 5  ;;  %v5744_v42 = vld [vmem:[%s7017_s2 + $0x1a0] sm:$0xff]   ;;  %v38_v12 = vld [vmem:[%s7015_s0 + $0x18] sm:$0xff]  }
  0x3d   :  { %5220 = vmatprep.subr.bf16.mxu0 %v5713_v6  ;;  %5027 = vmatpush3.bf16.msra.mxu1 %v5730_v39  ;;  %v3325_v18 = vor.u32 %v3324_v8, %v3321_v0  ;;  %v2628_v39 = vshrl.u32 %v5734_v49, 16  ;;  %v6175_v0 = vld [vmem:[#allocation2] sm:$0xff]   ;;  %39 = vst [vmem:[#allocation2 + $0x18] sm:$0xff] %v38_v12   ;;  %v6235_v49 = vld [vmem:[#allocation2 + $0x10] sm:$0xff]  }
  0x3e   :  { %v2606_v2 = vor.u32 %v2604_v59, %v2602_v58  ;;  %5028 = vmatprep.subr.bf16.mxu1 %v5736_v15  ;;  %v6165_v46 = vor.u32 %v3368_v41, %v3365_v37  ;;  %v5737_v58 = vld [vmem:[#allocation2 + $0x140] sm:$0xff]   ;;  %v5754_v37 = vld [vmem:[%s7017_s2 + $0x90] sm:$0xff]  }
  0x3f   :  { %v6147_v35 = vsel %vm2974_vm1, %v3325_v18, %v3333_v24  ;;  %v2632_v63 = vshll.u32 %v5737_v58, 16  ;;  %v2630_v4 = vor.u32 %v2628_v39, %v2626_v62  ;;  %v5750_v24 = vld [vmem:[%s7017_s2 + $0x1a8] sm:$0xff]   ;;  %v50_v41 = vld [vmem:[%s7015_s0 + $0x30] sm:$0xff]   ;;  %v5749_v39 = vld [vmem:[#allocation2 + $0x160] sm:$0xff]  }
  0x40   :  { %5221 = vmatpush3.bf16.msra.mxu0 %v5713_v6  ;;  %v146_v6 = vld [vmem:[%s7015_s0 + $0xf8] sm:$0xff]   ;;  %v2611_v51 = vsel %vm1645_vm0, %v2606_v2, %v2610_v3  ;;  %v6172_v55 = vsel %vm2974_vm1, %v3360_v23, %v6165_v46  ;;  %v2636_v2 = vshrl.u32 %v5737_v58, 16  ;;  %v3374_v23 = vrot.slane %v3372_v7, 4  ;;  %51 = vst [vmem:[#allocation2 + $0x30] sm:$0xff] %v50_v41   ;;  %v58_v41 = vld [vmem:[%s7015_s0 + $0x40] sm:$0xff]  }
  0x41   :  { %5254 = vmatprep.subr.bf16.mxu0 %v5720_v11  ;;  %147 = vst [vmem:[#allocation2 + $0xf0] sm:$0xff] %v146_v6   ;;  %5029 = vmatpush3.bf16.msra.mxu1 %v5736_v15  ;;  %v5743_v6 = vld [vmem:[#allocation2 + $0x150] sm:$0xff]   ;;  %v6191_v15 = vld [vmem:[#allocation2 + $0x8] sm:$0xff]   ;;  %v3386_v58 = vrot.slane %v3384_v30, 5  ;;  %v2668_v7 = vshrl.u32 %v5749_v39, 16  ;;  %59 = vst [vmem:[#allocation2 + $0x40] sm:$0xff] %v58_v41  }
  0x42   :  { %4999 = vmatmul.mubr.bf16.gmra.mrb[16].mxu1 %v6067_v17  ;;  %5062 = vmatprep.subr.bf16.mxu1 %v6141_v33  ;;  %v2648_v18 = vshll.u32 %v5743_v6, 16 }
  0x43   :  { %5002 = vmatprep.mubr.bf16.mxu1 %v6071_v26  ;;  %5223 = vmatmul.mubr.bf16.vlgmr.msra.gmra.mrb[0].mxu0 %v2587_v44  ;;  %v2616_v44 = vshll.u32 %v5731_v38, 16  ;;  %v2652_v38 = vshrl.u32 %v5743_v6, 16 }
  0x44   :  { %5255 = vmatpush3.bf16.msra.mxu0 %v5720_v11  ;;  %5226 = vmatprep.mubr.bf16.mxu0 %v2595_v54  ;;  %v6114_v11 = vld [vmem:[#allocation2 + $0xe8] sm:$0xff]   ;;  %v6168_v54 = vld [vmem:[#allocation2 + $0xf8] sm:$0xff]   ;;  %v2650_v32 = vrot.slane %v2648_v18, 1 }
  0x45   :  { %5256 = vmatprep.subr.bf16.mxu0 %v5726_v43  ;;  %v2618_v52 = vrot.slane %v2616_v44, 1 }
  0x47   :  { %v2622_v60 = vor.u32 %v2620_v50, %v2618_v52  ;;  %v6260_v25 = vld [vmem:[#allocation2 + $0x30] sm:$0xff]  }
  0x48   :  { %5257 = vmatpush3.bf16.msra.mxu0 %v5726_v43  ;;  %v2614_v43 = vor.u32 %v2612_v29, %v2610_v3  ;;  %v6163_v45 = vld [vmem:[#allocation2 + $0xf0] sm:$0xff]   ;;  %v206_v29 = vld [vmem:[%s7015_s0 + $0x178] sm:$0xff]  }
  0x49   :  { %5258 = vmatprep.subr.bf16.mxu0 %v5732_v5  ;;  %v2627_v3 = vsel %vm1645_vm0, %v2622_v60, %v2626_v62  ;;  %207 = vst [vmem:[#allocation2 + $0x168] sm:$0xff] %v206_v29   ;;  %v2654_v60 = vor.u32 %v2652_v38, %v2650_v32 }
  0x4a   :  { %5003 = vmatmul.mubr.bf16.gmra.mrb[20].mxu1 %v6082_v48  ;;  %v2619_v59 = vsel %vm1645_vm0, %v2614_v43, %v2618_v52  ;;  %v54_v43 = vld [vmem:[%s7015_s0 + $0x38] sm:$0xff]  }
  0x4b   :  { %5006 = vmatprep.mubr.bf16.mxu1 %v6088_v56  ;;  %5227 = vmatmul.mubr.bf16.gmra.mrb[4].mxu0 %v2603_v47  ;;  %v2634_v47 = vrot.slane %v2632_v63, 1  ;;  %55 = vst [vmem:[#allocation2 + $0x38] sm:$0xff] %v54_v43   ;;  %v62_v43 = vld [vmem:[%s7015_s0 + $0x48] sm:$0xff]  }
  0x4c   :  { %5230 = vmatprep.mubr.bf16.mxu0 %v2611_v51  ;;  %5259 = vmatpush3.bf16.msra.mxu0 %v5732_v5  ;;  %v2640_v5 = vshll.u32 %v5740_v1, 16  ;;  %v198_v51 = vld [vmem:[%s7015_s0 + $0x168] sm:$0xff]   ;;  %63 = vst [vmem:[#allocation2 + $0x48] sm:$0xff] %v62_v43  }
  0x4d   :  { %5260 = vmatprep.subr.bf16.mxu0 %v5738_v21  ;;  %v2638_v8 = vor.u32 %v2636_v2, %v2634_v47  ;;  %v2635_v13 = vsel %vm1645_vm0, %v2630_v4, %v2634_v47  ;;  %199 = vst [vmem:[#allocation2 + $0x158] sm:$0xff] %v198_v51   ;;  %v2664_v47 = vshll.u32 %v5749_v39, 16  ;;  %v1647_v51 = vshrl.u32 %v6175_v0, 16 }
  0x4e   :  { %v2642_v14 = vrot.slane %v2640_v5, 1 }
  0x4f   :  { %v2666_v9 = vrot.slane %v2664_v47, 1 }
  0x50   :  { %5261 = vmatpush3.bf16.msra.mxu0 %v5738_v21  ;;  %v3375_v21 = vshll.u32 %v6000_v53, 16  ;;  %v2643_v22 = vsel %vm1645_vm0, %v2638_v8, %v2642_v14  ;;  %v46_v53 = vld [vmem:[%s7015_s0 + $0x28] sm:$0xff]   ;;  %v2646_v31 = vor.u32 %v2644_v16, %v2642_v14  ;;  %v5755_v14 = vld [vmem:[#allocation2 + $0x170] sm:$0xff]  }
  0x51   :  { %5262 = vmatprep.subr.bf16.mxu0 %v5744_v42  ;;  %47 = vst [vmem:[#allocation2 + $0x28] sm:$0xff] %v46_v53   ;;  %v5752_v6 = vld [vmem:[#allocation2 + $0x168] sm:$0xff]  }
  0x52   :  { %5007 = vmatmul.mubr.bf16.gmra.mrb[24].mxu1 %v6114_v11  ;;  %v3377_v44 = vrot.slane %v3375_v21, 5  ;;  %v2651_v50 = vsel %vm1645_vm0, %v2646_v31, %v2650_v32  ;;  %v2672_v12 = vshll.u32 %v5752_v6, 16  ;;  %v2676_v16 = vshrl.u32 %v5752_v6, 16  ;;  %v5760_v31 = vld [vmem:[%s7017_s2 + $0x98] sm:$0xff]   ;;  %v4318_v32 = vld [vmem:[%s7016_s1 + $0x190] sm:$0xff]   ;;  %v5769_v6 = vld [vmem:[%s7017_s2 + $0xa8] sm:$0xff]  }
  0x53   :  { %5010 = vmatprep.mubr.bf16.mxu1 %v6163_v45  ;;  %5231 = vmatmul.mubr.bf16.gmra.mrb[8].mxu0 %v2619_v59  ;;  %v6239_v59 = vld [vmem:[#allocation2 + $0x18] sm:$0xff]   ;;  %v2680_v21 = vshll.u32 %v5755_v14, 16  ;;  %589 = vst [vmem:[#allocation3 + $0x10] sm:$0xff] %v4318_v32  }
  0x54   :  { %5263 = vmatpush3.bf16.msra.mxu0 %v5744_v42  ;;  %5234 = vmatprep.mubr.bf16.mxu0 %v2627_v3  ;;  %v214_v42 = vld [vmem:[%s7015_s0 + $0x188] sm:$0xff]   ;;  %v5746_v52 = vld [vmem:[#allocation2 + $0x158] sm:$0xff]   ;;  %v3378_v57 = vor.u32 %v3377_v44, %v3374_v23  ;;  %v6247_v3 = vld [vmem:[#allocation2 + $0x20] sm:$0xff]   ;;  %v2674_v20 = vrot.slane %v2672_v12, 1  ;;  %v1670_v12 = vshll.u32 %v6239_v59, 16 }
  0x55   :  { %5264 = vmatprep.subr.bf16.mxu0 %v5750_v24  ;;  %215 = vst [vmem:[#allocation2 + $0x178] sm:$0xff] %v214_v42   ;;  %v2656_v62 = vshll.u32 %v5746_v52, 16  ;;  %v2660_v2 = vshrl.u32 %v5746_v52, 16  ;;  %v2682_v53 = vrot.slane %v2680_v21, 1  ;;  %v5762_v23 = vld [vmem:[%s7017_s2 + $0x1b8] sm:$0xff]   ;;  %v1658_v42 = vshrl.u32 %v6191_v15, 16 }
  0x56   :  { %v6243_v63 = vsel %vm2974_vm1, %v6165_v46, %v3378_v57  ;;  %v2678_v34 = vor.u32 %v2676_v16, %v2674_v20  ;;  %v5765_v44 = vld [vmem:[%s7017_s2 + $0xa0] sm:$0xff]   ;;  %v78_v16 = vld [vmem:[%s7015_s0 + $0x68] sm:$0xff]   ;;  %v1678_v43 = vshll.u32 %v6247_v3, 16 }
  0x57   :  { %v2658_v4 = vrot.slane %v2656_v62, 1  ;;  %v6293_v52 = vld [vmem:[%s7017_s2 + $0x1c0] sm:$0xff]   ;;  %v70_v62 = vld [vmem:[%s7015_s0 + $0x58] sm:$0xff]   ;;  %v2978_v47 = vrot.slane %v1658_v42, 4  ;;  %79 = vst [vmem:[#allocation2 + $0x68] sm:$0xff] %v78_v16  }
  0x58   :  { %5265 = vmatpush3.bf16.msra.mxu0 %v5750_v24  ;;  %v2684_v24 = vshrl.u32 %v5755_v14, 16  ;;  %71 = vst [vmem:[#allocation2 + $0x58] sm:$0xff] %v70_v62   ;;  %v1674_v14 = vshrl.u32 %v6239_v59, 16  ;;  %v6327_v21 = vld [vmem:[#allocation2 + $0x40] sm:$0xff]  }
  0x59   :  { %5266 = vmatprep.subr.bf16.mxu0 %v5756_v61  ;;  %v2659_v46 = vsel %vm1645_vm0, %v2654_v60, %v2658_v4  ;;  %v2662_v8 = vor.u32 %v2660_v2, %v2658_v4  ;;  %v6305_v2 = vld [vmem:[#allocation2 + $0x38] sm:$0xff]  }
  0x5a   :  { %5011 = vmatmul.mubr.bf16.gmra.mrb[28].mxu1 %v6168_v54 }
  0x5b   :  { %5030 = vmatprep.mubr.bf16.mxu1 %v6175_v0  ;;  %5235 = vmatmul.mubr.bf16.gmra.mrb[12].mxu0 %v2635_v13  ;;  %v6257_v13 = vld [vmem:[#allocation2 + $0x28] sm:$0xff]   ;;  %v2667_v18 = vsel %vm1645_vm0, %v2662_v8, %v2666_v9  ;;  %v5761_v8 = vld [vmem:[#allocation3 + $0x10] sm:$0xff]  }
  0x5c   :  { %5238 = vmatprep.mubr.bf16.mxu0 %v2643_v22  ;;  %5267 = vmatpush3.bf16.msra.mxu0 %v5756_v61  ;;  %v5758_v22 = vld [vmem:[#allocation2 + $0x178] sm:$0xff]   ;;  %v2686_v61 = vor.u32 %v2684_v24, %v2682_v53  ;;  %v1686_v62 = vshll.u32 %v6257_v13, 16 }
  0x5d   :  { %v2688_v30 = vshll.u32 %v5758_v22, 16  ;;  %5268 = vmatprep.subr.bf16.mxu0 %v5762_v23  ;;  %v2692_v4 = vshrl.u32 %v5758_v22, 16 }
  0x5f   :  { %v2690_v38 = vrot.slane %v2688_v30, 1 }
  0x60   :  { %5269 = vmatpush3.bf16.msra.mxu0 %v5762_v23  ;;  %v6338_v23 = vld [vmem:[#allocation2 + $0x48] sm:$0xff]  }
  0x61   :  { %v2691_v39 = vsel %vm1645_vm0, %v2686_v61, %v2690_v38  ;;  %5302 = vmatprep.subr.bf16.mxu0 %v6293_v52  ;;  %v2987_v61 = vrot.slane %v1670_v12, 5 }
  0x62   :  { %5031 = vmatmul.mubr.bf16.vlgmr.msra.gmra.mrb[0].mxu1 %v6191_v15 }
  0x63   :  { %5063 = vmatpush3.bf16.msra.mxu1 %v6141_v33  ;;  %v3383_v33 = vrot.slane %v3381_v27, 4  ;;  %5034 = vmatprep.mubr.bf16.mxu1 %v6235_v49  ;;  %v1649_v27 = vshll.u32 %v6175_v0, 16 }
  0x64   :  { %5064 = vmatprep.subr.bf16.mxu1 %v5748_v19  ;;  %5239 = vmatmul.mubr.bf16.gmra.mrb[16].mxu0 %v2651_v50 }
  0x65   :  { %v6245_v1 = vor.u32 %v3386_v58, %v3383_v33  ;;  %5242 = vmatprep.mubr.bf16.mxu0 %v2659_v46  ;;  %v2975_v33 = vrot.slane %v1647_v51, 4  ;;  %v2976_v50 = vrot.slane %v1649_v27, 5  ;;  %v2683_v58 = vsel %vm1645_vm0, %v2678_v34, %v2682_v53  ;;  %v74_v46 = vld [vmem:[%s7015_s0 + $0x60] sm:$0xff]  }
  0x66   :  { %75 = vst [vmem:[#allocation2 + $0x60] sm:$0xff] %v74_v46  }
  0x67   :  { %5065 = vmatpush3.bf16.msra.mxu1 %v5748_v19  ;;  %v6251_v5 = vsel %vm2974_vm1, %v3378_v57, %v6245_v1  ;;  %v2670_v19 = vor.u32 %v2668_v7, %v2666_v9  ;;  %v66_v57 = vld [vmem:[%s7015_s0 + $0x50] sm:$0xff]   ;;  %v1662_v7 = vshll.u32 %v6235_v49, 16  ;;  %v1666_v9 = vshrl.u32 %v6235_v49, 16 }
  0x68   :  { %5066 = vmatprep.subr.bf16.mxu1 %v5754_v37  ;;  %7039 = vst [vmem:[#allocation4_spill] sm:$0xff] %v6251_v5  ;;  %67 = vst [vmem:[#allocation2 + $0x50] sm:$0xff] %v66_v57   ;;  %v2977_v22 = vor.u32 %v2976_v50, %v2975_v33  ;;  %v82_v33 = vld [vmem:[%s7015_s0 + $0x70] sm:$0xff]   ;;  %v1651_v50 = vrot.slane %v1649_v27, 1  ;;  %v5780_v27 = vld [vmem:[%s7017_s2 + $0x1e0] sm:$0xff]  }
  0x69   :  { %v2675_v29 = vsel %vm1645_vm0, %v2670_v19, %v2674_v20  ;;  %v2694_v19 = vor.u32 %v2692_v4, %v2690_v38  ;;  %v2696_v20 = vshll.u32 %v5761_v8, 16  ;;  %v2982_v53 = vrot.slane %v1666_v9, 4  ;;  %83 = vst [vmem:[#allocation2 + $0x70] sm:$0xff] %v82_v33   ;;  %v86_v4 = vld [vmem:[%s7015_s0 + $0x78] sm:$0xff]  }
  0x6a   :  { %5035 = vmatmul.mubr.bf16.gmra.mrb[4].mxu1 %v6239_v59  ;;  %v2983_v30 = vrot.slane %v1662_v7, 5  ;;  %87 = vst [vmem:[#allocation2 + $0x78] sm:$0xff] %v86_v4   ;;  %v7021_v4 = vshrl.u32 %v6305_v2, 16  ;;  %v7023_v8 = vshll.u32 %v6305_v2, 16 }
  0x6b   :  { %5038 = vmatprep.mubr.bf16.mxu1 %v6247_v3  ;;  %5067 = vmatpush3.bf16.msra.mxu1 %v5754_v37  ;;  %v1654_v37 = vshll.u32 %v6191_v15, 16 }
  0x6c   :  { %5243 = vmatmul.mubr.bf16.gmra.mrb[20].mxu0 %v2667_v18  ;;  %5068 = vmatprep.subr.bf16.mxu1 %v5760_v31  ;;  %v5773_v18 = vld [vmem:[%s7017_s2 + $0xb0] sm:$0xff]  }
  0x6d   :  { %5246 = vmatprep.mubr.bf16.mxu0 %v2675_v29  ;;  %v2979_v60 = vrot.slane %v1654_v37, 5  ;;  %v2698_v29 = vrot.slane %v2696_v20, 1  ;;  %v6408_v20 = vld [vmem:[#allocation2 + $0x68] sm:$0xff]  }
  0x6f   :  { %5069 = vmatpush3.bf16.msra.mxu1 %v5760_v31  ;;  %v2980_v24 = vor.u32 %v2979_v60, %v2978_v47  ;;  %v2986_v31 = vrot.slane %v1674_v14, 4  ;;  %v2699_v32 = vsel %vm1645_vm0, %v2694_v19, %v2698_v29  ;;  %v6342_v38 = vld [vmem:[#allocation2 + $0x50] sm:$0xff]   ;;  %v5777_v47 = vld [vmem:[%s7017_s2 + $0xb8] sm:$0xff]   ;;  %v6372_v19 = vld [vmem:[%s7017_s2 + $0xc0] sm:$0xff]  }
  0x70   :  { %5070 = vmatprep.subr.bf16.mxu1 %v5765_v44 }
  0x71   :  { %v2981_v34 = vsel %vm2974_vm1, %v2977_v22, %v2980_v24  ;;  %v2988_v60 = vor.u32 %v2987_v61, %v2986_v31  ;;  %v5770_v31 = vld [vmem:[%s7017_s2 + $0x1c8] sm:$0xff]   ;;  %v6388_v61 = vld [vmem:[#allocation2 + $0x60] sm:$0xff]   ;;  %v7028_v22 = vshrl.u32 %v6327_v21, 16  ;;  %v6464_v41 = vld [vmem:[#allocation2 + $0x78] sm:$0xff]  }
  0x72   :  { %5039 = vmatmul.mubr.bf16.gmra.mrb[8].mxu1 %v6257_v13 }
  0x73   :  { %5042 = vmatprep.mubr.bf16.mxu1 %v6260_v25  ;;  %5071 = vmatpush3.bf16.msra.mxu1 %v5765_v44  ;;  %v7025_v44 = vshrl.u32 %v6247_v3, 16 }
  0x74   :  { %5247 = vmatmul.mubr.bf16.gmra.mrb[24].mxu0 %v2683_v58  ;;  %5072 = vmatprep.subr.bf16.mxu1 %v5769_v6  ;;  %v2984_v58 = vor.u32 %v2983_v30, %v2982_v53  ;;  %v6378_v30 = vld [vmem:[#allocation2 + $0x58] sm:$0xff]  }
  0x75   :  { %5250 = vmatprep.mubr.bf16.mxu0 %v2691_v39  ;;  %v7022_v39 = vshrl.u32 %v6257_v13, 16  ;;  %v2990_v16 = vrot.slane %v7025_v44, 4 }
  0x76   :  { %v2985_v29 = vsel %vm2974_vm1, %v2980_v24, %v2984_v58  ;;  %v2989_v53 = vsel %vm2974_vm1, %v2984_v58, %v2988_v60  ;;  %v7024_v24 = vshll.u32 %v6260_v25, 16  ;;  %v7020_v58 = vshrl.u32 %v6260_v25, 16 }
  0x77   :  { %5073 = vmatpush3.bf16.msra.mxu1 %v5769_v6 }
  0x78   :  { %5074 = vmatprep.subr.bf16.mxu1 %v5773_v18  ;;  %v2998_v46 = vrot.slane %v7020_v58, 4  ;;  %v5778_v58 = vld [vmem:[%s7017_s2 + $0x1d8] sm:$0xff]  }
  0x7a   :  { %5043 = vmatmul.mubr.bf16.gmra.mrb[12].mxu1 %v6305_v2 }
  0x7b   :  { %5046 = vmatprep.mubr.bf16.mxu1 %v6327_v21  ;;  %5075 = vmatpush3.bf16.msra.mxu1 %v5773_v18  ;;  %v2991_v18 = vrot.slane %v1678_v43, 5 }
  0x7c   :  { %5251 = vmatmul.mubr.bf16.gmra.mrb[28].mxu0 %v2699_v32  ;;  %5076 = vmatprep.subr.bf16.mxu1 %v5777_v47  ;;  %v2994_v32 = vrot.slane %v7022_v39, 4  ;;  %v6425_v39 = vld [vmem:[#allocation2 + $0x70] sm:$0xff]  }
  0x7d   :  { %5270 = vmatprep.mubr.bf16.mxu0 %v2981_v34  ;;  %v2995_v34 = vrot.slane %v1686_v62, 5  ;;  %v2992_v33 = vor.u32 %v2991_v18, %v2990_v16  ;;  %v5774_v18 = vld [vmem:[%s7017_s2 + $0x1d0] sm:$0xff]  }
  0x7f   :  { %5077 = vmatpush3.bf16.msra.mxu1 %v5777_v47  ;;  %v2996_v16 = vor.u32 %v2995_v34, %v2994_v32  ;;  %v3002_v32 = vrot.slane %v7021_v4, 4  ;;  %v7029_v34 = vshll.u32 %v6327_v21, 16  ;;  %v7027_v47 = vshll.u32 %v6338_v23, 16 }
  0x80   :  { %5110 = vmatprep.subr.bf16.mxu1 %v6372_v19  ;;  %v7031_v4 = vshll.u32 %v6342_v38, 16 }
  0x81   :  { %v2997_v6 = vsel %vm2974_vm1, %v2992_v33, %v2996_v16  ;;  %v3007_v57 = vrot.slane %v7029_v34, 5 }
  0x82   :  { %5047 = vmatmul.mubr.bf16.gmra.mrb[16].mxu1 %v6338_v23 }
  0x83   :  { %5050 = vmatprep.mubr.bf16.mxu1 %v6342_v38 }
  0x84   :  { %5271 = vmatmul.mubr.bf16.vlgmr.msra.gmra.mrb[0].mxu0 %v2985_v29  ;;  %v3003_v29 = vrot.slane %v7023_v8, 5 }
  0x85   :  { %5303 = vmatpush3.bf16.msra.mxu0 %v6293_v52  ;;  %5274 = vmatprep.mubr.bf16.mxu0 %v2989_v53  ;;  %v2999_v52 = vrot.slane %v7024_v24, 5  ;;  %v2993_v53 = vsel %vm2974_vm1, %v2988_v60, %v2992_v33  ;;  %v7026_v60 = vshrl.u32 %v6338_v23, 16  ;;  %v1656_v33 = vrot.slane %v1654_v37, 1  ;;  %v4314_v24 = vld [vmem:[%s7016_s1 + $0x80] sm:$0xff]  }
  0x86   :  { %5304 = vmatprep.subr.bf16.mxu0 %v5770_v31  ;;  %v3004_v44 = vor.u32 %v3003_v29, %v3002_v32  ;;  %581 = vst [vmem:[#allocation3] sm:$0xff] %v4314_v24   ;;  %v7037_v37 = vshll.u32 %v6378_v30, 16  ;;  %v3015_v32 = vrot.slane %v7031_v4, 5  ;;  %v1672_v24 = vrot.slane %v1670_v12, 1  ;;  %v5782_v12 = vld [vmem:[%s7017_s2 + $0x1e8] sm:$0xff]  }
  0x87   :  { %v3000_v8 = vor.u32 %v2999_v52, %v2998_v46  ;;  %v3010_v46 = vrot.slane %v7026_v60, 4  ;;  %v3011_v52 = vrot.slane %v7027_v47, 5  ;;  %v1652_v47 = vor.u32 %v1651_v50, %v1647_v51 }
  0x88   :  { %v1660_v4 = vor.u32 %v1658_v42, %v1656_v33  ;;  %v3019_v50 = vrot.slane %v7037_v37, 5  ;;  %v1676_v15 = vor.u32 %v1674_v14, %v1672_v24  ;;  %v1680_v42 = vrot.slane %v1678_v43, 1 }
  0x89   :  { %5305 = vmatpush3.bf16.msra.mxu0 %v5770_v31  ;;  %v7030_v31 = vshrl.u32 %v6342_v38, 16  ;;  %v3001_v34 = vsel %vm2974_vm1, %v2996_v16, %v3000_v8  ;;  %v3012_v0 = vor.u32 %v3011_v52, %v3010_v46  ;;  %v7032_v16 = vshrl.u32 %v6408_v20, 16  ;;  %v5784_v52 = vld [vmem:[%s7017_s2 + $0x1f0] sm:$0xff]  }
  0x8a   :  { %5051 = vmatmul.mubr.bf16.gmra.mrb[20].mxu1 %v6378_v30  ;;  %5306 = vmatprep.subr.bf16.mxu0 %v5774_v18  ;;  %v7033_v14 = vshll.u32 %v6408_v20, 16 }
  0x8b   :  { %5054 = vmatprep.mubr.bf16.mxu1 %v6388_v61  ;;  %v3014_v29 = vrot.slane %v7030_v31, 4 }
  0x8c   :  { %5275 = vmatmul.mubr.bf16.gmra.mrb[4].mxu0 %v2993_v53  ;;  %v3006_v53 = vrot.slane %v7028_v22, 4  ;;  %v1664_v22 = vrot.slane %v1662_v7, 1 }
  0x8d   :  { %5278 = vmatprep.mubr.bf16.mxu0 %v2997_v6  ;;  %5307 = vmatpush3.bf16.msra.mxu0 %v5774_v18  ;;  %v7035_v6 = vshrl.u32 %v6378_v30, 16  ;;  %v3005_v18 = vsel %vm2974_vm1, %v3000_v8, %v3004_v44  ;;  %v7036_v8 = vshll.u32 %v6388_v61, 16 }
  0x8e   :  { %5308 = vmatprep.subr.bf16.mxu0 %v5778_v58  ;;  %v3008_v31 = vor.u32 %v3007_v57, %v3006_v53  ;;  %v1668_v51 = vor.u32 %v1666_v9, %v1664_v22  ;;  %v3016_v57 = vor.u32 %v3015_v32, %v3014_v29  ;;  %v7034_v9 = vshrl.u32 %v6388_v61, 16 }
  0x8f   :  { %v3018_v7 = vrot.slane %v7035_v6, 4  ;;  %v1665_v46 = vsel %vm1645_vm0, %v1660_v4, %v1664_v22  ;;  %v7041_v29 = vshrl.u32 %v6247_v3, 16  ;;  %v7050_v53 = vshll.u32 %v6082_v48, 16 }
  0x90   :  { %v3009_v43 = vsel %vm2974_vm1, %v3004_v44, %v3008_v31  ;;  %v6498_v22 = vsel %vm2974_vm1, %v3012_v0, %v3016_v57  ;;  %v6503_v44 = vsel %vm1645_vm0, %v1676_v15, %v1680_v42 }
  0x91   :  { %5309 = vmatpush3.bf16.msra.mxu0 %v5778_v58  ;;  %v1657_v58 = vsel %vm1645_vm0, %v1652_v47, %v1656_v33  ;;  %v1673_v47 = vsel %vm1645_vm0, %v1668_v51, %v1672_v24  ;;  %v1688_v33 = vrot.slane %v1686_v62, 1  ;;  %v6500_v4 = vor.u32 %v3019_v50, %v3018_v7 }
  0x92   :  { %5055 = vmatmul.mubr.bf16.gmra.mrb[24].mxu1 %v6408_v20  ;;  %5310 = vmatprep.subr.bf16.mxu0 %v5780_v27  ;;  %v3023_v62 = vrot.slane %v7036_v8, 5  ;;  %v1684_v32 = vor.u32 %v7041_v29, %v1680_v42  ;;  %v6515_v24 = vrot.slane %v7032_v16, 4  ;;  %v7042_v51 = vshll.u32 %v6260_v25, 16  ;;  %v5781_v42 = vld [vmem:[%s7017_s2 + $0xc8] sm:$0xff]  }
  0x93   :  { %5058 = vmatprep.mubr.bf16.mxu1 %v6425_v39  ;;  %v7043_v50 = vshll.u32 %v6058_v10, 16  ;;  %v7046_v16 = vshll.u32 %v6067_v17, 16  ;;  %v6547_v6 = vsel %vm2974_vm1, %v3016_v57, %v6500_v4  ;;  %v7049_v8 = vshrl.u32 %v6082_v48, 16  ;;  %v4316_v57 = vld [vmem:[%s7016_s1 + $0x108] sm:$0xff]  }
  0x94   :  { %5279 = vmatmul.mubr.bf16.gmra.mrb[8].mxu0 %v3001_v34  ;;  %v3013_v34 = vsel %vm2974_vm1, %v3008_v31, %v3012_v0  ;;  %v7040_v31 = vshrl.u32 %v6058_v10, 16  ;;  %v6519_v0 = vrot.slane %v7033_v14, 5  ;;  %v6523_v7 = vrot.slane %v7042_v51, 1  ;;  %v5787_v51 = vld [vmem:[%s7017_s2 + $0x1f8] sm:$0xff]   ;;  %585 = vst [vmem:[#allocation3 + $0x8] sm:$0xff] %v4316_v57  }
  0x95   :  { %5282 = vmatprep.mubr.bf16.mxu0 %v3005_v18  ;;  %5311 = vmatpush3.bf16.msra.mxu0 %v5780_v27  ;;  %v3022_v18 = vrot.slane %v7034_v9, 4  ;;  %v3395_v15 = vrot.slane %v7043_v50, 5  ;;  %v3404_v10 = vrot.slane %v7046_v16, 5  ;;  %v7047_v50 = vshrl.u32 %v6071_v26, 16 }
  0x96   :  { %5312 = vmatprep.subr.bf16.mxu0 %v5782_v12  ;;  %v3392_v27 = vrot.slane %v7040_v31, 4  ;;  %v3419_v37 = vrot.slane %v7049_v8, 4  ;;  %v3422_v60 = vrot.slane %v7050_v53, 5  ;;  %v7052_v53 = vshll.u32 %v6088_v56, 16 }
  0x97   :  { %v3410_v14 = vrot.slane %v7047_v50, 4  ;;  %v7051_v50 = vshrl.u32 %v6088_v56, 16 }
  0x98   :  { %v3423_v48 = vor.u32 %v3422_v60, %v3419_v37  ;;  %v7054_v60 = vshll.u32 %v6114_v11, 16 }
  0x99   :  { %5313 = vmatpush3.bf16.msra.mxu0 %v5782_v12  ;;  %v7045_v12 = vshrl.u32 %v6257_v13, 16 }
  0x9a   :  { %5059 = vmatmul.mubr.bf16.gmra.mrb[28].mxu1 %v6464_v41  ;;  %5314 = vmatprep.subr.bf16.mxu0 %v5784_v52  ;;  %v3440_v37 = vrot.slane %v7054_v60, 5  ;;  %v3754_v60 = vrot.slane %v6257_v13, 5  ;;  %v3756_v13 = vrot.slane %v6260_v25, 5 }
  0x9b   :  { %5078 = vmatprep.mubr.bf16.mxu1 %v1657_v58  ;;  %v7044_v58 = vshrl.u32 %v6067_v17, 16  ;;  %v6534_v29 = vor.u32 %v7045_v12, %v1688_v33  ;;  %v3396_v12 = vor.u32 %v3395_v15, %v3392_v27  ;;  %v6553_v17 = vor.u32 %v3023_v62, %v3022_v18 }
  0x9c   :  { %5283 = vmatmul.mubr.bf16.gmra.mrb[12].mxu0 %v3009_v43  ;;  %v3431_v43 = vrot.slane %v7052_v53, 5  ;;  %v7053_v27 = vshrl.u32 %v6114_v11, 16  ;;  %v7057_v11 = vshrl.u32 %v6168_v54, 16  ;;  %v7038_v53 = vrot.slane %v6235_v49, 5 }
  0x9d   :  { %v3401_v31 = vrot.slane %v7044_v58, 4  ;;  %v7048_v58 = vshll.u32 %v6071_v26, 16  ;;  %v3428_v26 = vrot.slane %v7051_v50, 4  ;;  %5286 = vmatprep.mubr.bf16.mxu0 %v3013_v34  ;;  %5315 = vmatpush3.bf16.msra.mxu0 %v5784_v52  ;;  %v6562_v8 = vsel %vm2974_vm1, %v6245_v1, %v3396_v12  ;;  %v6574_v34 = vld [vmem:[%s7017_s2 + $0x200] sm:$0xff]  }
  0x9e   :  { %5316 = vmatprep.subr.bf16.mxu0 %v5787_v51  ;;  %v7055_v52 = vshrl.u32 %v6163_v45, 16 }
  0x9f   :  { %v3413_v9 = vrot.slane %v7048_v58, 5  ;;  %v3405_v16 = vor.u32 %v3404_v10, %v3401_v31  ;;  %v3432_v15 = vor.u32 %v3431_v43, %v3428_v26  ;;  %v7056_v31 = vshll.u32 %v6163_v45, 16 }
  0xa0   :  { %v3446_v18 = vrot.slane %v7055_v52, 4  ;;  %v3455_v58 = vrot.slane %v7057_v11, 4  ;;  %v1762_v45 = vshrl.u32 %v6425_v39, 16  ;;  %v3750_v43 = vrot.slane %v6239_v59, 5  ;;  %v5785_v59 = vld [vmem:[%s7017_s2 + $0xd8] sm:$0xff]  }
  0xa1   :  { %v3414_v5 = vor.u32 %v3413_v9, %v3410_v14  ;;  %v3437_v9 = vrot.slane %v7053_v27, 4  ;;  %v250_v14 = vld [vmem:[%s7015_s0 + $0x1d8] sm:$0xff]   ;;  %v6577_v1 = vsel %vm2974_vm1, %v3396_v12, %v3405_v16  ;;  %v3449_v10 = vrot.slane %v7056_v31, 5  ;;  %5317 = vmatpush3.bf16.msra.mxu0 %v5787_v51 }
  0xa2   :  { %5079 = vmatmul.mubr.bf16.vlgmr.msra.gmra.mrb[0].mxu1 %v1665_v46  ;;  %251 = vst [vmem:[#allocation2 + $0x1c0] sm:$0xff] %v250_v14   ;;  %v254_v46 = vld [vmem:[%s7015_s0 + $0x1e0] sm:$0xff]   ;;  %v1689_v12 = vsel %vm1645_vm0, %v1684_v32, %v1688_v33  ;;  %v6606_v26 = vsel %vm2974_vm1, %v3423_v48, %v3432_v15  ;;  %v258_v33 = vld [vmem:[%s7015_s0 + $0x1e8] sm:$0xff]   ;;  %5350 = vmatprep.subr.bf16.mxu0 %v6574_v34  ;;  %v3752_v51 = vrot.slane %v6247_v3, 5  ;;  %v7059_v27 = vshll.u32 %v6305_v2, 16 }
  0xa3   :  { %v6580_v56 = vsel %vm2974_vm1, %v3405_v16, %v3414_v5  ;;  %5111 = vmatpush3.bf16.msra.mxu1 %v6372_v19  ;;  %5082 = vmatprep.mubr.bf16.mxu1 %v1673_v47  ;;  %v6591_v62 = vsel %vm2974_vm1, %v3414_v5, %v3423_v48  ;;  %255 = vst [vmem:[#allocation2 + $0x1c8] sm:$0xff] %v254_v46   ;;  %v5783_v16 = vld [vmem:[%s7017_s2 + $0xd0] sm:$0xff]   ;;  %v1758_v19 = vshll.u32 %v6425_v39, 16  ;;  %v7058_v5 = vshll.u32 %v6168_v54, 16 }
  0xa4   :  { %5112 = vmatprep.subr.bf16.mxu1 %v5781_v42  ;;  %v3441_v47 = vor.u32 %v3440_v37, %v3437_v9  ;;  %v3450_v57 = vor.u32 %v3449_v10, %v3446_v18  ;;  %259 = vst [vmem:[#allocation2 + $0x1d0] sm:$0xff] %v258_v33   ;;  %v262_v48 = vld [vmem:[%s7015_s0 + $0x1f0] sm:$0xff]   ;;  %v6625_v9 = vrot.slane %v7059_v27, 1  ;;  %5287 = vmatmul.mubr.bf16.gmra.mrb[16].mxu0 %v6498_v22  ;;  %v3758_v18 = vrot.slane %v6305_v2, 5 }
  0xa5   :  { %v3458_v50 = vrot.slane %v7058_v5, 5  ;;  %263 = vst [vmem:[#allocation2 + $0x1d8] sm:$0xff] %v262_v48   ;;  %v6645_v37 = vsel %vm3744_vm2, %v3750_v43, %v3752_v51  ;;  %5290 = vmatprep.mubr.bf16.mxu0 %v6547_v6  ;;  %v3028_v22 = vor.u32 %v6519_v0, %v6515_v24  ;;  %v6652_v52 = vsel %vm3744_vm2, %v3752_v51, %v3754_v60 }
  0xa6   :  { %v6614_v32 = vsel %vm2974_vm1, %v3432_v15, %v3441_v47  ;;  %v6628_v14 = vsel %vm2974_vm1, %v3441_v47, %v3450_v57  ;;  %v3760_v46 = vrot.slane %v6327_v21, 5  ;;  %v1766_v15 = vshll.u32 %v6464_v41, 16 }
  0xa7   :  { %v6616_v54 = vor.u32 %v3458_v50, %v3455_v58  ;;  %5113 = vmatpush3.bf16.msra.mxu1 %v5781_v42  ;;  %v6642_v42 = vsel %vm3744_vm2, %v7038_v53, %v3750_v43  ;;  %v1770_v31 = vshrl.u32 %v6464_v41, 16  ;;  %v6660_v10 = vsel %vm3744_vm2, %v3754_v60, %v3756_v13  ;;  %v6688_v43 = vld [vmem:[#allocation3] sm:$0xff]  }
  0xa8   :  { %5114 = vmatprep.subr.bf16.mxu1 %v5783_v16  ;;  %v3762_v6 = vrot.slane %v6338_v23, 5  ;;  %v6664_v24 = vsel %vm3744_vm2, %v3756_v13, %v3758_v18  ;;  %v6667_v0 = vsel %vm3744_vm2, %v3758_v18, %v3760_v46  ;;  %v3764_v11 = vrot.slane %v6342_v38, 5  ;;  %v266_v18 = vld [vmem:[%s7015_s0 + $0x1f8] sm:$0xff]  }
  0xa9   :  { %v6637_v3 = vsel %vm2974_vm1, %v3450_v57, %v6616_v54  ;;  %v3031_v58 = vrot.slane %v1758_v19, 5  ;;  %v7060_v47 = vshrl.u32 %v6260_v25, 16  ;;  %v3768_v50 = vrot.slane %v6388_v61, 5  ;;  %267 = vst [vmem:[#allocation2 + $0x1e0] sm:$0xff] %v266_v18  }
  0xaa   :  { %5083 = vmatmul.mubr.bf16.gmra.mrb[4].mxu1 %v6503_v44  ;;  %v3766_v44 = vrot.slane %v6378_v30, 5  ;;  %v3025_v57 = vsel %vm2974_vm1, %v6500_v4, %v6553_v17  ;;  %v3030_v33 = vrot.slane %v1762_v45, 4  ;;  %v6691_v25 = vsel %vm3744_vm2, %v3762_v6, %v3764_v11 }
  0xab   :  { %5086 = vmatprep.mubr.bf16.mxu1 %v1689_v12  ;;  %5115 = vmatpush3.bf16.msra.mxu1 %v5783_v16  ;;  %v1700_v5 = vor.u32 %v7060_v47, %v6523_v7  ;;  %v5788_v12 = vld [vmem:[%s7017_s2 + $0xe0] sm:$0xff]   ;;  %v6680_v16 = vsel %vm3744_vm2, %v3760_v46, %v3762_v6  ;;  %v3029_v48 = vsel %vm2974_vm1, %v6553_v17, %v3028_v22  ;;  %v3034_v27 = vrot.slane %v1770_v31, 4  ;;  %v5790_v6 = vld [vmem:[%s7017_s2 + $0xe8] sm:$0xff]  }
  0xac   :  { %5116 = vmatprep.subr.bf16.mxu1 %v5785_v59  ;;  %v6694_v51 = vsel %vm3744_vm2, %v3764_v11, %v3766_v44  ;;  %v3035_v4 = vrot.slane %v1766_v15, 5  ;;  %v6703_v60 = vsel %vm3744_vm2, %v3766_v44, %v3768_v50  ;;  %v1697_v13 = vsel %vm1645_vm0, %v6534_v29, %v6523_v7  ;;  %v270_v17 = vld [vmem:[%s7015_s0 + $0x200] sm:$0xff]   ;;  %5291 = vmatmul.mubr.bf16.gmra.mrb[20].mxu0 %v3025_v57 }
  0xad   :  { %v1705_v46 = vsel %vm1645_vm0, %v1700_v5, %v6625_v9  ;;  %v3770_v7 = vrot.slane %v6408_v20, 5  ;;  %271 = vst [vmem:[#allocation2 + $0x1e8] sm:$0xff] %v270_v17   ;;  %5294 = vmatprep.mubr.bf16.mxu0 %v3029_v48  ;;  %v3032_v29 = vor.u32 %v3031_v58, %v3030_v33  ;;  %v3038_v11 = vshrl.u32 %v6688_v43, 16 }
  0xae   :  { %v3036_v44 = vor.u32 %v3035_v4, %v3034_v27  ;;  %v7061_v47 = vshll.u32 %v6327_v21, 16  ;;  %v3772_v53 = vrot.slane %v6425_v39, 5  ;;  %v7062_v18 = vshrl.u32 %v6305_v2, 16  ;;  %v5796_v39 = vld [vmem:[%s7017_s2 + $0x220] sm:$0xff]  }
  0xaf   :  { %5117 = vmatpush3.bf16.msra.mxu1 %v5785_v59  ;;  %v1774_v59 = vshll.u32 %v6688_v43, 16  ;;  %v6725_v57 = vsel %vm3744_vm2, %v3768_v50, %v3770_v7  ;;  %v7063_v58 = vshrl.u32 %v6327_v21, 16  ;;  %v5792_v50 = vld [vmem:[%s7017_s2 + $0xf0] sm:$0xff]   ;;  %v3033_v17 = vsel %vm2974_vm1, %v3028_v22, %v3032_v29  ;;  %v274_v21 = vld [vmem:[%s7015_s0 + $0x208] sm:$0xff]  }
  0xb0   :  { %5118 = vmatprep.subr.bf16.mxu1 %v5788_v12  ;;  %v1712_v5 = vrot.slane %v7061_v47, 1  ;;  %v1708_v48 = vor.u32 %v7062_v18, %v6625_v9  ;;  %v6739_v4 = vsel %vm3744_vm2, %v3770_v7, %v3772_v53  ;;  %v3037_v9 = vsel %vm2974_vm1, %v3032_v29, %v3036_v44  ;;  %275 = vst [vmem:[#allocation2 + $0x1f0] sm:$0xff] %v274_v21  }
  0xb1   :  { %v3041_v2 = vrot.slane %v1774_v59, 5  ;;  %v3774_v47 = vrot.slane %v6464_v41, 5  ;;  %v7065_v18 = vshll.u32 %v6342_v38, 16  ;;  %v7068_v21 = vshll.u32 %v6378_v30, 16  ;;  %v5798_v41 = vld [vmem:[%s7017_s2 + $0x230] sm:$0xff]  }
  0xb2   :  { %5087 = vmatmul.mubr.bf16.gmra.mrb[8].mxu1 %v1697_v13  ;;  %v1716_v33 = vor.u32 %v7063_v58, %v1712_v5  ;;  %v7064_v13 = vshll.u32 %v6338_v23, 16  ;;  %v1713_v7 = vsel %vm1645_vm0, %v1708_v48, %v1712_v5  ;;  %v7066_v48 = vshrl.u32 %v6338_v23, 16 }
  0xb3   :  { %5090 = vmatprep.mubr.bf16.mxu1 %v1705_v46  ;;  %5119 = vmatpush3.bf16.msra.mxu1 %v5788_v12  ;;  %v3040_v46 = vrot.slane %v3038_v11, 4  ;;  %v278_v12 = vld [vmem:[%s7015_s0 + $0x210] sm:$0xff]   ;;  %v5794_v11 = vld [vmem:[%s7017_s2 + $0xf8] sm:$0xff]   ;;  %v1728_v58 = vrot.slane %v7065_v18, 1  ;;  %v6760_v5 = vsel %vm3744_vm2, %v3772_v53, %v3774_v47 }
  0xb4   :  { %v1720_v27 = vrot.slane %v7064_v13, 1  ;;  %5120 = vmatprep.subr.bf16.mxu1 %v5790_v6  ;;  %279 = vst [vmem:[#allocation2 + $0x1f8] sm:$0xff] %v278_v12   ;;  %5295 = vmatmul.mubr.bf16.gmra.mrb[24].mxu0 %v3033_v17  ;;  %v7067_v13 = vshrl.u32 %v6342_v38, 16  ;;  %v5809_v38 = vld [vmem:[%s7017_s2 + $0x100] sm:$0xff]  }
  0xb5   :  { %5298 = vmatprep.mubr.bf16.mxu0 %v3037_v9  ;;  %v3042_v29 = vor.u32 %v3041_v2, %v3040_v46  ;;  %v1736_v46 = vrot.slane %v7068_v21, 1  ;;  %v5799_v21 = vld [vmem:[#allocation3 + $0x8] sm:$0xff]  }
  0xb6   :  { %v1721_v22 = vsel %vm1645_vm0, %v1716_v33, %v1720_v27  ;;  %v1724_v33 = vor.u32 %v7066_v48, %v1720_v27  ;;  %v1732_v17 = vor.u32 %v7067_v13, %v1728_v58  ;;  %v7069_v27 = vshll.u32 %v6388_v61, 16  ;;  %v5816_v13 = vld [vmem:[#allocation2 + $0x120] sm:$0xff]  }
  0xb7   :  { %5121 = vmatpush3.bf16.msra.mxu1 %v5790_v6  ;;  %v3776_v6 = vrot.slane %v6688_v43, 5  ;;  %v3043_v53 = vsel %vm2974_vm1, %v3036_v44, %v3042_v29  ;;  %v7070_v44 = vshrl.u32 %v6378_v30, 16  ;;  %v5791_v29 = vld [vmem:[%s7017_s2 + $0x208] sm:$0xff]   ;;  %v1760_v30 = vrot.slane %v1758_v19, 1  ;;  %v5800_v43 = vld [vmem:[%s7017_s2 + $0x238] sm:$0xff]  }
  0xb8   :  { %5122 = vmatprep.subr.bf16.mxu1 %v5792_v50  ;;  %v1729_v9 = vsel %vm1645_vm0, %v1724_v33, %v1728_v58  ;;  %v1737_v23 = vsel %vm1645_vm0, %v1732_v17, %v1736_v46  ;;  %v7073_v58 = vshrl.u32 %v6408_v20, 16  ;;  %v5813_v33 = vld [vmem:[%s7017_s2 + $0x108] sm:$0xff]   ;;  %v5817_v17 = vld [vmem:[%s7017_s2 + $0x118] sm:$0xff]  }
  0xb9   :  { %v6770_v2 = vsel %vm3744_vm2, %v3774_v47, %v3776_v6  ;;  %v1740_v12 = vor.u32 %v7070_v44, %v1736_v46  ;;  %v3465_v46 = vshll.u32 %v5799_v21, 16  ;;  %v5824_v44 = vld [vmem:[#allocation2] sm:$0xff]  }
  0xba   :  { %5091 = vmatmul.mubr.bf16.gmra.mrb[12].mxu1 %v1713_v7  ;;  %v7071_v7 = vshrl.u32 %v6388_v61, 16  ;;  %v5793_v61 = vld [vmem:[%s7017_s2 + $0x210] sm:$0xff]  }
  0xbb   :  { %5094 = vmatprep.mubr.bf16.mxu1 %v1721_v22  ;;  %5123 = vmatpush3.bf16.msra.mxu1 %v5792_v50  ;;  %v1744_v50 = vrot.slane %v7069_v27, 1 }
  0xbc   :  { %5124 = vmatprep.subr.bf16.mxu1 %v5794_v11  ;;  %5299 = vmatmul.mubr.bf16.gmra.mrb[28].mxu0 %v3043_v53  ;;  %v5819_v53 = vld [vmem:[#allocation2 + $0x128] sm:$0xff]  }
  0xbd   :  { %5318 = vmatprep.mubr.bf16.mxu0 %v6147_v35  ;;  %v1748_v22 = vor.u32 %v7071_v7, %v1744_v50  ;;  %v1745_v35 = vsel %vm1645_vm0, %v1740_v12, %v1744_v50  ;;  %v5823_v50 = vld [vmem:[#allocation2 + $0x138] sm:$0xff]   ;;  %v3745_v12 = vrot.slane %v5824_v44, 5  ;;  %v5825_v7 = vld [vmem:[#allocation2 + $0x8] sm:$0xff]  }
  0xbf   :  { %5125 = vmatpush3.bf16.msra.mxu1 %v5794_v11  ;;  %v7072_v11 = vshll.u32 %v6408_v20, 16 }
  0xc0   :  { %5398 = vmatprep.subr.bf16.mxu1 %v5809_v38 }
  0xc1   :  { %v1752_v47 = vrot.slane %v7072_v11, 1  ;;  %v5826_v11 = vld [vmem:[#allocation2 + $0x140] sm:$0xff]  }
  0xc2   :  { %5095 = vmatmul.mubr.bf16.gmra.mrb[16].mxu1 %v1729_v9  ;;  %v5820_v9 = vld [vmem:[#allocation2 + $0x130] sm:$0xff]  }
  0xc3   :  { %5098 = vmatprep.mubr.bf16.mxu1 %v1737_v23  ;;  %v1753_v18 = vsel %vm1645_vm0, %v1748_v22, %v1752_v47  ;;  %v1756_v6 = vor.u32 %v7073_v58, %v1752_v47  ;;  %v5821_v23 = vld [vmem:[%s7017_s2 + $0x128] sm:$0xff]   ;;  %v3746_v22 = vrot.slane %v5825_v7, 5  ;;  %v5831_v58 = vld [vmem:[#allocation2 + $0x160] sm:$0xff]  }
  0xc4   :  { %5319 = vmatmul.mubr.bf16.vlgmr.msra.gmra.mrb[0].mxu0 %v6150_v36  ;;  %v1764_v36 = vor.u32 %v1762_v45, %v1760_v30  ;;  %v1776_v45 = vrot.slane %v1774_v59, 1  ;;  %v5812_v59 = vld [vmem:[#allocation2 + $0x110] sm:$0xff]  }
  0xc5   :  { %5351 = vmatpush3.bf16.msra.mxu0 %v6574_v34  ;;  %5322 = vmatprep.mubr.bf16.mxu0 %v6153_v40  ;;  %v1768_v34 = vrot.slane %v1766_v15, 1  ;;  %v5795_v40 = vld [vmem:[%s7017_s2 + $0x218] sm:$0xff]   ;;  %v1761_v19 = vsel %vm1645_vm0, %v1756_v6, %v1760_v30  ;;  %v7074_v15 = vld [vmem:[#allocation4_spill] sm:$0xff]  ;;  %v5833_v6 = vld [vmem:[#allocation2 + $0x170] sm:$0xff]  }
  0xc6   :  { %5352 = vmatprep.subr.bf16.mxu0 %v5791_v29 }
  0xc7   :  { %v1769_v48 = vsel %vm1645_vm0, %v1764_v36, %v1768_v34  ;;  %v1772_v20 = vor.u32 %v1770_v31, %v1768_v34  ;;  %v5810_v31 = vld [vmem:[#allocation2 + $0x100] sm:$0xff]   ;;  %v5803_v34 = vld [vmem:[#allocation2 + $0x1d0] sm:$0xff]  }
  0xc8   :  { %v5801_v36 = vld [vmem:[#allocation2 + $0x1c0] sm:$0xff]  }
  0xc9   :  { %5353 = vmatpush3.bf16.msra.mxu0 %v5791_v29  ;;  %v5828_v29 = vld [vmem:[#allocation2 + $0x148] sm:$0xff]  }
  0xca   :  { %5099 = vmatmul.mubr.bf16.gmra.mrb[20].mxu1 %v1745_v35  ;;  %5354 = vmatprep.subr.bf16.mxu0 %v5793_v61  ;;  %v5829_v35 = vld [vmem:[#allocation2 + $0x150] sm:$0xff]  }
  0xcb   :  { %5102 = vmatprep.mubr.bf16.mxu1 %v1753_v18  ;;  %v7075_v18 = vrot.slane %v6235_v49, 5  ;;  %v5834_v49 = vld [vmem:[#allocation2 + $0x178] sm:$0xff]  }
  0xcc   :  { %5323 = vmatmul.mubr.bf16.gmra.mrb[4].mxu0 %v6161_v28  ;;  %v5797_v28 = vld [vmem:[%s7017_s2 + $0x228] sm:$0xff]  }
  0xcd   :  { %5326 = vmatprep.mubr.bf16.mxu0 %v6172_v55  ;;  %5355 = vmatpush3.bf16.msra.mxu0 %v5793_v61  ;;  %v1777_v55 = vsel %vm1645_vm0, %v1772_v20, %v1776_v45  ;;  %v3749_v30 = vsel %vm3744_vm2, %v3746_v22, %v7075_v18  ;;  %v5830_v61 = vld [vmem:[#allocation2 + $0x158] sm:$0xff]  }
  0xce   :  { %5356 = vmatprep.subr.bf16.mxu0 %v5795_v40 }
  0xd1   :  { %5357 = vmatpush3.bf16.msra.mxu0 %v5795_v40 }
  0xd2   :  { %5103 = vmatmul.mubr.bf16.gmra.mrb[24].mxu1 %v1761_v19  ;;  %5358 = vmatprep.subr.bf16.mxu0 %v5796_v39 }
  0xd3   :  { %5106 = vmatprep.mubr.bf16.mxu1 %v1769_v48 }
  0xd4   :  { %5327 = vmatmul.mubr.bf16.gmra.mrb[8].mxu0 %v6243_v63  ;;  %v5811_v63 = vld [vmem:[#allocation2 + $0x108] sm:$0xff]  }
  0xd5   :  { %5330 = vmatprep.mubr.bf16.mxu0 %v7074_v15  ;;  %5359 = vmatpush3.bf16.msra.mxu0 %v5796_v39 }
  0xd6   :  { %5360 = vmatprep.subr.bf16.mxu0 %v5797_v28 }
  0xd9   :  { %5361 = vmatpush3.bf16.msra.mxu0 %v5797_v28 }
  0xda   :  { %5107 = vmatmul.mubr.bf16.gmra.mrb[28].mxu1 %v1777_v55  ;;  %5362 = vmatprep.subr.bf16.mxu0 %v5798_v41 }
  0xdb   :  { %5126 = vmatprep.mubr.bf16.mxu1 %v5810_v31 }
  0xdc   :  { %5331 = vmatmul.mubr.bf16.gmra.mrb[12].mxu0 %v6562_v8  ;;  %v5814_v8 = vld [vmem:[%s7017_s2 + $0x110] sm:$0xff]  }
  0xdd   :  { %5334 = vmatprep.mubr.bf16.mxu0 %v6577_v1  ;;  %5363 = vmatpush3.bf16.msra.mxu0 %v5798_v41  ;;  %v5815_v1 = vld [vmem:[#allocation2 + $0x118] sm:$0xff]   ;;  %v6892_v41 = vld [vmem:[%s7018_s3] ss:$0 sm:$0xff] }
  0xde   :  { %5364 = vmatprep.subr.bf16.mxu0 %v5800_v43 }
  0xe1   :  { %5365 = vmatpush3.bf16.msra.mxu0 %v5800_v43 }
  0xe2   :  { %5127 = vmatmul.mubr.bf16.vlgmr.msra.gmra.mrb[0].mxu1 %v5811_v63  ;;  %v6897_v63 = vld [vmem:[%s7018_s3 + $0x1] ss:$0 sm:$0xff] }
  0xe3   :  { %5406 = vmatpush3.bf16.msra.mxu1 %v5809_v38  ;;  %5130 = vmatprep.mubr.bf16.mxu1 %v5812_v59  ;;  %v3467_v38 = vrot.slane %v3465_v46, 5 }
  0xe4   :  { %5399 = vmatprep.subr.bf16.mxu1 %v5813_v33  ;;  %5335 = vmatmul.mubr.bf16.gmra.mrb[16].mxu0 %v6580_v56  ;;  %v5818_v56 = vld [vmem:[%s7017_s2 + $0x120] sm:$0xff]  }
  0xe5   :  { %5338 = vmatprep.mubr.bf16.mxu0 %v6591_v62  ;;  %v3462_v62 = vshrl.u32 %v5799_v21, 16 }
  0xe7   :  { %5407 = vmatpush3.bf16.msra.mxu1 %v5813_v33 }
  0xe8   :  { %5400 = vmatprep.subr.bf16.mxu1 %v5814_v8 }
  0xea   :  { %5131 = vmatmul.mubr.bf16.gmra.mrb[4].mxu1 %v5815_v1 }
  0xeb   :  { %5134 = vmatprep.mubr.bf16.mxu1 %v5816_v13  ;;  %5408 = vmatpush3.bf16.msra.mxu1 %v5814_v8 }
  0xec   :  { %5401 = vmatprep.subr.bf16.mxu1 %v5817_v17  ;;  %5339 = vmatmul.mubr.bf16.gmra.mrb[20].mxu0 %v6606_v26  ;;  %v3464_v26 = vrot.slane %v3462_v62, 4 }
  0xed   :  { %5342 = vmatprep.mubr.bf16.mxu0 %v6614_v32  ;;  %v5822_v32 = vld [vmem:[%s7017_s2 + $0x130] sm:$0xff]  }
  0xee   :  { %v3468_v27 = vor.u32 %v3467_v38, %v3464_v26 }
  0xef   :  { %5409 = vmatpush3.bf16.msra.mxu1 %v5817_v17 }
  0xf0   :  { %5402 = vmatprep.subr.bf16.mxu1 %v5818_v56  ;;  %v3469_v47 = vsel %vm2974_vm1, %v6616_v54, %v3468_v27  ;;  %v5832_v54 = vld [vmem:[#allocation2 + $0x168] sm:$0xff]  }
  0xf2   :  { %5135 = vmatmul.mubr.bf16.gmra.mrb[8].mxu1 %v5819_v53 }
  0xf3   :  { %5138 = vmatprep.mubr.bf16.mxu1 %v5820_v9  ;;  %5410 = vmatpush3.bf16.msra.mxu1 %v5818_v56 }
  0xf4   :  { %5403 = vmatprep.subr.bf16.mxu1 %v5821_v23  ;;  %5343 = vmatmul.mubr.bf16.gmra.mrb[24].mxu0 %v6628_v14  ;;  %v5827_v14 = vld [vmem:[%s7017_s2 + $0x138] sm:$0xff]  }
  0xf5   :  { %5346 = vmatprep.mubr.bf16.mxu0 %v6637_v3  ;;  %v3747_v3 = vsel %vm3744_vm2, %v3745_v12, %v3746_v22 }
  0xf7   :  { %5411 = vmatpush3.bf16.msra.mxu1 %v5821_v23 }
  0xf8   :  { %5404 = vmatprep.subr.bf16.mxu1 %v5822_v32 }
  0xfa   :  { %5139 = vmatmul.mubr.bf16.gmra.mrb[12].mxu1 %v5823_v50 }
  0xfb   :  { %5142 = vmatprep.mubr.bf16.mxu1 %v5826_v11  ;;  %5412 = vmatpush3.bf16.msra.mxu1 %v5822_v32 }
  0xfc   :  { %5405 = vmatprep.subr.bf16.mxu1 %v5827_v14  ;;  %5347 = vmatmul.mubr.bf16.gmra.mrb[28].mxu0 %v3469_v47 }
  0xfd   :  { %5366 = vmatprep.mubr.bf16.mxu0 %v3747_v3 }
  0xff   :  { %5413 = vmatpush3.bf16.msra.mxu1 %v5827_v14 }
 0x102   :  { %5143 = vmatmul.mubr.bf16.gmra.mrb[16].mxu1 %v5828_v29 }
 0x103   :  { %5146 = vmatprep.mubr.bf16.mxu1 %v5829_v35 }
 0x104   :  { %5367 = vmatmul.mubr.bf16.vlgmr.msra.gmra.mrb[0].mxu0 %v3749_v30 }
 0x105   :  { %5370 = vmatprep.mubr.bf16.mxu0 %v6642_v42  ;;  %v5802_v42 = vld [vmem:[#allocation2 + $0x1c8] sm:$0xff]  }
 0x10a   :  { %5147 = vmatmul.mubr.bf16.gmra.mrb[20].mxu1 %v5830_v61 }
 0x10b   :  { %5150 = vmatprep.mubr.bf16.mxu1 %v5831_v58 }
 0x10c   :  { %5371 = vmatmul.mubr.bf16.gmra.mrb[4].mxu0 %v6645_v37  ;;  %v5804_v37 = vld [vmem:[#allocation2 + $0x1d8] sm:$0xff]  }
 0x10d   :  { %5374 = vmatprep.mubr.bf16.mxu0 %v6652_v52  ;;  %v5805_v52 = vld [vmem:[#allocation2 + $0x1e0] sm:$0xff]  }
 0x112   :  { %5151 = vmatmul.mubr.bf16.gmra.mrb[24].mxu1 %v5832_v54 }
 0x113   :  { %5154 = vmatprep.mubr.bf16.mxu1 %v5833_v6 }
 0x114   :  { %5375 = vmatmul.mubr.bf16.gmra.mrb[8].mxu0 %v6660_v10  ;;  %v5806_v10 = vld [vmem:[#allocation2 + $0x1e8] sm:$0xff]  }
 0x115   :  { %5378 = vmatprep.mubr.bf16.mxu0 %v6664_v24  ;;  %v5807_v24 = vld [vmem:[#allocation2 + $0x1f0] sm:$0xff]  }
 0x11a   :  { %5155 = vmatmul.mubr.bf16.gmra.mrb[28].mxu1 %v5834_v49 }
 0x11b   :  { %5190 = vmatprep.mubr.bf16.mxu1 %v5801_v36 }
 0x11c   :  { %5379 = vmatmul.mubr.bf16.gmra.mrb[12].mxu0 %v6667_v0  ;;  %v5808_v0 = vld [vmem:[#allocation2 + $0x1f8] sm:$0xff]  }
 0x11d   :  { %5382 = vmatprep.mubr.bf16.mxu0 %v6680_v16 }
 0x122   :  { %5191 = vmatmul.mubr.bf16.vlgmr.msra.gmra.mrb[16].mxu1 %v5802_v42 }
 0x123   :  { %5194 = vmatprep.mubr.bf16.mxu1 %v5803_v34 }
 0x124   :  { %5383 = vmatmul.mubr.bf16.gmra.mrb[16].mxu0 %v6691_v25 }
 0x125   :  { %5386 = vmatprep.mubr.bf16.mxu0 %v6694_v51 }
 0x12a   :  { %5195 = vmatmul.mubr.bf16.gmra.mrb[20].mxu1 %v5804_v37 }
 0x12b   :  { %5198 = vmatprep.mubr.bf16.mxu1 %v5805_v52 }
 0x12c   :  { %5387 = vmatmul.mubr.bf16.gmra.mrb[20].mxu0 %v6703_v60 }
 0x12d   :  { %5390 = vmatprep.mubr.bf16.mxu0 %v6725_v57 }
 0x132   :  { %5199 = vmatmul.mubr.bf16.gmra.mrb[24].mxu1 %v5806_v10 }
 0x133   :  { %5202 = vmatprep.mubr.bf16.mxu1 %v5807_v24 }
 0x134   :  { %5391 = vmatmul.mubr.bf16.gmra.mrb[24].mxu0 %v6739_v4 }
 0x135   :  { %5394 = vmatprep.mubr.bf16.mxu0 %v6760_v5 }
 0x13a   :  { %5203 = vmatmul.mubr.bf16.gmra.mrb[28].mxu1 %v5808_v0 }
 0x13c   :  { %5395 = vmatmul.mubr.bf16.gmra.mrb[28].mxu0 %v6770_v2 }
 0x1b5   :  { %v5128_v16 = vpop.f32.mrb[0].mxu1 }
 0x1b6   :  { %v2134_v25 = vpop.f32.mrb[1].mxu1 }
 0x1b7   :  { %v5129_v51 = vpop.f32.mrb[2].mxu1 }
 0x1b8   :  { %v2137_v40 = vpop.f32.mrb[3].mxu1 }
 0x1bd   :  { %v5132_v19 = vpop.f32.mrb[4].mxu1 }
 0x1be   :  { %v2150_v48 = vpop.f32.mrb[5].mxu1 }
 0x1bf   :  { %v5133_v39 = vpop.f32.mrb[6].mxu1 }
 0x1c0   :  { %v2153_v60 = vpop.f32.mrb[7].mxu1 }
 0x1c5   :  { %v5136_v20 = vpop.f32.mrb[8].mxu1 }
 0x1c6   :  { %v2166_v57 = vpop.f32.mrb[9].mxu1 }
 0x1c7   :  { %v5137_v45 = vpop.f32.mrb[10].mxu1 }
 0x1c8   :  { %v2169_v28 = vpop.f32.mrb[11].mxu1 }
 0x1cd   :  { %v6881_v55 = vpop.f32.mrb[12].mxu1 }
 0x1ce   :  { %v6883_v4 = vpop.f32.mrb[13].mxu1 }
 0x1cf   :  { %v6885_v5 = vpop.f32.mrb[14].mxu1 }
 0x1d0   :  { %v6887_v15 = vpop.f32.mrb[15].mxu1 }
 0x1d7   :  { %v5368_v2 = vpop.f32.mrb[0].mxu0 }
 0x1d8   :  { %v5414_v31 = vadd.f32 %v5368_v2, %v5128_v16  ;;  %v3876_v43 = vpop.f32.mrb[1].mxu0 }
 0x1d9   :  { %v5415_v59 = vadd.f32 %v3876_v43, %v2134_v25  ;;  %v5369_v33 = vpop.f32.mrb[2].mxu0 }
 0x1da   :  { %v4042_v8 = vmul.f32 %v5414_v31, %v6892_v41  ;;  %v5416_v1 = vadd.f32 %v5369_v33, %v5129_v51  ;;  %v3879_v13 = vpop.f32.mrb[3].mxu0 }
 0x1db   :  { %v4040_v17 = vmul.f32 %v5415_v59, %v6892_v41  ;;  %v5417_v21 = vadd.f32 %v3879_v13, %v2137_v40 }
 0x1dc   :  { %v4079_v56 = vadd.f32 %v6897_v63, %v4042_v8  ;;  %v4043_v62 = vmul.f32 %v5416_v1, %v6892_v41 }
 0x1dd   :  { %v4077_v46 = vadd.f32 %v6897_v63, %v4040_v17  ;;  %v4041_v53 = vmul.f32 %v5417_v21, %v6892_v41 }
 0x1de   :  { %v4080_v9 = vadd.f32 %v6897_v63, %v4043_v62  ;;  %v4111_v38 = vmax.f32 %v4079_v56, 0.0 }
 0x1df   :  { %v4078_v23 = vadd.f32 %v6897_v63, %v4041_v53  ;;  %v5372_v26 = vpop.f32.mrb[4].mxu0  ;;  %v4109_v44 = vmax.f32 %v4077_v46, 0.0 }
 0x1e0   :  { %v4112_v32 = vmax.f32 %v4080_v9, 0.0  ;;  %v5418_v27 = vadd.f32 %v5372_v26, %v5132_v19  ;;  %v3892_v50 = vpop.f32.mrb[5].mxu0 }
 0x1e1   :  { %v4110_v12 = vmax.f32 %v4078_v23, 0.0  ;;  %v5419_v7 = vadd.f32 %v3892_v50, %v2150_v48  ;;  %v5373_v22 = vpop.f32.mrb[6].mxu0 }
 0x1e2   :  { %v4663_v11 = vpack.c.bf16 %v4112_v32, %v4111_v38  ;;  %v4046_v14 = vmul.f32 %v5418_v27, %v6892_v41  ;;  %v5420_v47 = vadd.f32 %v5373_v22, %v5133_v39  ;;  %v3895_v3 = vpop.f32.mrb[7].mxu0 }
 0x1e3   :  { %v4658_v29 = vpack.c.bf16 %v4110_v12, %v4109_v44  ;;  %v4044_v35 = vmul.f32 %v5419_v7, %v6892_v41  ;;  %v5421_v18 = vadd.f32 %v3895_v3, %v2153_v60 }
 0x1e4   :  { %4735 = vst [vmem:[%s7019_s4 + $0x8] sm:$0xff] %v4663_v11   ;;  %v4083_v30 = vadd.f32 %v6897_v63, %v4046_v14  ;;  %v4047_v61 = vmul.f32 %v5420_v47, %v6892_v41 }
 0x1e5   :  { %4659 = vst [vmem:[%s7019_s4] sm:$0xff] %v4658_v29   ;;  %v4081_v58 = vadd.f32 %v6897_v63, %v4044_v35  ;;  %v4045_v54 = vmul.f32 %v5421_v18, %v6892_v41 }
 0x1e6   :  { %v4084_v6 = vadd.f32 %v6897_v63, %v4047_v61  ;;  %v4115_v42 = vmax.f32 %v4083_v30, 0.0 }
 0x1e7   :  { %v4082_v36 = vadd.f32 %v6897_v63, %v4045_v54  ;;  %v5376_v49 = vpop.f32.mrb[8].mxu0  ;;  %v4113_v10 = vmax.f32 %v4081_v58, 0.0 }
 0x1e8   :  { %v4116_v34 = vmax.f32 %v4084_v6, 0.0  ;;  %v5422_v37 = vadd.f32 %v5376_v49, %v5136_v20  ;;  %v3908_v52 = vpop.f32.mrb[9].mxu0 }
 0x1e9   :  { %v4114_v24 = vmax.f32 %v4082_v36, 0.0  ;;  %v5423_v0 = vadd.f32 %v3908_v52, %v2166_v57  ;;  %v5377_v16 = vpop.f32.mrb[10].mxu0 }
 0x1ea   :  { %v4673_v25 = vpack.c.bf16 %v4116_v34, %v4115_v42  ;;  %v4050_v51 = vmul.f32 %v5422_v37, %v6892_v41  ;;  %v5424_v40 = vadd.f32 %v5377_v16, %v5137_v45  ;;  %v3911_v19 = vpop.f32.mrb[11].mxu0 }
 0x1eb   :  { %v4668_v48 = vpack.c.bf16 %v4114_v24, %v4113_v10  ;;  %v4048_v39 = vmul.f32 %v5423_v0, %v6892_v41  ;;  %v5425_v60 = vadd.f32 %v3911_v19, %v2169_v28 }
 0x1ec   :  { %4737 = vst [vmem:[%s7019_s4 + $0x18] sm:$0xff] %v4673_v25   ;;  %v4087_v20 = vadd.f32 %v6897_v63, %v4050_v51  ;;  %v4051_v2 = vmul.f32 %v5424_v40, %v6892_v41 }
 0x1ed   :  { %4736 = vst [vmem:[%s7019_s4 + $0x10] sm:$0xff] %v4668_v48   ;;  %v4085_v57 = vadd.f32 %v6897_v63, %v4048_v39  ;;  %v4049_v45 = vmul.f32 %v5425_v60, %v6892_v41 }
 0x1ee   :  { %v4088_v31 = vadd.f32 %v6897_v63, %v4051_v2  ;;  %v4119_v59 = vmax.f32 %v4087_v20, 0.0 }
 0x1ef   :  { %v4086_v28 = vadd.f32 %v6897_v63, %v4049_v45  ;;  %v5380_v43 = vpop.f32.mrb[12].mxu0  ;;  %v4117_v13 = vmax.f32 %v4085_v57, 0.0 }
 0x1f0   :  { %v4120_v33 = vmax.f32 %v4088_v31, 0.0  ;;  %v5426_v8 = vadd.f32 %v5380_v43, %v6881_v55  ;;  %v3924_v1 = vpop.f32.mrb[13].mxu0 }
 0x1f1   :  { %v4118_v17 = vmax.f32 %v4086_v28, 0.0  ;;  %v5427_v21 = vadd.f32 %v3924_v1, %v6883_v4  ;;  %v5381_v56 = vpop.f32.mrb[14].mxu0 }
 0x1f2   :  { %v4683_v46 = vpack.c.bf16 %v4120_v33, %v4119_v59  ;;  %v4054_v53 = vmul.f32 %v5426_v8, %v6892_v41  ;;  %v5428_v9 = vadd.f32 %v5381_v56, %v6885_v5  ;;  %v3927_v23 = vpop.f32.mrb[15].mxu0 }
 0x1f3   :  { %v4678_v38 = vpack.c.bf16 %v4118_v17, %v4117_v13  ;;  %v4052_v32 = vmul.f32 %v5427_v21, %v6892_v41  ;;  %v5429_v27 = vadd.f32 %v3927_v23, %v6887_v15 }
 0x1f4   :  { %4739 = vst [vmem:[%s7019_s4 + $0x28] sm:$0xff] %v4683_v46   ;;  %v4091_v4 = vadd.f32 %v6897_v63, %v4054_v53  ;;  %v4055_v50 = vmul.f32 %v5428_v9, %v6892_v41 }
 0x1f5   :  { %v5192_v62 = vpop.f32.mrb[16].mxu1  ;;  %4738 = vst [vmem:[%s7019_s4 + $0x20] sm:$0xff] %v4678_v38   ;;  %v4089_v5 = vadd.f32 %v6897_v63, %v4052_v32  ;;  %v4053_v12 = vmul.f32 %v5429_v27, %v6892_v41 }
 0x1f6   :  { %v2456_v26 = vpop.f32.mrb[17].mxu1  ;;  %v4092_v15 = vadd.f32 %v6897_v63, %v4055_v50  ;;  %v4123_v11 = vmax.f32 %v4091_v4, 0.0 }
 0x1f7   :  { %v5193_v55 = vpop.f32.mrb[18].mxu1  ;;  %v4090_v7 = vadd.f32 %v6897_v63, %v4053_v12  ;;  %v5384_v22 = vpop.f32.mrb[16].mxu0  ;;  %v4121_v29 = vmax.f32 %v4089_v5, 0.0 }
 0x1f8   :  { %v2459_v44 = vpop.f32.mrb[19].mxu1  ;;  %v4124_v14 = vmax.f32 %v4092_v15, 0.0  ;;  %v5430_v47 = vadd.f32 %v5384_v22, %v5192_v62  ;;  %v3940_v3 = vpop.f32.mrb[17].mxu0 }
 0x1f9   :  { %v4122_v35 = vmax.f32 %v4090_v7, 0.0  ;;  %v5431_v18 = vadd.f32 %v3940_v3, %v2456_v26  ;;  %v5385_v30 = vpop.f32.mrb[18].mxu0 }
 0x1fa   :  { %v4693_v58 = vpack.c.bf16 %v4124_v14, %v4123_v11  ;;  %v4058_v54 = vmul.f32 %v5430_v47, %v6892_v41  ;;  %v5432_v6 = vadd.f32 %v5385_v30, %v5193_v55  ;;  %v3943_v36 = vpop.f32.mrb[19].mxu0 }
 0x1fb   :  { %v4688_v42 = vpack.c.bf16 %v4122_v35, %v4121_v29  ;;  %v4056_v34 = vmul.f32 %v5431_v18, %v6892_v41  ;;  %v5433_v37 = vadd.f32 %v3943_v36, %v2459_v44 }
 0x1fc   :  { %4741 = vst [vmem:[%s7019_s4 + $0x38] sm:$0xff] %v4693_v58   ;;  %v4095_v10 = vadd.f32 %v6897_v63, %v4058_v54  ;;  %v4059_v24 = vmul.f32 %v5432_v6, %v6892_v41 }
 0x1fd   :  { %v5196_v61 = vpop.f32.mrb[20].mxu1  ;;  %4740 = vst [vmem:[%s7019_s4 + $0x30] sm:$0xff] %v4688_v42   ;;  %v4093_v16 = vadd.f32 %v6897_v63, %v4056_v34  ;;  %v4057_v25 = vmul.f32 %v5433_v37, %v6892_v41 }
 0x1fe   :  { %v2472_v49 = vpop.f32.mrb[21].mxu1  ;;  %v4096_v51 = vadd.f32 %v6897_v63, %v4059_v24  ;;  %v4127_v48 = vmax.f32 %v4095_v10, 0.0 }
 0x1ff   :  { %v5197_v52 = vpop.f32.mrb[22].mxu1  ;;  %v4094_v40 = vadd.f32 %v6897_v63, %v4057_v25  ;;  %v5388_v19 = vpop.f32.mrb[20].mxu0  ;;  %v4125_v2 = vmax.f32 %v4093_v16, 0.0 }
 0x200   :  { %v2475_v0 = vpop.f32.mrb[23].mxu1  ;;  %v4128_v39 = vmax.f32 %v4096_v51, 0.0  ;;  %v5434_v60 = vadd.f32 %v5388_v19, %v5196_v61  ;;  %v3956_v20 = vpop.f32.mrb[21].mxu0 }
 0x201   :  { %v4126_v57 = vmax.f32 %v4094_v40, 0.0  ;;  %v5435_v45 = vadd.f32 %v3956_v20, %v2472_v49  ;;  %v5389_v31 = vpop.f32.mrb[22].mxu0 }
 0x202   :  { %v4703_v43 = vpack.c.bf16 %v4128_v39, %v4127_v48  ;;  %v4062_v59 = vmul.f32 %v5434_v60, %v6892_v41  ;;  %v5436_v33 = vadd.f32 %v5389_v31, %v5197_v52  ;;  %v3959_v8 = vpop.f32.mrb[23].mxu0 }
 0x203   :  { %v4698_v13 = vpack.c.bf16 %v4126_v57, %v4125_v2  ;;  %v4060_v17 = vmul.f32 %v5435_v45, %v6892_v41  ;;  %v5437_v21 = vadd.f32 %v3959_v8, %v2475_v0 }
 0x204   :  { %4743 = vst [vmem:[%s7019_s4 + $0x48] sm:$0xff] %v4703_v43   ;;  %v4099_v62 = vadd.f32 %v6897_v63, %v4062_v59  ;;  %v4063_v46 = vmul.f32 %v5436_v33, %v6892_v41 }
 0x205   :  { %v5200_v28 = vpop.f32.mrb[24].mxu1  ;;  %4742 = vst [vmem:[%s7019_s4 + $0x40] sm:$0xff] %v4698_v13   ;;  %v4097_v9 = vadd.f32 %v6897_v63, %v4060_v17  ;;  %v4061_v23 = vmul.f32 %v5437_v21, %v6892_v41 }
 0x206   :  { %v2488_v1 = vpop.f32.mrb[25].mxu1  ;;  %v4100_v26 = vadd.f32 %v6897_v63, %v4063_v46  ;;  %v4131_v27 = vmax.f32 %v4099_v62, 0.0 }
 0x207   :  { %v5201_v56 = vpop.f32.mrb[26].mxu1  ;;  %v4098_v38 = vadd.f32 %v6897_v63, %v4061_v23  ;;  %v5392_v32 = vpop.f32.mrb[24].mxu0  ;;  %v4129_v44 = vmax.f32 %v4097_v9, 0.0 }
 0x208   :  { %v2491_v53 = vpop.f32.mrb[27].mxu1  ;;  %v4132_v55 = vmax.f32 %v4100_v26, 0.0  ;;  %v5438_v4 = vadd.f32 %v5392_v32, %v5200_v28  ;;  %v3972_v50 = vpop.f32.mrb[25].mxu0 }
 0x209   :  { %v4130_v5 = vmax.f32 %v4098_v38, 0.0  ;;  %v5439_v12 = vadd.f32 %v3972_v50, %v2488_v1  ;;  %v5393_v15 = vpop.f32.mrb[26].mxu0 }
 0x20a   :  { %v4713_v22 = vpack.c.bf16 %v4132_v55, %v4131_v27  ;;  %v4066_v11 = vmul.f32 %v5438_v4, %v6892_v41  ;;  %v5440_v14 = vadd.f32 %v5393_v15, %v5201_v56  ;;  %v3975_v47 = vpop.f32.mrb[27].mxu0 }
 0x20b   :  { %v4708_v29 = vpack.c.bf16 %v4130_v5, %v4129_v44  ;;  %v4064_v35 = vmul.f32 %v5439_v12, %v6892_v41  ;;  %v5441_v18 = vadd.f32 %v3975_v47, %v2491_v53 }
 0x20c   :  { %4745 = vst [vmem:[%s7019_s4 + $0x58] sm:$0xff] %v4713_v22   ;;  %v4103_v61 = vadd.f32 %v6897_v63, %v4066_v11  ;;  %v4067_v58 = vmul.f32 %v5440_v14, %v6892_v41 }
 0x20d   :  { %v5204_v7 = vpop.f32.mrb[28].mxu1  ;;  %4744 = vst [vmem:[%s7019_s4 + $0x50] sm:$0xff] %v4708_v29   ;;  %v4101_v6 = vadd.f32 %v6897_v63, %v4064_v35  ;;  %v4065_v36 = vmul.f32 %v5441_v18, %v6892_v41 }
 0x20e   :  { %v2504_v3 = vpop.f32.mrb[29].mxu1  ;;  %v4104_v49 = vadd.f32 %v6897_v63, %v4067_v58  ;;  %v4135_v37 = vmax.f32 %v4103_v61, 0.0 }
 0x20f   :  { %v5205_v30 = vpop.f32.mrb[30].mxu1  ;;  %v4102_v42 = vadd.f32 %v6897_v63, %v4065_v36  ;;  %v5396_v34 = vpop.f32.mrb[28].mxu0  ;;  %v4133_v0 = vmax.f32 %v4101_v6, 0.0 }
 0x210   :  { %v2507_v54 = vpop.f32.mrb[31].mxu1  ;;  %v4136_v52 = vmax.f32 %v4104_v49, 0.0  ;;  %v5442_v10 = vadd.f32 %v5396_v34, %v5204_v7  ;;  %v3988_v24 = vpop.f32.mrb[29].mxu0 }
 0x211   :  { %v4134_v16 = vmax.f32 %v4102_v42, 0.0  ;;  %v5443_v25 = vadd.f32 %v3988_v24, %v2504_v3  ;;  %v5397_v51 = vpop.f32.mrb[30].mxu0 }
 0x212   :  { %v4723_v40 = vpack.c.bf16 %v4136_v52, %v4135_v37  ;;  %v4070_v19 = vmul.f32 %v5442_v10, %v6892_v41  ;;  %v5444_v48 = vadd.f32 %v5397_v51, %v5205_v30  ;;  %v3991_v39 = vpop.f32.mrb[31].mxu0 }
 0x213   :  { %v4718_v60 = vpack.c.bf16 %v4134_v16, %v4133_v0  ;;  %v4068_v20 = vmul.f32 %v5443_v25, %v6892_v41  ;;  %v5445_v2 = vadd.f32 %v3991_v39, %v2507_v54 }
 0x214   :  { %4747 = vst [vmem:[%s7019_s4 + $0x68] sm:$0xff] %v4723_v40   ;;  %v4107_v57 = vadd.f32 %v6897_v63, %v4070_v19  ;;  %v4071_v45 = vmul.f32 %v5444_v48, %v6892_v41 }
 0x215   :  { %4746 = vst [vmem:[%s7019_s4 + $0x60] sm:$0xff] %v4718_v60   ;;  %v4105_v31 = vadd.f32 %v6897_v63, %v4068_v20  ;;  %v4069_v28 = vmul.f32 %v5445_v2, %v6892_v41 }
 0x216   :  { %v4108_v43 = vadd.f32 %v6897_v63, %v4071_v45  ;;  %v4139_v33 = vmax.f32 %v4107_v57, 0.0 }
 0x217   :  { %v4106_v59 = vadd.f32 %v6897_v63, %v4069_v28  ;;  %v4137_v1 = vmax.f32 %v4105_v31, 0.0 }
 0x218   :  { %v4140_v8 = vmax.f32 %v4108_v43, 0.0 }
 0x219   :  { %v4138_v13 = vmax.f32 %v4106_v59, 0.0 }
 0x21a   :  { %v4733_v17 = vpack.c.bf16 %v4140_v8, %v4139_v33 }
 0x21b   :  { %v4728_v21 = vpack.c.bf16 %v4138_v13, %v4137_v1 }
 0x21c   :  { %4749 = vst [vmem:[%s7019_s4 + $0x78] sm:$0xff] %v4733_v17  }
 0x21d   :  { %4748 = vst [vmem:[%s7019_s4 + $0x70] sm:$0xff] %v4728_v21  }

// kernel: bottleneck_forward.8
= control target key start
LH: loop header
LB: loop body
LE: loop exit
PB: predicated region body
PF: predicated region fallthrough
CT: control target
= control target key end

     0   :  { %vm1657_vm0 = vsmask.f32 7424  ;;  %vm2986_vm1 = vsmask.f32 3328  ;;  %vm3756_vm2 = vcmask 1042432   ;;  %vm4406_vm3 = vcmask 1040384   ;;  %s7022_s0 = inlined_call_operand.vmem [shape: bf16[4,272,128], index: 0, kind: input, shape index: {}, may-alias: {0,1}]   ;;  %s7023_s1 = inlined_call_operand.vmem [shape: bf16[4,272,128], index: 1, kind: input, shape index: {}, may-alias: {0,1}]   ;;  %s7024_s2 = inlined_call_operand.vmem [shape: bf16[9,128,128], index: 2, kind: input, shape index: {}]   ;;  %s7025_s3 = inlined_call_operand.vmem [shape: f32[256,1], index: 3, kind: input, shape index: {}]   ;;  %s7026_s4 = inlined_call_operand.vmem [shape: f32[1,128], index: 4, kind: input, shape index: {}]   ;;  %s7027_s5 = inlined_call_operand.vmem [shape: f32[1,128], index: 5, kind: input, shape index: {}]   ;;  %s7028_s6 = inlined_call_operand.vmem [shape: f32[2,128], index: 6, kind: output, shape index: {}]  }
   0x1   :  { %v5621_v0 = vld [vmem:[%s7024_s2 + $0x40] sm:$0xff]   ;;  %v5623_v2 = vld [vmem:[%s7024_s2 + $0x48] sm:$0xff]   ;;  %v5625_v4 = vld [vmem:[%s7024_s2 + $0x50] sm:$0xff]  }
   0x2   :  { %v5622_v1 = vld [vmem:[%s7024_s2 + $0x100] sm:$0xff]   ;;  %4913 = vmatprep.subr.bf16.mxu1 %v5621_v0  ;;  %v5624_v3 = vld [vmem:[%s7024_s2 + $0x108] sm:$0xff]   ;;  %v5626_v5 = vld [vmem:[%s7024_s2 + $0x110] sm:$0xff]  }
   0x3   :  { %5105 = vmatprep.subr.bf16.mxu0 %v5622_v1  ;;  %4914 = vmatpush3.bf16.msra.mxu1 %v5621_v0  ;;  %v5627_v6 = vld [vmem:[%s7024_s2 + $0x58] sm:$0xff]   ;;  %v5629_v8 = vld [vmem:[%s7024_s2 + $0x60] sm:$0xff]   ;;  %v5631_v10 = vld [vmem:[%s7024_s2 + $0x68] sm:$0xff]  }
   0x4   :  { %5106 = vmatpush3.bf16.msra.mxu0 %v5622_v1  ;;  %4915 = vmatprep.subr.bf16.mxu1 %v5623_v2  ;;  %v5628_v7 = vld [vmem:[%s7024_s2 + $0x118] sm:$0xff]   ;;  %v5630_v9 = vld [vmem:[%s7024_s2 + $0x120] sm:$0xff]   ;;  %v92_v11 = vld [vmem:[%s7022_s0 + $0x88] sm:$0xff]  }
   0x5   :  { %5107 = vmatprep.subr.bf16.mxu0 %v5624_v3  ;;  %v220_v12 = vld [vmem:[%s7022_s0 + $0x198] sm:$0xff]   ;;  %93 = vst [vmem:[#allocation4 + $0x80] sm:$0xff] %v92_v11   ;;  %v96_v13 = vld [vmem:[%s7022_s0 + $0x90] sm:$0xff]   ;;  %v5632_v14 = vld [vmem:[%s7024_s2 + $0x128] sm:$0xff]  }
   0x6   :  { %221 = vst [vmem:[#allocation4 + $0x180] sm:$0xff] %v220_v12   ;;  %97 = vst [vmem:[#allocation4 + $0x88] sm:$0xff] %v96_v13   ;;  %v224_v15 = vld [vmem:[%s7022_s0 + $0x1a0] sm:$0xff]   ;;  %v5633_v16 = vld [vmem:[%s7024_s2 + $0x70] sm:$0xff]  }
   0x7   :  { %4916 = vmatpush3.bf16.msra.mxu1 %v5623_v2  ;;  %225 = vst [vmem:[#allocation4 + $0x188] sm:$0xff] %v224_v15   ;;  %v100_v17 = vld [vmem:[%s7022_s0 + $0x98] sm:$0xff]   ;;  %v228_v18 = vld [vmem:[%s7022_s0 + $0x1a8] sm:$0xff]   ;;  %v104_v19 = vld [vmem:[%s7022_s0 + $0xa0] sm:$0xff]  }
   0x8   :  { %5108 = vmatpush3.bf16.msra.mxu0 %v5624_v3  ;;  %4917 = vmatprep.subr.bf16.mxu1 %v5625_v4  ;;  %101 = vst [vmem:[#allocation4 + $0x90] sm:$0xff] %v100_v17   ;;  %v5634_v20 = vld [vmem:[%s7024_s2 + $0x130] sm:$0xff]   ;;  %229 = vst [vmem:[#allocation4 + $0x190] sm:$0xff] %v228_v18   ;;  %v5635_v22 = vld [vmem:[%s7024_s2 + $0x78] sm:$0xff]  }
   0x9   :  { %5109 = vmatprep.subr.bf16.mxu0 %v5626_v5  ;;  %105 = vst [vmem:[#allocation4 + $0x98] sm:$0xff] %v104_v19   ;;  %v232_v21 = vld [vmem:[%s7022_s0 + $0x1b0] sm:$0xff]   ;;  %v5636_v25 = vld [vmem:[%s7024_s2 + $0x138] sm:$0xff]   ;;  %v5640_v26 = vld [vmem:[%s7024_s2] sm:$0xff]  }
   0xa   :  { %233 = vst [vmem:[#allocation4 + $0x198] sm:$0xff] %v232_v21   ;;  %v5642_v27 = vld [vmem:[%s7024_s2 + $0x140] sm:$0xff]   ;;  %v5643_v30 = vld [vmem:[%s7024_s2 + $0x148] sm:$0xff]   ;;  %v236_v34 = vld [vmem:[%s7022_s0 + $0x1b8] sm:$0xff]  }
   0xb   :  { %4918 = vmatpush3.bf16.msra.mxu1 %v5625_v4  ;;  %v108_v33 = vld [vmem:[%s7022_s0 + $0xa8] sm:$0xff]   ;;  %v112_v35 = vld [vmem:[%s7022_s0 + $0xb0] sm:$0xff]   ;;  %237 = vst [vmem:[#allocation4 + $0x1a0] sm:$0xff] %v236_v34   ;;  %v240_v37 = vld [vmem:[%s7022_s0 + $0x1c0] sm:$0xff]  }
   0xc   :  { %5110 = vmatpush3.bf16.msra.mxu0 %v5626_v5  ;;  %4919 = vmatprep.subr.bf16.mxu1 %v5627_v6  ;;  %v5894_v23 = vld [vmem:[#allocation4 + $0x80] sm:$0xff]   ;;  %109 = vst [vmem:[#allocation4 + $0xa0] sm:$0xff] %v108_v33   ;;  %113 = vst [vmem:[#allocation4 + $0xa8] sm:$0xff] %v112_v35   ;;  %v5649_v38 = vld [vmem:[%s7024_s2 + $0x150] sm:$0xff]  }
   0xd   :  { %5111 = vmatprep.subr.bf16.mxu0 %v5628_v7  ;;  %v5638_v24 = vld [vmem:[#allocation4 + $0x180] sm:$0xff]   ;;  %4929 = vmatprep.mubr.bf16.mxu1 %v5894_v23  ;;  %v5906_v28 = vld [vmem:[#allocation4 + $0x88] sm:$0xff]   ;;  %241 = vst [vmem:[#allocation4 + $0x1a8] sm:$0xff] %v240_v37   ;;  %v116_v41 = vld [vmem:[%s7022_s0 + $0xb8] sm:$0xff]   ;;  %v3331_v12 = vshrl.u32 %v5894_v23, 16 }
   0xe   :  { %5121 = vmatprep.mubr.bf16.mxu0 %v5638_v24  ;;  %v5641_v29 = vld [vmem:[#allocation4 + $0x188] sm:$0xff]   ;;  %v120_v43 = vld [vmem:[%s7022_s0 + $0xc0] sm:$0xff]   ;;  %117 = vst [vmem:[#allocation4 + $0xb0] sm:$0xff] %v116_v41   ;;  %v5650_v45 = vld [vmem:[%s7024_s2 + $0x158] sm:$0xff]   ;;  %v3339_v24 = vshrl.u32 %v5906_v28, 16 }
   0xf   :  { %4920 = vmatpush3.bf16.msra.mxu1 %v5627_v6  ;;  %v5911_v31 = vld [vmem:[#allocation4 + $0x90] sm:$0xff]   ;;  %v5647_v36 = vld [vmem:[%s7024_s2 + $0x8] sm:$0xff]   ;;  %121 = vst [vmem:[#allocation4 + $0xb8] sm:$0xff] %v120_v43   ;;  %v5656_v50 = vld [vmem:[%s7024_s2 + $0x160] sm:$0xff]  }
  0x10   :  { %5112 = vmatpush3.bf16.msra.mxu0 %v5628_v7  ;;  %4921 = vmatprep.subr.bf16.mxu1 %v5629_v8  ;;  %v5645_v32 = vld [vmem:[#allocation4 + $0x190] sm:$0xff]   ;;  %v5933_v39 = vld [vmem:[#allocation4 + $0x98] sm:$0xff]   ;;  %v244_v42 = vld [vmem:[%s7022_s0 + $0x1c8] sm:$0xff]   ;;  %v3348_v13 = vshrl.u32 %v5911_v31, 16 }
  0x11   :  { %5113 = vmatprep.subr.bf16.mxu0 %v5630_v9  ;;  %v5654_v40 = vld [vmem:[%s7024_s2 + $0x10] sm:$0xff]   ;;  %v5648_v44 = vld [vmem:[#allocation4 + $0x198] sm:$0xff]   ;;  %245 = vst [vmem:[#allocation4 + $0x1b0] sm:$0xff] %v244_v42   ;;  %v5657_v55 = vld [vmem:[%s7024_s2 + $0x168] sm:$0xff]  }
  0x12   :  { %v248_v46 = vld [vmem:[%s7022_s0 + $0x1d0] sm:$0xff]   ;;  %v5652_v48 = vld [vmem:[#allocation4 + $0x1a0] sm:$0xff]   ;;  %v5661_v49 = vld [vmem:[%s7024_s2 + $0x18] sm:$0xff]  }
  0x13   :  { %4922 = vmatpush3.bf16.msra.mxu1 %v5629_v8  ;;  %v5953_v47 = vld [vmem:[#allocation4 + $0xa0] sm:$0xff]   ;;  %249 = vst [vmem:[#allocation4 + $0x1b8] sm:$0xff] %v248_v46   ;;  %v5963_v51 = vld [vmem:[#allocation4 + $0xa8] sm:$0xff]   ;;  %v160_v58 = vld [vmem:[%s7022_s0 + $0x118] sm:$0xff]  }
  0x14   :  { %5114 = vmatpush3.bf16.msra.mxu0 %v5630_v9  ;;  %4923 = vmatprep.subr.bf16.mxu1 %v5631_v10  ;;  %v5655_v52 = vld [vmem:[#allocation4 + $0x1a8] sm:$0xff]   ;;  %161 = vst [vmem:[#allocation4 + $0x108] sm:$0xff] %v160_v58   ;;  %v5669_v62 = vld [vmem:[%s7024_s2 + $0x20] sm:$0xff]   ;;  %v132_v1 = vld [vmem:[%s7022_s0 + $0xd8] sm:$0xff]  }
  0x15   :  { %5115 = vmatprep.subr.bf16.mxu0 %v5632_v14  ;;  %v5965_v53 = vld [vmem:[#allocation4 + $0xb0] sm:$0xff]   ;;  %v124_v56 = vld [vmem:[%s7022_s0 + $0xc8] sm:$0xff]   ;;  %v164_v63 = vld [vmem:[%s7022_s0 + $0x120] sm:$0xff]   ;;  %133 = vst [vmem:[#allocation4 + $0xd0] sm:$0xff] %v132_v1   ;;  %v3375_v1 = vshrl.u32 %v5963_v51, 16 }
  0x16   :  { %v156_v57 = vld [vmem:[%s7022_s0 + $0x110] sm:$0xff]   ;;  %125 = vst [vmem:[#allocation4 + $0xc0] sm:$0xff] %v124_v56   ;;  %v5987_v61 = vld [vmem:[#allocation4 + $0xb8] sm:$0xff]   ;;  %165 = vst [vmem:[#allocation4 + $0x110] sm:$0xff] %v164_v63  }
  0x17   :  { %4924 = vmatpush3.bf16.msra.mxu1 %v5631_v10  ;;  %v5663_v59 = vld [vmem:[%s7024_s2 + $0x170] sm:$0xff]   ;;  %157 = vst [vmem:[#allocation4 + $0x100] sm:$0xff] %v156_v57   ;;  %v168_v2 = vld [vmem:[%s7022_s0 + $0x128] sm:$0xff]   ;;  %v136_v3 = vld [vmem:[%s7022_s0 + $0xe0] sm:$0xff]   ;;  %v3366_v57 = vshrl.u32 %v5953_v47, 16 }
  0x18   :  { %5116 = vmatpush3.bf16.msra.mxu0 %v5632_v14  ;;  %4925 = vmatprep.subr.bf16.mxu1 %v5633_v16  ;;  %v5659_v54 = vld [vmem:[#allocation4 + $0x1b0] sm:$0xff]   ;;  %169 = vst [vmem:[#allocation4 + $0x118] sm:$0xff] %v168_v2   ;;  %137 = vst [vmem:[#allocation4 + $0xd8] sm:$0xff] %v136_v3   ;;  %v5675_v4 = vld [vmem:[%s7024_s2 + $0x28] sm:$0xff]  }
  0x19   :  { %5117 = vmatprep.subr.bf16.mxu0 %v5634_v20  ;;  %v128_v60 = vld [vmem:[%s7022_s0 + $0xd0] sm:$0xff]   ;;  %v5664_v6 = vld [vmem:[%s7024_s2 + $0x178] sm:$0xff]   ;;  %v140_v7 = vld [vmem:[%s7022_s0 + $0xe8] sm:$0xff]  }
  0x1a   :  { %129 = vst [vmem:[#allocation4 + $0xc8] sm:$0xff] %v128_v60   ;;  %v5662_v0 = vld [vmem:[#allocation4 + $0x1b8] sm:$0xff]   ;;  %v172_v5 = vld [vmem:[%s7022_s0 + $0x130] sm:$0xff]   ;;  %141 = vst [vmem:[#allocation4 + $0xe0] sm:$0xff] %v140_v7  }
  0x1b   :  { %4926 = vmatpush3.bf16.msra.mxu1 %v5633_v16  ;;  %173 = vst [vmem:[#allocation4 + $0x120] sm:$0xff] %v172_v5   ;;  %v176_v8 = vld [vmem:[%s7022_s0 + $0x138] sm:$0xff]   ;;  %v144_v9 = vld [vmem:[%s7022_s0 + $0xf0] sm:$0xff]   ;;  %v5671_v11 = vld [vmem:[%s7024_s2 + $0x180] sm:$0xff]   ;;  %v3351_v16 = vshll.u32 %v5911_v31, 16 }
  0x1c   :  { %5118 = vmatpush3.bf16.msra.mxu0 %v5634_v20  ;;  %4927 = vmatprep.subr.bf16.mxu1 %v5635_v22  ;;  %177 = vst [vmem:[#allocation4 + $0x128] sm:$0xff] %v176_v8   ;;  %145 = vst [vmem:[#allocation4 + $0xe8] sm:$0xff] %v144_v9   ;;  %v5667_v15 = vld [vmem:[#allocation4 + $0x108] sm:$0xff]   ;;  %v180_v63 = vld [vmem:[%s7022_s0 + $0x140] sm:$0xff]   ;;  %v3341_v9 = vrot.slane %v3339_v24, 4 }
  0x1d   :  { %5119 = vmatprep.subr.bf16.mxu0 %v5636_v25  ;;  %v6023_v10 = vld [vmem:[#allocation4 + $0xc0] sm:$0xff]   ;;  %v2588_v20 = vshll.u32 %v5667_v15, 16  ;;  %v2592_v21 = vshrl.u32 %v5667_v15, 16  ;;  %v3353_v34 = vrot.slane %v3351_v16, 5  ;;  %181 = vst [vmem:[#allocation4 + $0x130] sm:$0xff] %v180_v63   ;;  %v5683_v5 = vld [vmem:[%s7024_s2 + $0x190] sm:$0xff]  }
  0x1e   :  { %v5666_v14 = vld [vmem:[#allocation4 + $0x100] sm:$0xff]   ;;  %v5687_v15 = vld [vmem:[%s7024_s2 + $0x38] sm:$0xff]   ;;  %v188_v16 = vld [vmem:[%s7022_s0 + $0x150] sm:$0xff]  }
  0x1f   :  { %4928 = vmatpush3.bf16.msra.mxu1 %v5635_v22  ;;  %v2581_v18 = vshrl.u32 %v5666_v14, 16  ;;  %v2583_v19 = vshll.u32 %v5666_v14, 16  ;;  %v3334_v22 = vshll.u32 %v5894_v23, 16  ;;  %v5673_v33 = vld [vmem:[#allocation4 + $0x118] sm:$0xff]   ;;  %v5677_v43 = vld [vmem:[%s7024_s2 + $0x188] sm:$0xff]   ;;  %189 = vst [vmem:[#allocation4 + $0x140] sm:$0xff] %v188_v16  }
  0x20   :  { %5120 = vmatpush3.bf16.msra.mxu0 %v5636_v25  ;;  %4961 = vmatprep.subr.bf16.mxu1 %v5640_v26  ;;  %v5670_v25 = vld [vmem:[#allocation4 + $0x110] sm:$0xff]   ;;  %v184_v7 = vld [vmem:[%s7022_s0 + $0x148] sm:$0xff]  }
  0x21   :  { %5153 = vmatprep.subr.bf16.mxu0 %v5642_v27  ;;  %v6032_v17 = vld [vmem:[#allocation4 + $0xc8] sm:$0xff]   ;;  %v2600_v23 = vshrl.u32 %v5670_v25, 16  ;;  %v6053_v56 = vld [vmem:[#allocation4 + $0xe0] sm:$0xff]   ;;  %v3336_v8 = vrot.slane %v3334_v22, 5  ;;  %185 = vst [vmem:[#allocation4 + $0x138] sm:$0xff] %v184_v7   ;;  %v3384_v7 = vshrl.u32 %v5965_v53, 16 }
  0x22   :  { %4930 = vmatmul.mubr.bf16.vlgmr.msra.gmra.mrb[0].mxu1 %v5906_v28  ;;  %v5676_v42 = vld [vmem:[#allocation4 + $0x120] sm:$0xff]  }
  0x23   :  { %5122 = vmatmul.mubr.bf16.vlgmr.msra.gmra.mrb[0].mxu0 %v5641_v29  ;;  %4962 = vmatpush3.bf16.msra.mxu1 %v5640_v26  ;;  %v6036_v26 = vld [vmem:[#allocation4 + $0xd0] sm:$0xff]   ;;  %v2590_v29 = vrot.slane %v2588_v20, 1  ;;  %v28_v22 = vld [vmem:[%s7022_s0] sm:$0xff]  }
  0x24   :  { %5154 = vmatpush3.bf16.msra.mxu0 %v5642_v27  ;;  %4933 = vmatprep.mubr.bf16.mxu1 %v5911_v31  ;;  %v2585_v27 = vrot.slane %v2583_v19, 1  ;;  %v3350_v31 = vrot.slane %v3348_v13, 4  ;;  %29 = vst [vmem:[#allocation4] sm:$0xff] %v28_v22  }
  0x25   :  { %5155 = vmatprep.subr.bf16.mxu0 %v5643_v30  ;;  %5125 = vmatprep.mubr.bf16.mxu0 %v5645_v32  ;;  %v2596_v32 = vshll.u32 %v5670_v25, 16  ;;  %v3368_v25 = vrot.slane %v3366_v57, 4 }
  0x26   :  { %4963 = vmatprep.subr.bf16.mxu1 %v5647_v36  ;;  %v2586_v35 = vor.u32 %v2585_v27, %v2581_v18  ;;  %v3354_v14 = vor.u32 %v3353_v34, %v3350_v31  ;;  %v32_v31 = vld [vmem:[%s7022_s0 + $0x8] sm:$0xff]   ;;  %v196_v34 = vld [vmem:[%s7022_s0 + $0x160] sm:$0xff]  }
  0x27   :  { %4964 = vmatpush3.bf16.msra.mxu1 %v5647_v36  ;;  %v2594_v36 = vor.u32 %v2592_v21, %v2590_v29  ;;  %v2598_v37 = vrot.slane %v2596_v32, 1  ;;  %v5689_v21 = vld [vmem:[%s7024_s2 + $0x198] sm:$0xff]   ;;  %33 = vst [vmem:[#allocation4 + $0x8] sm:$0xff] %v32_v31   ;;  %197 = vst [vmem:[#allocation4 + $0x150] sm:$0xff] %v196_v34   ;;  %v212_v34 = vld [vmem:[%s7022_s0 + $0x180] sm:$0xff]  }
  0x28   :  { %5156 = vmatpush3.bf16.msra.mxu0 %v5643_v30  ;;  %4965 = vmatprep.subr.bf16.mxu1 %v5654_v40  ;;  %v3342_v30 = vshll.u32 %v5906_v28, 16  ;;  %v2591_v41 = vsel %vm1657_vm0, %v2586_v35, %v2590_v29  ;;  %v2608_v28 = vshrl.u32 %v5673_v33, 16  ;;  %213 = vst [vmem:[#allocation4 + $0x170] sm:$0xff] %v212_v34  }
  0x29   :  { %5157 = vmatprep.subr.bf16.mxu0 %v5649_v38 }
  0x2a   :  { %4934 = vmatmul.mubr.bf16.gmra.mrb[4].mxu1 %v5933_v39  ;;  %v3344_v13 = vrot.slane %v3342_v30, 5  ;;  %v192_v30 = vld [vmem:[%s7022_s0 + $0x158] sm:$0xff]  }
  0x2b   :  { %5126 = vmatmul.mubr.bf16.gmra.mrb[4].mxu0 %v5648_v44  ;;  %4937 = vmatprep.mubr.bf16.mxu1 %v5953_v47  ;;  %v2599_v44 = vsel %vm1657_vm0, %v2594_v36, %v2598_v37  ;;  %193 = vst [vmem:[#allocation4 + $0x148] sm:$0xff] %v192_v30   ;;  %v3396_v30 = vshll.u32 %v5987_v61, 16 }
  0x2c   :  { %5158 = vmatpush3.bf16.msra.mxu0 %v5649_v38  ;;  %5129 = vmatprep.mubr.bf16.mxu0 %v5652_v48  ;;  %v2604_v38 = vshll.u32 %v5673_v33, 16  ;;  %v6047_v48 = vld [vmem:[#allocation4 + $0xd8] sm:$0xff]   ;;  %v3345_v24 = vor.u32 %v3344_v13, %v3341_v9  ;;  %v36_v9 = vld [vmem:[%s7022_s0 + $0x10] sm:$0xff]  }
  0x2d   :  { %5159 = vmatprep.subr.bf16.mxu0 %v5650_v45  ;;  %4966 = vmatpush3.bf16.msra.mxu1 %v5654_v40  ;;  %v3357_v40 = vshrl.u32 %v5933_v39, 16  ;;  %v6106_v33 = vld [vmem:[%s7024_s2 + $0x80] sm:$0xff]   ;;  %37 = vst [vmem:[#allocation4 + $0x10] sm:$0xff] %v36_v9  }
  0x2e   :  { %4967 = vmatprep.subr.bf16.mxu1 %v5661_v49  ;;  %v2606_v46 = vrot.slane %v2604_v38, 1  ;;  %v6115_v36 = vsel %vm2986_vm1, %v3345_v24, %v3354_v14  ;;  %v5682_v38 = vld [vmem:[#allocation4 + $0x130] sm:$0xff]  }
  0x2f   :  { %v3359_v19 = vrot.slane %v3357_v40, 4 }
  0x30   :  { %5160 = vmatpush3.bf16.msra.mxu0 %v5650_v45  ;;  %v2602_v45 = vor.u32 %v2600_v23, %v2598_v37  ;;  %v3377_v37 = vrot.slane %v3375_v1, 4 }
  0x31   :  { %5161 = vmatprep.subr.bf16.mxu0 %v5656_v50  ;;  %4968 = vmatpush3.bf16.msra.mxu1 %v5661_v49  ;;  %v2612_v49 = vshll.u32 %v5676_v42, 16 }
  0x32   :  { %4938 = vmatmul.mubr.bf16.gmra.mrb[8].mxu1 %v5963_v51  ;;  %4969 = vmatprep.subr.bf16.mxu1 %v5669_v62  ;;  %v5691_v1 = vld [vmem:[#allocation4 + $0x148] sm:$0xff]  }
  0x33   :  { %5130 = vmatmul.mubr.bf16.gmra.mrb[8].mxu0 %v5655_v52  ;;  %4941 = vmatprep.mubr.bf16.mxu1 %v5965_v53  ;;  %v3360_v52 = vshll.u32 %v5933_v39, 16  ;;  %v2614_v58 = vrot.slane %v2612_v49, 1  ;;  %v5681_v39 = vld [vmem:[%s7024_s2 + $0x30] sm:$0xff]   ;;  %v5685_v49 = vld [vmem:[#allocation4 + $0x138] sm:$0xff]   ;;  %v2656_v16 = vshrl.u32 %v5691_v1, 16 }
  0x34   :  { %5162 = vmatpush3.bf16.msra.mxu0 %v5656_v50  ;;  %5133 = vmatprep.mubr.bf16.mxu0 %v5659_v54  ;;  %v6049_v50 = vld [vmem:[#allocation4 + $0x128] sm:$0xff]   ;;  %v2607_v54 = vsel %vm1657_vm0, %v2602_v45, %v2606_v46  ;;  %v2636_v57 = vshll.u32 %v5685_v49, 16 }
  0x35   :  { %5163 = vmatprep.subr.bf16.mxu0 %v5657_v55  ;;  %4970 = vmatpush3.bf16.msra.mxu1 %v5669_v62  ;;  %v2620_v60 = vshll.u32 %v6049_v50, 16  ;;  %v3369_v62 = vshll.u32 %v5953_v47, 16  ;;  %v3362_v20 = vrot.slane %v3360_v52, 5  ;;  %v2624_v29 = vshrl.u32 %v6049_v50, 16 }
  0x36   :  { %4971 = vmatprep.subr.bf16.mxu1 %v5675_v4  ;;  %v2632_v50 = vshrl.u32 %v5682_v38, 16 }
  0x37   :  { %v2622_v3 = vrot.slane %v2620_v60, 1  ;;  %v3371_v27 = vrot.slane %v3369_v62, 5  ;;  %v3363_v32 = vor.u32 %v3362_v20, %v3359_v19  ;;  %v2638_v62 = vrot.slane %v2636_v57, 1  ;;  %v5699_v19 = vld [vmem:[%s7024_s2 + $0x88] sm:$0xff]   ;;  %v204_v20 = vld [vmem:[%s7022_s0 + $0x170] sm:$0xff]  }
  0x38   :  { %5164 = vmatpush3.bf16.msra.mxu0 %v5657_v55  ;;  %v2610_v55 = vor.u32 %v2608_v28, %v2606_v46  ;;  %205 = vst [vmem:[#allocation4 + $0x160] sm:$0xff] %v204_v20  }
  0x39   :  { %5165 = vmatprep.subr.bf16.mxu0 %v5663_v59  ;;  %4972 = vmatpush3.bf16.msra.mxu1 %v5675_v4  ;;  %v3378_v4 = vshll.u32 %v5963_v51, 16  ;;  %v3372_v23 = vor.u32 %v3371_v27, %v3368_v25  ;;  %v6118_v40 = vsel %vm2986_vm1, %v3354_v14, %v3363_v32  ;;  %v44_v25 = vld [vmem:[%s7022_s0 + $0x20] sm:$0xff]   ;;  %v3393_v27 = vshrl.u32 %v5987_v61, 16 }
  0x3a   :  { %4942 = vmatmul.mubr.bf16.gmra.mrb[12].mxu1 %v5987_v61  ;;  %v2615_v47 = vsel %vm1657_vm0, %v2610_v55, %v2614_v58  ;;  %4973 = vmatprep.subr.bf16.mxu1 %v5681_v39  ;;  %45 = vst [vmem:[#allocation4 + $0x20] sm:$0xff] %v44_v25   ;;  %v5707_v61 = vld [vmem:[%s7024_s2 + $0x1b0] sm:$0xff]  }
  0x3b   :  { %5134 = vmatmul.mubr.bf16.gmra.mrb[12].mxu0 %v5662_v0  ;;  %4945 = vmatprep.mubr.bf16.mxu1 %v6023_v10  ;;  %v3333_v0 = vrot.slane %v3331_v12, 4  ;;  %v152_v12 = vld [vmem:[%s7022_s0 + $0x100] sm:$0xff]   ;;  %v6126_v28 = vsel %vm2986_vm1, %v3363_v32, %v3372_v23 }
  0x3c   :  { %5166 = vmatpush3.bf16.msra.mxu0 %v5663_v59  ;;  %5169 = vmatprep.mubr.bf16.mxu0 %v2591_v41  ;;  %v2616_v59 = vshrl.u32 %v5676_v42, 16  ;;  %153 = vst [vmem:[#allocation4 + $0xf8] sm:$0xff] %v152_v12   ;;  %v3380_v41 = vrot.slane %v3378_v4, 5  ;;  %v5695_v42 = vld [vmem:[%s7024_s2 + $0x1a0] sm:$0xff]   ;;  %v40_v12 = vld [vmem:[%s7022_s0 + $0x18] sm:$0xff]  }
  0x3d   :  { %5167 = vmatprep.subr.bf16.mxu0 %v5664_v6  ;;  %4974 = vmatpush3.bf16.msra.mxu1 %v5681_v39  ;;  %v3337_v18 = vor.u32 %v3336_v8, %v3333_v0  ;;  %v2640_v39 = vshrl.u32 %v5685_v49, 16  ;;  %v6140_v0 = vld [vmem:[#allocation4] sm:$0xff]   ;;  %41 = vst [vmem:[#allocation4 + $0x18] sm:$0xff] %v40_v12   ;;  %v6200_v49 = vld [vmem:[#allocation4 + $0x10] sm:$0xff]  }
  0x3e   :  { %v2618_v2 = vor.u32 %v2616_v59, %v2614_v58  ;;  %4975 = vmatprep.subr.bf16.mxu1 %v5687_v15  ;;  %v6130_v46 = vor.u32 %v3380_v41, %v3377_v37  ;;  %v5688_v58 = vld [vmem:[#allocation4 + $0x140] sm:$0xff]   ;;  %v5705_v37 = vld [vmem:[%s7024_s2 + $0x90] sm:$0xff]  }
  0x3f   :  { %v6112_v35 = vsel %vm2986_vm1, %v3337_v18, %v3345_v24  ;;  %v2644_v63 = vshll.u32 %v5688_v58, 16  ;;  %v2642_v4 = vor.u32 %v2640_v39, %v2638_v62  ;;  %v5701_v24 = vld [vmem:[%s7024_s2 + $0x1a8] sm:$0xff]   ;;  %v52_v41 = vld [vmem:[%s7022_s0 + $0x30] sm:$0xff]  }
  0x40   :  { %5168 = vmatpush3.bf16.msra.mxu0 %v5664_v6  ;;  %v148_v6 = vld [vmem:[%s7022_s0 + $0xf8] sm:$0xff]   ;;  %v2623_v51 = vsel %vm1657_vm0, %v2618_v2, %v2622_v3  ;;  %v6137_v55 = vsel %vm2986_vm1, %v3372_v23, %v6130_v46  ;;  %v2648_v2 = vshrl.u32 %v5688_v58, 16  ;;  %v3386_v23 = vrot.slane %v3384_v7, 4  ;;  %53 = vst [vmem:[#allocation4 + $0x30] sm:$0xff] %v52_v41   ;;  %v5700_v39 = vld [vmem:[#allocation4 + $0x160] sm:$0xff]  }
  0x41   :  { %5201 = vmatprep.subr.bf16.mxu0 %v5671_v11  ;;  %149 = vst [vmem:[#allocation4 + $0xf0] sm:$0xff] %v148_v6   ;;  %4976 = vmatpush3.bf16.msra.mxu1 %v5687_v15  ;;  %v5694_v6 = vld [vmem:[#allocation4 + $0x150] sm:$0xff]   ;;  %v6156_v15 = vld [vmem:[#allocation4 + $0x8] sm:$0xff]   ;;  %v3398_v58 = vrot.slane %v3396_v30, 5  ;;  %v2680_v7 = vshrl.u32 %v5700_v39, 16  ;;  %v60_v41 = vld [vmem:[%s7022_s0 + $0x40] sm:$0xff]  }
  0x42   :  { %4946 = vmatmul.mubr.bf16.gmra.mrb[16].mxu1 %v6032_v17  ;;  %5009 = vmatprep.subr.bf16.mxu1 %v6106_v33  ;;  %v2660_v18 = vshll.u32 %v5694_v6, 16  ;;  %61 = vst [vmem:[#allocation4 + $0x40] sm:$0xff] %v60_v41  }
  0x43   :  { %4949 = vmatprep.mubr.bf16.mxu1 %v6036_v26  ;;  %5170 = vmatmul.mubr.bf16.vlgmr.msra.gmra.mrb[0].mxu0 %v2599_v44  ;;  %v2628_v44 = vshll.u32 %v5682_v38, 16  ;;  %v2664_v38 = vshrl.u32 %v5694_v6, 16 }
  0x44   :  { %5202 = vmatpush3.bf16.msra.mxu0 %v5671_v11  ;;  %5173 = vmatprep.mubr.bf16.mxu0 %v2607_v54  ;;  %v6079_v11 = vld [vmem:[#allocation4 + $0xe8] sm:$0xff]   ;;  %v6133_v54 = vld [vmem:[#allocation4 + $0xf8] sm:$0xff]   ;;  %v2662_v32 = vrot.slane %v2660_v18, 1 }
  0x45   :  { %5203 = vmatprep.subr.bf16.mxu0 %v5677_v43  ;;  %v2630_v52 = vrot.slane %v2628_v44, 1 }
  0x47   :  { %v2634_v60 = vor.u32 %v2632_v50, %v2630_v52  ;;  %v6225_v25 = vld [vmem:[#allocation4 + $0x30] sm:$0xff]  }
  0x48   :  { %5204 = vmatpush3.bf16.msra.mxu0 %v5677_v43  ;;  %v2626_v43 = vor.u32 %v2624_v29, %v2622_v3  ;;  %v6128_v45 = vld [vmem:[#allocation4 + $0xf0] sm:$0xff]  }
  0x49   :  { %5205 = vmatprep.subr.bf16.mxu0 %v5683_v5  ;;  %v2639_v3 = vsel %vm1657_vm0, %v2634_v60, %v2638_v62  ;;  %v208_v29 = vld [vmem:[%s7022_s0 + $0x178] sm:$0xff]   ;;  %v2666_v60 = vor.u32 %v2664_v38, %v2662_v32 }
  0x4a   :  { %4950 = vmatmul.mubr.bf16.gmra.mrb[20].mxu1 %v6047_v48  ;;  %v2631_v59 = vsel %vm1657_vm0, %v2626_v43, %v2630_v52  ;;  %209 = vst [vmem:[#allocation4 + $0x168] sm:$0xff] %v208_v29   ;;  %v56_v43 = vld [vmem:[%s7022_s0 + $0x38] sm:$0xff]  }
  0x4b   :  { %4953 = vmatprep.mubr.bf16.mxu1 %v6053_v56  ;;  %5174 = vmatmul.mubr.bf16.gmra.mrb[4].mxu0 %v2615_v47  ;;  %v2646_v47 = vrot.slane %v2644_v63, 1  ;;  %57 = vst [vmem:[#allocation4 + $0x38] sm:$0xff] %v56_v43   ;;  %v64_v43 = vld [vmem:[%s7022_s0 + $0x48] sm:$0xff]  }
  0x4c   :  { %5177 = vmatprep.mubr.bf16.mxu0 %v2623_v51  ;;  %5206 = vmatpush3.bf16.msra.mxu0 %v5683_v5  ;;  %v2652_v5 = vshll.u32 %v5691_v1, 16  ;;  %v200_v51 = vld [vmem:[%s7022_s0 + $0x168] sm:$0xff]   ;;  %65 = vst [vmem:[#allocation4 + $0x48] sm:$0xff] %v64_v43  }
  0x4d   :  { %5207 = vmatprep.subr.bf16.mxu0 %v5689_v21  ;;  %v2650_v8 = vor.u32 %v2648_v2, %v2646_v47  ;;  %v2647_v13 = vsel %vm1657_vm0, %v2642_v4, %v2646_v47  ;;  %201 = vst [vmem:[#allocation4 + $0x158] sm:$0xff] %v200_v51   ;;  %v2676_v47 = vshll.u32 %v5700_v39, 16  ;;  %v1659_v51 = vshrl.u32 %v6140_v0, 16 }
  0x4e   :  { %v2654_v14 = vrot.slane %v2652_v5, 1 }
  0x4f   :  { %v2678_v9 = vrot.slane %v2676_v47, 1 }
  0x50   :  { %5208 = vmatpush3.bf16.msra.mxu0 %v5689_v21  ;;  %v3387_v21 = vshll.u32 %v5965_v53, 16  ;;  %v2655_v22 = vsel %vm1657_vm0, %v2650_v8, %v2654_v14  ;;  %v48_v53 = vld [vmem:[%s7022_s0 + $0x28] sm:$0xff]   ;;  %v2658_v31 = vor.u32 %v2656_v16, %v2654_v14  ;;  %v5706_v14 = vld [vmem:[#allocation4 + $0x170] sm:$0xff]  }
  0x51   :  { %5209 = vmatprep.subr.bf16.mxu0 %v5695_v42  ;;  %49 = vst [vmem:[#allocation4 + $0x28] sm:$0xff] %v48_v53   ;;  %v5703_v6 = vld [vmem:[#allocation4 + $0x168] sm:$0xff]  }
  0x52   :  { %4954 = vmatmul.mubr.bf16.gmra.mrb[24].mxu1 %v6079_v11  ;;  %v3389_v44 = vrot.slane %v3387_v21, 5  ;;  %v2663_v50 = vsel %vm1657_vm0, %v2658_v31, %v2662_v32  ;;  %v2684_v12 = vshll.u32 %v5703_v6, 16  ;;  %v2688_v16 = vshrl.u32 %v5703_v6, 16  ;;  %v5711_v31 = vld [vmem:[%s7024_s2 + $0x98] sm:$0xff]   ;;  %v4426_v32 = vld [vmem:[%s7023_s1 + $0x190] sm:$0xff]   ;;  %v5720_v6 = vld [vmem:[%s7024_s2 + $0xa8] sm:$0xff]  }
  0x53   :  { %4957 = vmatprep.mubr.bf16.mxu1 %v6128_v45  ;;  %5178 = vmatmul.mubr.bf16.gmra.mrb[8].mxu0 %v2631_v59  ;;  %v6204_v59 = vld [vmem:[#allocation4 + $0x18] sm:$0xff]   ;;  %v2692_v21 = vshll.u32 %v5706_v14, 16  ;;  %591 = vst [vmem:[#allocation5 + $0x10] sm:$0xff] %v4426_v32  }
  0x54   :  { %5210 = vmatpush3.bf16.msra.mxu0 %v5695_v42  ;;  %5181 = vmatprep.mubr.bf16.mxu0 %v2639_v3  ;;  %v216_v42 = vld [vmem:[%s7022_s0 + $0x188] sm:$0xff]   ;;  %v5697_v52 = vld [vmem:[#allocation4 + $0x158] sm:$0xff]   ;;  %v3390_v57 = vor.u32 %v3389_v44, %v3386_v23  ;;  %v2686_v20 = vrot.slane %v2684_v12, 1  ;;  %v1682_v12 = vshll.u32 %v6204_v59, 16 }
  0x55   :  { %5211 = vmatprep.subr.bf16.mxu0 %v5701_v24  ;;  %217 = vst [vmem:[#allocation4 + $0x178] sm:$0xff] %v216_v42   ;;  %v2668_v62 = vshll.u32 %v5697_v52, 16  ;;  %v2672_v2 = vshrl.u32 %v5697_v52, 16  ;;  %v6212_v3 = vld [vmem:[#allocation4 + $0x20] sm:$0xff]   ;;  %v2694_v53 = vrot.slane %v2692_v21, 1  ;;  %v5713_v23 = vld [vmem:[%s7024_s2 + $0x1b8] sm:$0xff]  }
  0x56   :  { %v6208_v63 = vsel %vm2986_vm1, %v6130_v46, %v3390_v57  ;;  %v2690_v34 = vor.u32 %v2688_v16, %v2686_v20  ;;  %v1670_v42 = vshrl.u32 %v6156_v15, 16  ;;  %v5716_v44 = vld [vmem:[%s7024_s2 + $0xa0] sm:$0xff]   ;;  %v80_v16 = vld [vmem:[%s7022_s0 + $0x68] sm:$0xff]   ;;  %v1690_v43 = vshll.u32 %v6212_v3, 16 }
  0x57   :  { %v2670_v4 = vrot.slane %v2668_v62, 1  ;;  %v6258_v52 = vld [vmem:[%s7024_s2 + $0x1c0] sm:$0xff]   ;;  %v72_v62 = vld [vmem:[%s7022_s0 + $0x58] sm:$0xff]   ;;  %81 = vst [vmem:[#allocation4 + $0x68] sm:$0xff] %v80_v16  }
  0x58   :  { %5212 = vmatpush3.bf16.msra.mxu0 %v5701_v24  ;;  %v2696_v24 = vshrl.u32 %v5706_v14, 16  ;;  %v2990_v47 = vrot.slane %v1670_v42, 4  ;;  %73 = vst [vmem:[#allocation4 + $0x58] sm:$0xff] %v72_v62   ;;  %v1686_v14 = vshrl.u32 %v6204_v59, 16  ;;  %v6292_v21 = vld [vmem:[#allocation4 + $0x40] sm:$0xff]  }
  0x59   :  { %5213 = vmatprep.subr.bf16.mxu0 %v5707_v61  ;;  %v2671_v46 = vsel %vm1657_vm0, %v2666_v60, %v2670_v4  ;;  %v2674_v8 = vor.u32 %v2672_v2, %v2670_v4  ;;  %v6270_v2 = vld [vmem:[#allocation4 + $0x38] sm:$0xff]  }
  0x5a   :  { %4958 = vmatmul.mubr.bf16.gmra.mrb[28].mxu1 %v6133_v54 }
  0x5b   :  { %4977 = vmatprep.mubr.bf16.mxu1 %v6140_v0  ;;  %5182 = vmatmul.mubr.bf16.gmra.mrb[12].mxu0 %v2647_v13  ;;  %v6222_v13 = vld [vmem:[#allocation4 + $0x28] sm:$0xff]   ;;  %v2679_v18 = vsel %vm1657_vm0, %v2674_v8, %v2678_v9  ;;  %v5712_v8 = vld [vmem:[#allocation5 + $0x10] sm:$0xff]  }
  0x5c   :  { %5185 = vmatprep.mubr.bf16.mxu0 %v2655_v22  ;;  %5214 = vmatpush3.bf16.msra.mxu0 %v5707_v61  ;;  %v5709_v22 = vld [vmem:[#allocation4 + $0x178] sm:$0xff]   ;;  %v2698_v61 = vor.u32 %v2696_v24, %v2694_v53  ;;  %v1698_v62 = vshll.u32 %v6222_v13, 16 }
  0x5d   :  { %v2700_v30 = vshll.u32 %v5709_v22, 16  ;;  %5215 = vmatprep.subr.bf16.mxu0 %v5713_v23  ;;  %v2704_v4 = vshrl.u32 %v5709_v22, 16 }
  0x5f   :  { %v2702_v38 = vrot.slane %v2700_v30, 1 }
  0x60   :  { %5216 = vmatpush3.bf16.msra.mxu0 %v5713_v23  ;;  %v6303_v23 = vld [vmem:[#allocation4 + $0x48] sm:$0xff]  }
  0x61   :  { %v2703_v39 = vsel %vm1657_vm0, %v2698_v61, %v2702_v38  ;;  %5249 = vmatprep.subr.bf16.mxu0 %v6258_v52  ;;  %v2999_v61 = vrot.slane %v1682_v12, 5 }
  0x62   :  { %4978 = vmatmul.mubr.bf16.vlgmr.msra.gmra.mrb[0].mxu1 %v6156_v15 }
  0x63   :  { %5010 = vmatpush3.bf16.msra.mxu1 %v6106_v33  ;;  %v3395_v33 = vrot.slane %v3393_v27, 4  ;;  %4981 = vmatprep.mubr.bf16.mxu1 %v6200_v49  ;;  %v1661_v27 = vshll.u32 %v6140_v0, 16  ;;  %v5733_v0 = vld [vmem:[%s7024_s2 + $0x1e8] sm:$0xff]  }
  0x64   :  { %5011 = vmatprep.subr.bf16.mxu1 %v5699_v19  ;;  %5186 = vmatmul.mubr.bf16.gmra.mrb[16].mxu0 %v2663_v50 }
  0x65   :  { %v6210_v1 = vor.u32 %v3398_v58, %v3395_v33  ;;  %5189 = vmatprep.mubr.bf16.mxu0 %v2671_v46  ;;  %v2987_v33 = vrot.slane %v1659_v51, 4  ;;  %v2988_v50 = vrot.slane %v1661_v27, 5  ;;  %v2695_v58 = vsel %vm1657_vm0, %v2690_v34, %v2694_v53  ;;  %v76_v46 = vld [vmem:[%s7022_s0 + $0x60] sm:$0xff]  }
  0x66   :  { %77 = vst [vmem:[#allocation4 + $0x60] sm:$0xff] %v76_v46   ;;  %v7031_v46 = vshrl.u32 %v6270_v2, 16 }
  0x67   :  { %5012 = vmatpush3.bf16.msra.mxu1 %v5699_v19  ;;  %v6216_v5 = vsel %vm2986_vm1, %v3390_v57, %v6210_v1  ;;  %v2682_v19 = vor.u32 %v2680_v7, %v2678_v9  ;;  %v68_v57 = vld [vmem:[%s7022_s0 + $0x50] sm:$0xff]   ;;  %v1674_v7 = vshll.u32 %v6200_v49, 16  ;;  %v1678_v9 = vshrl.u32 %v6200_v49, 16 }
  0x68   :  { %5013 = vmatprep.subr.bf16.mxu1 %v5705_v37  ;;  %7048 = vst [vmem:[#allocation6_spill] sm:$0xff] %v6216_v5  ;;  %69 = vst [vmem:[#allocation4 + $0x50] sm:$0xff] %v68_v57   ;;  %v2989_v22 = vor.u32 %v2988_v50, %v2987_v33  ;;  %v84_v33 = vld [vmem:[%s7022_s0 + $0x70] sm:$0xff]  }
  0x69   :  { %v2687_v29 = vsel %vm1657_vm0, %v2682_v19, %v2686_v20  ;;  %v2706_v19 = vor.u32 %v2704_v4, %v2702_v38  ;;  %v2708_v20 = vshll.u32 %v5712_v8, 16  ;;  %v2994_v53 = vrot.slane %v1678_v9, 4  ;;  %85 = vst [vmem:[#allocation4 + $0x70] sm:$0xff] %v84_v33   ;;  %v88_v4 = vld [vmem:[%s7022_s0 + $0x78] sm:$0xff]  }
  0x6a   :  { %4982 = vmatmul.mubr.bf16.gmra.mrb[4].mxu1 %v6204_v59  ;;  %v2995_v30 = vrot.slane %v1674_v7, 5  ;;  %89 = vst [vmem:[#allocation4 + $0x78] sm:$0xff] %v88_v4   ;;  %v7032_v8 = vshll.u32 %v6270_v2, 16 }
  0x6b   :  { %4985 = vmatprep.mubr.bf16.mxu1 %v6212_v3  ;;  %5014 = vmatpush3.bf16.msra.mxu1 %v5705_v37  ;;  %v1666_v37 = vshll.u32 %v6156_v15, 16 }
  0x6c   :  { %5190 = vmatmul.mubr.bf16.gmra.mrb[20].mxu0 %v2679_v18  ;;  %5015 = vmatprep.subr.bf16.mxu1 %v5711_v31  ;;  %v5724_v18 = vld [vmem:[%s7024_s2 + $0xb0] sm:$0xff]  }
  0x6d   :  { %5193 = vmatprep.mubr.bf16.mxu0 %v2687_v29  ;;  %v2991_v60 = vrot.slane %v1666_v37, 5  ;;  %v2710_v29 = vrot.slane %v2708_v20, 1  ;;  %v6375_v20 = vld [vmem:[#allocation4 + $0x68] sm:$0xff]  }
  0x6f   :  { %5016 = vmatpush3.bf16.msra.mxu1 %v5711_v31  ;;  %v2992_v24 = vor.u32 %v2991_v60, %v2990_v47  ;;  %v2998_v31 = vrot.slane %v1686_v14, 4  ;;  %v2711_v32 = vsel %vm1657_vm0, %v2706_v19, %v2710_v29  ;;  %v6307_v38 = vld [vmem:[#allocation4 + $0x50] sm:$0xff]   ;;  %v6337_v19 = vld [vmem:[%s7024_s2 + $0xc0] sm:$0xff]   ;;  %v5721_v29 = vld [vmem:[%s7024_s2 + $0x1c8] sm:$0xff]  }
  0x70   :  { %5017 = vmatprep.subr.bf16.mxu1 %v5716_v44  ;;  %v5728_v47 = vld [vmem:[%s7024_s2 + $0xb8] sm:$0xff]   ;;  %v7036_v33 = vshll.u32 %v6307_v38, 16  ;;  %v7038_v57 = vshrl.u32 %v6307_v38, 16 }
  0x71   :  { %v2993_v34 = vsel %vm2986_vm1, %v2989_v22, %v2992_v24  ;;  %v3000_v60 = vor.u32 %v2999_v61, %v2998_v31  ;;  %v7029_v61 = vshrl.u32 %v6225_v25, 16 }
  0x72   :  { %4986 = vmatmul.mubr.bf16.gmra.mrb[8].mxu1 %v6222_v13 }
  0x73   :  { %4989 = vmatprep.mubr.bf16.mxu1 %v6225_v25  ;;  %5018 = vmatpush3.bf16.msra.mxu1 %v5716_v44  ;;  %v7034_v44 = vshrl.u32 %v6212_v3, 16 }
  0x74   :  { %5194 = vmatmul.mubr.bf16.gmra.mrb[24].mxu0 %v2695_v58  ;;  %5019 = vmatprep.subr.bf16.mxu1 %v5720_v6  ;;  %v2996_v58 = vor.u32 %v2995_v30, %v2994_v53  ;;  %v6345_v30 = vld [vmem:[#allocation4 + $0x58] sm:$0xff]  }
  0x75   :  { %5197 = vmatprep.mubr.bf16.mxu0 %v2703_v39  ;;  %v7030_v39 = vshrl.u32 %v6222_v13, 16  ;;  %v3002_v16 = vrot.slane %v7034_v44, 4  ;;  %v4422_v44 = vld [vmem:[%s7023_s1 + $0x80] sm:$0xff]  }
  0x76   :  { %v2997_v22 = vsel %vm2986_vm1, %v2992_v24, %v2996_v58  ;;  %v3001_v53 = vsel %vm2986_vm1, %v2996_v58, %v3000_v60  ;;  %v6353_v24 = vld [vmem:[#allocation4 + $0x60] sm:$0xff]   ;;  %v7037_v58 = vshll.u32 %v6303_v23, 16  ;;  %583 = vst [vmem:[#allocation5] sm:$0xff] %v4422_v44   ;;  %v1684_v44 = vrot.slane %v1682_v12, 1 }
  0x77   :  { %5020 = vmatpush3.bf16.msra.mxu1 %v5720_v6  ;;  %v3006_v31 = vrot.slane %v7030_v39, 4  ;;  %v5729_v39 = vld [vmem:[%s7024_s2 + $0x1d8] sm:$0xff]  }
  0x78   :  { %5021 = vmatprep.subr.bf16.mxu1 %v5724_v18 }
  0x7a   :  { %4990 = vmatmul.mubr.bf16.gmra.mrb[12].mxu1 %v6270_v2 }
  0x7b   :  { %4993 = vmatprep.mubr.bf16.mxu1 %v6292_v21  ;;  %5022 = vmatpush3.bf16.msra.mxu1 %v5724_v18  ;;  %v3003_v18 = vrot.slane %v1690_v43, 5 }
  0x7c   :  { %5198 = vmatmul.mubr.bf16.gmra.mrb[28].mxu0 %v2711_v32  ;;  %5023 = vmatprep.subr.bf16.mxu1 %v5728_v47  ;;  %v3007_v32 = vrot.slane %v1698_v62, 5 }
  0x7d   :  { %5217 = vmatprep.mubr.bf16.mxu0 %v2993_v34  ;;  %v7033_v34 = vshll.u32 %v6225_v25, 16  ;;  %v3004_v4 = vor.u32 %v3003_v18, %v3002_v16  ;;  %v1663_v16 = vrot.slane %v1661_v27, 1  ;;  %v3014_v27 = vrot.slane %v7031_v46, 4 }
  0x7e   :  { %v3008_v6 = vor.u32 %v3007_v32, %v3006_v31  ;;  %v7040_v31 = vshll.u32 %v6292_v21, 16  ;;  %v7039_v32 = vshrl.u32 %v6292_v21, 16  ;;  %v1668_v46 = vrot.slane %v1666_v37, 1 }
  0x7f   :  { %5024 = vmatpush3.bf16.msra.mxu1 %v5728_v47  ;;  %v3011_v18 = vrot.slane %v7033_v34, 5  ;;  %v7035_v47 = vshrl.u32 %v6303_v23, 16  ;;  %v3023_v37 = vrot.slane %v7037_v58, 5 }
  0x80   :  { %5057 = vmatprep.subr.bf16.mxu1 %v6337_v19  ;;  %v3018_v50 = vrot.slane %v7039_v32, 4  ;;  %v1672_v32 = vor.u32 %v1670_v42, %v1668_v46  ;;  %v1692_v42 = vrot.slane %v1690_v43, 1 }
  0x81   :  { %v3022_v34 = vrot.slane %v7035_v47, 4  ;;  %v1676_v47 = vrot.slane %v1674_v7, 1 }
  0x82   :  { %4994 = vmatmul.mubr.bf16.gmra.mrb[16].mxu1 %v6303_v23 }
  0x83   :  { %4997 = vmatprep.mubr.bf16.mxu1 %v6307_v38  ;;  %v1680_v7 = vor.u32 %v1678_v9, %v1676_v47  ;;  %v7045_v9 = vshll.u32 %v6353_v24, 16 }
  0x84   :  { %5218 = vmatmul.mubr.bf16.vlgmr.msra.gmra.mrb[0].mxu0 %v2997_v22  ;;  %v5725_v22 = vld [vmem:[%s7024_s2 + $0x1d0] sm:$0xff]  }
  0x85   :  { %5250 = vmatpush3.bf16.msra.mxu0 %v6258_v52  ;;  %5221 = vmatprep.mubr.bf16.mxu0 %v3001_v53  ;;  %v3010_v52 = vrot.slane %v7029_v61, 4  ;;  %v3005_v53 = vsel %vm2986_vm1, %v3000_v60, %v3004_v4  ;;  %v3015_v61 = vrot.slane %v7032_v8, 5  ;;  %v3009_v60 = vsel %vm2986_vm1, %v3004_v4, %v3008_v6 }
  0x86   :  { %5251 = vmatprep.subr.bf16.mxu0 %v5721_v29  ;;  %v3019_v4 = vrot.slane %v7040_v31, 5 }
  0x87   :  { %v3012_v8 = vor.u32 %v3011_v18, %v3010_v52  ;;  %v3016_v41 = vor.u32 %v3015_v61, %v3014_v27  ;;  %v3027_v52 = vrot.slane %v7036_v33, 5  ;;  %v5731_v18 = vld [vmem:[%s7024_s2 + $0x1e0] sm:$0xff]   ;;  %v7044_v61 = vshrl.u32 %v6345_v30, 16 }
  0x88   :  { %v3020_v27 = vor.u32 %v3019_v4, %v3018_v50  ;;  %v1688_v50 = vor.u32 %v1686_v14, %v1684_v44  ;;  %v1677_v14 = vsel %vm1657_vm0, %v1672_v32, %v1676_v47  ;;  %v7059_v4 = vshll.u32 %v6047_v48, 16 }
  0x89   :  { %5252 = vmatpush3.bf16.msra.mxu0 %v5721_v29  ;;  %v6391_v29 = vld [vmem:[#allocation4 + $0x70] sm:$0xff]   ;;  %v3013_v58 = vsel %vm2986_vm1, %v3008_v6, %v3012_v8  ;;  %v3017_v31 = vsel %vm2986_vm1, %v3012_v8, %v3016_v41  ;;  %v3030_v15 = vrot.slane %v7044_v61, 4 }
  0x8a   :  { %4998 = vmatmul.mubr.bf16.gmra.mrb[20].mxu1 %v6345_v30  ;;  %5253 = vmatprep.subr.bf16.mxu0 %v5725_v22  ;;  %v3021_v43 = vsel %vm2986_vm1, %v3016_v41, %v3020_v27  ;;  %v5735_v41 = vld [vmem:[%s7024_s2 + $0x1f0] sm:$0xff]   ;;  %v3434_v33 = vrot.slane %v7059_v4, 5  ;;  %v7061_v4 = vshll.u32 %v6053_v56, 16 }
  0x8b   :  { %5001 = vmatprep.mubr.bf16.mxu1 %v6353_v24 }
  0x8c   :  { %5222 = vmatmul.mubr.bf16.gmra.mrb[4].mxu0 %v3005_v53  ;;  %v7046_v53 = vshll.u32 %v6345_v30, 16 }
  0x8d   :  { %5225 = vmatprep.mubr.bf16.mxu0 %v3009_v60  ;;  %5254 = vmatpush3.bf16.msra.mxu0 %v5725_v22  ;;  %v3026_v22 = vrot.slane %v7038_v57, 4  ;;  %v1664_v57 = vor.u32 %v1663_v16, %v1659_v51  ;;  %v6430_v60 = vld [vmem:[#allocation4 + $0x78] sm:$0xff]   ;;  %v3024_v51 = vor.u32 %v3023_v37, %v3022_v34  ;;  %v7042_v34 = vshll.u32 %v6375_v20, 16 }
  0x8e   :  { %5255 = vmatprep.subr.bf16.mxu0 %v5729_v39  ;;  %v3031_v12 = vrot.slane %v7046_v53, 5  ;;  %v7041_v16 = vshrl.u32 %v6375_v20, 16 }
  0x8f   :  { %v3028_v6 = vor.u32 %v3027_v52, %v3026_v22  ;;  %v1669_v8 = vsel %vm1657_vm0, %v1664_v57, %v1668_v46  ;;  %v1685_v46 = vsel %vm1657_vm0, %v1680_v7, %v1684_v44  ;;  %v1700_v52 = vrot.slane %v1698_v62, 1 }
  0x90   :  { %v6465_v47 = vor.u32 %v3031_v12, %v3030_v15  ;;  %v7050_v62 = vshrl.u32 %v6212_v3, 16  ;;  %v6480_v7 = vrot.slane %v7041_v16, 4  ;;  %v6484_v12 = vrot.slane %v7042_v34, 5  ;;  %v5732_v16 = vld [vmem:[%s7024_s2 + $0xc8] sm:$0xff]  }
  0x91   :  { %5256 = vmatpush3.bf16.msra.mxu0 %v5729_v39  ;;  %v7043_v39 = vshrl.u32 %v6353_v24, 16  ;;  %v6457_v57 = vsel %vm2986_vm1, %v3024_v51, %v3028_v6  ;;  %v7054_v34 = vshrl.u32 %v6222_v13, 16 }
  0x92   :  { %5002 = vmatmul.mubr.bf16.gmra.mrb[24].mxu1 %v6375_v20  ;;  %5257 = vmatprep.subr.bf16.mxu0 %v5731_v18  ;;  %v1696_v44 = vor.u32 %v7050_v62, %v1692_v42  ;;  %v6513_v53 = vsel %vm2986_vm1, %v3028_v6, %v6465_v47  ;;  %v4424_v6 = vld [vmem:[%s7023_s1 + $0x108] sm:$0xff]  }
  0x93   :  { %5005 = vmatprep.mubr.bf16.mxu1 %v6391_v29  ;;  %v3034_v32 = vrot.slane %v7043_v39, 4  ;;  %v6500_v39 = vor.u32 %v7054_v34, %v1700_v52  ;;  %587 = vst [vmem:[#allocation5 + $0x8] sm:$0xff] %v4424_v6  }
  0x94   :  { %5226 = vmatmul.mubr.bf16.gmra.mrb[8].mxu0 %v3013_v58  ;;  %v3025_v58 = vsel %vm2986_vm1, %v3020_v27, %v3024_v51  ;;  %v3035_v27 = vrot.slane %v7045_v9, 5  ;;  %v7051_v51 = vshll.u32 %v6225_v25, 16 }
  0x95   :  { %5229 = vmatprep.mubr.bf16.mxu0 %v3017_v31  ;;  %5258 = vmatpush3.bf16.msra.mxu0 %v5731_v18  ;;  %v6468_v31 = vsel %vm1657_vm0, %v1688_v50, %v1692_v42  ;;  %v7049_v18 = vshrl.u32 %v6023_v10, 16  ;;  %v7053_v42 = vshrl.u32 %v6032_v17, 16  ;;  %v7058_v50 = vshrl.u32 %v6047_v48, 16 }
  0x96   :  { %5259 = vmatprep.subr.bf16.mxu0 %v5733_v0  ;;  %v6488_v15 = vrot.slane %v7051_v51, 1  ;;  %v7055_v51 = vshll.u32 %v6032_v17, 16  ;;  %v6519_v17 = vor.u32 %v3035_v27, %v3034_v32  ;;  %v7062_v32 = vshrl.u32 %v6079_v11, 16 }
  0x97   :  { %v3404_v22 = vrot.slane %v7049_v18, 4  ;;  %v3413_v62 = vrot.slane %v7053_v42, 4  ;;  %v7057_v42 = vshll.u32 %v6036_v26, 16  ;;  %v3431_v37 = vrot.slane %v7058_v50, 4 }
  0x99   :  { %5260 = vmatpush3.bf16.msra.mxu0 %v5733_v0  ;;  %v5738_v0 = vld [vmem:[%s7024_s2 + $0x1f8] sm:$0xff]   ;;  %v3425_v9 = vrot.slane %v7057_v42, 5  ;;  %v3435_v48 = vor.u32 %v3434_v33, %v3431_v37  ;;  %v7064_v37 = vshrl.u32 %v6128_v45, 16  ;;  %v256_v42 = vld [vmem:[%s7022_s0 + $0x1e0] sm:$0xff]  }
  0x9a   :  { %5006 = vmatmul.mubr.bf16.gmra.mrb[28].mxu1 %v6430_v60  ;;  %5261 = vmatprep.subr.bf16.mxu0 %v5735_v41  ;;  %257 = vst [vmem:[#allocation4 + $0x1c8] sm:$0xff] %v256_v42   ;;  %v5788_v42 = vmov 0  }
  0x9b   :  { %5025 = vmatprep.mubr.bf16.mxu1 %v1669_v8  ;;  %v7052_v8 = vshll.u32 %v6023_v10, 16  ;;  %v3416_v10 = vrot.slane %v7055_v51, 5  ;;  %5619 = vset.pattern.permute.xlu0 %v5788_v42 }
  0x9c   :  { %5230 = vmatmul.mubr.bf16.gmra.mrb[12].mxu0 %v3021_v43  ;;  %v3443_v43 = vrot.slane %v7061_v4, 5  ;;  %v260_v4 = vld [vmem:[%s7022_s0 + $0x1e8] sm:$0xff]   ;;  %5620 = vset.pattern.permute.xlu1 %v5788_v42  ;;  %v268_v42 = vld [vmem:[%s7022_s0 + $0x1f8] sm:$0xff]  }
  0x9d   :  { %v3407_v18 = vrot.slane %v7052_v8, 5  ;;  %v7056_v8 = vshrl.u32 %v6036_v26, 16  ;;  %v3417_v51 = vor.u32 %v3416_v10, %v3413_v62  ;;  %5233 = vmatprep.mubr.bf16.mxu0 %v3025_v58  ;;  %5262 = vmatpush3.bf16.msra.mxu0 %v5735_v41  ;;  %v3458_v41 = vrot.slane %v7064_v37, 4  ;;  %261 = vst [vmem:[#allocation4 + $0x1d0] sm:$0xff] %v260_v4   ;;  %269 = vst [vmem:[#allocation4 + $0x1e0] sm:$0xff] %v268_v42   ;;  %v4051_v42 = vld [vmem:[%s7025_s3 + $0x20] sm:$0xff] }
  0x9e   :  { %5263 = vmatprep.subr.bf16.mxu0 %v5738_v0  ;;  %v3037_v4 = vsel %vm2986_vm1, %v6465_v47, %v6519_v17  ;;  %v4048_v47 = vld [vmem:[%s7025_s3 + $0x8] sm:$0xff] }
  0x9f   :  { %v3422_v61 = vrot.slane %v7056_v8, 4  ;;  %v3408_v34 = vor.u32 %v3407_v18, %v3404_v22  ;;  %v7060_v8 = vshrl.u32 %v6053_v56, 16  ;;  %v7063_v56 = vshll.u32 %v6079_v11, 16 }
  0xa0   :  { %v7065_v18 = vshll.u32 %v6128_v45, 16  ;;  %v7066_v11 = vshrl.u32 %v6133_v54, 16  ;;  %v7067_v45 = vshll.u32 %v6133_v54, 16 }
  0xa1   :  { %v3426_v5 = vor.u32 %v3425_v9, %v3422_v61  ;;  %v3440_v26 = vrot.slane %v7060_v8, 4  ;;  %v6528_v22 = vsel %vm2986_vm1, %v6210_v1, %v3408_v34  ;;  %v3449_v61 = vrot.slane %v7062_v32, 4  ;;  %v6537_v9 = vld [vmem:[%s7024_s2 + $0x200] sm:$0xff]   ;;  %5264 = vmatpush3.bf16.msra.mxu0 %v5738_v0 }
  0xa2   :  { %5026 = vmatmul.mubr.bf16.vlgmr.msra.gmra.mrb[0].mxu1 %v1677_v14  ;;  %v6540_v58 = vsel %vm2986_vm1, %v3408_v34, %v3417_v51  ;;  %v3452_v33 = vrot.slane %v7063_v56, 5  ;;  %v252_v14 = vld [vmem:[%s7022_s0 + $0x1d8] sm:$0xff]   ;;  %v3461_v62 = vrot.slane %v7065_v18, 5  ;;  %v3467_v10 = vrot.slane %v7066_v11, 4  ;;  %5297 = vmatprep.subr.bf16.mxu0 %v6537_v9 }
  0xa3   :  { %v6543_v1 = vsel %vm2986_vm1, %v3417_v51, %v3426_v5  ;;  %5058 = vmatpush3.bf16.msra.mxu1 %v6337_v19  ;;  %5029 = vmatprep.mubr.bf16.mxu1 %v1685_v46  ;;  %v6554_v27 = vsel %vm2986_vm1, %v3426_v5, %v3435_v48  ;;  %v3444_v50 = vor.u32 %v3443_v43, %v3440_v26  ;;  %v5734_v5 = vld [vmem:[%s7024_s2 + $0xd0] sm:$0xff]   ;;  %v1774_v19 = vshrl.u32 %v6391_v29, 16 }
  0xa4   :  { %253 = vst [vmem:[#allocation4 + $0x1c0] sm:$0xff] %v252_v14   ;;  %5059 = vmatprep.subr.bf16.mxu1 %v5732_v16  ;;  %v1701_v34 = vsel %vm1657_vm0, %v1696_v44, %v1700_v52  ;;  %v3453_v46 = vor.u32 %v3452_v33, %v3449_v61  ;;  %v3470_v51 = vrot.slane %v7067_v45, 5  ;;  %v7068_v8 = vshll.u32 %v6270_v2, 16  ;;  %5234 = vmatmul.mubr.bf16.gmra.mrb[16].mxu0 %v6457_v57 }
  0xa5   :  { %v6575_v6 = vsel %vm2986_vm1, %v3435_v48, %v3444_v50  ;;  %v3462_v52 = vor.u32 %v3461_v62, %v3458_v41  ;;  %v7047_v44 = vrot.slane %v6200_v49, 5  ;;  %v3762_v32 = vrot.slane %v6204_v59, 5  ;;  %v264_v48 = vld [vmem:[%s7022_s0 + $0x1f0] sm:$0xff]   ;;  %v5736_v59 = vld [vmem:[%s7024_s2 + $0xd8] sm:$0xff]   ;;  %5237 = vmatprep.mubr.bf16.mxu0 %v6513_v53 }
  0xa6   :  { %v6572_v26 = vrot.slane %v7068_v8, 1  ;;  %v6583_v54 = vsel %vm2986_vm1, %v3444_v50, %v3453_v46  ;;  %v6585_v43 = vor.u32 %v3470_v51, %v3467_v10  ;;  %v3764_v0 = vrot.slane %v6212_v3, 5  ;;  %265 = vst [vmem:[#allocation4 + $0x1d8] sm:$0xff] %v264_v48   ;;  %v4047_v50 = vld [vmem:[%s7025_s3] sm:$0xff] }
  0xa7   :  { %5060 = vmatpush3.bf16.msra.mxu1 %v5732_v16  ;;  %v1782_v61 = vshrl.u32 %v6430_v60, 16  ;;  %v6594_v56 = vsel %vm2986_vm1, %v3453_v46, %v3462_v52  ;;  %v3766_v33 = vrot.slane %v6222_v13, 5  ;;  %v6608_v16 = vsel %vm3756_vm2, %v7047_v44, %v3762_v32  ;;  %4081 = vperm.xlu0 %5619, %v4047_v50  }
  0xa8   :  { %5061 = vmatprep.subr.bf16.mxu1 %v5734_v5  ;;  %v6603_v3 = vsel %vm2986_vm1, %v3462_v52, %v6585_v43  ;;  %v6611_v37 = vsel %vm3756_vm2, %v3762_v32, %v3764_v0  ;;  %v3768_v13 = vrot.slane %v6225_v25, 5  ;;  %v3770_v41 = vrot.slane %v6270_v2, 5  ;;  %v6659_v32 = vld [vmem:[#allocation5] sm:$0xff]  }
  0xa9   :  { %v6616_v57 = vsel %vm3756_vm2, %v3764_v0, %v3766_v33  ;;  %v3772_v14 = vrot.slane %v6292_v21, 5  ;;  %v6626_v18 = vor.u32 %v6484_v12, %v6480_v7  ;;  %v7069_v62 = vshll.u32 %v6391_v29, 16  ;;  %v4049_v12 = vld [vmem:[%s7025_s3 + $0x10] sm:$0xff] }
  0xaa   :  { %5030 = vmatmul.mubr.bf16.gmra.mrb[4].mxu1 %v6468_v31  ;;  %v1778_v11 = vshll.u32 %v6430_v60, 16  ;;  %v6632_v10 = vsel %vm3756_vm2, %v3766_v33, %v3768_v13  ;;  %v7070_v46 = vshrl.u32 %v6225_v25, 16  ;;  %v6638_v45 = vsel %vm3756_vm2, %v3768_v13, %v3770_v41  ;;  %v5739_v25 = vld [vmem:[%s7024_s2 + $0xe0] sm:$0xff]   ;;  %4091 = vperm.xlu1 %5620, %v4049_v12  }
  0xab   :  { %v3043_v53 = vrot.slane %v7069_v62, 5  ;;  %5033 = vmatprep.mubr.bf16.mxu1 %v1701_v34  ;;  %5062 = vmatpush3.bf16.msra.mxu1 %v5734_v5  ;;  %v6641_v7 = vsel %vm3756_vm2, %v3770_v41, %v3772_v14  ;;  %v3774_v51 = vrot.slane %v6303_v23, 5  ;;  %v3042_v34 = vrot.slane %v1774_v19, 4 }
  0xac   :  { %v1712_v31 = vor.u32 %v7070_v46, %v6488_v15  ;;  %v3046_v5 = vrot.slane %v1782_v61, 4  ;;  %5063 = vmatprep.subr.bf16.mxu1 %v5736_v59  ;;  %v3776_v8 = vrot.slane %v6307_v38, 5  ;;  %v3778_v52 = vrot.slane %v6345_v30, 5  ;;  %v272_v46 = vld [vmem:[%s7022_s0 + $0x200] sm:$0xff]   ;;  %5238 = vmatmul.mubr.bf16.gmra.mrb[20].mxu0 %v3037_v4 }
  0xad   :  { %v6662_v0 = vsel %vm3756_vm2, %v3772_v14, %v3774_v51  ;;  %v3780_v48 = vrot.slane %v6353_v24, 5  ;;  %v3041_v33 = vsel %vm2986_vm1, %v6519_v17, %v6626_v18  ;;  %v3047_v13 = vrot.slane %v1778_v11, 5  ;;  %v4050_v17 = vld [vmem:[%s7025_s3 + $0x18] sm:$0xff]  ;;  %273 = vst [vmem:[#allocation4 + $0x1e8] sm:$0xff] %v272_v46   ;;  %4086 = vperm.xlu0 %5619, %v4048_v47  }
  0xae   :  { %v6674_v41 = vsel %vm3756_vm2, %v3774_v51, %v3776_v8  ;;  %v6677_v14 = vsel %vm3756_vm2, %v3776_v8, %v3778_v52  ;;  %v1709_v50 = vsel %vm1657_vm0, %v6500_v39, %v6488_v15  ;;  %v1717_v39 = vsel %vm1657_vm0, %v1712_v31, %v6572_v26  ;;  %v5741_v15 = vld [vmem:[%s7024_s2 + $0xe8] sm:$0xff]   ;;  %5241 = vmatprep.mubr.bf16.mxu0 %v3041_v33 }
  0xaf   :  { %5064 = vmatpush3.bf16.msra.mxu1 %v5736_v59  ;;  %v6686_v62 = vsel %vm3756_vm2, %v3778_v52, %v3780_v48  ;;  %v3782_v59 = vrot.slane %v6375_v20, 5  ;;  %v3044_v12 = vor.u32 %v3043_v53, %v3042_v34  ;;  %v1786_v51 = vshll.u32 %v6659_v32, 16  ;;  %4096 = vperm.xlu1 %5620, %v4050_v17  }
  0xb0   :  { %5065 = vmatprep.subr.bf16.mxu1 %v5739_v25  ;;  %v3050_v8 = vshrl.u32 %v6659_v32, 16  ;;  %v3048_v52 = vor.u32 %v3047_v13, %v3046_v5  ;;  %v7071_v31 = vshll.u32 %v6292_v21, 16  ;;  %v3784_v53 = vrot.slane %v6391_v29, 5  ;;  %v4052_v5 = vld [vmem:[%s7025_s3 + $0x28] sm:$0xff] }
  0xb1   :  { %v6708_v44 = vsel %vm3756_vm2, %v3780_v48, %v3782_v59  ;;  %v7072_v34 = vshrl.u32 %v6270_v2, 16  ;;  %v7073_v13 = vshrl.u32 %v6292_v21, 16  ;;  %v5743_v48 = vld [vmem:[%s7024_s2 + $0xf0] sm:$0xff]   ;;  %v3045_v2 = vsel %vm2986_vm1, %v6626_v18, %v3044_v12  ;;  %4101 = vperm.xlu0 %5619, %v4051_v42   ;;  %v276_v21 = vld [vmem:[%s7022_s0 + $0x208] sm:$0xff]   ;;  %v5745_v42 = vld [vmem:[%s7024_s2 + $0xf8] sm:$0xff]  }
  0xb2   :  { %5034 = vmatmul.mubr.bf16.gmra.mrb[8].mxu1 %v1709_v50  ;;  %v1724_v4 = vrot.slane %v7071_v31, 1  ;;  %v7074_v50 = vshll.u32 %v6303_v23, 16  ;;  %v6725_v46 = vsel %vm3756_vm2, %v3782_v59, %v3784_v53  ;;  %v4053_v59 = vld [vmem:[%s7025_s3 + $0x30] sm:$0xff]  ;;  %277 = vst [vmem:[#allocation4 + $0x1f0] sm:$0xff] %v276_v21   ;;  %v4054_v31 = vld [vmem:[%s7025_s3 + $0x38] sm:$0xff] }
  0xb3   :  { %5037 = vmatprep.mubr.bf16.mxu1 %v1717_v39  ;;  %v1720_v33 = vor.u32 %v7072_v34, %v6572_v26  ;;  %5066 = vmatpush3.bf16.msra.mxu1 %v5739_v25  ;;  %v3052_v26 = vrot.slane %v3050_v8, 4  ;;  %v3053_v25 = vrot.slane %v1786_v51, 5  ;;  %v3049_v39 = vsel %vm2986_vm1, %v3044_v12, %v3048_v52  ;;  %v280_v18 = vld [vmem:[%s7022_s0 + $0x210] sm:$0xff]  }
  0xb4   :  { %v1728_v47 = vor.u32 %v7073_v13, %v1724_v4  ;;  %v1732_v17 = vrot.slane %v7074_v50, 1  ;;  %5067 = vmatprep.subr.bf16.mxu1 %v5741_v15  ;;  %4106 = vperm.xlu1 %5620, %v4052_v5   ;;  %281 = vst [vmem:[#allocation4 + $0x1f8] sm:$0xff] %v280_v18   ;;  %v3786_v34 = vrot.slane %v6430_v60, 5  ;;  %v7076_v50 = vshrl.u32 %v6303_v23, 16  ;;  %v4057_v23 = vld [vmem:[%s7025_s3 + $0x50] sm:$0xff]  ;;  %v5748_v60 = vld [vmem:[%s7024_s2 + $0x228] sm:$0xff]  }
  0xb5   :  { %v1725_v8 = vsel %vm1657_vm0, %v1720_v33, %v1724_v4  ;;  %5242 = vmatmul.mubr.bf16.gmra.mrb[24].mxu0 %v3045_v2  ;;  %v3054_v5 = vor.u32 %v3053_v25, %v3052_v26  ;;  %4111 = vperm.xlu0 %5619, %v4053_v59   ;;  %v4055_v33 = vld [vmem:[%s7025_s3 + $0x40] sm:$0xff]  ;;  %v4056_v26 = vld [vmem:[%s7025_s3 + $0x48] sm:$0xff]  ;;  %v7077_v25 = vshrl.u32 %v6307_v38, 16 }
  0xb6   :  { %v1733_v12 = vsel %vm1657_vm0, %v1728_v47, %v1732_v17  ;;  %5245 = vmatprep.mubr.bf16.mxu0 %v3049_v39  ;;  %v6756_v13 = vsel %vm3756_vm2, %v3784_v53, %v3786_v34  ;;  %v3788_v47 = vrot.slane %v6659_v32, 5  ;;  %v1736_v2 = vor.u32 %v7076_v50, %v1732_v17  ;;  %v4069_v32 = vld [vmem:[%s7025_s3 + $0xb0] sm:$0xff] }
  0xb7   :  { %5068 = vmatpush3.bf16.msra.mxu1 %v5741_v15  ;;  %v7075_v15 = vshll.u32 %v6307_v38, 16  ;;  %v7078_v39 = vshll.u32 %v6345_v30, 16  ;;  %v3055_v18 = vsel %vm2986_vm1, %v3048_v52, %v3054_v5  ;;  %v4058_v38 = vld [vmem:[%s7025_s3 + $0x58] sm:$0xff]  ;;  %v6783_v52 = vld [vmem:[%s7024_s2 + $0x100] sm:$0xff]   ;;  %v4060_v5 = vld [vmem:[%s7025_s3 + $0x68] sm:$0xff] }
  0xb8   :  { %5069 = vmatprep.subr.bf16.mxu1 %v5743_v48  ;;  %4116 = vperm.xlu1 %5620, %v4054_v31   ;;  %v6769_v53 = vsel %vm3756_vm2, %v3786_v34, %v3788_v47  ;;  %v5742_v47 = vld [vmem:[%s7024_s2 + $0x208] sm:$0xff]  }
  0xb9   :  { %v1740_v4 = vrot.slane %v7075_v15, 1  ;;  %v1748_v59 = vrot.slane %v7078_v39, 1  ;;  %4121 = vperm.xlu0 %5619, %v4055_v33  }
  0xba   :  { %5038 = vmatmul.mubr.bf16.gmra.mrb[12].mxu1 %v1725_v8  ;;  %v7079_v8 = vshll.u32 %v6353_v24, 16 }
  0xbb   :  { %5041 = vmatprep.mubr.bf16.mxu1 %v1733_v12  ;;  %5070 = vmatpush3.bf16.msra.mxu1 %v5743_v48  ;;  %v1744_v21 = vor.u32 %v7077_v25, %v1740_v4  ;;  %v1741_v17 = vsel %vm1657_vm0, %v1736_v2, %v1740_v4  ;;  %v4059_v12 = vld [vmem:[%s7025_s3 + $0x60] sm:$0xff]  ;;  %v7082_v4 = vshll.u32 %v6375_v20, 16  ;;  %v4062_v2 = vld [vmem:[%s7025_s3 + $0x78] sm:$0xff] }
  0xbc   :  { %5071 = vmatprep.subr.bf16.mxu1 %v5745_v42  ;;  %4126 = vperm.xlu1 %5620, %v4056_v26   ;;  %v1756_v31 = vrot.slane %v7079_v8, 1  ;;  %v7083_v26 = vshll.u32 %v6391_v29, 16  ;;  %v4070_v8 = vld [vmem:[%s7025_s3 + $0xb8] sm:$0xff] }
  0xbd   :  { %5246 = vmatmul.mubr.bf16.gmra.mrb[28].mxu0 %v3055_v18  ;;  %v1749_v48 = vsel %vm1657_vm0, %v1744_v21, %v1748_v59  ;;  %4131 = vperm.xlu0 %5619, %v4057_v23   ;;  %v1764_v33 = vrot.slane %v7082_v4, 1  ;;  %v7084_v21 = vshrl.u32 %v6375_v20, 16  ;;  %v4064_v18 = vld [vmem:[%s7025_s3 + $0x88] sm:$0xff]  ;;  %v5746_v20 = vld [vmem:[%s7024_s2 + $0x218] sm:$0xff]  }
  0xbe   :  { %5265 = vmatprep.mubr.bf16.mxu0 %v6112_v35  ;;  %v7081_v35 = vshrl.u32 %v6353_v24, 16  ;;  %v4061_v24 = vld [vmem:[%s7025_s3 + $0x70] sm:$0xff]  ;;  %v1772_v25 = vrot.slane %v7083_v26, 1  ;;  %v4066_v23 = vld [vmem:[%s7025_s3 + $0x98] sm:$0xff] }
  0xbf   :  { %5072 = vmatpush3.bf16.msra.mxu1 %v5745_v42  ;;  %v7080_v42 = vshrl.u32 %v6345_v30, 16  ;;  %v1768_v39 = vor.u32 %v7084_v21, %v1764_v33  ;;  %v5765_v4 = vld [vmem:[#allocation4 + $0x110] sm:$0xff]  }
  0xc0   :  { %5345 = vmatprep.subr.bf16.mxu1 %v6783_v52  ;;  %4136 = vperm.xlu1 %5620, %v4058_v38   ;;  %v1760_v15 = vor.u32 %v7081_v35, %v1756_v31  ;;  %v1788_v38 = vrot.slane %v1786_v51, 1  ;;  %v7085_v51 = vld [vmem:[#allocation6_spill] sm:$0xff]  ;;  %v5764_v35 = vld [vmem:[#allocation4 + $0x108] sm:$0xff]   ;;  %v5773_v21 = vld [vmem:[#allocation4 + $0x130] sm:$0xff]  }
  0xc1   :  { %v1752_v34 = vor.u32 %v7080_v42, %v1748_v59  ;;  %4141 = vperm.xlu0 %5619, %v4059_v12   ;;  %v4063_v59 = vld [vmem:[%s7025_s3 + $0x80] sm:$0xff]  ;;  %v1773_v29 = vsel %vm1657_vm0, %v1768_v39, %v1772_v25  ;;  %v4072_v42 = vld [vmem:[%s7025_s3 + $0xc8] sm:$0xff] }
  0xc2   :  { %5042 = vmatmul.mubr.bf16.gmra.mrb[16].mxu1 %v1741_v17  ;;  %v1765_v30 = vsel %vm1657_vm0, %v1760_v15, %v1764_v33  ;;  %v5763_v12 = vld [vmem:[#allocation4 + $0x100] sm:$0xff]   ;;  %v4074_v15 = vld [vmem:[%s7025_s3 + $0xd8] sm:$0xff] }
  0xc3   :  { %5045 = vmatprep.mubr.bf16.mxu1 %v1749_v48  ;;  %v1757_v50 = vsel %vm1657_vm0, %v1752_v34, %v1756_v31  ;;  %v4068_v48 = vld [vmem:[%s7025_s3 + $0xa8] sm:$0xff]  ;;  %v5749_v31 = vld [vmem:[%s7024_s2 + $0x230] sm:$0xff]   ;;  %v5751_v34 = vld [vmem:[%s7024_s2 + $0x238] sm:$0xff]  }
  0xc4   :  { %4146 = vperm.xlu1 %5620, %v4060_v5   ;;  %v4073_v5 = vld [vmem:[%s7025_s3 + $0xd0] sm:$0xff]  ;;  %v4076_v33 = vld [vmem:[%s7025_s3 + $0xe8] sm:$0xff] }
  0xc5   :  { %5266 = vmatmul.mubr.bf16.vlgmr.msra.gmra.mrb[0].mxu0 %v6115_v36  ;;  %v5744_v36 = vld [vmem:[%s7024_s2 + $0x210] sm:$0xff]   ;;  %4151 = vperm.xlu0 %5619, %v4061_v24   ;;  %v5770_v24 = vld [vmem:[%s7024_s2 + $0x118] sm:$0xff]   ;;  %v5774_v39 = vld [vmem:[%s7024_s2 + $0x128] sm:$0xff]  }
  0xc6   :  { %5298 = vmatpush3.bf16.msra.mxu0 %v6537_v9  ;;  %5269 = vmatprep.mubr.bf16.mxu0 %v6118_v40  ;;  %v1776_v40 = vor.u32 %v1774_v19, %v1772_v25  ;;  %v1780_v9 = vrot.slane %v1778_v11, 1  ;;  %v4065_v11 = vld [vmem:[%s7025_s3 + $0x90] sm:$0xff] }
  0xc7   :  { %5299 = vmatprep.subr.bf16.mxu0 %v5742_v47 }
  0xc8   :  { %4156 = vperm.xlu1 %5620, %v4062_v2   ;;  %v1781_v19 = vsel %vm1657_vm0, %v1776_v40, %v1780_v9  ;;  %v1784_v17 = vor.u32 %v1782_v61, %v1780_v9  ;;  %v5771_v2 = vld [vmem:[%s7024_s2 + $0x120] sm:$0xff]  }
  0xc9   :  { %4161 = vperm.xlu0 %5619, %v4063_v59   ;;  %v5776_v59 = vld [vmem:[#allocation4 + $0x138] sm:$0xff]  }
  0xca   :  { %5046 = vmatmul.mubr.bf16.gmra.mrb[20].mxu1 %v1757_v50  ;;  %5300 = vmatpush3.bf16.msra.mxu0 %v5742_v47  ;;  %v1789_v61 = vsel %vm1657_vm0, %v1784_v17, %v1788_v38  ;;  %v5768_v47 = vld [vmem:[#allocation4 + $0x118] sm:$0xff]   ;;  %v4077_v50 = vld [vmem:[%s7025_s3 + $0xf0] sm:$0xff]  ;;  %v7086_v38 = vrot.slane %v6200_v49, 5 }
  0xcb   :  { %5049 = vmatprep.mubr.bf16.mxu1 %v1765_v30  ;;  %5301 = vmatprep.subr.bf16.mxu0 %v5744_v36  ;;  %v5769_v30 = vld [vmem:[#allocation4 + $0x120] sm:$0xff]   ;;  %v5782_v17 = vld [vmem:[#allocation4 + $0x150] sm:$0xff]   ;;  %v5787_v49 = vld [vmem:[#allocation4 + $0x178] sm:$0xff]  }
  0xcc   :  { %4166 = vperm.xlu1 %5620, %v4064_v18   ;;  %v5777_v18 = vld [vmem:[#allocation4] sm:$0xff]  }
  0xcd   :  { %5270 = vmatmul.mubr.bf16.gmra.mrb[4].mxu0 %v6126_v28  ;;  %v5747_v28 = vld [vmem:[%s7024_s2 + $0x220] sm:$0xff]   ;;  %4171 = vperm.xlu0 %5619, %v4065_v11  }
  0xce   :  { %5273 = vmatprep.mubr.bf16.mxu0 %v6137_v55  ;;  %5302 = vmatpush3.bf16.msra.mxu0 %v5744_v36  ;;  %v4067_v55 = vld [vmem:[%s7025_s3 + $0xa0] sm:$0xff]  ;;  %v5772_v36 = vld [vmem:[#allocation4 + $0x128] sm:$0xff]  }
  0xcf   :  { %5303 = vmatprep.subr.bf16.mxu0 %v5746_v20  ;;  %v5779_v11 = vld [vmem:[#allocation4 + $0x140] sm:$0xff]  }
  0xd0   :  { %4176 = vperm.xlu1 %5620, %v4066_v23  }
  0xd1   :  { %4181 = vperm.xlu0 %5619, %v4067_v55  }
  0xd2   :  { %5050 = vmatmul.mubr.bf16.gmra.mrb[24].mxu1 %v1773_v29  ;;  %5304 = vmatpush3.bf16.msra.mxu0 %v5746_v20  ;;  %v3757_v20 = vrot.slane %v5777_v18, 5  ;;  %v5778_v29 = vld [vmem:[#allocation4 + $0x8] sm:$0xff]  }
  0xd3   :  { %5053 = vmatprep.mubr.bf16.mxu1 %v1781_v19  ;;  %5305 = vmatprep.subr.bf16.mxu0 %v5747_v28  ;;  %v3758_v19 = vrot.slane %v5778_v29, 5 }
  0xd4   :  { %4186 = vperm.xlu1 %5620, %v4068_v48   ;;  %v5783_v48 = vld [vmem:[#allocation4 + $0x158] sm:$0xff]  }
  0xd5   :  { %5274 = vmatmul.mubr.bf16.gmra.mrb[8].mxu0 %v6208_v63  ;;  %4191 = vperm.xlu0 %5619, %v4069_v32   ;;  %v4071_v63 = vld [vmem:[%s7025_s3 + $0xc0] sm:$0xff]  ;;  %v3761_v55 = vsel %vm3756_vm2, %v3758_v19, %v7086_v38 }
  0xd6   :  { %5277 = vmatprep.mubr.bf16.mxu0 %v7085_v51  ;;  %5306 = vmatpush3.bf16.msra.mxu0 %v5747_v28  ;;  %v5781_v28 = vld [vmem:[#allocation4 + $0x148] sm:$0xff]   ;;  %v5752_v32 = vld [vmem:[#allocation4 + $0x1c0] sm:$0xff]   ;;  %v5754_v51 = vld [vmem:[#allocation4 + $0x1d0] sm:$0xff]  }
  0xd7   :  { %5307 = vmatprep.subr.bf16.mxu0 %v5748_v60 }
  0xd8   :  { %4196 = vperm.xlu1 %5620, %v4070_v8  }
  0xd9   :  { %4201 = vperm.xlu0 %5619, %v4071_v63  }
  0xda   :  { %5054 = vmatmul.mubr.bf16.gmra.mrb[28].mxu1 %v1789_v61  ;;  %5308 = vmatpush3.bf16.msra.mxu0 %v5748_v60  ;;  %v5784_v60 = vld [vmem:[#allocation4 + $0x160] sm:$0xff]   ;;  %v5786_v61 = vld [vmem:[#allocation4 + $0x170] sm:$0xff]  }
  0xdb   :  { %5073 = vmatprep.mubr.bf16.mxu1 %v5763_v12  ;;  %5309 = vmatprep.subr.bf16.mxu0 %v5749_v31 }
  0xdc   :  { %4206 = vperm.xlu1 %5620, %v4072_v42  }
  0xdd   :  { %5278 = vmatmul.mubr.bf16.gmra.mrb[12].mxu0 %v6528_v22  ;;  %v5766_v22 = vld [vmem:[%s7024_s2 + $0x108] sm:$0xff]   ;;  %4211 = vperm.xlu0 %5619, %v4073_v5  }
  0xde   :  { %5281 = vmatprep.mubr.bf16.mxu0 %v6540_v58  ;;  %5310 = vmatpush3.bf16.msra.mxu0 %v5749_v31  ;;  %v4075_v58 = vld [vmem:[%s7025_s3 + $0xe0] sm:$0xff] }
  0xdf   :  { %5311 = vmatprep.subr.bf16.mxu0 %v5751_v34 }
  0xe0   :  { %4216 = vperm.xlu1 %5620, %v4074_v15  }
  0xe1   :  { %4221 = vperm.xlu0 %5619, %v4075_v58  }
  0xe2   :  { %5074 = vmatmul.mubr.bf16.vlgmr.msra.gmra.mrb[0].mxu1 %v5764_v35  ;;  %5312 = vmatpush3.bf16.msra.mxu0 %v5751_v34 }
  0xe3   :  { %5353 = vmatpush3.bf16.msra.mxu1 %v6783_v52  ;;  %5077 = vmatprep.mubr.bf16.mxu1 %v5765_v4  ;;  %v5767_v52 = vld [vmem:[%s7024_s2 + $0x110] sm:$0xff]  }
  0xe4   :  { %5346 = vmatprep.subr.bf16.mxu1 %v5766_v22  ;;  %4226 = vperm.xlu1 %5620, %v4076_v33  }
  0xe5   :  { %5282 = vmatmul.mubr.bf16.gmra.mrb[16].mxu0 %v6543_v1  ;;  %v4078_v1 = vld [vmem:[%s7025_s3 + $0xf8] sm:$0xff]  ;;  %4231 = vperm.xlu0 %5619, %v4077_v50  }
  0xe6   :  { %5285 = vmatprep.mubr.bf16.mxu0 %v6554_v27  ;;  %v5750_v27 = vld [vmem:[#allocation5 + $0x8] sm:$0xff]  }
  0xe7   :  { %5354 = vmatpush3.bf16.msra.mxu1 %v5766_v22  ;;  %v3474_v26 = vshrl.u32 %v5750_v27, 16  ;;  %v3477_v25 = vshll.u32 %v5750_v27, 16 }
  0xe8   :  { %5347 = vmatprep.subr.bf16.mxu1 %v5767_v52  ;;  %4236 = vperm.xlu1 %5620, %v4078_v1  }
  0xe9   :  { %v3479_v40 = vrot.slane %v3477_v25, 5 }
  0xea   :  { %5078 = vmatmul.mubr.bf16.gmra.mrb[4].mxu1 %v5768_v47 }
  0xeb   :  { %5081 = vmatprep.mubr.bf16.mxu1 %v5769_v30  ;;  %5355 = vmatpush3.bf16.msra.mxu1 %v5767_v52 }
  0xec   :  { %5348 = vmatprep.subr.bf16.mxu1 %v5770_v24 }
  0xed   :  { %5286 = vmatmul.mubr.bf16.gmra.mrb[20].mxu0 %v6575_v6  ;;  %v3476_v6 = vrot.slane %v3474_v26, 4 }
  0xee   :  { %5289 = vmatprep.mubr.bf16.mxu0 %v6583_v54  ;;  %v5775_v54 = vld [vmem:[%s7024_s2 + $0x130] sm:$0xff]  }
  0xef   :  { %5356 = vmatpush3.bf16.msra.mxu1 %v5770_v24  ;;  %v3480_v9 = vor.u32 %v3479_v40, %v3476_v6 }
  0xf0   :  { %5349 = vmatprep.subr.bf16.mxu1 %v5771_v2 }
  0xf1   :  { %v3481_v23 = vsel %vm2986_vm1, %v6585_v43, %v3480_v9  ;;  %v5785_v43 = vld [vmem:[#allocation4 + $0x168] sm:$0xff]  }
  0xf2   :  { %5082 = vmatmul.mubr.bf16.gmra.mrb[8].mxu1 %v5772_v36 }
  0xf3   :  { %5085 = vmatprep.mubr.bf16.mxu1 %v5773_v21  ;;  %5357 = vmatpush3.bf16.msra.mxu1 %v5771_v2 }
  0xf4   :  { %5350 = vmatprep.subr.bf16.mxu1 %v5774_v39 }
  0xf5   :  { %5290 = vmatmul.mubr.bf16.gmra.mrb[24].mxu0 %v6594_v56  ;;  %v5780_v56 = vld [vmem:[%s7024_s2 + $0x138] sm:$0xff]  }
  0xf6   :  { %5293 = vmatprep.mubr.bf16.mxu0 %v6603_v3  ;;  %v3759_v3 = vsel %vm3756_vm2, %v3757_v20, %v3758_v19 }
  0xf7   :  { %5358 = vmatpush3.bf16.msra.mxu1 %v5774_v39 }
  0xf8   :  { %5351 = vmatprep.subr.bf16.mxu1 %v5775_v54 }
  0xfa   :  { %5086 = vmatmul.mubr.bf16.gmra.mrb[12].mxu1 %v5776_v59 }
  0xfb   :  { %5089 = vmatprep.mubr.bf16.mxu1 %v5779_v11  ;;  %5359 = vmatpush3.bf16.msra.mxu1 %v5775_v54 }
  0xfc   :  { %5352 = vmatprep.subr.bf16.mxu1 %v5780_v56 }
  0xfd   :  { %5294 = vmatmul.mubr.bf16.gmra.mrb[28].mxu0 %v3481_v23 }
  0xfe   :  { %5313 = vmatprep.mubr.bf16.mxu0 %v3759_v3 }
  0xff   :  { %5360 = vmatpush3.bf16.msra.mxu1 %v5780_v56 }
 0x102   :  { %5090 = vmatmul.mubr.bf16.gmra.mrb[16].mxu1 %v5781_v28 }
 0x103   :  { %5093 = vmatprep.mubr.bf16.mxu1 %v5782_v17 }
 0x105   :  { %5314 = vmatmul.mubr.bf16.vlgmr.msra.gmra.mrb[0].mxu0 %v3761_v55 }
 0x106   :  { %5317 = vmatprep.mubr.bf16.mxu0 %v6608_v16  ;;  %v5753_v16 = vld [vmem:[#allocation4 + $0x1c8] sm:$0xff]  }
 0x10a   :  { %5094 = vmatmul.mubr.bf16.gmra.mrb[20].mxu1 %v5783_v48 }
 0x10b   :  { %5097 = vmatprep.mubr.bf16.mxu1 %v5784_v60 }
 0x10d   :  { %5318 = vmatmul.mubr.bf16.gmra.mrb[4].mxu0 %v6611_v37  ;;  %v5755_v37 = vld [vmem:[#allocation4 + $0x1d8] sm:$0xff]  }
 0x10e   :  { %5321 = vmatprep.mubr.bf16.mxu0 %v6616_v57  ;;  %v5756_v57 = vld [vmem:[#allocation4 + $0x1e0] sm:$0xff]  }
 0x112   :  { %5098 = vmatmul.mubr.bf16.gmra.mrb[24].mxu1 %v5785_v43 }
 0x113   :  { %5101 = vmatprep.mubr.bf16.mxu1 %v5786_v61 }
 0x115   :  { %5322 = vmatmul.mubr.bf16.gmra.mrb[8].mxu0 %v6632_v10  ;;  %v5757_v10 = vld [vmem:[#allocation4 + $0x1e8] sm:$0xff]  }
 0x116   :  { %5325 = vmatprep.mubr.bf16.mxu0 %v6638_v45  ;;  %v5758_v45 = vld [vmem:[#allocation4 + $0x1f0] sm:$0xff]  }
 0x11a   :  { %5102 = vmatmul.mubr.bf16.gmra.mrb[28].mxu1 %v5787_v49 }
 0x11b   :  { %5137 = vmatprep.mubr.bf16.mxu1 %v5752_v32 }
 0x11d   :  { %5326 = vmatmul.mubr.bf16.gmra.mrb[12].mxu0 %v6641_v7  ;;  %v5759_v7 = vld [vmem:[#allocation4 + $0x1f8] sm:$0xff]  }
 0x11e   :  { %5329 = vmatprep.mubr.bf16.mxu0 %v6662_v0  ;;  %v5789_v0 = vmov 0.0  }
 0x11f   :  { %654 = vst [vmem:[#allocation2] sm:$0x1] %v5789_v0  ;;  %655 = vst [vmem:[#allocation3] sm:$0x1] %v5789_v0 }
 0x122   :  { %5138 = vmatmul.mubr.bf16.vlgmr.msra.gmra.mrb[16].mxu1 %v5753_v16 }
 0x123   :  { %5141 = vmatprep.mubr.bf16.mxu1 %v5754_v51 }
 0x125   :  { %5330 = vmatmul.mubr.bf16.gmra.mrb[16].mxu0 %v6674_v41 }
 0x126   :  { %5333 = vmatprep.mubr.bf16.mxu0 %v6677_v14  ;;  %v4082_v8 = vpop.permute.xlu0 %4081 }
 0x12a   :  { %5142 = vmatmul.mubr.bf16.gmra.mrb[20].mxu1 %v5755_v37 }
 0x12b   :  { %5145 = vmatprep.mubr.bf16.mxu1 %v5756_v57 }
 0x12d   :  { %5334 = vmatmul.mubr.bf16.gmra.mrb[20].mxu0 %v6686_v62  ;;  %v4092_v62 = vpop.permute.xlu1 %4091 }
 0x12e   :  { %5337 = vmatprep.mubr.bf16.mxu0 %v6708_v44  ;;  %v4087_v44 = vpop.permute.xlu0 %4086 }
 0x131   :  { %v4097_v42 = vpop.permute.xlu1 %4096 }
 0x132   :  { %5146 = vmatmul.mubr.bf16.gmra.mrb[24].mxu1 %v5757_v10  ;;  %v4102_v35 = vpop.permute.xlu0 %4101 }
 0x133   :  { %5149 = vmatprep.mubr.bf16.mxu1 %v5758_v45 }
 0x135   :  { %5338 = vmatmul.mubr.bf16.gmra.mrb[24].mxu0 %v6725_v46 }
 0x136   :  { %5341 = vmatprep.mubr.bf16.mxu0 %v6756_v13  ;;  %v4107_v13 = vpop.permute.xlu1 %4106  ;;  %v4112_v58 = vpop.permute.xlu0 %4111 }
 0x13a   :  { %5150 = vmatmul.mubr.bf16.gmra.mrb[28].mxu1 %v5759_v7  ;;  %v4117_v33 = vpop.permute.xlu1 %4116  ;;  %v6960_v50 = vpop.permute.xlu0 %4121 }
 0x13d   :  { %5342 = vmatmul.mubr.bf16.gmra.mrb[28].mxu0 %v6769_v53 }
 0x13e   :  { %v6964_v1 = vpop.permute.xlu1 %4126  ;;  %v6968_v27 = vpop.permute.xlu0 %4131 }
 0x142   :  { %v6970_v2 = vpop.permute.xlu1 %4136  ;;  %v6972_v26 = vpop.permute.xlu0 %4141 }
 0x146   :  { %v6974_v36 = vpop.permute.xlu1 %4146  ;;  %v6976_v20 = vpop.permute.xlu0 %4151 }
 0x14a   :  { %v6978_v11 = vpop.permute.xlu1 %4156  ;;  %v6980_v37 = vpop.permute.xlu0 %4161 }
 0x14e   :  { %v6982_v0 = vpop.permute.xlu1 %4166 }
 0x1b5   :  { %v5075_v41 = vpop.f32.mrb[0].mxu1 }
 0x1b6   :  { %v2146_v14 = vpop.f32.mrb[1].mxu1 }
 0x1b7   :  { %v5076_v31 = vpop.f32.mrb[2].mxu1 }
 0x1b8   :  { %v2149_v12 = vpop.f32.mrb[3].mxu1 }
 0x1bd   :  { %v5079_v63 = vpop.f32.mrb[4].mxu1 }
 0x1be   :  { %v2162_v34 = vpop.f32.mrb[5].mxu1 }
 0x1bf   :  { %v5080_v5 = vpop.f32.mrb[6].mxu1 }
 0x1c0   :  { %v2165_v46 = vpop.f32.mrb[7].mxu1 }
 0x1c5   :  { %v5083_v15 = vpop.f32.mrb[8].mxu1 }
 0x1c6   :  { %v6950_v4 = vpop.f32.mrb[9].mxu1 }
 0x1c7   :  { %v6952_v53 = vpop.f32.mrb[10].mxu1 }
 0x1c8   :  { %v6954_v22 = vpop.f32.mrb[11].mxu1 }
 0x1cd   :  { %v6956_v52 = vpop.f32.mrb[12].mxu1 }
 0x1ce   :  { %v6958_v47 = vpop.f32.mrb[13].mxu1 }
 0x1cf   :  { %v6962_v30 = vpop.f32.mrb[14].mxu1 }
 0x1d0   :  { %v6966_v24 = vpop.f32.mrb[15].mxu1 }
 0x1d8   :  { %v5315_v25 = vpop.f32.mrb[0].mxu0 }
 0x1d9   :  { %v5361_v21 = vadd.f32 %v5315_v25, %v5075_v41  ;;  %v3888_v39 = vpop.f32.mrb[1].mxu0 }
 0x1da   :  { %v5362_v6 = vadd.f32 %v3888_v39, %v2146_v14  ;;  %v5316_v40 = vpop.f32.mrb[2].mxu0 }
 0x1db   :  { %v5363_v54 = vadd.f32 %v5316_v40, %v5076_v31  ;;  %v3891_v9 = vpop.f32.mrb[3].mxu0  ;;  %v4241_v29 = vmul.f32 %v5361_v21, %v4092_v62 }
 0x1dc   :  { %v4239_v59 = vmul.f32 %v5362_v6, %v4082_v8  ;;  %v5364_v18 = vadd.f32 %v3891_v9, %v2149_v12 }
 0x1dd   :  { %v4242_v56 = vmul.f32 %v5363_v54, %v4097_v42  ;;  %v4314_v48 = vmul.f32 %v5361_v21, %v4241_v29  ;;  %v6984_v21 = vpop.permute.xlu0 %4171 }
 0x1de   :  { %v4240_v19 = vmul.f32 %v5364_v18, %v4087_v44  ;;  %v4312_v23 = vmul.f32 %v5362_v6, %v4239_v59 }
 0x1df   :  { %v4315_v49 = vmul.f32 %v5363_v54, %v4242_v56 }
 0x1e0   :  { %v4272_v3 = vadd.f32 %v4240_v19, %v4239_v59  ;;  %v4313_v28 = vmul.f32 %v5364_v18, %v4240_v19  ;;  %v5319_v17 = vpop.f32.mrb[4].mxu0 }
 0x1e1   :  { %v5365_v38 = vadd.f32 %v5319_v17, %v5079_v63  ;;  %v3904_v55 = vpop.f32.mrb[5].mxu0 }
 0x1e2   :  { %v4273_v60 = vadd.f32 %v4272_v3, %v4241_v29  ;;  %v4344_v43 = vadd.f32 %v4313_v28, %v4312_v23  ;;  %v5366_v61 = vadd.f32 %v3904_v55, %v2162_v34  ;;  %v5320_v32 = vpop.f32.mrb[6].mxu0  ;;  %v6995_v28 = vpop.permute.xlu0 %4181 }
 0x1e3   :  { %v5367_v16 = vadd.f32 %v5320_v32, %v5080_v5  ;;  %v3907_v51 = vpop.f32.mrb[7].mxu0  ;;  %v4245_v41 = vmul.f32 %v5365_v38, %v4112_v58  ;;  %v6987_v58 = vpop.permute.xlu1 %4176 }
 0x1e4   :  { %v4345_v57 = vadd.f32 %v4344_v43, %v4314_v48  ;;  %v4243_v10 = vmul.f32 %v5366_v61, %v4102_v35  ;;  %v4274_v45 = vadd.f32 %v4273_v60, %v4242_v56  ;;  %v5368_v7 = vadd.f32 %v3907_v51, %v2165_v46 }
 0x1e5   :  { %v4246_v12 = vmul.f32 %v5367_v16, %v4117_v33  ;;  %v4318_v39 = vmul.f32 %v5365_v38, %v4245_v41 }
 0x1e6   :  { %v4275_v14 = vadd.f32 %v4274_v45, %v4243_v10  ;;  %v4316_v8 = vmul.f32 %v5366_v61, %v4243_v10  ;;  %v4346_v31 = vadd.f32 %v4345_v57, %v4315_v49  ;;  %v4244_v62 = vmul.f32 %v5368_v7, %v4107_v13 }
 0x1e7   :  { %v4319_v54 = vmul.f32 %v5367_v16, %v4246_v12  ;;  %v6997_v48 = vpop.permute.xlu1 %4186 }
 0x1e8   :  { %v4347_v44 = vadd.f32 %v4346_v31, %v4316_v8  ;;  %v4276_v63 = vadd.f32 %v4275_v14, %v4244_v62  ;;  %v4317_v42 = vmul.f32 %v5368_v7, %v4244_v62  ;;  %v5323_v34 = vpop.f32.mrb[8].mxu0 }
 0x1e9   :  { %v5369_v5 = vadd.f32 %v5323_v34, %v5083_v15  ;;  %v3920_v25 = vpop.f32.mrb[9].mxu0 }
 0x1ea   :  { %v4277_v35 = vadd.f32 %v4276_v63, %v4245_v41  ;;  %v4348_v6 = vadd.f32 %v4347_v44, %v4317_v42  ;;  %v5370_v46 = vadd.f32 %v3920_v25, %v6950_v4  ;;  %v5324_v40 = vpop.f32.mrb[10].mxu0 }
 0x1eb   :  { %v5371_v13 = vadd.f32 %v5324_v40, %v6952_v53  ;;  %v3923_v33 = vpop.f32.mrb[11].mxu0  ;;  %v4249_v29 = vmul.f32 %v5369_v5, %v6968_v27 }
 0x1ec   :  { %v4349_v9 = vadd.f32 %v4348_v6, %v4318_v39  ;;  %v4247_v59 = vmul.f32 %v5370_v46, %v6960_v50  ;;  %v4278_v18 = vadd.f32 %v4277_v35, %v4246_v12  ;;  %v5372_v15 = vadd.f32 %v3923_v33, %v6954_v22 }
 0x1ed   :  { %v4250_v3 = vmul.f32 %v5371_v13, %v6970_v2  ;;  %v4322_v60 = vmul.f32 %v5369_v5, %v4249_v29 }
 0x1ee   :  { %v4279_v19 = vadd.f32 %v4278_v18, %v4247_v59  ;;  %v4320_v56 = vmul.f32 %v5370_v46, %v4247_v59  ;;  %v4350_v23 = vadd.f32 %v4349_v9, %v4319_v54  ;;  %v4248_v4 = vmul.f32 %v5372_v15, %v6964_v1 }
 0x1ef   :  { %v4323_v49 = vmul.f32 %v5371_v13, %v4250_v3 }
 0x1f0   :  { %v4351_v17 = vadd.f32 %v4350_v23, %v4320_v56  ;;  %v4280_v53 = vadd.f32 %v4279_v19, %v4248_v4  ;;  %v4321_v38 = vmul.f32 %v5372_v15, %v4248_v4  ;;  %v5327_v55 = vpop.f32.mrb[12].mxu0 }
 0x1f1   :  { %v5373_v50 = vadd.f32 %v5327_v55, %v6956_v52  ;;  %v3936_v22 = vpop.f32.mrb[13].mxu0 }
 0x1f2   :  { %v4281_v27 = vadd.f32 %v4280_v53, %v4249_v29  ;;  %v4352_v43 = vadd.f32 %v4351_v17, %v4321_v38  ;;  %v5374_v61 = vadd.f32 %v3936_v22, %v6958_v47  ;;  %v5328_v32 = vpop.f32.mrb[14].mxu0 }
 0x1f3   :  { %v5375_v2 = vadd.f32 %v5328_v32, %v6962_v30  ;;  %v3939_v16 = vpop.f32.mrb[15].mxu0  ;;  %v4253_v41 = vmul.f32 %v5373_v50, %v6976_v20  ;;  %v4192_v30 = vpop.permute.xlu0 %4191 }
 0x1f4   :  { %v4353_v57 = vadd.f32 %v4352_v43, %v4322_v60  ;;  %v4251_v10 = vmul.f32 %v5374_v61, %v6972_v26  ;;  %v4282_v45 = vadd.f32 %v4281_v27, %v4250_v3  ;;  %v5376_v7 = vadd.f32 %v3939_v16, %v6966_v24  ;;  %v4197_v26 = vpop.permute.xlu1 %4196 }
 0x1f5   :  { %v5139_v1 = vpop.f32.mrb[16].mxu1  ;;  %v4254_v12 = vmul.f32 %v5375_v2, %v6978_v11  ;;  %v4326_v24 = vmul.f32 %v5373_v50, %v4253_v41 }
 0x1f6   :  { %v2468_v51 = vpop.f32.mrb[17].mxu1  ;;  %v4283_v8 = vadd.f32 %v4282_v45, %v4251_v10  ;;  %v4324_v31 = vmul.f32 %v5374_v61, %v4251_v10  ;;  %v4354_v47 = vadd.f32 %v4353_v57, %v4323_v49  ;;  %v4252_v62 = vmul.f32 %v5376_v7, %v6974_v36 }
 0x1f7   :  { %v5140_v52 = vpop.f32.mrb[18].mxu1  ;;  %v4327_v40 = vmul.f32 %v5375_v2, %v4254_v12  ;;  %v4202_v17 = vpop.permute.xlu0 %4201 }
 0x1f8   :  { %v2471_v14 = vpop.f32.mrb[19].mxu1  ;;  %v4355_v44 = vadd.f32 %v4354_v47, %v4324_v31  ;;  %v4284_v63 = vadd.f32 %v4283_v8, %v4252_v62  ;;  %v4325_v42 = vmul.f32 %v5376_v7, %v4252_v62  ;;  %v5331_v34 = vpop.f32.mrb[16].mxu0 }
 0x1f9   :  { %v5377_v5 = vadd.f32 %v5331_v34, %v5139_v1  ;;  %v3952_v25 = vpop.f32.mrb[17].mxu0  ;;  %v4207_v22 = vpop.permute.xlu1 %4206 }
 0x1fa   :  { %v4285_v39 = vadd.f32 %v4284_v63, %v4253_v41  ;;  %v4356_v35 = vadd.f32 %v4355_v44, %v4325_v42  ;;  %v5378_v20 = vadd.f32 %v3952_v25, %v2468_v51  ;;  %v5332_v6 = vpop.f32.mrb[18].mxu0 }
 0x1fb   :  { %v5379_v54 = vadd.f32 %v5332_v6, %v5140_v52  ;;  %v3955_v13 = vpop.f32.mrb[19].mxu0  ;;  %v4257_v15 = vmul.f32 %v5377_v5, %v6984_v21  ;;  %v4212_v62 = vpop.permute.xlu0 %4211 }
 0x1fc   :  { %v4357_v33 = vadd.f32 %v4356_v35, %v4326_v24  ;;  %v4255_v11 = vmul.f32 %v5378_v20, %v6980_v37  ;;  %v4286_v9 = vadd.f32 %v4285_v39, %v4254_v12  ;;  %v5380_v59 = vadd.f32 %v3955_v13, %v2471_v14 }
 0x1fd   :  { %v5143_v46 = vpop.f32.mrb[20].mxu1  ;;  %v4258_v3 = vmul.f32 %v5379_v54, %v6987_v58  ;;  %v4330_v27 = vmul.f32 %v5377_v5, %v4257_v15  ;;  %v4217_v34 = vpop.permute.xlu1 %4216 }
 0x1fe   :  { %v2484_v36 = vpop.f32.mrb[21].mxu1  ;;  %v4287_v19 = vadd.f32 %v4286_v9, %v4255_v11  ;;  %v4328_v56 = vmul.f32 %v5378_v20, %v4255_v11  ;;  %v4358_v23 = vadd.f32 %v4357_v33, %v4327_v40  ;;  %v4256_v4 = vmul.f32 %v5380_v59, %v6982_v0 }
 0x1ff   :  { %v5144_v18 = vpop.f32.mrb[22].mxu1  ;;  %v4331_v49 = vmul.f32 %v5379_v54, %v4258_v3 }
 0x200   :  { %v2487_v29 = vpop.f32.mrb[23].mxu1  ;;  %v4359_v53 = vadd.f32 %v4358_v23, %v4328_v56  ;;  %v4288_v38 = vadd.f32 %v4287_v19, %v4256_v4  ;;  %v4329_v55 = vmul.f32 %v5380_v59, %v4256_v4  ;;  %v5335_v50 = vpop.f32.mrb[20].mxu0 }
 0x201   :  { %v5381_v37 = vadd.f32 %v5335_v50, %v5143_v46  ;;  %v3968_v60 = vpop.f32.mrb[21].mxu0  ;;  %v4222_v59 = vpop.permute.xlu0 %4221 }
 0x202   :  { %v4289_v43 = vadd.f32 %v4288_v38, %v4257_v15  ;;  %v4360_v61 = vadd.f32 %v4359_v53, %v4329_v55  ;;  %v5382_v21 = vadd.f32 %v3968_v60, %v2484_v36  ;;  %v5336_v32 = vpop.f32.mrb[22].mxu0  ;;  %v4227_v38 = vpop.permute.xlu1 %4226 }
 0x203   :  { %v5383_v2 = vadd.f32 %v5336_v32, %v5144_v18  ;;  %v3971_v16 = vpop.f32.mrb[23].mxu0  ;;  %v4261_v7 = vmul.f32 %v5381_v37, %v4192_v30 }
 0x204   :  { %v4361_v51 = vadd.f32 %v4360_v61, %v4330_v27  ;;  %v4259_v58 = vmul.f32 %v5382_v21, %v6995_v28  ;;  %v4290_v57 = vadd.f32 %v4289_v43, %v4258_v3  ;;  %v5384_v10 = vadd.f32 %v3971_v16, %v2487_v29 }
 0x205   :  { %v5147_v1 = vpop.f32.mrb[24].mxu1  ;;  %v4262_v47 = vmul.f32 %v5383_v2, %v4197_v26  ;;  %v4334_v28 = vmul.f32 %v5381_v37, %v4261_v7 }
 0x206   :  { %v2500_v0 = vpop.f32.mrb[25].mxu1  ;;  %v4291_v41 = vadd.f32 %v4290_v57, %v4259_v58  ;;  %v4332_v14 = vmul.f32 %v5382_v21, %v4259_v58  ;;  %v4362_v8 = vadd.f32 %v4361_v51, %v4331_v49  ;;  %v4260_v31 = vmul.f32 %v5384_v10, %v6997_v48 }
 0x207   :  { %v5148_v45 = vpop.f32.mrb[26].mxu1  ;;  %v4335_v6 = vmul.f32 %v5383_v2, %v4262_v47 }
 0x208   :  { %v2503_v52 = vpop.f32.mrb[27].mxu1  ;;  %v4363_v12 = vadd.f32 %v4362_v8, %v4332_v14  ;;  %v4292_v44 = vadd.f32 %v4291_v41, %v4260_v31  ;;  %v4333_v63 = vmul.f32 %v5384_v10, %v4260_v31  ;;  %v5339_v42 = vpop.f32.mrb[24].mxu0 }
 0x209   :  { %v5385_v5 = vadd.f32 %v5339_v42, %v5147_v1  ;;  %v3984_v25 = vpop.f32.mrb[25].mxu0  ;;  %v4232_v1 = vpop.permute.xlu0 %4231 }
 0x20a   :  { %v4293_v24 = vadd.f32 %v4292_v44, %v4261_v7  ;;  %v4364_v39 = vadd.f32 %v4363_v12, %v4333_v63  ;;  %v5386_v35 = vadd.f32 %v3984_v25, %v2500_v0  ;;  %v5340_v30 = vpop.f32.mrb[26].mxu0 }
 0x20b   :  { %v5387_v46 = vadd.f32 %v5340_v30, %v5148_v45  ;;  %v3987_v40 = vpop.f32.mrb[27].mxu0  ;;  %v4265_v11 = vmul.f32 %v5385_v5, %v4212_v62  ;;  %v4237_v45 = vpop.permute.xlu1 %4236 }
 0x20c   :  { %v4365_v48 = vadd.f32 %v4364_v39, %v4334_v28  ;;  %v4263_v26 = vmul.f32 %v5386_v35, %v4202_v17  ;;  %v4294_v13 = vadd.f32 %v4293_v24, %v4262_v47  ;;  %v5388_v36 = vadd.f32 %v3987_v40, %v2503_v52  ;;  %v4311_v40 = vld [vmem:[#allocation3] sm:$0x1] }
 0x20d   :  { %v5151_v20 = vpop.f32.mrb[28].mxu1  ;;  %v4266_v56 = vmul.f32 %v5387_v46, %v4217_v34  ;;  %v4338_v37 = vmul.f32 %v5385_v5, %v4265_v11 }
 0x20e   :  { %v2516_v54 = vpop.f32.mrb[29].mxu1  ;;  %v4295_v18 = vadd.f32 %v4294_v13, %v4263_v26  ;;  %v4336_v15 = vmul.f32 %v5386_v35, %v4263_v26  ;;  %v4366_v29 = vadd.f32 %v4365_v48, %v4335_v6  ;;  %v4264_v19 = vmul.f32 %v5388_v36, %v4207_v22 }
 0x20f   :  { %v5152_v33 = vpop.f32.mrb[30].mxu1  ;;  %v4339_v61 = vmul.f32 %v5387_v46, %v4266_v56 }
 0x210   :  { %v2519_v9 = vpop.f32.mrb[31].mxu1  ;;  %v4367_v23 = vadd.f32 %v4366_v29, %v4336_v15  ;;  %v4296_v4 = vadd.f32 %v4295_v18, %v4264_v19  ;;  %v4337_v3 = vmul.f32 %v5388_v36, %v4264_v19  ;;  %v5343_v53 = vpop.f32.mrb[28].mxu0  ;;  %v4401_v29 = vlaneseq  ;;  %v4393_v19 = vld [vmem:[%s7026_s4] sm:$0x1] }
 0x211   :  { %v5389_v55 = vadd.f32 %v5343_v53, %v5151_v20  ;;  %v4000_v50 = vpop.f32.mrb[29].mxu0  ;;  %v4271_v20 = vld [vmem:[#allocation2] sm:$0x1] }
 0x212   :  { %v4297_v17 = vadd.f32 %v4296_v4, %v4265_v11  ;;  %v4368_v60 = vadd.f32 %v4367_v23, %v4337_v3  ;;  %v5390_v27 = vadd.f32 %v4000_v50, %v2516_v54  ;;  %v5344_v43 = vpop.f32.mrb[30].mxu0  ;;  %v4397_v3 = vld [vmem:[%s7027_s5] sm:$0x1] }
 0x213   :  { %v5391_v21 = vadd.f32 %v5344_v43, %v5152_v33  ;;  %v4003_v32 = vpop.f32.mrb[31].mxu0  ;;  %v4269_v0 = vmul.f32 %v5389_v55, %v4232_v1 }
 0x214   :  { %v4369_v49 = vadd.f32 %v4368_v60, %v4338_v37  ;;  %v4267_v2 = vmul.f32 %v5390_v27, %v4222_v59  ;;  %v4298_v22 = vadd.f32 %v4297_v17, %v4266_v56  ;;  %v5392_v16 = vadd.f32 %v4003_v32, %v2519_v9 }
 0x215   :  { %v4270_v52 = vmul.f32 %v5391_v21, %v4237_v45  ;;  %v4342_v8 = vmul.f32 %v5389_v55, %v4269_v0  ;;  %v4402_v56 = vshrl.u32 %v4401_v29, 7 }
 0x216   :  { %v4299_v51 = vadd.f32 %v4298_v22, %v4267_v2  ;;  %v4340_v58 = vmul.f32 %v5390_v27, %v4267_v2  ;;  %v4370_v57 = vadd.f32 %v4369_v49, %v4339_v61  ;;  %v4268_v10 = vmul.f32 %v5392_v16, %v4227_v38 }
 0x217   :  { %v4343_v62 = vmul.f32 %v5391_v21, %v4270_v52  ;;  %v4403_v38 = vsub.s32 0, %v4402_v56 }
 0x218   :  { %v4371_v7 = vadd.f32 %v4370_v57, %v4340_v58  ;;  %v4300_v41 = vadd.f32 %v4299_v51, %v4268_v10  ;;  %v4341_v14 = vmul.f32 %v5392_v16, %v4268_v10 }
 0x21a   :  { %v4301_v31 = vadd.f32 %v4300_v41, %v4269_v0  ;;  %v4372_v47 = vadd.f32 %v4371_v7, %v4341_v14 }
 0x21c   :  { %v4302_v12 = vadd.f32 %v4301_v31, %v4270_v52  ;;  %v4373_v44 = vadd.f32 %v4372_v47, %v4342_v8 }
 0x21e   :  { %v4303_v63 = vrot.slane %v4302_v12, 4  ;;  %v4374_v42 = vadd.f32 %v4373_v44, %v4343_v62 }
 0x220   :  { %v4304_v34 = vadd.f32 %v4303_v63, %v4302_v12  ;;  %v4375_v5 = vrot.slane %v4374_v42, 4 }
 0x222   :  { %v4305_v25 = vrot.slane %v4304_v34, 2  ;;  %v4376_v28 = vadd.f32 %v4375_v5, %v4374_v42 }
 0x224   :  { %v4306_v24 = vadd.f32 %v4305_v25, %v4304_v34  ;;  %v4377_v39 = vrot.slane %v4376_v28, 2 }
 0x226   :  { %v4307_v35 = vrot.slane %v4306_v24, 1  ;;  %v4378_v30 = vadd.f32 %v4377_v39, %v4376_v28 }
 0x228   :  { %v4308_v6 = vadd.f32 %v4307_v35, %v4306_v24  ;;  %v4379_v46 = vrot.slane %v4378_v30, 1 }
 0x22a   :  { %v4309_v54 = vadd.f32 %v4308_v6, %v4271_v20  ;;  %v4380_v48 = vadd.f32 %v4379_v46, %v4378_v30 }
 0x22c   :  { %4310 = vst [vmem:[#allocation2] sm:$0x1] %v4309_v54  ;;  %v4381_v26 = vadd.f32 %v4380_v48, %v4311_v40 }
 0x22e   :  { %4382 = vst [vmem:[#allocation3] sm:$0x1] %v4381_v26 }
 0x233   :  { %v4386_v13 = vld [vmem:[#allocation2] sm:$0x1] }
 0x234   :  { %v4387_v36 = vmul.f32 0.0078125, %v4386_v13 }
 0x235   :  { %v4388_v33 = vld [vmem:[#allocation3] sm:$0x1] }
 0x236   :  { %v4389_v11 = vmul.f32 0.0078125, %v4388_v33  ;;  %v4390_v9 = vmul.f32 %v4387_v36, %v4387_v36 }
 0x238   :  { %v4391_v59 = vsub.f32 %v4389_v11, %v4390_v9 }
 0x23a   :  { %v4392_v18 = vmax.f32 %v4391_v59, 0.0 }
 0x23c   :  { %v4394_v15 = vadd.f32 1e-05, %v4392_v18 }
 0x23e   :  { %5760 = vrsqrt.f32 %v4394_v15 }
 0x248   :  { %v5761_v23 = vpop.eup %5760 }
 0x249   :  { %v4396_v4 = vmul.f32 %v5761_v23, %v4393_v19 }
 0x24b   :  { %v4398_v53 = vmul.f32 %v4396_v4, %v4387_v36 }
 0x24d   :  { %v4399_v55 = vsub.f32 %v4397_v3, %v4398_v53 }
 0x24f   :  { %v4404_v50 = vrot.slane %v4399_v55, %v4403_v38 }
 0x251   :  { %v4407_v37 = vsel %vm4406_vm3, %v4396_v4, %v4404_v50 }
 0x252   :  { %4408 = vst [vmem:[%s7028_s6] sm:$0x3] %v4407_v37 }

</bundles_post_ra>
